<compile_context>
chip_gen: v7x
topology: tpu7x:2x2x1
jax: 0.10.0
libtpu: 0.0.40
codegen_flags: <defaults>
</compile_context>

<pallas_src>
import math

import jax
import jax.numpy as jnp
from jax.experimental import pallas as pl
from jax.experimental.pallas import tpu as pltpu

# ---------------- RENIAutoDecoder hyper-parameters ----------------
DATASET_SIZE = 4
NDIMS = 9
EQUIVARIANCE = "SO3"                 # -> in_features = ndims + ndims**2
HIDDEN_FEATURES = 64
HIDDEN_LAYERS = 3
OUT_FEATURES = 3
LAST_LAYER_LINEAR = True
OUTPUT_ACTIVATION = "tanh"
FIRST_OMEGA_0 = 30.0
HIDDEN_OMEGA_0 = 30.0

IN_FEATURES = NDIMS + NDIMS * NDIMS  # SO3InvariantRepresentation feature width

MAX_TILE_N = 2048                    # 64*2048*4B = 512 KiB activation -> well within VMEM


def _pick_tile_n(n):
    """Largest lane-dense tile (multiple of 128, <= MAX_TILE_N) dividing N, else full N."""
    if n <= MAX_TILE_N:
        return n                      # block == full dim along N -> always legal
    for t in range(MAX_TILE_N, 127, -128):
        if n % t == 0:
            return t
    return n                          # fallback: single step over the full N axis


# ---------------- Pallas kernel (transposed layout) ----------------
def reni_kernel(dT_ref, aT_ref, b0T_ref, whT_ref, bhT_ref, wfT_ref, bfT_ref,
                o_ref):
    dT = dT_ref[0]                    # (3, TILE_N)        directions^T
    aT = aT_ref[0]                    # (H, 3)             omega0 * W0a^T @ Z
    b0T = b0T_ref[0]                  # (H, 1)             omega0 * (gflat @ W0b + b0)^T

    # First SineLayer (omega and the Z-invariant part already folded in).
    h = jnp.sin(jnp.dot(aT, dT, preferred_element_type=jnp.float32) + b0T)  # (H, TILE_N)

    # Hidden SineLayers (weights pre-transposed and pre-scaled by omega_h).
    # Static Python loop -> fully unrolled at trace time (LLO sees everything).
    for l in range(HIDDEN_LAYERS):
        pre = jnp.dot(whT_ref[l], h, preferred_element_type=jnp.float32) + bhT_ref[l]
        h = jnp.sin(pre)

    # Final linear (+ tanh); output kept transposed -> lane-dense store.
    out = jnp.dot(wfT_ref[...], h, preferred_element_type=jnp.float32) + bfT_ref[...]
    o_ref[0] = jnp.tanh(out)          # (OUT_FEATURES, TILE_N)


# ---------------- wrapper ----------------
@jax.jit
def reni_forward(Z, directions, params):
    """Equivalent of RENIAutoDecoder.forward(x: Tensor latent codes, directions)."""
    B, N, _ = directions.shape
    H = HIDDEN_FEATURES
    L = HIDDEN_LAYERS
    TILE_N = _pick_tile_n(N)
    assert N % TILE_N == 0

    hp = jax.lax.Precision.HIGHEST
    w0a = params["w0"][:NDIMS]                             # (ndims, H)
    w0b = params["w0"][NDIMS:]                             # (ndims^2, H)

    # --- tiny per-batch glue (O(B * ndims^2 * H)), hoisted out of the kernel ---
    G = jnp.einsum("bnd,bmd->bnm", Z, Z, precision=hp)     # (B, ndims, ndims) = Z Z^T
    gflat = G.reshape(B, NDIMS * NDIMS)                    # (B, ndims^2)
    # fused first-layer weight: A^T = W0a^T @ Z  (per batch), omega folded in
    aT = FIRST_OMEGA_0 * jnp.einsum("nh,bnd->bhd", w0a, Z, precision=hp)   # (B, H, 3)
    # batch-constant first-layer bias, omega folded in
    b0_eff = jnp.einsum("bm,mh->bh", gflat, w0b, precision=hp) + params["b0"]
    b0T = (FIRST_OMEGA_0 * b0_eff)[:, :, None]                             # (B, H, 1)

    # pre-transposed / omega-folded static weights
    whT = HIDDEN_OMEGA_0 * jnp.transpose(params["wh"], (0, 2, 1))          # (L, H, H)
    bhT = HIDDEN_OMEGA_0 * jnp.transpose(params["bh"], (0, 2, 1))          # (L, H, 1)
    wfT = params["wf"].T                                                   # (OUT, H)
    bfT = params["bf"].T                                                   # (OUT, 1)

    dT = jnp.transpose(directions, (0, 2, 1))                              # (B, 3, N)

    grid = (B, N // TILE_N)

    outT = pl.pallas_call(
        reni_kernel,
        out_shape=jax.ShapeDtypeStruct((B, OUT_FEATURES, N), jnp.float32),
        grid=grid,
        in_specs=[
            pl.BlockSpec((1, 3, TILE_N), lambda b, n: (b, 0, n)),          # D^T
            pl.BlockSpec((1, H, 3), lambda b, n: (b, 0, 0)),               # A^T (per batch)
            pl.BlockSpec((1, H, 1), lambda b, n: (b, 0, 0)),               # b0_eff^T (per batch)
            pl.BlockSpec((L, H, H), lambda b, n: (0, 0, 0)),               # hidden weights^T
            pl.BlockSpec((L, H, 1), lambda b, n: (0, 0, 0)),               # hidden biases^T
            pl.BlockSpec((OUT_FEATURES, H), lambda b, n: (0, 0)),          # final weight^T
            pl.BlockSpec((OUT_FEATURES, 1), lambda b, n: (0, 0)),          # final bias^T
        ],
        out_specs=pl.BlockSpec((1, OUT_FEATURES, TILE_N), lambda b, n: (b, 0, n)),
        compiler_params=pltpu.CompilerParams(
            dimension_semantics=("parallel", "parallel")),
    )(dT, aT, b0T, whT, bhT, wfT, bfT)

    return jnp.transpose(outT, (0, 2, 1))                                  # (B, N, OUT)


# ---------------- deterministic parameter init (SIREN scheme) ----------------
def init_params(key):
    H = HIDDEN_FEATURES
    ks = jax.random.split(key, 8)
    # First SineLayer (is_first=True): weight ~ U(-1/in, 1/in); PyTorch-style bias.
    w0 = jax.random.uniform(ks[0], (IN_FEATURES, H), jnp.float32,
                            -1.0 / IN_FEATURES, 1.0 / IN_FEATURES)
    b0 = jax.random.uniform(ks[1], (1, H), jnp.float32,
                            -1.0 / math.sqrt(IN_FEATURES), 1.0 / math.sqrt(IN_FEATURES))
    # Hidden SineLayers: weight ~ U(-sqrt(6/H)/omega, sqrt(6/H)/omega).
    lim_h = math.sqrt(6.0 / H) / HIDDEN_OMEGA_0
    wh = jax.random.uniform(ks[2], (HIDDEN_LAYERS, H, H), jnp.float32, -lim_h, lim_h)
    bh = jax.random.uniform(ks[3], (HIDDEN_LAYERS, 1, H), jnp.float32,
                            -1.0 / math.sqrt(H), 1.0 / math.sqrt(H))
    # Final linear layer (last_layer_linear=True).
    wf = jax.random.uniform(ks[4], (H, OUT_FEATURES), jnp.float32, -lim_h, lim_h)
    bf = jax.random.uniform(ks[5], (1, OUT_FEATURES), jnp.float32,
                            -1.0 / math.sqrt(H), 1.0 / math.sqrt(H))
    return dict(w0=w0, b0=b0, wh=wh, bh=bh, wf=wf, bf=bf)


# ---------------- pure-JAX reference (mirrors the PyTorch forward) ----------------
def reni_reference(Z, D, params):
    hp = jax.lax.Precision.HIGHEST
    G = jnp.einsum("bnd,bmd->bnm", Z, Z, precision=hp)                       # Z @ Z^T
    innerprod = jnp.einsum("bkd,bnd->bkn", D, Z, precision=hp)               # D @ Z^T
    Zinv = jnp.broadcast_to(G.reshape(G.shape[0], 1, -1),
                            (G.shape[0], D.shape[1], NDIMS * NDIMS))
    x = jnp.concatenate([innerprod, Zinv], axis=-1)                          # (B, N, in_features)
    h = jnp.sin(FIRST_OMEGA_0 * (jnp.einsum("bnf,fh->bnh", x, params["w0"],
                                            precision=hp) + params["b0"]))
    for l in range(HIDDEN_LAYERS):
        h = jnp.sin(HIDDEN_OMEGA_0 * (jnp.einsum("bnf,fh->bnh", h, params["wh"][l],
                                                 precision=hp) + params["bh"][l]))
    out = jnp.einsum("bnf,fh->bnh", h, params["wf"], precision=hp) + params["bf"]
    return jnp.tanh(out)


if __name__ == "__main__":
    key = jax.random.PRNGKey(0)
    k_z, k_d, k_p = jax.random.split(key, 3)

    B = 2          # batch of environment maps
    N = 256        # number of sample directions per map

    # Latent codes (the "x is a Tensor of latent codes" forward overload) and
    # unit direction vectors.
    Z = jax.random.normal(k_z, (B, NDIMS, 3), jnp.float32)
    D = jax.random.normal(k_d, (B, N, 3), jnp.float32)
    D = D / jnp.linalg.norm(D, axis=-1, keepdims=True)

    params = init_params(k_p)

    out = reni_forward(Z, D, params)
    out = jax.block_until_ready(out)

    ref = reni_reference(Z, D, params)
    assert out.shape == (B, N, OUT_FEATURES)
    assert jnp.allclose(out, ref, atol=2e-3, rtol=2e-3), \
        f"max abs err {jnp.max(jnp.abs(out - ref))}"

    # TODO(synk): the int / list-of-int index dispatch (methdispatch) just selects
    # rows of the latent table self.Z before the same compute; handled by plain
    # indexing outside the kernel and therefore not reimplemented here.
    print("KERNEL_OK")
</pallas_src>

<mosaic_0001>
module attributes {stable_mosaic.version = 11 : i64} {
  func.func @reni_kernel(%arg0: i32, %arg1: i32, %arg2: memref<1x3x256xf32, #tpu.memory_space<vmem>>, %arg3: memref<1x64x3xf32, #tpu.memory_space<vmem>>, %arg4: memref<1x64x1xf32, #tpu.memory_space<vmem>>, %arg5: memref<3x64x64xf32, #tpu.memory_space<vmem>>, %arg6: memref<3x64x1xf32, #tpu.memory_space<vmem>>, %arg7: memref<3x64xf32, #tpu.memory_space<vmem>>, %arg8: memref<3x1xf32, #tpu.memory_space<vmem>>, %arg9: memref<1x3x256xf32, #tpu.memory_space<vmem>>) attributes {dimension_semantics = [#tpu.dimension_semantics<parallel>, #tpu.dimension_semantics<parallel>], iteration_bounds = array<i64: 2, 1>, scalar_prefetch = 0 : i64, scratch_operands = 0 : i64, tpu.core_type = #tpu.core_type<tc>, window_params = [{transform_indices = @transform_0, window_bounds = array<i64: 1, 3, 256>}, {transform_indices = @transform_1, window_bounds = array<i64: 1, 64, 3>}, {transform_indices = @transform_2, window_bounds = array<i64: 1, 64, 1>}, {pipeline_mode = #tpu.pipeline_mode<synchronous>, transform_indices = @transform_3, window_bounds = array<i64: 3, 64, 64>}, {pipeline_mode = #tpu.pipeline_mode<synchronous>, transform_indices = @transform_4, window_bounds = array<i64: 3, 64, 1>}, {pipeline_mode = #tpu.pipeline_mode<synchronous>, transform_indices = @transform_5, window_bounds = array<i64: 3, 64>}, {pipeline_mode = #tpu.pipeline_mode<synchronous>, transform_indices = @transform_6, window_bounds = array<i64: 3, 1>}, {transform_indices = @transform_7, window_bounds = array<i64: 1, 3, 256>}]} {
    %c0 = arith.constant 0 : index
    %c0_0 = arith.constant 0 : index
    %c0_1 = arith.constant 0 : index
    %0 = vector.load %arg2[%c0, %c0_0, %c0_1] : memref<1x3x256xf32, #tpu.memory_space<vmem>>, vector<1x3x256xf32>
    %1 = vector.shape_cast %0 : vector<1x3x256xf32> to vector<3x256xf32>
    %c0_2 = arith.constant 0 : index
    %c0_3 = arith.constant 0 : index
    %c0_4 = arith.constant 0 : index
    %2 = vector.load %arg3[%c0_2, %c0_3, %c0_4] : memref<1x64x3xf32, #tpu.memory_space<vmem>>, vector<1x64x3xf32>
    %3 = vector.shape_cast %2 : vector<1x64x3xf32> to vector<64x3xf32>
    %c0_5 = arith.constant 0 : index
    %c0_6 = arith.constant 0 : index
    %c0_7 = arith.constant 0 : index
    %4 = vector.load %arg4[%c0_5, %c0_6, %c0_7] : memref<1x64x1xf32, #tpu.memory_space<vmem>>, vector<1x64x1xf32>
    %5 = vector.shape_cast %4 : vector<1x64x1xf32> to vector<64x1xf32>
    %cst = arith.constant dense<0.000000e+00> : vector<64x256xf32>
    %6 = tpu.matmul %3, %1, %cst {dimension_numbers = #tpu.dot_dimension_numbers<[1], [0], [0], [1], [0, 0, 1, 1], [], []>} : vector<64x3xf32>, vector<3x256xf32>, vector<64x256xf32> -> vector<64x256xf32>
    %7 = vector.broadcast %5 : vector<64x1xf32> to vector<64x256xf32>
    %8 = arith.addf %6, %7 : vector<64x256xf32>
    %9 = math.sin %8 : vector<64x256xf32>
    %c0_8 = arith.constant 0 : index
    %c0_9 = arith.constant 0 : index
    %c0_10 = arith.constant 0 : index
    %10 = vector.load %arg5[%c0_8, %c0_9, %c0_10] : memref<3x64x64xf32, #tpu.memory_space<vmem>>, vector<1x64x64xf32>
    %11 = vector.shape_cast %10 : vector<1x64x64xf32> to vector<64x64xf32>
    %cst_11 = arith.constant dense<0.000000e+00> : vector<64x256xf32>
    %12 = tpu.matmul %11, %9, %cst_11 {dimension_numbers = #tpu.dot_dimension_numbers<[1], [0], [0], [1], [0, 0, 1, 1], [], []>} : vector<64x64xf32>, vector<64x256xf32>, vector<64x256xf32> -> vector<64x256xf32>
    %c0_12 = arith.constant 0 : index
    %c0_13 = arith.constant 0 : index
    %c0_14 = arith.constant 0 : index
    %13 = vector.load %arg6[%c0_12, %c0_13, %c0_14] : memref<3x64x1xf32, #tpu.memory_space<vmem>>, vector<1x64x1xf32>
    %14 = vector.shape_cast %13 : vector<1x64x1xf32> to vector<64x1xf32>
    %15 = vector.broadcast %14 : vector<64x1xf32> to vector<64x256xf32>
    %16 = arith.addf %12, %15 : vector<64x256xf32>
    %17 = math.sin %16 : vector<64x256xf32>
    %c1 = arith.constant 1 : index
    %c0_15 = arith.constant 0 : index
    %c0_16 = arith.constant 0 : index
    %18 = vector.load %arg5[%c1, %c0_15, %c0_16] : memref<3x64x64xf32, #tpu.memory_space<vmem>>, vector<1x64x64xf32>
    %19 = vector.shape_cast %18 : vector<1x64x64xf32> to vector<64x64xf32>
    %cst_17 = arith.constant dense<0.000000e+00> : vector<64x256xf32>
    %20 = tpu.matmul %19, %17, %cst_17 {dimension_numbers = #tpu.dot_dimension_numbers<[1], [0], [0], [1], [0, 0, 1, 1], [], []>} : vector<64x64xf32>, vector<64x256xf32>, vector<64x256xf32> -> vector<64x256xf32>
    %c1_18 = arith.constant 1 : index
    %c0_19 = arith.constant 0 : index
    %c0_20 = arith.constant 0 : index
    %21 = vector.load %arg6[%c1_18, %c0_19, %c0_20] : memref<3x64x1xf32, #tpu.memory_space<vmem>>, vector<1x64x1xf32>
    %22 = vector.shape_cast %21 : vector<1x64x1xf32> to vector<64x1xf32>
    %23 = vector.broadcast %22 : vector<64x1xf32> to vector<64x256xf32>
    %24 = arith.addf %20, %23 : vector<64x256xf32>
    %25 = math.sin %24 : vector<64x256xf32>
    %c2 = arith.constant 2 : index
    %c0_21 = arith.constant 0 : index
    %c0_22 = arith.constant 0 : index
    %26 = vector.load %arg5[%c2, %c0_21, %c0_22] : memref<3x64x64xf32, #tpu.memory_space<vmem>>, vector<1x64x64xf32>
    %27 = vector.shape_cast %26 : vector<1x64x64xf32> to vector<64x64xf32>
    %cst_23 = arith.constant dense<0.000000e+00> : vector<64x256xf32>
    %28 = tpu.matmul %27, %25, %cst_23 {dimension_numbers = #tpu.dot_dimension_numbers<[1], [0], [0], [1], [0, 0, 1, 1], [], []>} : vector<64x64xf32>, vector<64x256xf32>, vector<64x256xf32> -> vector<64x256xf32>
    %c2_24 = arith.constant 2 : index
    %c0_25 = arith.constant 0 : index
    %c0_26 = arith.constant 0 : index
    %29 = vector.load %arg6[%c2_24, %c0_25, %c0_26] : memref<3x64x1xf32, #tpu.memory_space<vmem>>, vector<1x64x1xf32>
    %30 = vector.shape_cast %29 : vector<1x64x1xf32> to vector<64x1xf32>
    %31 = vector.broadcast %30 : vector<64x1xf32> to vector<64x256xf32>
    %32 = arith.addf %28, %31 : vector<64x256xf32>
    %33 = math.sin %32 : vector<64x256xf32>
    %c0_27 = arith.constant 0 : index
    %c0_28 = arith.constant 0 : index
    %34 = vector.load %arg7[%c0_27, %c0_28] : memref<3x64xf32, #tpu.memory_space<vmem>>, vector<3x64xf32>
    %cst_29 = arith.constant dense<0.000000e+00> : vector<3x256xf32>
    %35 = tpu.matmul %34, %33, %cst_29 {dimension_numbers = #tpu.dot_dimension_numbers<[1], [0], [0], [1], [0, 0, 1, 1], [], []>} : vector<3x64xf32>, vector<64x256xf32>, vector<3x256xf32> -> vector<3x256xf32>
    %c0_30 = arith.constant 0 : index
    %c0_31 = arith.constant 0 : index
    %36 = vector.load %arg8[%c0_30, %c0_31] : memref<3x1xf32, #tpu.memory_space<vmem>>, vector<3x1xf32>
    %37 = vector.broadcast %36 : vector<3x1xf32> to vector<3x256xf32>
    %38 = arith.addf %35, %37 : vector<3x256xf32>
    %39 = math.tanh %38 : vector<3x256xf32>
    %c0_32 = arith.constant 0 : index
    %c0_33 = arith.constant 0 : index
    %c0_34 = arith.constant 0 : index
    %40 = vector.load %arg9[%c0_32, %c0_33, %c0_34] : memref<1x3x256xf32, #tpu.memory_space<vmem>>, vector<1x3x256xf32>
    %41 = vector.shape_cast %40 : vector<1x3x256xf32> to vector<3x256xf32>
    %42 = vector.shape_cast %39 : vector<3x256xf32> to vector<1x3x256xf32>
    tpu.vector_store %arg9[%c0_32, %c0_33, %c0_34], %42 {strides = array<i32>} : memref<1x3x256xf32, #tpu.memory_space<vmem>>, vector<1x3x256xf32>,
    return
  }
  func.func @transform_0(%arg0: i32, %arg1: i32) -> (i32, i32, i32) {
    %c0_i32 = arith.constant 0 : i32
    %c0_i32_0 = arith.constant 0 : i32
    return %arg0, %c0_i32, %arg1 : i32, i32, i32
  }
  func.func @transform_1(%arg0: i32, %arg1: i32) -> (i32, i32, i32) {
    %c0_i32 = arith.constant 0 : i32
    %c0_i32_0 = arith.constant 0 : i32
    %c0_i32_1 = arith.constant 0 : i32
    return %arg0, %c0_i32, %c0_i32_0 : i32, i32, i32
  }
  func.func @transform_2(%arg0: i32, %arg1: i32) -> (i32, i32, i32) {
    %c0_i32 = arith.constant 0 : i32
    %c0_i32_0 = arith.constant 0 : i32
    %c0_i32_1 = arith.constant 0 : i32
    return %arg0, %c0_i32, %c0_i32_0 : i32, i32, i32
  }
  func.func @transform_3(%arg0: i32, %arg1: i32) -> (i32, i32, i32) {
    %c0_i32 = arith.constant 0 : i32
    %c0_i32_0 = arith.constant 0 : i32
    %c0_i32_1 = arith.constant 0 : i32
    %c0_i32_2 = arith.constant 0 : i32
    return %c0_i32, %c0_i32_0, %c0_i32_1 : i32, i32, i32
  }
  func.func @transform_4(%arg0: i32, %arg1: i32) -> (i32, i32, i32) {
    %c0_i32 = arith.constant 0 : i32
    %c0_i32_0 = arith.constant 0 : i32
    %c0_i32_1 = arith.constant 0 : i32
    %c0_i32_2 = arith.constant 0 : i32
    return %c0_i32, %c0_i32_0, %c0_i32_1 : i32, i32, i32
  }
  func.func @transform_5(%arg0: i32, %arg1: i32) -> (i32, i32) {
    %c0_i32 = arith.constant 0 : i32
    %c0_i32_0 = arith.constant 0 : i32
    %c0_i32_1 = arith.constant 0 : i32
    return %c0_i32, %c0_i32_0 : i32, i32
  }
  func.func @transform_6(%arg0: i32, %arg1: i32) -> (i32, i32) {
    %c0_i32 = arith.constant 0 : i32
    %c0_i32_0 = arith.constant 0 : i32
    %c0_i32_1 = arith.constant 0 : i32
    return %c0_i32, %c0_i32_0 : i32, i32
  }
  func.func @transform_7(%arg0: i32, %arg1: i32) -> (i32, i32, i32) {
    %c0_i32 = arith.constant 0 : i32
    %c0_i32_0 = arith.constant 0 : i32
    return %arg0, %c0_i32, %arg1 : i32, i32, i32
  }
}

</mosaic_0001>

<bundles_post_ra>
// kernel: reni_forward.1
= control target key start
LH: loop header
LB: loop body
LE: loop exit
PB: predicated region body
PF: predicated region fallthrough
CT: control target
= control target key end

     0   :  { %s9028_s24 = smov 0   ;;  %s9030_s25 = smov 0   ;;  %s15238_s0 = inlined_call_operand.vmem [shape: f32[2,3,256], index: 0, kind: input, shape index: {}]   ;;  %s15239_s1 = inlined_call_operand.vmem [shape: f32[2,64,3], index: 1, kind: input, shape index: {}]   ;;  %s15240_s2 = inlined_call_operand.vmem [shape: f32[2,64,1], index: 2, kind: input, shape index: {}]   ;;  %s15241_s3 = inlined_call_operand.vmem [shape: f32[3,64,64], index: 3, kind: input, shape index: {}]   ;;  %s15242_s4 = inlined_call_operand.vmem [shape: f32[3,64,1], index: 4, kind: input, shape index: {}]   ;;  %s15243_s5 = inlined_call_operand.vmem [shape: f32[3,64], index: 5, kind: input, shape index: {}]   ;;  %s15244_s6 = inlined_call_operand.vmem [shape: f32[3,1], index: 6, kind: input, shape index: {}]   ;;  %s15245_s7 = inlined_call_operand.vmem [shape: f32[2,3,256], index: 7, kind: output, shape index: {}]  }
   0x1   :  { %s9032_s26 = smov 0  }
   0x2 LB: > { %s29_s27 = sadd.s32 1, %s8974_s25  ;;  %p8003_p0 = scmp.ge.s32.totalorder %s8978_s26, 1  ;;  %s8978_s26 = sphi %s9032_s26, %s17_s26   ;;  %s8974_s25 = sphi %s9030_s25, %s16068_s25   ;;  %s8970_s24 = sphi %s9028_s24, %s16067_s24  }
   0x3   : > { %p31_p1 = scmp.ge.s32.totalorder %s29_s27, 2  ;;  %p278_p2 = scmp.lt.s32.totalorder %s8978_s26, 3 }
   0x5   : > { %s16070_s27 = smov (%p31_p1, %s29_s27), 0  ;;  %p279_p3 = pnand %p8003_p0, %p278_p2 }
   0x7   : > { %282 = sbr.rel (%p279_p3) target bundleno = 2773 (0xad5), region = 48 }
   0xe   : > { %p329_p4 = scmp.lt.s32.totalorder %s8970_s24, 1  ;;  %v15246_v0 = vmov 0.0   ;;  %v8981_v1 = vmov 0   ;;  %vm442_vm0 = vcmask 1042432   ;;  %vm417_vm1 = vcmask 23552   ;;  %v2232_v16 = vld [vmem:[%s15242_s4] sm:$0xff] }
   0xf   : > { %511 = vmatprep.mubr.f32.mxu0 %v15246_v0  ;;  %8693 = vset.pattern.permute.xlu0 %v8981_v1  ;;  %v2233_v18 = vld [vmem:[%s15242_s4 + $0x8] sm:$0xff]  ;;  %v2234_v19 = vld [vmem:[%s15242_s4 + $0x10] sm:$0xff]  ;;  %v2235_v21 = vld [vmem:[%s15242_s4 + $0x18] sm:$0xff] }
  0x10   : > { %s16072_s24 = smov (!%p329_p4, %s8970_s24), 1  ;;  %8694 = vset.pattern.permute.xlu1 %v8981_v1  ;;  %2369 = vmatprep.mubr.f32.mxu1 %v15246_v0  ;;  %v2236_v22 = vld [vmem:[%s15242_s4 + $0x20] sm:$0xff]  ;;  %v2237_v24 = vld [vmem:[%s15242_s4 + $0x28] sm:$0xff]  ;;  %v2238_v25 = vld [vmem:[%s15242_s4 + $0x30] sm:$0xff] }
  0x11   : > { %s8337_s28 = sshll.u32 %s16072_s24, 3  ;;  %s8338_s29 = sshll.u32 %s16072_s24, 6  ;;  %v2239_v27 = vld [vmem:[%s15242_s4 + $0x38] sm:$0xff]  ;;  %v8166_v28 = vld [vmem:[%s15242_s4 + $0x40] sm:$0xff]  ;;  %v8167_v29 = vld [vmem:[%s15242_s4 + $0x48] sm:$0xff] }
  0x12   : > { %s336_s9 = scalar_lea.vmem %s15238_s0, %s8337_s28  ;;  %s9060_s12 = scalar_lea.vmem %s15239_s1, %s8338_s29  ;;  %v8168_v30 = vld [vmem:[%s15242_s4 + $0x50] sm:$0xff]  ;;  %v8169_v31 = vld [vmem:[%s15242_s4 + $0x58] sm:$0xff]  ;;  %v8170_v32 = vld [vmem:[%s15242_s4 + $0x60] sm:$0xff] }
  0x13   : > { %s9065_s15 = scalar_lea.vmem %s15240_s2, %s8338_s29  ;;  %v358_v2 = vld [vmem:[%s336_s9] sm:$0x77]  ;;  %v360_v8 = vld [vmem:[%s9060_s12 + $0x8] sm:$0xff]  ;;  %v361_v11 = vld [vmem:[%s9060_s12 + $0x10] sm:$0xff]  ;;  %s356_s10 = scalar_lea.vmem %s15245_s7, %s8337_s28 }
  0x14   : > { %v416_v3 = vcombine.high %v358_v2, %v358_v2  ;;  %v359_v4 = vld [vmem:[%s9060_s12] sm:$0xff]  ;;  %v369_v6 = vld [vmem:[%s9065_s15 + $0x10] sm:$0xff]  ;;  %v368_v7 = vld [vmem:[%s9065_s15 + $0x8] sm:$0xff] }
  0x15   : > { %v367_v5 = vld [vmem:[%s9065_s15] sm:$0xff]  ;;  %387 = vperm.xlu1 %8694, %v369_v6   ;;  %v370_v9 = vld [vmem:[%s9065_s15 + $0x18] sm:$0xff]  ;;  %v372_v12 = vld [vmem:[%s9065_s15 + $0x28] sm:$0xff] }
  0x16   : > { %8012 = vmatprep.subr.msk.mxu0 %vm442_vm0, %v416_v3  ;;  %377 = vperm.xlu0 %8693, %v367_v5   ;;  %v371_v10 = vld [vmem:[%s9065_s15 + $0x20] sm:$0xff]  ;;  %v373_v13 = vld [vmem:[%s9065_s15 + $0x30] sm:$0xff]  ;;  %v362_v14 = vld [vmem:[%s9060_s12 + $0x18] sm:$0xff] }
  0x17   : > { %8013 = vmatpush1.msk.msra.mxu0 %vm442_vm0, %v358_v2  ;;  %v374_v15 = vld [vmem:[%s9065_s15 + $0x38] sm:$0xff]  ;;  %v363_v17 = vld [vmem:[%s9060_s12 + $0x20] sm:$0xff]  ;;  %v364_v20 = vld [vmem:[%s9060_s12 + $0x28] sm:$0xff] }
  0x18   : > { %8014 = vmatmul.mubr.msk.f32.vlgmr.msra.gmra.mrb[0].mxu0 %vm417_vm1, %v359_v4  ;;  %v365_v23 = vld [vmem:[%s9060_s12 + $0x30] sm:$0xff]  ;;  %v366_v26 = vld [vmem:[%s9060_s12 + $0x38] sm:$0xff]  ;;  %v8171_v33 = vld [vmem:[%s15242_s4 + $0x68] sm:$0xff] }
  0x19   : > { %517 = vmatprep.mubr.f32.mxu0 %v15246_v0  ;;  %392 = vperm.xlu1 %8694, %v370_v9   ;;  %v8172_v34 = vld [vmem:[%s15242_s4 + $0x70] sm:$0xff]  ;;  %v8173_v35 = vld [vmem:[%s15242_s4 + $0x78] sm:$0xff]  ;;  %v8254_v36 = vld [vmem:[%s15242_s4 + $0x80] sm:$0xff] }
  0x1a   : > { %382 = vperm.xlu0 %8693, %v368_v7   ;;  %v8255_v37 = vld [vmem:[%s15242_s4 + $0x88] sm:$0xff]  ;;  %v8256_v38 = vld [vmem:[%s15242_s4 + $0x90] sm:$0xff]  ;;  %v8257_v39 = vld [vmem:[%s15242_s4 + $0x98] sm:$0xff] }
  0x1b   : > { %v8258_v40 = vld [vmem:[%s15242_s4 + $0xa0] sm:$0xff]  ;;  %v8259_v41 = vld [vmem:[%s15242_s4 + $0xa8] sm:$0xff]  ;;  %v8260_v42 = vld [vmem:[%s15242_s4 + $0xb0] sm:$0xff] }
  0x1c   : > { %8015 = vmatmul.mubr.msk.f32.gmra.mrb[2].mxu0 %vm417_vm1, %v360_v8  ;;  %v8261_v43 = vld [vmem:[%s15242_s4 + $0xb8] sm:$0xff]  ;;  %v7801_v44 = vld [vmem:[%s15244_s6] sm:$0x7] }
  0x1d   : > { %523 = vmatprep.mubr.f32.mxu0 %v15246_v0  ;;  %402 = vperm.xlu1 %8694, %v372_v12  }
  0x1e   : > { %397 = vperm.xlu0 %8693, %v371_v10  }
  0x20   : > { %8016 = vmatmul.mubr.msk.f32.gmra.mrb[4].mxu0 %vm417_vm1, %v361_v11 }
  0x21   : > { %529 = vmatprep.mubr.f32.mxu0 %v15246_v0  ;;  %412 = vperm.xlu1 %8694, %v374_v15  }
  0x22   : > { %407 = vperm.xlu0 %8693, %v373_v13  }
  0x24   : > { %8017 = vmatmul.mubr.msk.f32.gmra.mrb[6].mxu0 %vm417_vm1, %v362_v14 }
  0x25   : > { %535 = vmatprep.mubr.f32.mxu0 %v15246_v0  ;;  %2247 = vperm.xlu1 %8694, %v2233_v18   ;;  %v15261_v18 = vmov 2475754826  }
  0x26   : > { %2242 = vperm.xlu0 %8693, %v2232_v16   ;;  %v15259_v16 = vmov 683565275  }
  0x28   : > { %8018 = vmatmul.mubr.msk.f32.gmra.mrb[8].mxu0 %vm417_vm1, %v363_v17 }
  0x29   : > { %541 = vmatprep.mubr.f32.mxu0 %v15246_v0  ;;  %2257 = vperm.xlu1 %8694, %v2235_v21  }
  0x2a   : > { %2252 = vperm.xlu0 %8693, %v2234_v19  }
  0x2c   : > { %8019 = vmatmul.mubr.msk.f32.gmra.mrb[10].mxu0 %vm417_vm1, %v364_v20 }
  0x2d   : > { %547 = vmatprep.mubr.f32.mxu0 %v15246_v0  ;;  %2267 = vperm.xlu1 %8694, %v2237_v24  }
  0x2e   : > { %2262 = vperm.xlu0 %8693, %v2236_v22  }
  0x30   : > { %8020 = vmatmul.mubr.msk.f32.gmra.mrb[12].mxu0 %vm417_vm1, %v365_v23  ;;  %v15265_v23 = vmov 2131351028  }
  0x31   : > { %553 = vmatprep.mubr.f32.mxu0 %v15246_v0  ;;  %2277 = vperm.xlu1 %8694, %v2239_v27  }
  0x32   : > { %2272 = vperm.xlu0 %8693, %v2238_v25  }
  0x34   : > { %8021 = vmatmul.mubr.msk.f32.gmra.mrb[14].mxu0 %vm417_vm1, %v366_v26  ;;  %v15252_v26 = vmov 2102212464  }
  0x35   : > { %4228 = vmatprep.mubr.f32.mxu0 %v15246_v0  ;;  %4107 = vperm.xlu1 %8694, %v8167_v29  }
  0x36   : > { %4102 = vperm.xlu0 %8693, %v8166_v28  }
  0x39   : > { %4117 = vperm.xlu1 %8694, %v8169_v31  }
  0x3a   : > { %4112 = vperm.xlu0 %8693, %v8168_v30   ;;  %v15257_v30 = vmov 920167782  }
  0x3d   : > { %4127 = vperm.xlu1 %8694, %v8171_v33   ;;  %v15255_v33 = vmov 1326507024  }
  0x3e   : > { %4122 = vperm.xlu0 %8693, %v8170_v32  }
  0x41   : > { %4137 = vperm.xlu1 %8694, %v8173_v35  }
  0x42   : > { %4132 = vperm.xlu0 %8693, %v8172_v34  }
  0x45   : > { %5966 = vperm.xlu1 %8694, %v8255_v37  }
  0x46   : > { %5961 = vperm.xlu0 %8693, %v8254_v36  }
  0x49   : > { %5976 = vperm.xlu1 %8694, %v8257_v39  }
  0x4a   : > { %5971 = vperm.xlu0 %8693, %v8256_v38  }
  0x4d   : > { %5986 = vperm.xlu1 %8694, %v8259_v41  }
  0x4e   : > { %5981 = vperm.xlu0 %8693, %v8258_v40  }
  0x51   : > { %5996 = vperm.xlu1 %8694, %v8261_v43  }
  0x52   : > { %5991 = vperm.xlu0 %8693, %v8260_v42  }
  0x56   : > { %7804 = vperm.xlu0 %8693, %v7801_v44  }
  0x95   : > { %v378_v45 = vpop.permute.xlu0 %377 }
  0x99   : > { %v383_v52 = vpop.permute.xlu0 %382 }
  0xeb   : > { %v513_v46 = vpop.f32.mrb[0].mxu0 }
  0xec   : > { %v9174_v47 = vadd.f32 %v513_v46, %v378_v45  ;;  %v515_v48 = vpop.f32.mrb[1].mxu0 }
  0xed   : > { %v9176_v49 = vadd.f32 %v515_v48, %v378_v45 }
  0xee   : > { %v15249_v50 = vand.u32 2147483647, %v9174_v47  ;;  %v563_v51 = vand.u32 2139095040, %v9174_v47 }
  0xef   : > { %v519_v53 = vpop.f32.mrb[2].mxu0  ;;  %v667_v57 = vand.u32 2139095040, %v9176_v49 }
  0xf0   : > { %v564_v54 = vshrl.u32 %v563_v51, 23  ;;  %v9180_v55 = vadd.f32 %v519_v53, %v383_v52  ;;  %v521_v56 = vpop.f32.mrb[3].mxu0  ;;  %v567_v59 = vand.u32 8388607, %v15249_v50 }
  0xf1   : > { %v668_v1 = vshrl.u32 %v667_v57, 23  ;;  %v9191_v4 = vadd.f32 %v521_v56, %v383_v52 }
  0xf2   : > { %15494 = vst [vmem:[#allocation2_spill] sm:$0xff] %v9180_v55  ;;  %v8022_v58 = vadd.s32 4294967169, %v564_v54  ;;  %v771_v60 = vand.u32 2139095040, %v9180_v55  ;;  %v568_v2 = vor.u32 8388608, %v567_v59  ;;  %v15248_v3 = vand.u32 2147483647, %v9180_v55 }
  0xf3   : > { %v9186_v61 = vpop.f32.mrb[4].mxu0  ;;  %15495 = vst [vmem:[#allocation3_spill] sm:$0xff] %v9191_v4  ;;  %v8026_v10 = vadd.s32 4294967169, %v668_v1  ;;  %v875_v14 = vand.u32 2139095040, %v9191_v4 }
  0xf4   : > { %v570_v62 = vadd.s32 1, %v8022_v58  ;;  %v9188_v63 = vpop.f32.mrb[5].mxu0  ;;  %v772_v6 = vshrl.u32 %v771_v60, 23  ;;  %v9197_v12 = vshll.u32 %v568_v2, 8  ;;  %v9201_v13 = vand.u32 8388607, %v15248_v3 }
  0xf5   : > { %v674_v38 = vadd.s32 1, %v8026_v10  ;;  %v876_v53 = vshrl.u32 %v875_v14, 23 }
  0xf6   : > { %vm571_vm2 = vcmp.gt.s32.totalorder %v570_v62, 0  ;;  %v8030_v20 = vadd.s32 4294967169, %v772_v6  ;;  %v9231_v6 = vpop.permute.xlu1 %387 }
  0xf7   : > { %v572_v5 = vsel %vm571_vm2, %v570_v62, 0  ;;  %v9193_v7 = vpop.f32.mrb[6].mxu0  ;;  %vm675_vm7 = vcmp.gt.s32.totalorder %v674_v38, 0  ;;  %v9235_v14 = vadd.f32 %v9186_v61, %v9231_v6 }
  0xf8   : > { %v574_v8 = vand.u32 31, %v572_v5  ;;  %v9195_v9 = vpop.f32.mrb[7].mxu0  ;;  %v573_v15 = vshrl.u32 %v572_v5, 5  ;;  %v778_v44 = vadd.s32 1, %v8030_v20  ;;  %v776_v5 = vor.u32 8388608, %v9201_v13 }
  0xf9   : > { %15496 = vst [vmem:[#allocation4_spill] sm:$0xff] %v9235_v14 }
  0xfa   : > { %v575_v11 = vsub.s32 32, %v574_v8  ;;  %v577_v17 = vshll.u32 %v15259_v16, %v574_v8  ;;  %v580_v19 = vshll.u32 %v15261_v18, %v574_v8  ;;  %v583_v25 = vshll.u32 %v15265_v23, %v574_v8 }
  0xfb   : > { %v9206_v21 = vpop.f32.mrb[8].mxu0  ;;  %v586_v29 = vshll.u32 %v15252_v26, %v574_v8  ;;  %v589_v32 = vshll.u32 %v15257_v30, %v574_v8  ;;  %vm592_vm3 = vcmp.lt.s32.totalorder %v573_v15, 1  ;;  %vm595_vm4 = vcmp.lt.s32.totalorder %v573_v15, 4 }
  0xfc   : > { %v578_v22 = vshrl.u32 %v15261_v18, %v575_v11  ;;  %v581_v24 = vshrl.u32 %v15265_v23, %v575_v11  ;;  %v584_v27 = vshrl.u32 %v15252_v26, %v575_v11  ;;  %v9212_v28 = vpop.f32.mrb[9].mxu0  ;;  %v587_v31 = vshrl.u32 %v15257_v30, %v575_v11 }
  0xfd   : > { %v590_v34 = vshrl.u32 %v15255_v33, %v575_v11  ;;  %v576_v45 = vshrl.u32 %v15259_v16, %v575_v11  ;;  %vm594_vm5 = vcmp.lt.s32.totalorder %v573_v15, 3  ;;  %vm593_vm6 = vcmp.lt.s32.totalorder %v573_v15, 2 }
  0xfe   : > { %v579_v35 = vor.u32 %v578_v22, %v577_v17  ;;  %v582_v36 = vor.u32 %v581_v24, %v580_v19  ;;  %v585_v37 = vor.u32 %v584_v27, %v583_v25  ;;  %v588_v39 = vor.u32 %v587_v31, %v586_v29 }
  0xff   : > { %v591_v40 = vor.u32 %v590_v34, %v589_v32  ;;  %v9219_v54 = vpop.f32.mrb[10].mxu0  ;;  %vm779_vm8 = vcmp.gt.s32.totalorder %v778_v44, 0  ;;  %v9240_v17 = vsel %vm675_vm7, %v674_v38, 0  ;;  %v8034_v19 = vadd.s32 4294967169, %v876_v53 }
 0x100   : > { %v597_v41 = vsel %vm595_vm4, %v585_v37, 2102212464  ;;  %v600_v42 = vsel %vm592_vm3, %v579_v35, %v582_v36  ;;  %v604_v43 = vsel %vm592_vm3, %v582_v36, %v585_v37  ;;  %v601_v46 = vsel %vm595_vm4, %v588_v39, 920167782 }
 0x101   : > { %v605_v48 = vsel %vm595_vm4, %v591_v40, 1326507024  ;;  %v602_v51 = vsel %vm594_vm5, %v585_v37, %v601_v46  ;;  %v596_v56 = vsel %vm592_vm3, %v576_v45, %v579_v35  ;;  %v598_v57 = vsel %vm594_vm5, %v582_v36, %v597_v41 }
 0x102   : > { %v606_v52 = vsel %vm594_vm5, %v588_v39, %v605_v48  ;;  %v603_v58 = vsel %vm593_vm6, %v600_v42, %v602_v51  ;;  %v599_v8 = vsel %vm593_vm6, %v596_v56, %v598_v57  ;;  %v780_v10 = vsel %vm779_vm8, %v778_v44, 0 }
 0x103   : > { %v607_v59 = vsel %vm593_vm6, %v604_v43, %v606_v52  ;;  %v9226_v1 = vmul.u32.u64.low %v9197_v12, %v603_v58  ;;  %v9227_v2 = vmul.u32.u64.high %v9197_v12, %v603_v58, %v9226_v1  ;;  %v782_v11 = vand.u32 31, %v780_v10 }
 0x104   : > { %v9222_v60 = vmul.u32.u64.low %v9197_v12, %v607_v59  ;;  %v9223_v62 = vmul.u32.u64.high %v9197_v12, %v607_v59, %v9222_v60  ;;  %v615_v13 = vmul.u32 %v9197_v12, %v599_v8  ;;  %v781_v20 = vshrl.u32 %v780_v10, 5 }
 0x105   : > { %v618_v15 = vadd.s32 1, %v9227_v2  ;;  %v783_v22 = vsub.s32 32, %v782_v11  ;;  %v9243_v24 = vshll.u32 %v776_v5, 8  ;;  %v785_v27 = vshll.u32 %v15259_v16, %v782_v11 }
 0x106   : > { %vm617_vm9 = vc.u32 %v9223_v62, %v9226_v1  ;;  %v788_v61 = vshll.u32 %v15261_v18, %v782_v11  ;;  %v791_v29 = vshll.u32 %v15265_v23, %v782_v11  ;;  %v794_v35 = vshll.u32 %v15252_v26, %v782_v11 }
 0x107   : > { %v619_v25 = vsel %vm617_vm9, %v618_v15, %v9227_v2  ;;  %v786_v32 = vshrl.u32 %v15261_v18, %v783_v22  ;;  %v789_v34 = vshrl.u32 %v15265_v23, %v783_v22  ;;  %v792_v12 = vshrl.u32 %v15252_v26, %v783_v22 }
 0x108   : > { %v620_v31 = vadd.s32 %v619_v25, %v615_v13  ;;  %v795_v36 = vshrl.u32 %v15257_v30, %v783_v22  ;;  %v797_v37 = vshll.u32 %v15257_v30, %v782_v11  ;;  %v798_v38 = vshrl.u32 %v15255_v33, %v783_v22 }
 0x109   : > { %v9257_v40 = vand.u32 31, %v9240_v17  ;;  %v787_v41 = vor.u32 %v786_v32, %v785_v27  ;;  %v790_v42 = vor.u32 %v789_v34, %v788_v61  ;;  %v793_v43 = vor.u32 %v792_v12, %v791_v29  ;;  %v9283_v27 = vpop.f32.mrb[11].mxu0 }
 0x10a   : > { %v621_v39 = vadd.s32 536870912, %v620_v31  ;;  %v796_v44 = vor.u32 %v795_v36, %v794_v35  ;;  %v799_v45 = vor.u32 %v798_v38, %v797_v37  ;;  %vm800_vm10 = vcmp.lt.s32.totalorder %v781_v20, 1 }
 0x10b   : > { %vm803_vm11 = vcmp.lt.s32.totalorder %v781_v20, 4  ;;  %v808_v48 = vsel %vm800_vm10, %v787_v41, %v790_v42  ;;  %v882_v51 = vadd.s32 1, %v8034_v19  ;;  %vm802_vm12 = vcmp.lt.s32.totalorder %v781_v20, 3 }
 0x10c   : > { %v9259_v46 = vshrl.u32 %v621_v39, 30  ;;  %v809_v52 = vsel %vm803_vm11, %v796_v44, 920167782  ;;  %v812_v53 = vsel %vm800_vm10, %v790_v42, %v793_v43  ;;  %v813_v56 = vsel %vm803_vm11, %v799_v45, 1326507024 }
 0x10d   : > { %vm801_vm13 = vcmp.lt.s32.totalorder %v781_v20, 2  ;;  %v810_v58 = vsel %vm802_vm12, %v793_v43, %v809_v52  ;;  %v814_v59 = vsel %vm802_vm12, %v796_v44, %v813_v56  ;;  %v805_v60 = vsel %vm803_vm11, %v793_v43, 2102212464 }
 0x10e   : > { %15497 = vst [vmem:[#allocation5_spill] sm:$0xff] %v9259_v46  ;;  %v623_v57 = vshll.u32 %v9259_v46, 30  ;;  %v811_v2 = vsel %vm801_vm13, %v808_v48, %v810_v58  ;;  %v815_v5 = vsel %vm801_vm13, %v812_v53, %v814_v59  ;;  %v784_v10 = vshrl.u32 %v15259_v16, %v783_v22 }
 0x10f   : > { %v9272_v11 = vmul.u32.u64.low %v9243_v24, %v815_v5  ;;  %v9273_v15 = vmul.u32.u64.high %v9243_v24, %v815_v5, %v9272_v11  ;;  %v9276_v19 = vsub.s32 32, %v9257_v40  ;;  %v806_v29 = vsel %vm802_vm12, %v790_v42, %v805_v60 }
 0x110   : > { %v9268_v8 = vsub.s32 %v620_v31, %v623_v57  ;;  %v9279_v13 = vmul.u32.u64.low %v9243_v24, %v811_v2  ;;  %v9280_v25 = vmul.u32.u64.high %v9243_v24, %v811_v2, %v9279_v13  ;;  %v804_v61 = vsel %vm800_vm10, %v784_v10, %v787_v41 }
 0x111   : > { %15498 = vst [vmem:[#allocation6_spill] sm:$0xff] %v9276_v19  ;;  %vm883_vm14 = vcmp.gt.s32.totalorder %v882_v51, 0  ;;  %v979_v22 = vand.u32 2139095040, %v9235_v14  ;;  %v15251_v32 = vand.u32 2147483647, %v9235_v14  ;;  %v9294_v34 = vadd.f32 %v9188_v63, %v9231_v6 }
 0x112   : > { %v626_v31 = vsub.s32 0, %v9268_v8  ;;  %vm825_vm15 = vc.u32 %v9273_v15, %v9279_v13  ;;  %v807_v35 = vsel %vm801_vm13, %v804_v61, %v806_v29  ;;  %v826_v12 = vadd.s32 1, %v9280_v25 }
 0x113   : > { %v884_v36 = vsel %vm883_vm14, %v882_v51, 0  ;;  %v980_v37 = vshrl.u32 %v979_v22, 23  ;;  %v691_v38 = vshrl.u32 %v15257_v30, %v9276_v19  ;;  %v690_v39 = vshll.u32 %v15252_v26, %v9257_v40  ;;  %v9339_v22 = vpop.permute.xlu1 %392 }
 0x114   : > { %v694_v41 = vshrl.u32 %v15255_v33, %v9276_v19  ;;  %v827_v42 = vsel %vm825_vm15, %v826_v12, %v9280_v25  ;;  %v8023_v63 = vmin.u32 %v626_v31, %v9268_v8  ;;  %v823_v6 = vmul.u32 %v9243_v24, %v807_v35 }
 0x115   : > { %v8038_v43 = vadd.s32 4294967169, %v980_v37  ;;  %v9307_v20 = vand.u32 31, %v884_v36  ;;  %v983_v44 = vand.u32 8388607, %v15251_v32  ;;  %v9312_v45 = vshrl.u32 %v9240_v17, 5 }
 0x116   : > { %v693_v48 = vshll.u32 %v15257_v30, %v9257_v40  ;;  %v1083_v52 = vand.u32 2139095040, %v9294_v34  ;;  %v9317_v53 = vor.u32 %v691_v38, %v690_v39  ;;  %v828_v56 = vadd.s32 %v827_v42, %v823_v6 }
 0x117   : > { %15499 = vst [vmem:[#allocation7_spill] sm:$0xff] %v9307_v20  ;;  %15500 = vst [vmem:[#allocation8_spill] sm:$0xff] %v9312_v45  ;;  %v986_v51 = vadd.s32 1, %v8038_v43  ;;  %v628_v24 = vclz %v8023_v63  ;;  %v9320_v58 = vsub.s32 32, %v9307_v20  ;;  %v984_v59 = vor.u32 8388608, %v983_v44 }
 0x118   : > { %15501 = vst [vmem:[#allocation9_spill] sm:$0xff] %v9317_v53  ;;  %v695_v57 = vor.u32 %v694_v41, %v693_v48  ;;  %vm699_vm1 = vcmp.lt.s32.totalorder %v9312_v45, 4  ;;  %v15250_v60 = vand.u32 2147483647, %v9294_v34  ;;  %v1084_v2 = vshrl.u32 %v1083_v52, 23 }
 0x119   : > { %vm987_vm0 = vcmp.gt.s32.totalorder %v986_v51, 0  ;;  %15502 = vst [vmem:[#allocation10_spill] sm:$0xff] %v9320_v58  ;;  %v9327_v5 = vsel %vm699_vm1, %v9317_v53, 920167782  ;;  %v829_v10 = vadd.s32 536870912, %v828_v56  ;;  %v9331_v11 = vadd.s32 %v9226_v1, %v9223_v62 }
 0x11a   : > { %v988_v17 = vsel %vm987_vm0, %v986_v51, 0  ;;  %15503 = vst [vmem:[#allocation11_spill] sm:$0xff] %v9327_v5  ;;  %v9335_v25 = vsel %vm699_vm1, %v695_v57, 1326507024  ;;  %v9337_v61 = vshrl.u32 %v884_v36, 5  ;;  %v8024_v31 = vadd.s32 4294967294, %v628_v24 }
 0x11b   : > { %15504 = vst [vmem:[#allocation12_spill] sm:$0xff] %v9335_v25  ;;  %v990_v29 = vand.u32 31, %v988_v17  ;;  %v898_v35 = vshll.u32 %v15252_v26, %v9307_v20  ;;  %v899_v12 = vshrl.u32 %v15257_v30, %v9320_v58  ;;  %v9345_v37 = vshll.u32 %v984_v59, 8 }
 0x11c   : > { %v8042_v1 = vadd.s32 4294967169, %v1084_v2  ;;  %v1087_v38 = vand.u32 8388607, %v15250_v60  ;;  %v9351_v36 = vadd.f32 %v9193_v7, %v9339_v22  ;;  %v9353_v39 = vshrl.u32 %v829_v10, 30 }
 0x11d   : > { %v991_v62 = vsub.s32 32, %v990_v29  ;;  %v989_v41 = vshrl.u32 %v988_v17, 5  ;;  %v993_v42 = vshll.u32 %v15259_v16, %v990_v29  ;;  %v996_v43 = vshll.u32 %v15261_v18, %v990_v29 }
 0x11e   : > { %15505 = vst [vmem:[#allocation13_spill] sm:$0xff] %v9351_v36  ;;  %15506 = vst [vmem:[#allocation14_spill] sm:$0xff] %v9353_v39  ;;  %v999_v44 = vshll.u32 %v15265_v23, %v990_v29  ;;  %vm8025_vm2 = vcmp.lt.s32.totalorder %v8024_v31, 0  ;;  %v1002_v51 = vshll.u32 %v15252_v26, %v990_v29  ;;  %v1005_v52 = vshll.u32 %v15257_v30, %v990_v29 }
 0x11f   : > { %v994_v63 = vshrl.u32 %v15261_v18, %v991_v62  ;;  %v997_v6 = vshrl.u32 %v15265_v23, %v991_v62  ;;  %v1000_v48 = vshrl.u32 %v15252_v26, %v991_v62  ;;  %v1003_v7 = vshrl.u32 %v15257_v30, %v991_v62 }
 0x120   : > { %v1006_v17 = vshrl.u32 %v15255_v33, %v991_v62  ;;  %v831_v2 = vshll.u32 %v9353_v39, 30  ;;  %v1088_v0 = vor.u32 8388608, %v1087_v38  ;;  %v15254_v3 = vand.u32 2147483647, %v9351_v36 }
 0x121   : > { %v995_v57 = vor.u32 %v994_v63, %v993_v42  ;;  %v998_v24 = vor.u32 %v997_v6, %v996_v43  ;;  %v1001_v59 = vor.u32 %v1000_v48, %v999_v44  ;;  %v1004_v10 = vor.u32 %v1003_v7, %v1002_v51  ;;  %v9374_v48 = vpop.f32.mrb[12].mxu0 }
 0x122   : > { %v631_v50 = vsel %vm8025_vm2, 0, %v8024_v31  ;;  %v1007_v60 = vor.u32 %v1006_v17, %v1005_v52  ;;  %vm1008_vm3 = vcmp.lt.s32.totalorder %v989_v41, 1  ;;  %v1090_v32 = vadd.s32 1, %v8042_v1 }
 0x123   : > { %vm1010_vm4 = vcmp.lt.s32.totalorder %v989_v41, 3  ;;  %vm1011_vm5 = vcmp.lt.s32.totalorder %v989_v41, 4  ;;  %v1016_v26 = vsel %vm1008_vm3, %v995_v57, %v998_v24  ;;  %v1187_v29 = vand.u32 2139095040, %v9351_v36 }
 0x124   : > { %v1013_v42 = vsel %vm1011_vm5, %v1001_v59, 2102212464  ;;  %v1017_v43 = vsel %vm1011_vm5, %v1004_v10, 920167782  ;;  %v1020_v63 = vsel %vm1008_vm3, %v998_v24, %v1001_v59  ;;  %v1021_v6 = vsel %vm1011_vm5, %v1007_v60, 1326507024 }
 0x125   : > { %v9370_v44 = vsub.s32 %v828_v56, %v831_v2  ;;  %v992_v38 = vshrl.u32 %v15259_v16, %v991_v62  ;;  %vm1009_vm6 = vcmp.lt.s32.totalorder %v989_v41, 2  ;;  %v1018_v31 = vsel %vm1010_vm4, %v1001_v59, %v1017_v43 }
 0x126   : > { %v632_v1 = vsub.s32 32, %v631_v50  ;;  %v1019_v51 = vsel %vm1009_vm6, %v1016_v26, %v1018_v31  ;;  %v1022_v7 = vsel %vm1010_vm4, %v1004_v10, %v1021_v6  ;;  %vm1091_vm7 = vcmp.gt.s32.totalorder %v1090_v32, 0 }
 0x127   : > { %v636_v52 = vsub.s32 4294967266, %v631_v50  ;;  %v1012_v17 = vsel %vm1008_vm3, %v992_v38, %v995_v57  ;;  %v1014_v60 = vsel %vm1010_vm4, %v998_v24, %v1013_v42  ;;  %v1023_v56 = vsel %vm1009_vm6, %v1020_v63, %v1022_v7 }
 0x128   : > { %v9382_v62 = vmul.u32.u64.low %v9345_v37, %v1023_v56  ;;  %v9383_v2 = vmul.u32.u64.high %v9345_v37, %v1023_v56, %v9382_v62  ;;  %v9386_v59 = vmul.u32.u64.low %v9345_v37, %v1019_v51  ;;  %v9387_v43 = vmul.u32.u64.high %v9345_v37, %v1019_v51, %v9386_v59 }
 0x129   : > { %v834_v26 = vsub.s32 0, %v9370_v44  ;;  %v9393_v10 = vshll.u32 %v15257_v30, %v9307_v20  ;;  %v1092_v57 = vsel %vm1091_vm7, %v1090_v32, 0  ;;  %v1188_v6 = vshrl.u32 %v1187_v29, 23 }
 0x12a   : > { %v9395_v24 = vor.u32 %v899_v12, %v898_v35  ;;  %v9399_v42 = vshrl.u32 %v15255_v33, %v9320_v58  ;;  %v1015_v63 = vsel %vm1009_vm6, %v1012_v17, %v1014_v60  ;;  %v1094_v38 = vand.u32 31, %v1092_v57 }
 0x12b   : > { %v633_v31 = vshll.u32 %v9268_v8, %v631_v50  ;;  %v634_v51 = vshrl.u32 %v9331_v11, %v632_v1  ;;  %v9404_v7 = vadd.s32 127, %v636_v52  ;;  %v9406_v56 = vshll.u32 %v1088_v0, 8 }
 0x12c   : > { %15507 = vst [vmem:[#allocation15_spill] sm:$0xff] %v9395_v24  ;;  %vm1033_vm8 = vc.u32 %v9383_v2, %v9386_v59  ;;  %v1034_v32 = vadd.s32 1, %v9387_v43  ;;  %v1095_v35 = vsub.s32 32, %v1094_v38  ;;  %v9413_v12 = vand.u32 8388607, %v15254_v3 }
 0x12d   : > { %v9416_v41 = vmin.u32 %v834_v26, %v9370_v44  ;;  %v1031_v50 = vmul.u32 %v9345_v37, %v1015_v63  ;;  %v1097_v8 = vshll.u32 %v15259_v16, %v1094_v38  ;;  %v8046_v11 = vadd.s32 4294967169, %v1188_v6 }
 0x12e   : > { %v1035_v0 = vsel %vm1033_vm8, %v1034_v32, %v9387_v43  ;;  %v1098_v29 = vshrl.u32 %v15261_v18, %v1095_v35  ;;  %v1100_v1 = vshll.u32 %v15261_v18, %v1094_v38  ;;  %v1101_v52 = vshrl.u32 %v15265_v23, %v1095_v35 }
 0x12f   : > { %v1036_v17 = vadd.s32 %v1035_v0, %v1031_v50  ;;  %v1093_v60 = vshrl.u32 %v1092_v57, 5  ;;  %v1103_v62 = vshll.u32 %v15265_v23, %v1094_v38  ;;  %v15508_v3 = vmov 2102212464  }
 0x130   : > { %v1104_v26 = vshrl.u32 %v15508_v3, %v1095_v35  ;;  %v1099_v33 = vor.u32 %v1098_v29, %v1097_v8  ;;  %v1102_v30 = vor.u32 %v1101_v52, %v1100_v1  ;;  %v1106_v37 = vshll.u32 %v15508_v3, %v1094_v38 }
 0x131   : > { %v15509_v63 = vmov 920167782   ;;  %v9428_v16 = vor.u32 %v634_v51, %v633_v31  ;;  %v638_v43 = vshll.u32 %v9404_v7, 23  ;;  %v1037_v32 = vadd.s32 536870912, %v1036_v17 }
 0x132   : > { %v1107_v6 = vshrl.u32 %v15509_v63, %v1095_v35  ;;  %v1105_v18 = vor.u32 %v1104_v26, %v1103_v62  ;;  %v836_v39 = vclz %v9416_v41  ;;  %vm907_vm9 = vcmp.lt.s32.totalorder %v9337_v61, 4  ;;  %v9438_v62 = vpop.f32.mrb[13].mxu0 }
 0x133   : > { %v1109_v50 = vshll.u32 %v15509_v63, %v1094_v38  ;;  %v15510_v0 = vmov 1326507024   ;;  %v9435_v29 = vshrl.u32 %v1037_v32, 30  ;;  %vm1112_vm10 = vcmp.lt.s32.totalorder %v1093_v60, 1 }
 0x134   : > { %v1108_v57 = vor.u32 %v1107_v6, %v1106_v37  ;;  %v1110_v8 = vshrl.u32 %v15510_v0, %v1095_v35  ;;  %vm1115_vm11 = vcmp.lt.s32.totalorder %v1093_v60, 4  ;;  %v1194_v1 = vadd.s32 1, %v8046_v11 }
 0x135   : > { %15511 = vst [vmem:[#allocation16_spill] sm:$0xff] %v9435_v29  ;;  %v15512_v31 = vmov 683565275   ;;  %v1117_v7 = vsel %vm1115_vm11, %v1105_v18, 2102212464  ;;  %v1120_v23 = vsel %vm1112_vm10, %v1099_v33, %v1102_v30  ;;  %v1039_v41 = vshll.u32 %v9435_v29, 30 }
 0x136   : > { %v1096_v51 = vshrl.u32 %v15512_v31, %v1095_v35  ;;  %v1111_v52 = vor.u32 %v1110_v8, %v1109_v50  ;;  %vm1113_vm12 = vcmp.lt.s32.totalorder %v1093_v60, 2  ;;  %vm1114_vm13 = vcmp.lt.s32.totalorder %v1093_v60, 3 }
 0x137   : > { %v1121_v26 = vsel %vm1115_vm11, %v1108_v57, 920167782  ;;  %v1124_v6 = vsel %vm1112_vm10, %v1102_v30, %v1105_v18  ;;  %v9441_v46 = vsub.s32 %v1036_v17, %v1039_v41  ;;  %v1118_v20 = vsel %vm1114_vm13, %v1102_v30, %v1117_v7 }
 0x138   : > { %v1116_v38 = vsel %vm1112_vm10, %v1096_v51, %v1099_v33  ;;  %v1122_v37 = vsel %vm1114_vm13, %v1105_v18, %v1121_v26  ;;  %v1125_v32 = vsel %vm1115_vm11, %v1111_v52, 1326507024  ;;  %vm1195_vm14 = vcmp.gt.s32.totalorder %v1194_v1, 0 }
 0x139   : > { %v1123_v11 = vsel %vm1113_vm12, %v1120_v23, %v1122_v37  ;;  %v1126_v35 = vsel %vm1114_vm13, %v1108_v57, %v1125_v32  ;;  %v1042_v29 = vsub.s32 0, %v9441_v46  ;;  %v1196_v17 = vsel %vm1195_vm14, %v1194_v1, 0 }
 0x13a   : > { %v1127_v50 = vsel %vm1113_vm12, %v1124_v6, %v1126_v35  ;;  %v9446_v8 = vmul.u32.u64.low %v9406_v56, %v1123_v11  ;;  %v9447_v58 = vmul.u32.u64.high %v9406_v56, %v1123_v11, %v9446_v8  ;;  %v9457_v30 = vadd.s32 %v9279_v13, %v9273_v15 }
 0x13b   : > { %v9452_v33 = vmul.u32.u64.low %v9406_v56, %v1127_v50  ;;  %v9453_v18 = vmul.u32.u64.high %v9406_v56, %v1127_v50, %v9452_v33  ;;  %v1119_v57 = vsel %vm1113_vm12, %v1116_v38, %v1118_v20  ;;  %v1198_v51 = vand.u32 31, %v1196_v17 }
 0x13c   : > { %v9462_v52 = vor.u32 4788187, %v638_v43  ;;  %v9467_v7 = vsel %vm907_vm9, %v9395_v24, 920167782  ;;  %v8039_v41 = vmin.u32 %v1042_v29, %v9441_v46  ;;  %v9472_v1 = vadd.f32 %v9195_v9, %v9339_v22 }
 0x13d   : > { %15513 = vst [vmem:[#allocation17_spill] sm:$0xff] %v9467_v7  ;;  %v9475_v13 = vadd.s32 4294967294, %v836_v39  ;;  %v1138_v20 = vadd.s32 1, %v9447_v58  ;;  %v1199_v60 = vsub.s32 32, %v1198_v51  ;;  %v1135_v26 = vmul.u32 %v9406_v56, %v1119_v57 }
 0x13e   : > { %v1044_v43 = vclz %v8039_v41  ;;  %vm1137_vm15 = vc.u32 %v9453_v18, %v9446_v8  ;;  %v1192_v38 = vor.u32 8388608, %v9413_v12  ;;  %v9483_v37 = vshrl.u32 %v1196_v17, 5 }
 0x13f   : > { %v1139_v29 = vsel %vm1137_vm15, %v1138_v20, %v9447_v58  ;;  %v15514_v9 = vmov 2475754826   ;;  %v15515_v6 = vmov 2131351028   ;;  %v1201_v35 = vshll.u32 %v15512_v31, %v1198_v51 }
 0x140   : > { %v1202_v22 = vshrl.u32 %v15514_v9, %v1199_v60  ;;  %v1205_v39 = vshrl.u32 %v15515_v6, %v1199_v60  ;;  %v8040_v32 = vadd.s32 4294967294, %v1044_v43  ;;  %v1140_v11 = vadd.s32 %v1139_v29, %v1135_v26 }
 0x141   : > { %v1208_v50 = vshrl.u32 %v15508_v3, %v1199_v60  ;;  %v1204_v56 = vshll.u32 %v15514_v9, %v1198_v51  ;;  %v1207_v33 = vshll.u32 %v15515_v6, %v1198_v51  ;;  %v1210_v12 = vshll.u32 %v15508_v3, %v1198_v51 }
 0x142   : > { %v1211_v58 = vshrl.u32 %v15509_v63, %v1199_v60  ;;  %vm8041_vm0 = vcmp.lt.s32.totalorder %v8040_v32, 0  ;;  %v1141_v17 = vadd.s32 536870912, %v1140_v11  ;;  %v1203_v57 = vor.u32 %v1202_v22, %v1201_v35 }
 0x143   : > { %v1214_v41 = vshrl.u32 %v15510_v0, %v1199_v60  ;;  %v1206_v20 = vor.u32 %v1205_v39, %v1204_v56  ;;  %v1209_v43 = vor.u32 %v1208_v50, %v1207_v33  ;;  %v1213_v29 = vshll.u32 %v15509_v63, %v1198_v51 }
 0x144   : > { %v1212_v26 = vor.u32 %v1211_v58, %v1210_v12  ;;  %v640_v23 = vand.u32 2147483647, %v9462_v52  ;;  %vm8033_vm2 = vcmp.lt.s32.totalorder %v9475_v13, 0  ;;  %v1032_v15 = vadd.s32 %v9386_v59, %v9383_v2 }
 0x145   : > { %v9499_v7 = vshrl.u32 %v1141_v17, 30  ;;  %v1047_v24 = vsel %vm8041_vm0, 0, %v8040_v32  ;;  %v1215_v4 = vor.u32 %v1214_v41, %v1213_v29  ;;  %v1232_v53 = vshll.u32 %v1192_v38, 8 }
 0x146   : > { %v1291_v22 = vand.u32 2139095040, %v9472_v1  ;;  %v1200_v35 = vshrl.u32 %v15512_v31, %v1199_v60  ;;  %vm1216_vm3 = vcmp.lt.s32.totalorder %v9483_v37, 1  ;;  %vm1219_vm4 = vcmp.lt.s32.totalorder %v9483_v37, 4 }
 0x147   : > { %15516 = vst [vmem:[#allocation18_spill] sm:$0xff] %v9499_v7  ;;  %v1143_v39 = vshll.u32 %v9499_v7, 30  ;;  %vm1217_vm5 = vcmp.lt.s32.totalorder %v9483_v37, 2  ;;  %v1221_v51 = vsel %vm1219_vm4, %v1209_v43, 2102212464  ;;  %v1224_v52 = vsel %vm1216_vm3, %v1203_v57, %v1206_v20 }
 0x148   : > { %v1225_v2 = vsel %vm1219_vm4, %v1212_v26, 920167782  ;;  %v1048_v59 = vsub.s32 32, %v1047_v24  ;;  %v1052_v50 = vsub.s32 4294967266, %v1047_v24  ;;  %vm1218_vm6 = vcmp.lt.s32.totalorder %v9483_v37, 3 }
 0x149   : > { %v9507_v32 = vsub.s32 %v1140_v11, %v1143_v39  ;;  %v1226_v38 = vsel %vm1218_vm6, %v1209_v43, %v1225_v2  ;;  %v1228_v56 = vsel %vm1216_vm3, %v1206_v20, %v1209_v43  ;;  %v1229_v33 = vsel %vm1219_vm4, %v1215_v4, 1326507024 }
 0x14a   : > { %v1292_v12 = vshrl.u32 %v1291_v22, 23  ;;  %v1220_v58 = vsel %vm1216_vm3, %v1200_v35, %v1203_v57  ;;  %v1222_v17 = vsel %vm1218_vm6, %v1206_v20, %v1221_v51  ;;  %v1227_v41 = vsel %vm1217_vm5, %v1224_v52, %v1226_v38  ;;  %v9521_v22 = vpop.permute.xlu0 %397 }
 0x14b   : > { %v1146_v60 = vsub.s32 0, %v9507_v32  ;;  %v1230_v29 = vsel %vm1218_vm6, %v1212_v26, %v1229_v33  ;;  %v9513_v7 = vmul.u32.u64.low %v1232_v53, %v1227_v41  ;;  %v9514_v25 = vmul.u32.u64.high %v1232_v53, %v1227_v41, %v9513_v7  ;;  %v9545_v33 = vpop.f32.mrb[14].mxu0 }
 0x14c   : > { %v8050_v11 = vadd.s32 4294967169, %v1292_v12  ;;  %v1053_v39 = vadd.s32 127, %v1052_v50  ;;  %v1231_v4 = vsel %vm1217_vm5, %v1228_v56, %v1230_v29  ;;  %v15281_v43 = vand.u32 2147483647, %v9472_v1 }
 0x14d   : > { %v8043_v5 = vmin.u32 %v1146_v60, %v9507_v32  ;;  %v1050_v57 = vshrl.u32 %v1032_v15, %v1048_v59  ;;  %v9523_v20 = vmul.u32.u64.low %v1232_v53, %v1231_v4  ;;  %v9524_v35 = vmul.u32.u64.high %v1232_v53, %v1231_v4, %v9523_v20 }
 0x14e   : > { %v1298_v26 = vadd.s32 1, %v8050_v11  ;;  %v15517_v51 = vcvt.s32.f32 %v9428_v16  ;;  %v1223_v50 = vsel %vm1217_vm5, %v1220_v58, %v1222_v17  ;;  %v9534_v38 = vadd.f32 %v9206_v21, %v9521_v22 }
 0x14f   : > { %v1148_v2 = vclz %v8043_v5  ;;  %v9539_v15 = vsel %vm8033_vm2, 0, %v9475_v13  ;;  %v1049_v59 = vshll.u32 %v9441_v46, %v1047_v24  ;;  %v1242_v56 = vadd.s32 1, %v9514_v25 }
 0x150   : > { %v9528_v52 = vmul.f32 %v15517_v51, %v640_v23  ;;  %15518 = vst [vmem:[#allocation19_spill] sm:$0xff] %v9534_v38  ;;  %vm1299_vm7 = vcmp.gt.s32.totalorder %v1298_v26, 0  ;;  %v1054_v16 = vshll.u32 %v1053_v39, 23  ;;  %v1295_v5 = vand.u32 8388607, %v15281_v43 }
 0x151   : > { %v8044_v23 = vadd.s32 4294967294, %v1148_v2  ;;  %v1300_v37 = vsel %vm1299_vm7, %v1298_v26, 0  ;;  %v9547_v21 = vor.u32 %v1050_v57, %v1049_v59  ;;  %v1239_v12 = vmul.u32 %v1232_v53, %v1223_v50 }
 0x152   : > { %vm1241_vm8 = vc.u32 %v9524_v35, %v9513_v7  ;;  %v1302_v13 = vand.u32 31, %v1300_v37  ;;  %v9558_v11 = vor.u32 4788187, %v1054_v16  ;;  %v1136_v53 = vadd.s32 %v9446_v8, %v9453_v18 }
 0x153   : > { %vm8045_vm10 = vcmp.lt.s32.totalorder %v8044_v23, 0  ;;  %v1243_v60 = vsel %vm1241_vm8, %v1242_v56, %v9514_v25  ;;  %v1058_v57 = vcvt.s32.f32 %v9547_v21  ;;  %v1296_v26 = vor.u32 8388608, %v1295_v5 }
 0x154   : > { %v9556_v17 = vsel %vm8045_vm10, 0, %v8044_v23  ;;  %v1244_v41 = vadd.s32 %v1243_v60, %v1239_v12  ;;  %v1303_v29 = vsub.s32 32, %v1302_v13  ;;  %v1395_v25 = vand.u32 2139095040, %v9534_v38 }
 0x155   : > { %v1156_v39 = vsub.s32 4294967266, %v9556_v17  ;;  %v1305_v2 = vshll.u32 %v15512_v31, %v1302_v13  ;;  %v1308_v59 = vshll.u32 %v15514_v9, %v1302_v13  ;;  %v1311_v18 = vshll.u32 %v15515_v6, %v1302_v13 }
 0x156   : > { %v1245_v20 = vadd.s32 536870912, %v1244_v41  ;;  %v1306_v50 = vshrl.u32 %v15514_v9, %v1303_v29  ;;  %v1309_v8 = vshrl.u32 %v15515_v6, %v1303_v29  ;;  %v1312_v16 = vshrl.u32 %v15508_v3, %v1303_v29 }
 0x157   : > { %v1157_v51 = vadd.s32 127, %v1156_v39  ;;  %v1152_v23 = vsub.s32 32, %v9556_v17  ;;  %v1301_v5 = vshrl.u32 %v1300_v37, 5  ;;  %v1314_v12 = vshll.u32 %v15508_v3, %v1302_v13 }
 0x158   : > { %v9569_v56 = vshrl.u32 %v1245_v20, 30  ;;  %v1307_v21 = vor.u32 %v1306_v50, %v1305_v2  ;;  %v1310_v39 = vor.u32 %v1309_v8, %v1308_v59  ;;  %v1313_v43 = vor.u32 %v1312_v16, %v1311_v18 }
 0x159   : > { %v1315_v24 = vshrl.u32 %v15509_v63, %v1303_v29  ;;  %v1056_v20 = vand.u32 2147483647, %v9558_v11  ;;  %v1158_v58 = vshll.u32 %v1157_v51, 23  ;;  %v1317_v4 = vshll.u32 %v15509_v63, %v1302_v13 }
 0x15a   : > { %15519 = vst [vmem:[#allocation20_spill] sm:$0xff] %v9569_v56  ;;  %v1247_v60 = vshll.u32 %v9569_v56, 30  ;;  %v1318_v46 = vshrl.u32 %v15510_v0, %v1303_v29  ;;  %v1336_v37 = vshll.u32 %v1296_v26, 8  ;;  %v1396_v2 = vshrl.u32 %v1395_v25, 23 }
 0x15b   : > { %v1316_v55 = vor.u32 %v1315_v24, %v1314_v12  ;;  %v1304_v50 = vshrl.u32 %v15512_v31, %v1303_v29  ;;  %vm1320_vm11 = vcmp.lt.s32.totalorder %v1301_v5, 1  ;;  %vm1323_vm12 = vcmp.lt.s32.totalorder %v1301_v5, 4 }
 0x15c   : > { %v9581_v45 = vsub.s32 %v1244_v41, %v1247_v60  ;;  %v1319_v19 = vor.u32 %v1318_v46, %v1317_v4  ;;  %v1154_v59 = vshrl.u32 %v1136_v53, %v1152_v23  ;;  %v1325_v18 = vsel %vm1323_vm12, %v1313_v43, 2102212464 }
 0x15d   : > { %v1328_v11 = vsel %vm1320_vm11, %v1307_v21, %v1310_v39  ;;  %v1159_v51 = vor.u32 4788187, %v1158_v58  ;;  %vm1322_vm13 = vcmp.lt.s32.totalorder %v1301_v5, 3  ;;  %v1329_v13 = vsel %vm1323_vm12, %v1316_v55, 920167782  ;;  %v9592_v58 = vpop.f32.mrb[15].mxu0 }
 0x15e   : > { %v1250_v8 = vsub.s32 0, %v9581_v45  ;;  %v1332_v16 = vsel %vm1320_vm11, %v1310_v39, %v1313_v43  ;;  %vm1321_vm14 = vcmp.lt.s32.totalorder %v1301_v5, 2  ;;  %v1330_v24 = vsel %vm1322_vm13, %v1313_v43, %v1329_v13 }
 0x15f   : > { %v1333_v26 = vsel %vm1323_vm12, %v1319_v19, 1326507024  ;;  %v1324_v25 = vsel %vm1320_vm11, %v1304_v50, %v1307_v21  ;;  %v1326_v12 = vsel %vm1322_vm13, %v1310_v39, %v1325_v18  ;;  %v1331_v46 = vsel %vm1321_vm14, %v1328_v11, %v1330_v24 }
 0x160   : > { %v8047_v41 = vmin.u32 %v1250_v8, %v9581_v45  ;;  %v1334_v29 = vsel %vm1322_vm13, %v1316_v55, %v1333_v26  ;;  %v9588_v23 = vmul.u32.u64.low %v1336_v37, %v1331_v46  ;;  %v9589_v60 = vmul.u32.u64.high %v1336_v37, %v1331_v46, %v9588_v23 }
 0x161   : > { %v1335_v53 = vsel %vm1321_vm14, %v1332_v16, %v1334_v29  ;;  %v1153_v8 = vshll.u32 %v9507_v32, %v9556_v17  ;;  %v8054_v19 = vadd.s32 4294967169, %v1396_v2  ;;  %v15520_v21 = vsub.s32 32, %v9539_v15 }
 0x162   : > { %v1252_v4 = vclz %v8047_v41  ;;  %v9596_v56 = vmul.u32.u64.low %v1336_v37, %v1335_v53  ;;  %v9597_v43 = vmul.u32.u64.high %v1336_v37, %v1335_v53, %v9596_v56  ;;  %v1327_v50 = vsel %vm1321_vm14, %v1324_v25, %v1326_v12 }
 0x163   : > { %v842_v55 = vshrl.u32 %v9457_v30, %v15520_v21  ;;  %v15521_v18 = vand.u32 2147483647, %v9534_v38  ;;  %v15522_v13 = vsub.s32 4294967266, %v9539_v15  ;;  %v9609_v41 = vmul.f32 %v1058_v57, %v1056_v20 }
 0x164   : > { %v8048_v39 = vadd.s32 4294967294, %v1252_v4  ;;  %v1155_v32 = vor.u32 %v1154_v59, %v1153_v8  ;;  %v1402_v17 = vadd.s32 1, %v8054_v19  ;;  %v1160_v56 = vand.u32 2147483647, %v1159_v51 }
 0x165   : > { %v1399_v11 = vand.u32 8388607, %v15521_v18  ;;  %v9607_v16 = vadd.s32 127, %v15522_v13  ;;  %v1346_v2 = vadd.s32 1, %v9589_v60  ;;  %v9614_v30 = vadd.f32 %v9212_v28, %v9521_v22 }
 0x166   : > { %vm8049_vm15 = vcmp.lt.s32.totalorder %v8048_v39, 0  ;;  %v1343_v24 = vmul.u32 %v1336_v37, %v1327_v50  ;;  %vm1345_vm0 = vc.u32 %v9597_v43, %v9588_v23  ;;  %vm1403_vm2 = vcmp.gt.s32.totalorder %v1402_v17, 0 }
 0x167   : > { %v9616_v5 = vsel %vm8049_vm15, 0, %v8048_v39  ;;  %v1347_v59 = vsel %vm1345_vm0, %v1346_v2, %v9589_v60  ;;  %v1400_v51 = vor.u32 8388608, %v1399_v11  ;;  %v15523_v26 = vshll.u32 %v9370_v44, %v9539_v15 }
 0x168   : > { %v1260_v20 = vsub.s32 4294967266, %v9616_v5  ;;  %v1162_v28 = vcvt.s32.f32 %v1155_v32  ;;  %v1348_v22 = vadd.s32 %v1347_v59, %v1343_v24  ;;  %v1404_v12 = vsel %vm1403_vm2, %v1402_v17, 0 }
 0x169   : > { %v9626_v25 = vor.u32 %v842_v55, %v15523_v26  ;;  %v1406_v4 = vand.u32 31, %v1404_v12  ;;  %v1240_v60 = vadd.s32 %v9513_v7, %v9524_v35  ;;  %v1256_v44 = vsub.s32 32, %v9616_v5 }
 0x16a   : > { %v1261_v29 = vadd.s32 127, %v1260_v20  ;;  %v9630_v53 = vmul.f32 %v1162_v28, %v1160_v56  ;;  %v1349_v8 = vadd.s32 536870912, %v1348_v22  ;;  %v9636_v21 = vshll.u32 %v1400_v51, 8 }
 0x16b   : > { %v1407_v15 = vsub.s32 32, %v1406_v4  ;;  %v1499_v55 = vand.u32 2139095040, %v9614_v30  ;;  %v9641_v18 = vshrl.u32 %v1404_v12, 5  ;;  %v1409_v11 = vshll.u32 %v15512_v31, %v1406_v4 }
 0x16c   : > { %v1262_v39 = vshll.u32 %v1261_v29, 23  ;;  %v9639_v50 = vshrl.u32 %v1349_v8, 30  ;;  %v1412_v7 = vshll.u32 %v15514_v9, %v1406_v4  ;;  %v1415_v35 = vshll.u32 %v15515_v6, %v1406_v4 }
 0x16d   : > { %v1410_v13 = vshrl.u32 %v15514_v9, %v1407_v15  ;;  %v1418_v32 = vshll.u32 %v15508_v3, %v1406_v4  ;;  %v1413_v56 = vshrl.u32 %v15515_v6, %v1407_v15  ;;  %v1416_v2 = vshrl.u32 %v15508_v3, %v1407_v15 }
 0x16e   : > { %15524 = vst [vmem:[#allocation21_spill] sm:$0xff] %v9639_v50  ;;  %v1351_v17 = vshll.u32 %v9639_v50, 30  ;;  %v1419_v24 = vshrl.u32 %v15509_v63, %v1407_v15  ;;  %v1257_v20 = vshll.u32 %v9581_v45, %v9616_v5  ;;  %v1421_v51 = vshll.u32 %v15509_v63, %v1406_v4 }
 0x16f   : > { %v1411_v59 = vor.u32 %v1410_v13, %v1409_v11  ;;  %v1422_v26 = vshrl.u32 %v15510_v0, %v1407_v15  ;;  %v1414_v12 = vor.u32 %v1413_v56, %v1412_v7  ;;  %v1417_v29 = vor.u32 %v1416_v2, %v1415_v35 }
 0x170   : > { %v9656_v28 = vsub.s32 %v1348_v22, %v1351_v17  ;;  %v1420_v8 = vor.u32 %v1419_v24, %v1418_v32  ;;  %vm15309_vm3 = vcmp.lt.s32.totalorder %v9235_v14, 0  ;;  %v1258_v57 = vshrl.u32 %v1240_v60, %v1256_v44 }
 0x171   : > { %v1263_v46 = vor.u32 4788187, %v1262_v39  ;;  %v1423_v37 = vor.u32 %v1422_v26, %v1421_v51  ;;  %v1500_v19 = vshrl.u32 %v1499_v55, 23  ;;  %v1408_v45 = vshrl.u32 %v15512_v31, %v1407_v15  ;;  %v9697_v26 = vpop.permute.xlu1 %402 }
 0x172   : > { %v1354_v50 = vsub.s32 0, %v9656_v28  ;;  %vm1424_vm4 = vcmp.lt.s32.totalorder %v9641_v18, 1  ;;  %vm1427_vm5 = vcmp.lt.s32.totalorder %v9641_v18, 4  ;;  %vm15336_vm6 = vcmp.lt.s32.totalorder %v9174_v47, 0 }
 0x173   : > { %vm1425_vm7 = vcmp.lt.s32.totalorder %v9641_v18, 2  ;;  %vm1426_vm8 = vcmp.lt.s32.totalorder %v9641_v18, 3  ;;  %v1432_v5 = vsel %vm1424_vm4, %v1411_v59, %v1414_v12  ;;  %v1433_v22 = vsel %vm1427_vm5, %v1420_v8, 920167782 }
 0x174   : > { %v8051_v4 = vmin.u32 %v1354_v50, %v9656_v28  ;;  %v1429_v60 = vsel %vm1427_vm5, %v1417_v29, 2102212464  ;;  %v1434_v44 = vsel %vm1426_vm8, %v1417_v29, %v1433_v22  ;;  %v1436_v15 = vsel %vm1424_vm4, %v1414_v12, %v1417_v29 }
 0x175   : > { %v15525_v55 = vand.u32 2147483647, %v9235_v14  ;;  %v15526_v39 = vmov 0  ;;  %v1435_v11 = vsel %vm1425_vm7, %v1432_v5, %v1434_v44  ;;  %v1437_v13 = vsel %vm1427_vm5, %v1423_v37, 1326507024 }
 0x176   : > { %v8058_v7 = vadd.s32 4294967169, %v1500_v19  ;;  %v15529_v50 = vand.u32 2147483647, %v9614_v30  ;;  %vm15334_vm11 = vcmp.lt.s32.totalorder %v9294_v34, 0  ;;  %v1259_v32 = vor.u32 %v1258_v57, %v1257_v20 }
 0x177   : > { %vm9675_vm10 = vcmp.le.f32.partialorder %v15525_v55, 0.7853982  ;;  %v1356_v17 = vclz %v8051_v4  ;;  %v1428_v56 = vsel %vm1424_vm4, %v1408_v45, %v1411_v59  ;;  %v1438_v2 = vsel %vm1426_vm8, %v1420_v8, %v1437_v13 }
 0x178   : > { %v15527_v39 = vsel %vm9675_vm10, 4294967295, %v15526_v39  ;;  %v1503_v35 = vand.u32 8388607, %v15529_v50  ;;  %v1430_v24 = vsel %vm1426_vm8, %v1414_v12, %v1429_v60  ;;  %v1439_v37 = vsel %vm1425_vm7, %v1436_v15, %v1438_v2 }
 0x179   : > { %15528 = vst [vmem:[#allocation22_spill] sm:$0xff] %v15527_v39  ;;  %v9693_v19 = vmul.u32.u64.low %v9636_v21, %v1435_v11  ;;  %v9694_v51 = vmul.u32.u64.high %v9636_v21, %v1435_v11, %v9693_v19  ;;  %v1264_v57 = vand.u32 2147483647, %v1263_v46  ;;  %v8052_v20 = vadd.s32 4294967294, %v1356_v17 }
 0x17a   : > { %v9700_v59 = vmul.u32.u64.low %v9636_v21, %v1439_v37  ;;  %v9701_v29 = vmul.u32.u64.high %v9636_v21, %v1439_v37, %v9700_v59  ;;  %v15530_v8 = vshll.u32 %v9607_v16, 23  ;;  %v15531_v12 = vor.u32 %v9399_v42, %v9393_v10 }
 0x17b   : > { %v1506_v22 = vadd.s32 1, %v8058_v7  ;;  %v9716_v46 = vadd.f32 %v9219_v54, %v9697_v26  ;;  %v15533_v4 = vxor.u32 2147483648, %v9609_v41  ;;  %v1266_v60 = vcvt.s32.f32 %v1259_v32 }
 0x17c   : > { %v9705_v45 = vor.u32 4788187, %v15530_v8  ;;  %v9712_v5 = vsel %vm907_vm9, %v15531_v12, 1326507024  ;;  %vm8053_vm12 = vcmp.lt.s32.totalorder %v8052_v20, 0  ;;  %v1431_v10 = vsel %vm1425_vm7, %v1428_v56, %v1430_v24 }
 0x17d   : > { %15532 = vst [vmem:[#allocation23_spill] sm:$0xff] %v9716_v46  ;;  %v1061_v16 = vsel %vm15309_vm3, %v15533_v4, %v9609_v41  ;;  %v1164_v42 = vxor.u32 2147483648, %v9630_v53  ;;  %v9726_v44 = vsel %vm8053_vm12, 0, %v8052_v20  ;;  %v1450_v15 = vadd.s32 1, %v9694_v51 }
 0x17e   : > { %vm1507_vm13 = vcmp.gt.s32.totalorder %v1506_v22, 0  ;;  %v15534_v54 = vxor.u32 2147483648, %v9528_v52  ;;  %v9737_v11 = vmul.f32 %v1266_v60, %v1264_v57  ;;  %v1504_v18 = vor.u32 8388608, %v1503_v35 }
 0x17f   : > { %v1447_v13 = vmul.u32 %v9636_v21, %v1431_v10  ;;  %vm1449_vm14 = vc.u32 %v9701_v29, %v9693_v19  ;;  %v1508_v7 = vsel %vm1507_vm13, %v1506_v22, 0  ;;  %v1603_v50 = vand.u32 2139095040, %v9716_v46 }
 0x180   : > { %v9734_v55 = vsel %vm15336_vm6, %v15534_v54, %v9528_v52  ;;  %v848_v32 = vand.u32 2147483647, %v9705_v45  ;;  %v9747_v52 = vsel %vm9675_vm10, %v9235_v14, %v1061_v16  ;;  %v1364_v17 = vsub.s32 4294967266, %v9726_v44 }
 0x181   : > { %v1451_v56 = vsel %vm1449_vm14, %v1450_v15, %v9694_v51  ;;  %v9754_v21 = vsel %vm15334_vm11, %v1164_v42, %v9630_v53  ;;  %v1344_v35 = vadd.s32 %v9588_v23, %v9597_v43  ;;  %v1510_v24 = vand.u32 31, %v1508_v7 }
 0x182   : > { %v1452_v2 = vadd.s32 %v1451_v56, %v1447_v13  ;;  %v1360_v57 = vsub.s32 32, %v9726_v44  ;;  %v9760_v20 = vshll.u32 %v1504_v18, 8  ;;  %v1361_v51 = vshll.u32 %v9656_v28, %v9726_v44 }
 0x183   : > { %v1511_v45 = vsub.s32 32, %v1510_v24  ;;  %v1604_v53 = vshrl.u32 %v1603_v50, 23  ;;  %v1365_v12 = vadd.s32 127, %v1364_v17  ;;  %v1509_v22 = vshrl.u32 %v1508_v7, 5 }
 0x184   : > { %v1453_v8 = vadd.s32 536870912, %v1452_v2  ;;  %v1513_v23 = vshll.u32 %v15512_v31, %v1510_v24  ;;  %v1516_v43 = vshll.u32 %v15514_v9, %v1510_v24  ;;  %v1519_v10 = vshll.u32 %v15515_v6, %v1510_v24 }
 0x185   : > { %v1514_v16 = vshrl.u32 %v15514_v9, %v1511_v45  ;;  %v1517_v60 = vshrl.u32 %v15515_v6, %v1511_v45  ;;  %v1520_v42 = vshrl.u32 %v15508_v3, %v1511_v45  ;;  %v1522_v28 = vshll.u32 %v15508_v3, %v1510_v24 }
 0x186   : > { %v9767_v4 = vshrl.u32 %v1453_v8, 30  ;;  %v1523_v44 = vshrl.u32 %v15509_v63, %v1511_v45  ;;  %v1525_v15 = vshll.u32 %v15509_v63, %v1510_v24  ;;  %v1526_v7 = vshrl.u32 %v15510_v0, %v1511_v45 }
 0x187   : > { %v1515_v18 = vor.u32 %v1514_v16, %v1513_v23  ;;  %v1518_v13 = vor.u32 %v1517_v60, %v1516_v43  ;;  %v15536_v50 = vand.u32 2147483647, %v9294_v34  ;;  %vm15308_vm0 = vcmp.lt.s32.totalorder %v9351_v36, 0 }
 0x188   : > { %15535 = vst [vmem:[#allocation24_spill] sm:$0xff] %v9767_v4  ;;  %v1455_v54 = vshll.u32 %v9767_v4, 30  ;;  %v1366_v56 = vshll.u32 %v1365_v12, 23  ;;  %v1521_v8 = vor.u32 %v1520_v42, %v1519_v10  ;;  %v1524_v59 = vor.u32 %v1523_v44, %v1522_v28 }
 0x189   : > { %vm9780_vm15 = vcmp.le.f32.partialorder %v15536_v50, 0.7853982  ;;  %vm1528_vm2 = vcmp.lt.s32.totalorder %v1509_v22, 1  ;;  %v1527_v24 = vor.u32 %v1526_v7, %v1525_v15  ;;  %vm1529_vm4 = vcmp.lt.s32.totalorder %v1509_v22, 2 }
 0x18a   : > { %v9785_v37 = vsub.s32 %v1452_v2, %v1455_v54  ;;  %vm1531_vm5 = vcmp.lt.s32.totalorder %v1509_v22, 4  ;;  %vm1530_vm7 = vcmp.lt.s32.totalorder %v1509_v22, 3  ;;  %v1536_v43 = vsel %vm1528_vm2, %v1515_v18, %v1518_v13 }
 0x18b   : > { %v1533_v23 = vsel %vm1531_vm5, %v1521_v8, 2102212464  ;;  %v1537_v16 = vsel %vm1531_vm5, %v1524_v59, 920167782  ;;  %v1512_v50 = vshrl.u32 %v15512_v31, %v1511_v45  ;;  %v1540_v12 = vsel %vm1528_vm2, %v1518_v13, %v1521_v8 }
 0x18c   : > { %v1458_v60 = vsub.s32 0, %v9785_v37  ;;  %v1538_v41 = vsel %vm1530_vm7, %v1521_v8, %v1537_v16  ;;  %v1362_v10 = vshrl.u32 %v1344_v35, %v1360_v57  ;;  %v1541_v2 = vsel %vm1531_vm5, %v1527_v24, 1326507024 }
 0x18d   : > { %v1539_v42 = vsel %vm1529_vm4, %v1536_v43, %v1538_v41  ;;  %v8062_v28 = vadd.s32 4294967169, %v1604_v53  ;;  %v1532_v15 = vsel %vm1528_vm2, %v1512_v50, %v1515_v18  ;;  %v1534_v54 = vsel %vm1530_vm7, %v1518_v13, %v1533_v23  ;;  %v9830_v43 = vpop.permute.xlu0 %407 }
 0x18e   : > { %v8055_v44 = vmin.u32 %v1458_v60, %v9785_v37  ;;  %v1542_v7 = vsel %vm1530_vm7, %v1524_v59, %v1541_v2  ;;  %v1367_v4 = vor.u32 4788187, %v1366_v56  ;;  %v15539_v35 = vcvt.s32.f32 %v9626_v25 }
 0x18f   : > { %v1543_v39 = vsel %vm1529_vm4, %v1540_v12, %v1542_v7  ;;  %v9796_v14 = vmul.u32.u64.low %v9760_v20, %v1539_v42  ;;  %v9797_v45 = vmul.u32.u64.high %v9760_v20, %v1539_v42, %v9796_v14  ;;  %8696 = vcosq.f32 %v9747_v52 }
 0x190   : > { %v9802_v57 = vmul.f32 %v15539_v35, %v848_v32  ;;  %v1460_v41 = vclz %v8055_v44  ;;  %v9805_v53 = vmul.u32.u64.low %v9760_v20, %v1543_v39  ;;  %v9806_v8 = vmul.u32.u64.high %v9760_v20, %v1543_v39, %v9805_v53 }
 0x191   : > { %v1363_v59 = vor.u32 %v1362_v10, %v1361_v51  ;;  %v1535_v18 = vsel %vm1529_vm4, %v1532_v15, %v1534_v54  ;;  %v1610_v13 = vadd.s32 1, %v8062_v28  ;;  %8698 = vsinq.f32 %v9747_v52 }
 0x192   : > { %v9815_v25 = vsel %vm9780_vm15, %v9294_v34, %v9754_v21  ;;  %v15540_v32 = vxor.u32 2147483648, %v9737_v11  ;;  %v8056_v56 = vadd.s32 4294967294, %v1460_v41  ;;  %v1368_v51 = vand.u32 2147483647, %v1367_v4 }
 0x193   : > { %v1554_v22 = vadd.s32 1, %v9797_v45  ;;  %v15541_v24 = vand.u32 2147483647, %v9716_v46  ;;  %vm1611_vm8 = vcmp.gt.s32.totalorder %v1610_v13, 0  ;;  %v1551_v23 = vmul.u32 %v9760_v20, %v1535_v18 }
 0x194   : > { %v9822_v39 = vsel %vm15308_vm0, %v15540_v32, %v9737_v11  ;;  %vm8057_vm12 = vcmp.lt.s32.totalorder %v8056_v56, 0  ;;  %vm1553_vm13 = vc.u32 %v9806_v8, %v9796_v14  ;;  %v1612_v21 = vsel %vm1611_vm8, %v1610_v13, 0 }
 0x195   : > { %v1607_v52 = vand.u32 8388607, %v15541_v24  ;;  %v1370_v16 = vcvt.s32.f32 %v1363_v59  ;;  %v9832_v11 = vsel %vm8057_vm12, 0, %v8056_v56  ;;  %v1555_v4 = vsel %vm1553_vm13, %v1554_v22, %v9797_v45 }
 0x196   : > { %v1614_v60 = vand.u32 31, %v1612_v21  ;;  %v1448_v50 = vadd.s32 %v9693_v19, %v9701_v29  ;;  %v1556_v12 = vadd.s32 %v1555_v4, %v1551_v23  ;;  %v9839_v10 = vadd.f32 %v9283_v27, %v9697_v26 }
 0x197   : > { %v9843_v20 = vadd.f32 %v9374_v48, %v9830_v43  ;;  %v9845_v42 = vmul.f32 %v1370_v16, %v1368_v51  ;;  %v1464_v2 = vsub.s32 32, %v9832_v11  ;;  %v1608_v28 = vor.u32 8388608, %v1607_v52 }
 0x198   : > { %v1615_v44 = vsub.s32 32, %v1614_v60  ;;  %v1468_v15 = vsub.s32 4294967266, %v9832_v11  ;;  %v1557_v54 = vadd.s32 536870912, %v1556_v12  ;;  %v1617_v19 = vshll.u32 %v15512_v31, %v1614_v60 }
 0x199   : > { %v1620_v29 = vshll.u32 %v15514_v9, %v1614_v60  ;;  %v1623_v48 = vshll.u32 %v15515_v6, %v1614_v60  ;;  %v1613_v35 = vshrl.u32 %v1612_v21, 5  ;;  %v1626_v41 = vshll.u32 %v15508_v3, %v1614_v60  ;;  %v9859_v59 = vpop.eup %8696 }
 0x19a   : > { %v1618_v27 = vshrl.u32 %v15514_v9, %v1615_v44  ;;  %v1621_v26 = vshrl.u32 %v15515_v6, %v1615_v44  ;;  %v1624_v7 = vshrl.u32 %v15508_v3, %v1615_v44  ;;  %v9855_v45 = vshrl.u32 %v1557_v54, 30  ;;  %15543 = vst [vmem:[#allocation26_spill] sm:$0xff] %v9859_v59 }
 0x19b   : > { %v1627_v53 = vshrl.u32 %v15509_v63, %v1615_v44  ;;  %v9862_v51 = vpop.eup %8698  ;;  %v1648_v52 = vshll.u32 %v1608_v28, 8  ;;  %v1707_v23 = vand.u32 2139095040, %v9839_v10  ;;  %v15545_v21 = vand.u32 2147483647, %v9351_v36 }
 0x19c   : > { %15542 = vst [vmem:[#allocation25_spill] sm:$0xff] %v9855_v45  ;;  %v1619_v18 = vor.u32 %v1618_v27, %v1617_v19  ;;  %v1622_v13 = vor.u32 %v1621_v26, %v1620_v29  ;;  %v1625_v32 = vor.u32 %v1624_v7, %v1623_v48  ;;  %15544 = vst [vmem:[#allocation27_spill] sm:$0xff] %v9862_v51  ;;  %v1559_v22 = vshll.u32 %v9855_v45, 30 }
 0x19d   : > { %v1628_v24 = vor.u32 %v1627_v53, %v1626_v41  ;;  %vm9868_vm14 = vcmp.le.f32.partialorder %v15545_v21, 0.7853982  ;;  %v15546_v16 = vmov 0  ;;  %v1466_v4 = vshrl.u32 %v1448_v50, %v1464_v2 }
 0x19e   : > { %v15547_v16 = vsel %vm9868_vm14, 4294967295, %v15546_v16  ;;  %v1469_v54 = vadd.s32 127, %v1468_v15  ;;  %v1629_v19 = vshll.u32 %v15509_v63, %v1614_v60  ;;  %v1630_v29 = vshrl.u32 %v15510_v0, %v1615_v44 }
 0x19f   : > { %15548 = vst [vmem:[#allocation28_spill] sm:$0xff] %v15547_v16  ;;  %v9874_v27 = vsub.s32 %v1556_v12, %v1559_v22  ;;  %vm1632_vm2 = vcmp.lt.s32.totalorder %v1613_v35, 1  ;;  %vm1634_vm4 = vcmp.lt.s32.totalorder %v1613_v35, 3  ;;  %vm1635_vm5 = vcmp.lt.s32.totalorder %v1613_v35, 4 }
 0x1a0   : > { %vm15310_vm7 = vcmp.lt.s32.totalorder %v9472_v1, 0  ;;  %v1631_v28 = vor.u32 %v1630_v29, %v1629_v19  ;;  %v1637_v26 = vsel %vm1635_vm5, %v1625_v32, 2102212464  ;;  %v1640_v48 = vsel %vm1632_vm2, %v1619_v18, %v1622_v13 }
 0x1a1   : > { %v1641_v7 = vsel %vm1635_vm5, %v1628_v24, 920167782  ;;  %v1562_v41 = vsub.s32 0, %v9874_v27  ;;  %v1616_v50 = vshrl.u32 %v15512_v31, %v1615_v44  ;;  %vm1633_vm8 = vcmp.lt.s32.totalorder %v1613_v35, 2 }
 0x1a2   : > { %v1642_v60 = vsel %vm1634_vm4, %v1625_v32, %v1641_v7  ;;  %v1470_v2 = vshll.u32 %v1469_v54, 23  ;;  %v1644_v15 = vsel %vm1632_vm2, %v1622_v13, %v1625_v32  ;;  %v1645_v53 = vsel %vm1635_vm5, %v1631_v28, 1326507024 }
 0x1a3   : > { %v1643_v12 = vsel %vm1633_vm8, %v1640_v48, %v1642_v60  ;;  %v8059_v22 = vmin.u32 %v1562_v41, %v9874_v27  ;;  %v1636_v21 = vsel %vm1632_vm2, %v1616_v50, %v1619_v18  ;;  %v1638_v19 = vsel %vm1634_vm4, %v1622_v13, %v1637_v26 }
 0x1a4   : > { %v1646_v29 = vsel %vm1634_vm4, %v1628_v24, %v1645_v53  ;;  %v9888_v44 = vmul.u32.u64.low %v1648_v52, %v1643_v12  ;;  %v9889_v45 = vmul.u32.u64.high %v1648_v52, %v1643_v12, %v9888_v44  ;;  %v1708_v54 = vshrl.u32 %v1707_v23, 23 }
 0x1a5   : > { %v1647_v56 = vsel %vm1633_vm8, %v1644_v15, %v1646_v29  ;;  %v1372_v48 = vxor.u32 2147483648, %v9845_v42  ;;  %v1564_v7 = vclz %v8059_v22  ;;  %v1465_v18 = vshll.u32 %v9785_v37, %v9832_v11 }
 0x1a6   : > { %v9893_v32 = vmul.u32.u64.low %v1648_v52, %v1647_v56  ;;  %v9894_v28 = vmul.u32.u64.high %v1648_v52, %v1647_v56, %v9893_v32  ;;  %v1471_v41 = vor.u32 4788187, %v1470_v2  ;;  %v1639_v13 = vsel %vm1633_vm8, %v1636_v21, %v1638_v19 }
 0x1a7   : > { %v8066_v24 = vadd.s32 4294967169, %v1708_v54  ;;  %8700 = vcosq.f32 %v9815_v25  ;;  %v9904_v23 = vsel %vm9868_vm14, %v9351_v36, %v9822_v39  ;;  %v8060_v26 = vadd.s32 4294967294, %v1564_v7 }
 0x1a8   : > { %v15549_v50 = vand.u32 2147483647, %v9839_v10  ;;  %v1467_v60 = vor.u32 %v1466_v4, %v1465_v18  ;;  %v1658_v12 = vadd.s32 1, %v9889_v45  ;;  %v1811_v11 = vand.u32 2139095040, %v9843_v20 }
 0x1a9   : > { %v1714_v37 = vadd.s32 1, %v8066_v24  ;;  %v1373_v35 = vsel %vm15310_vm7, %v1372_v48, %v9845_v42  ;;  %vm8061_vm12 = vcmp.lt.s32.totalorder %v8060_v26, 0  ;;  %v1655_v2 = vmul.u32 %v1648_v52, %v1639_v13 }
 0x1aa   : > { %v1711_v56 = vand.u32 8388607, %v15549_v50  ;;  %vm1657_vm13 = vc.u32 %v9894_v28, %v9888_v44  ;;  %v1472_v39 = vand.u32 2147483647, %v1471_v41  ;;  %v9915_v15 = vsel %vm8061_vm12, 0, %v8060_v26 }
 0x1ab   : > { %v1659_v53 = vsel %vm1657_vm13, %v1658_v12, %v9889_v45  ;;  %vm1715_vm2 = vcmp.gt.s32.totalorder %v1714_v37, 0  ;;  %v1572_v4 = vsub.s32 4294967266, %v9915_v15  ;;  %v15299_v19 = vand.u32 2147483647, %v9843_v20 }
 0x1ac   : > { %v1660_v22 = vadd.s32 %v1659_v53, %v1655_v2  ;;  %v1712_v21 = vor.u32 8388608, %v1711_v56  ;;  %8702 = vsinq.f32 %v9815_v25  ;;  %v1474_v42 = vcvt.s32.f32 %v1467_v60 }
 0x1ad   : > { %v1716_v29 = vsel %vm1715_vm2, %v1714_v37, 0  ;;  %v1812_v52 = vshrl.u32 %v1811_v11, 23  ;;  %8704 = vcosq.f32 %v9904_v23  ;;  %v15550_v54 = vand.u32 2147483647, %v9472_v1 }
 0x1ae   : > { %v1573_v45 = vadd.s32 127, %v1572_v4  ;;  %v1661_v7 = vadd.s32 536870912, %v1660_v22  ;;  %v9933_v18 = vmul.f32 %v1474_v42, %v1472_v39  ;;  %v1552_v25 = vadd.s32 %v9796_v14, %v9806_v8 }
 0x1af   : > { %vm9924_vm4 = vcmp.le.f32.partialorder %v15550_v54, 0.7853982  ;;  %v1718_v41 = vand.u32 31, %v1716_v29  ;;  %v1568_v13 = vsub.s32 32, %v9915_v15  ;;  %v9940_v26 = vshll.u32 %v1712_v21, 8 }
 0x1b0   : > { %v9931_v32 = vsel %vm9924_vm4, %v9472_v1, %v1373_v35  ;;  %v9938_v24 = vshrl.u32 %v1661_v7, 30  ;;  %v9944_v50 = vand.u32 8388607, %v15299_v19  ;;  %v1569_v56 = vshll.u32 %v9874_v27, %v9915_v15 }
 0x1b1   : > { %v1717_v60 = vshrl.u32 %v1716_v29, 5  ;;  %v1719_v12 = vsub.s32 32, %v1718_v41  ;;  %v8070_v37 = vadd.s32 4294967169, %v1812_v52  ;;  %v9948_v11 = vpop.eup %8700  ;;  %v1574_v14 = vshll.u32 %v1573_v45, 23 }
 0x1b2   : > { %15553 = vst [vmem:[#allocation29_spill] sm:$0xff] %v9938_v24  ;;  %15554 = vst [vmem:[#allocation30_spill] sm:$0xff] %v9948_v11  ;;  %v1663_v8 = vshll.u32 %v9938_v24, 30  ;;  %v1721_v35 = vshll.u32 %v15512_v31, %v1718_v41  ;;  %v1724_v2 = vshll.u32 %v15514_v9, %v1718_v41  ;;  %v1727_v4 = vshll.u32 %v15515_v6, %v1718_v41 }
 0x1b3   : > { %v1722_v39 = vshrl.u32 %v15514_v9, %v1719_v12  ;;  %v1725_v53 = vshrl.u32 %v15515_v6, %v1719_v12  ;;  %v1728_v27 = vshrl.u32 %v15508_v3, %v1719_v12  ;;  %v1730_v21 = vshll.u32 %v15508_v3, %v1718_v41 }
 0x1b4   : > { %v9957_v15 = vsub.s32 %v1660_v22, %v1663_v8  ;;  %v1731_v42 = vshrl.u32 %v15509_v63, %v1719_v12  ;;  %v1733_v29 = vshll.u32 %v15509_v63, %v1718_v41  ;;  %v1734_v7 = vshrl.u32 %v15510_v0, %v1719_v12 }
 0x1b5   : > { %v1723_v52 = vor.u32 %v1722_v39, %v1721_v35  ;;  %v1726_v54 = vor.u32 %v1725_v53, %v1724_v2  ;;  %v1729_v45 = vor.u32 %v1728_v27, %v1727_v4  ;;  %v1570_v19 = vshrl.u32 %v1552_v25, %v1568_v13 }
 0x1b6   : > { %v1666_v24 = vsub.s32 0, %v9957_v15  ;;  %v1732_v59 = vor.u32 %v1731_v42, %v1730_v21  ;;  %v1818_v16 = vadd.s32 1, %v8070_v37  ;;  %v9964_v51 = vpop.eup %8702  ;;  %v1575_v22 = vor.u32 4788187, %v1574_v14 }
 0x1b7   : > { %v1720_v8 = vshrl.u32 %v15512_v31, %v1719_v12  ;;  %v1735_v36 = vor.u32 %v1734_v7, %v1733_v29  ;;  %vm1736_vm5 = vcmp.lt.s32.totalorder %v1717_v60, 1  ;;  %v9967_v11 = vpop.eup %8704  ;;  %vm1738_vm8 = vcmp.lt.s32.totalorder %v1717_v60, 3 }
 0x1b8   : > { %v8063_v41 = vmin.u32 %v1666_v24, %v9957_v15  ;;  %vm1739_vm12 = vcmp.lt.s32.totalorder %v1717_v60, 4  ;;  %v1744_v35 = vsel %vm1736_vm5, %v1723_v52, %v1726_v54  ;;  %v1748_v13 = vsel %vm1736_vm5, %v1726_v54, %v1729_v45 }
 0x1b9   : > { %v1741_v2 = vsel %vm1739_vm12, %v1729_v45, 2102212464  ;;  %v1745_v25 = vsel %vm1739_vm12, %v1732_v59, 920167782  ;;  %v1749_v39 = vsel %vm1739_vm12, %v1735_v36, 1326507024  ;;  %v1571_v12 = vor.u32 %v1570_v19, %v1569_v56 }
 0x1ba   : > { %v1668_v53 = vclz %v8063_v41  ;;  %vm1737_vm13 = vcmp.lt.s32.totalorder %v1717_v60, 2  ;;  %v1746_v37 = vsel %vm1738_vm8, %v1729_v45, %v1745_v25  ;;  %v1816_v14 = vor.u32 8388608, %v9944_v50 }
 0x1bb   : > { %v1740_v4 = vsel %vm1736_vm5, %v1720_v8, %v1723_v52  ;;  %v1747_v27 = vsel %vm1737_vm13, %v1744_v35, %v1746_v37  ;;  %v1750_v21 = vsel %vm1738_vm8, %v1732_v59, %v1749_v39  ;;  %v1742_v42 = vsel %vm1738_vm8, %v1726_v54, %v1741_v2 }
 0x1bc   : > { %v8064_v24 = vadd.s32 4294967294, %v1668_v53  ;;  %v1751_v29 = vsel %vm1737_vm13, %v1748_v13, %v1750_v21  ;;  %vm1819_vm2 = vcmp.gt.s32.totalorder %v1818_v16, 0  ;;  %v1576_v7 = vand.u32 2147483647, %v1575_v22 }
 0x1bd   : > { %v9977_v36 = vmul.u32.u64.low %v9940_v26, %v1751_v29  ;;  %v9978_v41 = vmul.u32.u64.high %v9940_v26, %v1751_v29, %v9977_v36  ;;  %v1820_v45 = vsel %vm1819_vm2, %v1818_v16, 0  ;;  %v1476_v50 = vxor.u32 2147483648, %v9933_v18 }
 0x1be   : > { %vm8065_vm12 = vcmp.lt.s32.totalorder %v8064_v24, 0  ;;  %v9982_v19 = vmul.u32.u64.low %v9940_v26, %v1747_v27  ;;  %v9983_v56 = vmul.u32.u64.high %v9940_v26, %v1747_v27, %v9982_v19  ;;  %v1578_v59 = vcvt.s32.f32 %v1571_v12 }
 0x1bf   : > { %v1671_v52 = vsel %vm8065_vm12, 0, %v8064_v24  ;;  %v1743_v54 = vsel %vm1737_vm13, %v1740_v4, %v1742_v42  ;;  %v1822_v8 = vand.u32 31, %v1820_v45  ;;  %v1656_v22 = vadd.s32 %v9888_v44, %v9894_v28 }
 0x1c0   : > { %v1676_v35 = vsub.s32 4294967266, %v1671_v52  ;;  %v9989_v2 = vshll.u32 %v1816_v14, 8  ;;  %v9993_v16 = vadd.f32 %v9438_v62, %v9830_v43  ;;  %v9995_v25 = vmul.f32 %v1578_v59, %v1576_v7 }
 0x1c1   : > { %v1672_v13 = vsub.s32 32, %v1671_v52  ;;  %vm1761_vm5 = vc.u32 %v9978_v41, %v9982_v19  ;;  %v1823_v39 = vsub.s32 32, %v1822_v8  ;;  %v1759_v53 = vmul.u32 %v9940_v26, %v1743_v54 }
 0x1c2   : > { %v1677_v60 = vadd.s32 127, %v1676_v35  ;;  %v1762_v37 = vadd.s32 1, %v9983_v56  ;;  %v1821_v44 = vshrl.u32 %v1820_v45, 5  ;;  %v1825_v28 = vshll.u32 %v15512_v31, %v1822_v8 }
 0x1c3   : > { %v1826_v14 = vshrl.u32 %v15514_v9, %v1823_v39  ;;  %v1828_v62 = vshll.u32 %v15514_v9, %v1822_v8  ;;  %v1829_v43 = vshrl.u32 %v15515_v6, %v1823_v39  ;;  %v1831_v27 = vshll.u32 %v15515_v6, %v1822_v8 }
 0x1c4   : > { %v1678_v12 = vshll.u32 %v1677_v60, 23  ;;  %v1763_v4 = vsel %vm1761_vm5, %v1762_v37, %v9983_v56  ;;  %v1832_v21 = vshrl.u32 %v15508_v3, %v1823_v39  ;;  %v1673_v26 = vshll.u32 %v9957_v15, %v1671_v52 }
 0x1c5   : > { %v1674_v24 = vshrl.u32 %v1656_v22, %v1672_v13  ;;  %v1764_v42 = vadd.s32 %v1763_v4, %v1759_v53  ;;  %v1827_v29 = vor.u32 %v1826_v14, %v1825_v28  ;;  %v1830_v7 = vor.u32 %v1829_v43, %v1828_v62 }
 0x1c6   : > { %v1833_v36 = vor.u32 %v1832_v21, %v1831_v27  ;;  %v1834_v45 = vshll.u32 %v15508_v3, %v1822_v8  ;;  %v1835_v59 = vshrl.u32 %v15509_v63, %v1823_v39  ;;  %vm15320_vm8 = vcmp.lt.s32.totalorder %v9534_v38, 0 }
 0x1c7   : > { %v1679_v54 = vor.u32 4788187, %v1678_v12  ;;  %v1765_v35 = vadd.s32 536870912, %v1764_v42  ;;  %v1837_v56 = vshll.u32 %v15509_v63, %v1822_v8  ;;  %v1838_v60 = vshrl.u32 %v15510_v0, %v1823_v39 }
 0x1c8   : > { %v1824_v37 = vshrl.u32 %v15512_v31, %v1823_v39  ;;  %v1836_v15 = vor.u32 %v1835_v59, %v1834_v45  ;;  %vm1840_vm13 = vcmp.lt.s32.totalorder %v1821_v44, 1  ;;  %vm1843_vm2 = vcmp.lt.s32.totalorder %v1821_v44, 4 }
 0x1c9   : > { %vm15324_vm12 = vcmp.lt.s32.totalorder %v9614_v30, 0  ;;  %v1675_v52 = vor.u32 %v1674_v24, %v1673_v26  ;;  %v10016_v22 = vshrl.u32 %v1765_v35, 30  ;;  %v1839_v13 = vor.u32 %v1838_v60, %v1837_v56 }
 0x1ca   : > { %v1845_v53 = vsel %vm1843_vm2, %v1833_v36, 2102212464  ;;  %v15556_v28 = vand.u32 2147483647, %v9534_v38  ;;  %v15557_v14 = vmov 0  ;;  %vm1841_vm0 = vcmp.lt.s32.totalorder %v1821_v44, 2 }
 0x1cb   : > { %15555 = vst [vmem:[#allocation31_spill] sm:$0xff] %v10016_v22  ;;  %vm1842_vm3 = vcmp.lt.s32.totalorder %v1821_v44, 3  ;;  %v1848_v8 = vsel %vm1840_vm13, %v1827_v29, %v1830_v7  ;;  %v1849_v39 = vsel %vm1843_vm2, %v1836_v15, 920167782  ;;  %v1680_v62 = vand.u32 2147483647, %v1679_v54 }
 0x1cc   : > { %vm10021_vm5 = vcmp.le.f32.partialorder %v15556_v28, 0.7853982  ;;  %v1767_v43 = vshll.u32 %v10016_v22, 30  ;;  %v1850_v12 = vsel %vm1842_vm3, %v1833_v36, %v1849_v39  ;;  %v1852_v4 = vsel %vm1840_vm13, %v1830_v7, %v1833_v36 }
 0x1cd   : > { %v15558_v14 = vsel %vm10021_vm5, 4294967295, %v15557_v14  ;;  %v15560_v27 = vand.u32 2147483647, %v9614_v30  ;;  %v15561_v21 = vmov 0  ;;  %v1844_v26 = vsel %vm1840_vm13, %v1824_v37, %v1827_v29 }
 0x1ce   : > { %15559 = vst [vmem:[#allocation32_spill] sm:$0xff] %v15558_v14  ;;  %v1846_v24 = vsel %vm1842_vm3, %v1830_v7, %v1845_v53  ;;  %v1851_v45 = vsel %vm1841_vm0, %v1848_v8, %v1850_v12  ;;  %v1853_v59 = vsel %vm1843_vm2, %v1839_v13, 1326507024  ;;  %v10038_v35 = vsub.s32 %v1764_v42, %v1767_v43  ;;  %v413_v43 = vpop.permute.xlu1 %412 }
 0x1cf   : > { %vm10031_vm7 = vcmp.le.f32.partialorder %v15560_v27, 0.7853982  ;;  %v1854_v54 = vsel %vm1842_vm3, %v1836_v15, %v1853_v59  ;;  %v10041_v56 = vmul.u32.u64.low %v9989_v2, %v1851_v45  ;;  %v10042_v60 = vmul.u32.u64.high %v9989_v2, %v1851_v45, %v10041_v56 }
 0x1d0   : > { %v15562_v21 = vsel %vm10031_vm7, 4294967295, %v15561_v21  ;;  %v1580_v36 = vxor.u32 2147483648, %v9995_v25  ;;  %v1855_v28 = vsel %vm1841_vm0, %v1852_v4, %v1854_v54  ;;  %v15311_v39 = vand.u32 2147483647, %v9993_v16 }
 0x1d1   : > { %15563 = vst [vmem:[#allocation33_spill] sm:$0xff] %v15562_v21  ;;  %v1915_v29 = vand.u32 2139095040, %v9993_v16  ;;  %v1682_v7 = vcvt.s32.f32 %v1675_v52  ;;  %v1770_v37 = vsub.s32 0, %v10038_v35  ;;  %8706 = vsinq.f32 %v9904_v23 }
 0x1d2   : > { %v10051_v42 = vmul.u32.u64.low %v9989_v2, %v1855_v28  ;;  %v10052_v13 = vmul.u32.u64.high %v9989_v2, %v1855_v28, %v10051_v42  ;;  %v1477_v15 = vsel %vm15320_vm8, %v1476_v50, %v9933_v18  ;;  %v1847_v53 = vsel %vm1841_vm0, %v1844_v26, %v1846_v24 }
 0x1d3   : > { %v1916_v8 = vshrl.u32 %v1915_v29, 23  ;;  %8708 = vcosq.f32 %v9931_v32  ;;  %v1683_v52 = vmul.f32 %v1682_v7, %v1680_v62  ;;  %v8067_v12 = vmin.u32 %v1770_v37, %v10038_v35 }
 0x1d4   : > { %v1866_v4 = vadd.s32 1, %v10042_v60  ;;  %v1581_v23 = vsel %vm15324_vm12, %v1580_v36, %v9995_v25  ;;  %v1919_v45 = vand.u32 8388607, %v15311_v39  ;;  %v10070_v18 = vadd.f32 %v9545_v33, %v413_v43 }
 0x1d5   : > { %v8074_v27 = vadd.s32 4294967169, %v1916_v8  ;;  %v1480_v50 = vsel %vm10021_vm5, %v9534_v38, %v1477_v15  ;;  %v1772_v44 = vclz %v8067_v12  ;;  %v1863_v62 = vmul.u32 %v9989_v2, %v1847_v53 }
 0x1d6   : > { %vm1865_vm3 = vc.u32 %v10052_v13, %v10041_v56  ;;  %8710 = vsinq.f32 %v9931_v32  ;;  %vm15319_vm0 = vcmp.lt.s32.totalorder %v9716_v46, 0  ;;  %v10084_v33 = vsel %vm10031_vm7, %v9614_v30, %v1581_v23 }
 0x1d7   : > { %v1867_v25 = vsel %vm1865_vm3, %v1866_v4, %v10042_v60  ;;  %v1922_v26 = vadd.s32 1, %v8074_v27  ;;  %v1684_v24 = vxor.u32 2147483648, %v1683_v52  ;;  %v8068_v59 = vadd.s32 4294967294, %v1772_v44 }
 0x1d8   : > { %v1868_v54 = vadd.s32 %v1867_v25, %v1863_v62  ;;  %8712 = vcosq.f32 %v1480_v50  ;;  %v1920_v2 = vor.u32 8388608, %v1919_v45  ;;  %v2019_v36 = vand.u32 2139095040, %v10070_v18 }
 0x1d9   : > { %vm1923_vm13 = vcmp.gt.s32.totalorder %v1922_v26, 0  ;;  %8714 = vsinq.f32 %v1480_v50  ;;  %vm8069_vm2 = vcmp.lt.s32.totalorder %v8068_v59, 0  ;;  %v1760_v60 = vadd.s32 %v9982_v19, %v9978_v41 }
 0x1da   : > { %v1869_v32 = vadd.s32 536870912, %v1868_v54  ;;  %v1924_v28 = vsel %vm1923_vm13, %v1922_v26, 0  ;;  %8716 = vcosq.f32 %v10084_v33  ;;  %v10090_v29 = vsel %vm8069_vm2, 0, %v8068_v59 }
 0x1db   : > { %v1926_v7 = vand.u32 31, %v1924_v28  ;;  %v10094_v37 = vsel %vm15319_vm0, %v1684_v24, %v1683_v52  ;;  %v1780_v42 = vsub.s32 4294967266, %v10090_v29  ;;  %v10100_v53 = vadd.f32 %v9592_v58, %v413_v43  ;;  %v10102_v8 = vpop.eup %8706 }
 0x1dc   : > { %v10097_v15 = vshrl.u32 %v1869_v32, 30  ;;  %v1776_v12 = vsub.s32 32, %v10090_v29  ;;  %v10105_v41 = vshll.u32 %v1920_v2, 8  ;;  %v2020_v19 = vshrl.u32 %v2019_v36, 23 }
 0x1dd   : > { %v1927_v4 = vsub.s32 32, %v1926_v7  ;;  %v10107_v23 = vpop.eup %8708  ;;  %v1929_v27 = vshll.u32 %v15512_v31, %v1926_v7  ;;  %v1932_v45 = vshll.u32 %v15514_v9, %v1926_v7  ;;  %v1935_v50 = vshll.u32 %v15515_v6, %v1926_v7 }
 0x1de   : > { %15564 = vst [vmem:[#allocation34_spill] sm:$0xff] %v10097_v15  ;;  %v1871_v52 = vshll.u32 %v10097_v15, 30  ;;  %v1781_v58 = vadd.s32 127, %v1780_v42  ;;  %v1925_v26 = vshrl.u32 %v1924_v28, 5  ;;  %v1938_v24 = vshll.u32 %v15508_v3, %v1926_v7 }
 0x1df   : > { %v1930_v43 = vshrl.u32 %v15514_v9, %v1927_v4  ;;  %v1933_v44 = vshrl.u32 %v15515_v6, %v1927_v4  ;;  %v1936_v62 = vshrl.u32 %v15508_v3, %v1927_v4  ;;  %v1939_v59 = vshrl.u32 %v15509_v63, %v1927_v4 }
 0x1e0   : > { %v10116_v25 = vsub.s32 %v1868_v54, %v1871_v52  ;;  %v10120_v2 = vpop.eup %8710  ;;  %v1777_v15 = vshll.u32 %v10038_v35, %v10090_v29  ;;  %v8078_v54 = vadd.s32 4294967169, %v2020_v19  ;;  %v15566_v28 = vand.u32 2147483647, %v9716_v46 }
 0x1e1   : > { %v1931_v36 = vor.u32 %v1930_v43, %v1929_v27  ;;  %v1934_v32 = vor.u32 %v1933_v44, %v1932_v45  ;;  %v1937_v39 = vor.u32 %v1936_v62, %v1935_v50  ;;  %v1940_v38 = vor.u32 %v1939_v59, %v1938_v24 }
 0x1e2   : > { %v1874_v14 = vsub.s32 0, %v10116_v25  ;;  %v10126_v52 = vpop.eup %8712  ;;  %vm10130_vm3 = vcmp.le.f32.partialorder %v15566_v28, 0.7853982  ;;  %v15567_v22 = vmov 0  ;;  %v1778_v27 = vshrl.u32 %v1760_v60, %v1776_v12 }
 0x1e3   : > { %15565 = vst [vmem:[#allocation35_spill] sm:$0xff] %v10126_v52  ;;  %v15568_v22 = vsel %vm10130_vm3, 4294967295, %v15567_v22  ;;  %v1782_v45 = vshll.u32 %v1781_v58, 23  ;;  %v1941_v50 = vshll.u32 %v15509_v63, %v1926_v7  ;;  %v1942_v43 = vshrl.u32 %v15510_v0, %v1927_v4  ;;  %v10136_v44 = vpop.eup %8714 }
 0x1e4   : > { %15569 = vst [vmem:[#allocation36_spill] sm:$0xff] %v15568_v22  ;;  %15570 = vst [vmem:[#allocation37_spill] sm:$0xff] %v10136_v44  ;;  %v8071_v35 = vmin.u32 %v1874_v14, %v10116_v25  ;;  %vm1944_vm13 = vcmp.lt.s32.totalorder %v1925_v26, 1  ;;  %vm1946_vm2 = vcmp.lt.s32.totalorder %v1925_v26, 3  ;;  %vm1947_vm0 = vcmp.lt.s32.totalorder %v1925_v26, 4  ;;  %v10139_v29 = vpop.eup %8716 }
 0x1e5   : > { %15571 = vst [vmem:[#allocation38_spill] sm:$0xff] %v10139_v29  ;;  %v1943_v19 = vor.u32 %v1942_v43, %v1941_v50  ;;  %v1949_v62 = vsel %vm1947_vm0, %v1937_v39, 2102212464  ;;  %v1952_v24 = vsel %vm1944_vm13, %v1931_v36, %v1934_v32  ;;  %v1953_v59 = vsel %vm1947_vm0, %v1940_v38, 920167782 }
 0x1e6   : > { %v1876_v60 = vclz %v8071_v35  ;;  %v1928_v12 = vshrl.u32 %v15512_v31, %v1927_v4  ;;  %vm1945_vm8 = vcmp.lt.s32.totalorder %v1925_v26, 2  ;;  %v1954_v7 = vsel %vm1946_vm2, %v1937_v39, %v1953_v59 }
 0x1e7   : > { %v1783_v58 = vor.u32 4788187, %v1782_v45  ;;  %v1955_v28 = vsel %vm1945_vm8, %v1952_v24, %v1954_v7  ;;  %v1956_v14 = vsel %vm1944_vm13, %v1934_v32, %v1937_v39  ;;  %v1957_v42 = vsel %vm1947_vm0, %v1943_v19, 1326507024 }
 0x1e8   : > { %v8072_v52 = vadd.s32 4294967294, %v1876_v60  ;;  %v1948_v44 = vsel %vm1944_vm13, %v1928_v12, %v1931_v36  ;;  %v1950_v50 = vsel %vm1946_vm2, %v1934_v32, %v1949_v62  ;;  %v1958_v43 = vsel %vm1946_vm2, %v1940_v38, %v1957_v42 }
 0x1e9   : > { %v1959_v35 = vsel %vm1945_vm8, %v1956_v14, %v1958_v43  ;;  %v10151_v4 = vmul.u32.u64.low %v10105_v41, %v1955_v28  ;;  %v10152_v29 = vmul.u32.u64.high %v10105_v41, %v1955_v28, %v10151_v4  ;;  %v2026_v45 = vadd.s32 1, %v8078_v54 }
 0x1ea   : > { %v1779_v59 = vor.u32 %v1778_v27, %v1777_v15  ;;  %vm8073_vm12 = vcmp.lt.s32.totalorder %v8072_v52, 0  ;;  %v10156_v39 = vmul.u32.u64.low %v10105_v41, %v1959_v35  ;;  %v10157_v19 = vmul.u32.u64.high %v10105_v41, %v1959_v35, %v10156_v39 }
 0x1eb   : > { %8718 = vsinq.f32 %v10084_v33  ;;  %v1879_v36 = vsel %vm8073_vm12, 0, %v8072_v52  ;;  %v1951_v32 = vsel %vm1945_vm8, %v1948_v44, %v1950_v50  ;;  %vm2027_vm0 = vcmp.gt.s32.totalorder %v2026_v45, 0 }
 0x1ec   : > { %v10165_v38 = vsel %vm10130_vm3, %v9716_v46, %v10094_v37  ;;  %v1784_v42 = vand.u32 2147483647, %v1783_v58  ;;  %v1884_v54 = vsub.s32 4294967266, %v1879_v36  ;;  %v15572_v15 = vand.u32 2147483647, %v10070_v18 }
 0x1ed   : > { %v1880_v62 = vsub.s32 32, %v1879_v36  ;;  %v1970_v24 = vadd.s32 1, %v10152_v29  ;;  %v2028_v60 = vsel %vm2027_vm0, %v2026_v45, 0  ;;  %v2123_v33 = vand.u32 2139095040, %v10100_v53 }
 0x1ee   : > { %v2023_v27 = vand.u32 8388607, %v15572_v15  ;;  %v1786_v26 = vcvt.s32.f32 %v1779_v59  ;;  %v1885_v52 = vadd.s32 127, %v1884_v54  ;;  %v1967_v44 = vmul.u32 %v10105_v41, %v1951_v32 }
 0x1ef   : > { %vm1969_vm8 = vc.u32 %v10157_v19, %v10151_v4  ;;  %v1864_v37 = vadd.s32 %v10041_v56, %v10052_v13  ;;  %v2030_v7 = vand.u32 31, %v2028_v60  ;;  %v1881_v14 = vshll.u32 %v10116_v25, %v1879_v36 }
 0x1f0   : > { %v1971_v12 = vsel %vm1969_vm8, %v1970_v24, %v10152_v29  ;;  %v10178_v28 = vmul.f32 %v1786_v26, %v1784_v42  ;;  %v2024_v43 = vor.u32 8388608, %v2023_v27  ;;  %v2029_v45 = vshrl.u32 %v2028_v60, 5 }
 0x1f1   : > { %v1972_v50 = vadd.s32 %v1971_v12, %v1967_v44  ;;  %v1882_v35 = vshrl.u32 %v1864_v37, %v1880_v62  ;;  %v2031_v41 = vsub.s32 32, %v2030_v7  ;;  %v2124_v59 = vshrl.u32 %v2123_v33, 23 }
 0x1f2   : > { %v1886_v39 = vshll.u32 %v1885_v52, 23  ;;  %v2033_v54 = vshll.u32 %v15512_v31, %v2030_v7  ;;  %v2036_v56 = vshll.u32 %v15514_v9, %v2030_v7  ;;  %v2039_v42 = vshll.u32 %v15515_v6, %v2030_v7 }
 0x1f3   : > { %v1973_v32 = vadd.s32 536870912, %v1972_v50  ;;  %v2034_v13 = vshrl.u32 %v15514_v9, %v2031_v41  ;;  %v2037_v29 = vshrl.u32 %v15515_v6, %v2031_v41  ;;  %v2040_v25 = vshrl.u32 %v15508_v3, %v2031_v41 }
 0x1f4   : > { %v2042_v15 = vshll.u32 %v15508_v3, %v2030_v7  ;;  %v2043_v27 = vshrl.u32 %v15509_v63, %v2031_v41  ;;  %v2045_v62 = vshll.u32 %v15509_v63, %v2030_v7  ;;  %v2046_v52 = vshrl.u32 %v15510_v0, %v2031_v41 }
 0x1f5   : > { %v10187_v36 = vshrl.u32 %v1973_v32, 30  ;;  %v10192_v24 = vpop.eup %8718  ;;  %v2035_v60 = vor.u32 %v2034_v13, %v2033_v54  ;;  %v2038_v33 = vor.u32 %v2037_v29, %v2036_v56  ;;  %v2041_v26 = vor.u32 %v2040_v25, %v2039_v42 }
 0x1f6   : > { %15574 = vst [vmem:[#allocation40_spill] sm:$0xff] %v10192_v24  ;;  %vm15333_vm12 = vcmp.lt.s32.totalorder %v9839_v10, 0  ;;  %v1788_v44 = vxor.u32 2147483648, %v10178_v28  ;;  %v2044_v12 = vor.u32 %v2043_v27, %v2042_v15  ;;  %v2064_v32 = vshll.u32 %v2024_v43, 8 }
 0x1f7   : > { %15573 = vst [vmem:[#allocation39_spill] sm:$0xff] %v10187_v36  ;;  %v1975_v37 = vshll.u32 %v10187_v36, 30  ;;  %v1883_v58 = vor.u32 %v1882_v35, %v1881_v14  ;;  %v1887_v22 = vor.u32 4788187, %v1886_v39  ;;  %v2047_v46 = vor.u32 %v2046_v52, %v2045_v62 }
 0x1f8   : > { %v8082_v21 = vadd.s32 4294967169, %v2124_v59  ;;  %v2032_v54 = vshrl.u32 %v15512_v31, %v2031_v41  ;;  %vm2048_vm13 = vcmp.lt.s32.totalorder %v2029_v45, 1  ;;  %vm2051_vm2 = vcmp.lt.s32.totalorder %v2029_v45, 4 }
 0x1f9   : > { %v10198_v7 = vsub.s32 %v1972_v50, %v1975_v37  ;;  %vm2050_vm0 = vcmp.lt.s32.totalorder %v2029_v45, 3  ;;  %v2053_v56 = vsel %vm2051_vm2, %v2041_v26, 2102212464  ;;  %v2056_v13 = vsel %vm2048_vm13, %v2035_v60, %v2038_v33 }
 0x1fa   : > { %v2057_v29 = vsel %vm2051_vm2, %v2044_v12, 920167782  ;;  %vm2049_vm8 = vcmp.lt.s32.totalorder %v2029_v45, 2  ;;  %v2060_v15 = vsel %vm2048_vm13, %v2038_v33, %v2041_v26  ;;  %v1888_v43 = vand.u32 2147483647, %v1887_v22 }
 0x1fb   : > { %v1978_v42 = vsub.s32 0, %v10198_v7  ;;  %v2058_v25 = vsel %vm2050_vm0, %v2041_v26, %v2057_v29  ;;  %v2061_v35 = vsel %vm2051_vm2, %v2047_v46, 1326507024  ;;  %v15575_v50 = vand.u32 2147483647, %v10100_v53 }
 0x1fc   : > { %v2059_v14 = vsel %vm2049_vm8, %v2056_v13, %v2058_v25  ;;  %v2052_v39 = vsel %vm2048_vm13, %v2032_v54, %v2035_v60  ;;  %v2054_v27 = vsel %vm2050_vm0, %v2038_v33, %v2053_v56  ;;  %v2062_v62 = vsel %vm2050_vm0, %v2044_v12, %v2061_v35 }
 0x1fd   : > { %v2127_v59 = vand.u32 8388607, %v15575_v50  ;;  %v8075_v41 = vmin.u32 %v1978_v42, %v10198_v7  ;;  %v1890_v52 = vcvt.s32.f32 %v1883_v58  ;;  %v2063_v37 = vsel %vm2049_vm8, %v2060_v15, %v2062_v62 }
 0x1fe   : > { %v10207_v36 = vmul.u32.u64.low %v2064_v32, %v2059_v14  ;;  %v10208_v24 = vmul.u32.u64.high %v2064_v32, %v2059_v14, %v10207_v36  ;;  %v10211_v22 = vmul.u32.u64.low %v2064_v32, %v2063_v37  ;;  %v10212_v29 = vmul.u32.u64.high %v2064_v32, %v2063_v37, %v10211_v22 }
 0x1ff   : > { %v1980_v26 = vclz %v8075_v41  ;;  %v2130_v46 = vadd.s32 1, %v8082_v21  ;;  %8720 = vcosq.f32 %v10165_v38  ;;  %v1789_v60 = vsel %vm15333_vm12, %v1788_v44, %v10178_v28 }
 0x200   : > { %v2055_v58 = vsel %vm2049_vm8, %v2052_v39, %v2054_v27  ;;  %v10220_v33 = vmul.f32 %v1890_v52, %v1888_v43  ;;  %v2128_v54 = vor.u32 8388608, %v2127_v59  ;;  %8722 = vsinq.f32 %v10165_v38 }
 0x201   : > { %v8076_v12 = vadd.s32 4294967294, %v1980_v26  ;;  %vm2131_vm13 = vcmp.gt.s32.totalorder %v2130_v46, 0  ;;  %v15576_v56 = vand.u32 2147483647, %v9839_v10  ;;  %v2074_v42 = vadd.s32 1, %v10208_v24 }
 0x202   : > { %v2132_v25 = vsel %vm2131_vm13, %v2130_v46, 0  ;;  %v2071_v45 = vmul.u32 %v2064_v32, %v2055_v58  ;;  %vm2073_vm8 = vc.u32 %v10212_v29, %v10207_v36  ;;  %v1968_v38 = vadd.s32 %v10151_v4, %v10157_v19 }
 0x203   : > { %vm10225_vm2 = vcmp.le.f32.partialorder %v15576_v56, 0.7853982  ;;  %vm8077_vm0 = vcmp.lt.s32.totalorder %v8076_v12, 0  ;;  %v2075_v15 = vsel %vm2073_vm8, %v2074_v42, %v10208_v24  ;;  %v2134_v43 = vand.u32 31, %v2132_v25 }
 0x204   : > { %v10233_v28 = vsel %vm10225_vm2, %v9839_v10, %v1789_v60  ;;  %v1983_v44 = vsel %vm8077_vm0, 0, %v8076_v12  ;;  %v2076_v50 = vadd.s32 %v2075_v15, %v2071_v45  ;;  %v10241_v59 = vshll.u32 %v2128_v54, 8 }
 0x205   : > { %v1988_v35 = vsub.s32 4294967266, %v1983_v44  ;;  %v1984_v41 = vsub.s32 32, %v1983_v44  ;;  %v2133_v39 = vshrl.u32 %v2132_v25, 5  ;;  %v2135_v27 = vsub.s32 32, %v2134_v43 }
 0x206   : > { %v2077_v52 = vadd.s32 536870912, %v2076_v50  ;;  %v2137_v37 = vshll.u32 %v15512_v31, %v2134_v43  ;;  %v2140_v4 = vshll.u32 %v15514_v9, %v2134_v43  ;;  %v2143_v26 = vshll.u32 %v15515_v6, %v2134_v43 }
 0x207   : > { %v1989_v62 = vadd.s32 127, %v1988_v35  ;;  %v2138_v19 = vshrl.u32 %v15514_v9, %v2135_v27  ;;  %v2141_v24 = vshrl.u32 %v15515_v6, %v2135_v27  ;;  %v2144_v22 = vshrl.u32 %v15508_v3, %v2135_v27 }
 0x208   : > { %v10250_v60 = vshrl.u32 %v2077_v52, 30  ;;  %v2146_v58 = vshll.u32 %v15508_v3, %v2134_v43  ;;  %v2147_v12 = vshrl.u32 %v15509_v63, %v2135_v27  ;;  %v681_v45 = vshll.u32 %v15512_v31, %v9257_v40 }
 0x209   : > { %v1990_v46 = vshll.u32 %v1989_v62, 23  ;;  %v10254_v54 = vpop.eup %8720  ;;  %v2139_v56 = vor.u32 %v2138_v19, %v2137_v37  ;;  %v2142_v42 = vor.u32 %v2141_v24, %v2140_v4  ;;  %v2145_v25 = vor.u32 %v2144_v22, %v2143_v26  ;;  %v15581_v62 = vld [vmem:[#allocation6_spill] sm:$0xff] }
 0x20a   : > { %15579 = vst [vmem:[#allocation41_spill] sm:$0xff] %v10250_v60  ;;  %15580 = vst [vmem:[#allocation42_spill] sm:$0xff] %v10254_v54  ;;  %v1985_v15 = vshll.u32 %v10198_v7, %v1983_v44  ;;  %v2079_v35 = vshll.u32 %v10250_v60, 30  ;;  %v2148_v13 = vor.u32 %v2147_v12, %v2146_v58  ;;  %v682_v52 = vshrl.u32 %v15514_v9, %v15581_v62  ;;  %v10262_v14 = vpop.eup %8722 }
 0x20b   : > { %vm15337_vm13 = vcmp.lt.s32.totalorder %v9843_v20, 0  ;;  %v1986_v32 = vshrl.u32 %v1968_v38, %v1984_v41  ;;  %v1991_v54 = vor.u32 4788187, %v1990_v46  ;;  %v2149_v37 = vshll.u32 %v15509_v63, %v2134_v43 }
 0x20c   : > { %v2150_v4 = vshrl.u32 %v15510_v0, %v2135_v27  ;;  %v10267_v19 = vsub.s32 %v2076_v50, %v2079_v35  ;;  %vm2152_vm0 = vcmp.lt.s32.totalorder %v2133_v39, 1  ;;  %vm2154_vm8 = vcmp.lt.s32.totalorder %v2133_v39, 3 }
 0x20d   : > { %vm2155_vm12 = vcmp.lt.s32.totalorder %v2133_v39, 4  ;;  %v2160_v24 = vsel %vm2152_vm0, %v2139_v56, %v2142_v42  ;;  %v2136_v58 = vshrl.u32 %v15512_v31, %v2135_v27  ;;  %vm2153_vm11 = vcmp.lt.s32.totalorder %v2133_v39, 2 }
 0x20e   : > { %v2151_v7 = vor.u32 %v2150_v4, %v2149_v37  ;;  %v2157_v44 = vsel %vm2155_vm12, %v2145_v25, 2102212464  ;;  %v2161_v26 = vsel %vm2155_vm12, %v2148_v13, 920167782  ;;  %v2082_v22 = vsub.s32 0, %v10267_v19 }
 0x20f   : > { %v2162_v38 = vsel %vm2154_vm8, %v2145_v25, %v2161_v26  ;;  %v1987_v43 = vor.u32 %v1986_v32, %v1985_v15  ;;  %v2164_v50 = vsel %vm2152_vm0, %v2142_v42, %v2145_v25  ;;  %v2156_v35 = vsel %vm2152_vm0, %v2136_v58, %v2139_v56 }
 0x210   : > { %v2163_v41 = vsel %vm2153_vm11, %v2160_v24, %v2162_v38  ;;  %v2165_v46 = vsel %vm2155_vm12, %v2151_v7, 1326507024  ;;  %v8079_v12 = vmin.u32 %v2082_v22, %v10267_v19  ;;  %v2158_v37 = vsel %vm2154_vm8, %v2142_v42, %v2157_v44 }
 0x211   : > { %v2166_v4 = vsel %vm2154_vm8, %v2148_v13, %v2165_v46  ;;  %v15582_v0 = vand.u32 2147483647, %v9843_v20  ;;  %v15583_v27 = vmov 0  ;;  %v1992_v32 = vand.u32 2147483647, %v1991_v54 }
 0x212   : > { %v2167_v15 = vsel %vm2153_vm11, %v2164_v50, %v2166_v4  ;;  %v10287_v25 = vmul.u32.u64.low %v10241_v59, %v2163_v41  ;;  %v10288_v7 = vmul.u32.u64.high %v10241_v59, %v2163_v41, %v10287_v25  ;;  %v2084_v24 = vclz %v8079_v12 }
 0x213   : > { %vm10281_vm6 = vcmp.le.f32.partialorder %v15582_v0, 0.7853982  ;;  %v10292_v56 = vmul.u32.u64.low %v10241_v59, %v2167_v15  ;;  %v10293_v42 = vmul.u32.u64.high %v10241_v59, %v2167_v15, %v10292_v56  ;;  %v15586_v13 = vand.u32 2147483647, %v9176_v49 }
 0x214   : > { %v15584_v27 = vsel %vm10281_vm6, 4294967295, %v15583_v27  ;;  %v1994_v0 = vcvt.s32.f32 %v1987_v43  ;;  %v2159_v26 = vsel %vm2153_vm11, %v2156_v35, %v2158_v37  ;;  %v684_v54 = vshll.u32 %v15514_v9, %v9257_v40  ;;  %v15588_v43 = vld [vmem:[#allocation2_spill] sm:$0xff] }
 0x215   : > { %15585 = vst [vmem:[#allocation6_spill] sm:$0xff] %v15584_v27  ;;  %v671_v44 = vand.u32 8388607, %v15586_v13  ;;  %v685_v22 = vshrl.u32 %v15515_v6, %v15581_v62  ;;  %v15587_v58 = vxor.u32 2147483648, %v10220_v33  ;;  %v8080_v41 = vadd.s32 4294967294, %v2084_v24 }
 0x216   : > { %v687_v50 = vshll.u32 %v15515_v6, %v9257_v40  ;;  %v688_v39 = vshrl.u32 %v15508_v3, %v15581_v62  ;;  %vm15343_vm11 = vcmp.lt.s32.totalorder %v15588_v43, 0  ;;  %v1995_v46 = vmul.f32 %v1994_v0, %v1992_v32  ;;  %v15590_v0 = vld [vmem:[#allocation11_spill] sm:$0xff] }
 0x217   : > { %v1893_v38 = vsel %vm15337_vm13, %v15587_v58, %v10220_v33  ;;  %v2178_v12 = vadd.s32 1, %v10288_v7  ;;  %v683_v35 = vor.u32 %v682_v52, %v681_v45  ;;  %v686_v37 = vor.u32 %v685_v22, %v684_v54  ;;  %v15589_v45 = vld [vmem:[#allocation8_spill] sm:$0xff] }
 0x218   : > { %vm8081_vm12 = vcmp.lt.s32.totalorder %v8080_v41, 0  ;;  %v2175_v4 = vmul.u32 %v10241_v59, %v2159_v26  ;;  %vm2177_vm0 = vc.u32 %v10293_v42, %v10287_v25  ;;  %v689_v33 = vor.u32 %v688_v39, %v687_v50  ;;  %v15592_v50 = vld [vmem:[#allocation9_spill] sm:$0xff] }
 0x219   : > { %v10316_v15 = vsel %vm8081_vm12, 0, %v8080_v41  ;;  %v2179_v40 = vsel %vm2177_vm0, %v2178_v12, %v10288_v7  ;;  %v672_v24 = vor.u32 8388608, %v671_v44  ;;  %v680_v56 = vshrl.u32 %v15512_v31, %v15581_v62  ;;  %v15591_v41 = vld [vmem:[#allocation12_spill] sm:$0xff] }
 0x21a   : > { %v2092_v32 = vsub.s32 4294967266, %v10316_v15  ;;  %v2180_v13 = vadd.s32 %v2179_v40, %v2175_v4  ;;  %vm696_vm8 = vcmp.lt.s32.totalorder %v15589_v45, 1  ;;  %vm698_vm13 = vcmp.lt.s32.totalorder %v15589_v45, 3 }
 0x21b   : > { %v701_v59 = vsel %vm699_vm1, %v689_v33, 2102212464  ;;  %v704_v52 = vsel %vm696_vm8, %v683_v35, %v686_v37  ;;  %v706_v26 = vsel %vm698_vm13, %v689_v33, %v15590_v0  ;;  %v708_v54 = vsel %vm696_vm8, %v686_v37, %v689_v33 }
 0x21c   : > { %v1896_v7 = vsel %vm10281_vm6, %v9843_v20, %v1893_v38  ;;  %v1996_v44 = vxor.u32 2147483648, %v1995_v46  ;;  %v2181_v62 = vadd.s32 536870912, %v2180_v13  ;;  %vm697_vm12 = vcmp.lt.s32.totalorder %v15589_v45, 2 }
 0x21d   : > { %v700_v22 = vsel %vm696_vm8, %v680_v56, %v683_v35  ;;  %v707_v58 = vsel %vm697_vm12, %v704_v52, %v706_v26  ;;  %v710_v39 = vsel %vm698_vm13, %v15592_v50, %v15591_v41  ;;  %v712_v12 = vshll.u32 %v672_v24, 8 }
 0x21e   : > { %v2093_v4 = vadd.s32 127, %v2092_v32  ;;  %v10335_v40 = vshrl.u32 %v2181_v62, 30  ;;  %v702_v33 = vsel %vm698_vm13, %v686_v37, %v701_v59  ;;  %v711_v0 = vsel %vm697_vm12, %v708_v54, %v710_v39 }
 0x21f   : > { %v10339_v38 = vmul.u32.u64.low %v712_v12, %v711_v0  ;;  %v10340_v63 = vmul.u32.u64.high %v712_v12, %v711_v0, %v10339_v38  ;;  %v10342_v60 = vmul.u32.u64.low %v712_v12, %v707_v58  ;;  %v10343_v27 = vmul.u32.u64.high %v712_v12, %v707_v58, %v10342_v60  ;;  %v15597_v58 = vld [vmem:[#allocation3_spill] sm:$0xff] }
 0x220   : > { %v15593_v35 = vxor.u32 2147483648, %v9802_v57  ;;  %8724 = vcosq.f32 %v10233_v28  ;;  %v15594_v37 = vand.u32 2147483647, %v9993_v16  ;;  %v15595_v56 = vmov 0 }
 0x221   : > { %v2183_v32 = vshll.u32 %v10335_v40, 30  ;;  %8726 = vsinq.f32 %v10233_v28  ;;  %vm15342_vm13 = vcmp.lt.s32.totalorder %v9993_v16, 0  ;;  %v2088_v59 = vsub.s32 32, %v10316_v15 }
 0x222   : > { %v10351_v24 = vsel %vm15343_vm11, %v15593_v35, %v9802_v57  ;;  %vm10356_vm1 = vcmp.le.f32.partialorder %v15594_v37, 0.7853982  ;;  %v703_v57 = vsel %vm697_vm12, %v700_v22, %v702_v33  ;;  %8728 = vcosq.f32 %v1896_v7 }
 0x223   : > { %v15596_v56 = vsel %vm10356_vm1, 4294967295, %v15595_v56  ;;  %v2072_v52 = vadd.s32 %v10207_v36, %v10212_v29  ;;  %v2094_v26 = vshll.u32 %v2093_v4, 23  ;;  %v10368_v54 = vsub.s32 %v2180_v13, %v2183_v32  ;;  %v15598_v36 = vld [vmem:[#allocation10_spill] sm:$0xff] }
 0x224   : > { %v1997_v62 = vsel %vm15342_vm13, %v1996_v44, %v1995_v46  ;;  %vm721_vm0 = vc.u32 %v10340_v63, %v10342_v60  ;;  %v722_v28 = vadd.s32 1, %v10343_v27  ;;  %v15345_v41 = vand.u32 2147483647, %v15597_v58  ;;  %v15599_v46 = vld [vmem:[#allocation7_spill] sm:$0xff] }
 0x225   : > { %v2089_v45 = vshll.u32 %v10267_v19, %v10316_v15  ;;  %v2186_v22 = vsub.s32 0, %v10368_v54  ;;  %v719_v50 = vmul.u32 %v712_v12, %v703_v57  ;;  %v890_v29 = vshrl.u32 %v15514_v9, %v15598_v36 }
 0x226   : > { %v2090_v13 = vshrl.u32 %v2072_v52, %v2088_v59  ;;  %v723_v39 = vsel %vm721_vm0, %v722_v28, %v10343_v27  ;;  %v892_v44 = vshll.u32 %v15514_v9, %v15599_v46  ;;  %v893_v4 = vshrl.u32 %v15515_v6, %v15598_v36 }
 0x227   : > { %v2095_v33 = vor.u32 4788187, %v2094_v26  ;;  %v8083_v0 = vmin.u32 %v2186_v22, %v10368_v54  ;;  %v724_v38 = vadd.s32 %v723_v39, %v719_v50  ;;  %v889_v19 = vshll.u32 %v15512_v31, %v15599_v46 }
 0x228   : > { %v879_v15 = vand.u32 8388607, %v15345_v41  ;;  %v894_v12 = vor.u32 %v893_v4, %v892_v44  ;;  %v895_v27 = vshll.u32 %v15515_v6, %v15599_v46  ;;  %v896_v35 = vshrl.u32 %v15508_v3, %v15598_v36  ;;  %v15601_v4 = vld [vmem:[#allocation17_spill] sm:$0xff]  ;;  %v15633_v6 = vld [vmem:[#allocation16_spill] sm:$0xff] }
 0x229   : > { %8730 = vsinq.f32 %v1896_v7  ;;  %v2188_v37 = vclz %v8083_v0  ;;  %v725_v32 = vadd.s32 536870912, %v724_v38  ;;  %v891_v59 = vor.u32 %v890_v29, %v889_v19 }
 0x22a   : > { %v10398_v57 = vsel %vm10356_vm1, %v9993_v16, %v1997_v62  ;;  %v2091_v52 = vor.u32 %v2090_v13, %v2089_v45  ;;  %v2176_v26 = vadd.s32 %v10287_v25, %v10293_v42  ;;  %v897_v28 = vor.u32 %v896_v35, %v895_v27  ;;  %v10402_v22 = vpop.eup %8724  ;;  %v15600_v45 = vld [vmem:[#allocation15_spill] sm:$0xff] }
 0x22b   : > { %v8084_v50 = vadd.s32 4294967294, %v2188_v37  ;;  %v726_v39 = vshrl.u32 %v725_v32, 30  ;;  %vm904_vm8 = vcmp.lt.s32.totalorder %v9337_v61, 1  ;;  %vm906_vm12 = vcmp.lt.s32.totalorder %v9337_v61, 3  ;;  %v10406_v7 = vpop.eup %8726 }
 0x22c   : > { %v2096_v29 = vand.u32 2147483647, %v2095_v33  ;;  %v880_v46 = vor.u32 8388608, %v879_v15  ;;  %v916_v62 = vsel %vm904_vm8, %v894_v12, %v897_v28  ;;  %v918_v25 = vsel %vm906_vm12, %v15600_v45, %v9712_v5  ;;  %v10414_v42 = vpop.eup %8728 }
 0x22d   : > { %vm8085_vm0 = vcmp.lt.s32.totalorder %v8084_v50, 0  ;;  %v727_v13 = vshll.u32 %v726_v39, 30  ;;  %v912_v44 = vsel %vm904_vm8, %v891_v59, %v894_v12  ;;  %v914_v33 = vsel %vm906_vm12, %v897_v28, %v15601_v4 }
 0x22e   : > { %v2098_v0 = vcvt.s32.f32 %v2091_v52  ;;  %v2191_v19 = vsel %vm8085_vm0, 0, %v8084_v50  ;;  %vm905_vm13 = vcmp.lt.s32.totalorder %v9337_v61, 2  ;;  %v909_v15 = vsel %vm907_vm9, %v897_v28, 2102212464 }
 0x22f   : > { %v2192_v5 = vsub.s32 32, %v2191_v19  ;;  %v2196_v27 = vsub.s32 4294967266, %v2191_v19  ;;  %v10426_v35 = vsub.s32 %v724_v38, %v727_v13  ;;  %v919_v37 = vsel %vm905_vm13, %v916_v62, %v918_v25 }
 0x230   : > { %v2099_v32 = vmul.f32 %v2098_v0, %v2096_v29  ;;  %v888_v52 = vshrl.u32 %v15512_v31, %v15598_v36  ;;  %v915_v50 = vsel %vm905_vm13, %v912_v44, %v914_v33  ;;  %v920_v45 = vshll.u32 %v880_v46, 8  ;;  %v15605_v33 = vld [vmem:[#allocation5_spill] sm:$0xff] }
 0x231   : > { %v2193_v28 = vshll.u32 %v10368_v54, %v2191_v19  ;;  %v2194_v4 = vshrl.u32 %v2176_v26, %v2192_v5  ;;  %v2197_v41 = vadd.s32 127, %v2196_v27  ;;  %v730_v3 = vsub.s32 0, %v10426_v35 }
 0x232   : > { %v15602_v38 = vand.u32 2147483647, %v10070_v18  ;;  %v15603_v13 = vmov 0  ;;  %v908_v29 = vsel %vm904_vm8, %v888_v52, %v891_v59  ;;  %v910_v36 = vsel %vm906_vm12, %v894_v12, %v909_v15 }
 0x233   : > { %v10446_v62 = vmul.u32.u64.low %v920_v45, %v919_v37  ;;  %v10447_v46 = vmul.u32.u64.high %v920_v45, %v919_v37, %v10446_v62  ;;  %v10449_v54 = vpop.eup %8730  ;;  %v2195_v26 = vor.u32 %v2194_v4, %v2193_v28  ;;  %v2198_v25 = vshll.u32 %v2197_v41, 23 }
 0x234   : > { %vm10438_vm9 = vcmp.le.f32.partialorder %v15602_v38, 0.7853982  ;;  %v8027_v44 = vmin.u32 %v730_v3, %v10426_v35  ;;  %v646_v0 = vsub.s32 4, %v15605_v33  ;;  %v2100_v19 = vxor.u32 2147483648, %v2099_v32 }
 0x235   : > { %v15604_v13 = vsel %vm10438_vm9, 4294967295, %v15603_v13  ;;  %v750_v5 = vsub.s32 4, %v726_v39  ;;  %v10453_v27 = vmul.u32.u64.low %v920_v45, %v915_v50  ;;  %v10454_v38 = vmul.u32.u64.high %v920_v45, %v915_v50, %v10453_v27 }
 0x236   : > { %v2199_v59 = vor.u32 4788187, %v2198_v25  ;;  %v15606_v12 = vand.u32 2147483647, %v9176_v49  ;;  %v732_v37 = vclz %v8027_v44  ;;  %v15609_v41 = vand.u32 2147483647, %v9174_v47 }
 0x237   : > { %8732 = vcosq.f32 %v10398_v57  ;;  %v911_v52 = vsel %vm905_vm13, %v908_v29, %v910_v36  ;;  %vm15612_vm0 = vcmp.lt.s32.totalorder %v9174_v47, 0  ;;  %vm15348_vm6 = vcmp.lt.s32.totalorder %v10100_v53, 0 }
 0x238   : > { %vm10459_vm8 = vcmp.le.f32.partialorder %v15606_v12, 0.7853982  ;;  %vm10465_vm12 = vcmp.le.f32.partialorder %v15609_v41, 0.7853982  ;;  %v647_v50 = vsel %vm15612_vm0, %v646_v0, %v15605_v33  ;;  %v2200_v4 = vand.u32 2147483647, %v2199_v59 }
 0x239   : > { %v648_v28 = vsel %vm10465_vm12, %v9174_v47, %v9734_v55  ;;  %v2202_v62 = vcvt.s32.f32 %v2195_v26  ;;  %v8028_v25 = vadd.s32 4294967294, %v732_v37  ;;  %vm929_vm11 = vc.u32 %v10447_v46, %v10453_v27 }
 0x23a   : > { %vm15613_vm1 = vcmp.lt.s32.totalorder %v10070_v18, 0  ;;  %v720_v29 = vadd.s32 %v10342_v60, %v10340_v63  ;;  %vm15614_vm13 = vcmp.lt.s32.totalorder %v9176_v49, 0  ;;  %v930_v44 = vadd.s32 1, %v10454_v38 }
 0x23b   : > { %v2101_v61 = vsel %vm15613_vm1, %v2100_v19, %v2099_v32  ;;  %v751_v36 = vsel %vm15614_vm13, %v750_v5, %v726_v39  ;;  %v2203_v55 = vmul.f32 %v2202_v62, %v2200_v4  ;;  %vm8029_vm0 = vcmp.lt.s32.totalorder %v8028_v25, 0  ;;  %v15615_v39 = vld [vmem:[#allocation14_spill] sm:$0xff] }
 0x23c   : > { %v649_v26 = vsel %vm10465_vm12, 0, %v647_v50  ;;  %8734 = vcosq.f32 %v648_v28  ;;  %v735_v33 = vsel %vm8029_vm0, 0, %v8028_v25  ;;  %v927_v0 = vmul.u32 %v920_v45, %v911_v52 }
 0x23d   : > { %v931_v59 = vsel %vm929_vm11, %v930_v44, %v10454_v38  ;;  %8736 = vsinq.f32 %v648_v28  ;;  %v2104_v63 = vsel %vm10438_vm9, %v10070_v18, %v2101_v61  ;;  %v736_v60 = vsub.s32 32, %v735_v33 }
 0x23e   : > { %v740_v32 = vsub.s32 4294967266, %v735_v33  ;;  %v854_v19 = vsub.s32 4, %v15615_v39  ;;  %v2204_v5 = vxor.u32 2147483648, %v2203_v55  ;;  %v753_v12 = vsel %vm10459_vm8, 0, %v751_v36 }
 0x23f   : > { %v932_v37 = vadd.s32 %v931_v59, %v927_v0  ;;  %v653_v41 = vadd.s32 3, %v649_v26  ;;  %v737_v3 = vshll.u32 %v10426_v35, %v735_v33  ;;  %v738_v45 = vshrl.u32 %v720_v29, %v736_v60  ;;  %v15623_v33 = vld [vmem:[#allocation18_spill] sm:$0xff] }
 0x240   : > { %v741_v52 = vadd.s32 127, %v740_v32  ;;  %v15616_v38 = vand.u32 2147483647, %v15588_v43  ;;  %8738 = vsinq.f32 %v10398_v57  ;;  %v15619_v28 = vand.u32 2147483647, %v10100_v53 }
 0x241   : > { %v933_v62 = vadd.s32 536870912, %v932_v37  ;;  %8740 = vcosq.f32 %v2104_v63  ;;  %v739_v25 = vor.u32 %v738_v45, %v737_v3  ;;  %vm15622_vm12 = vcmp.lt.s32.totalorder %v15588_v43, 0  ;;  %v10519_v57 = vpop.eup %8732 }
 0x242   : > { %vm10501_vm11 = vcmp.le.f32.partialorder %v15616_v38, 0.7853982  ;;  %vm10508_vm1 = vcmp.le.f32.partialorder %v15619_v28, 0.7853982  ;;  %v742_v61 = vshll.u32 %v741_v52, 23  ;;  %v855_v29 = vsel %vm15622_vm12, %v854_v19, %v15615_v39 }
 0x243   : > { %v856_v35 = vsel %vm10501_vm11, %v15588_v43, %v10351_v24  ;;  %v2205_v36 = vsel %vm15348_vm6, %v2204_v5, %v2203_v55  ;;  %v757_v44 = vadd.s32 3, %v753_v12  ;;  %v934_v26 = vshrl.u32 %v933_v62, 30 }
 0x244   : > { %v1166_v0 = vsub.s32 4, %v15623_v33  ;;  %v743_v59 = vor.u32 4788187, %v742_v61  ;;  %vm15349_vm13 = vcmp.lt.s32.totalorder %v15597_v58, 0  ;;  %v654_v24 = vand.u32 3, %v653_v41 }
 0x245   : > { %8742 = vcosq.f32 %v856_v35  ;;  %v15624_v60 = vand.u32 2147483647, %v15597_v58  ;;  %v935_v39 = vshll.u32 %v934_v26, 30  ;;  %v857_v19 = vsel %vm10501_vm11, 0, %v855_v29 }
 0x246   : > { %8744 = vsinq.f32 %v856_v35  ;;  %v8735_v55 = vpop.eup %8734  ;;  %v2208_v5 = vsel %vm10508_vm1, %v10100_v53, %v2205_v36  ;;  %v744_v12 = vand.u32 2147483647, %v743_v59  ;;  %v746_v3 = vcvt.s32.f32 %v739_v25 }
 0x247   : > { %vm10527_vm0 = vcmp.le.f32.partialorder %v15624_v60, 0.7853982  ;;  %v958_v41 = vsub.s32 4, %v934_v26  ;;  %v8737_v45 = vpop.eup %8736  ;;  %8746 = vsinq.f32 %v2104_v63  ;;  %v10536_v52 = vand.u32 3, %v757_v44 }
 0x248   : > { %v10538_v38 = vsub.s32 %v932_v37, %v935_v39  ;;  %vm15627_vm12 = vcmp.lt.s32.totalorder %v9294_v34, 0  ;;  %v747_v28 = vmul.f32 %v746_v3, %v744_v12  ;;  %v928_v62 = vadd.s32 %v10453_v27, %v10447_v46 }
 0x249   : > { %v1167_v50 = vsel %vm15627_vm12, %v1166_v0, %v15623_v33  ;;  %v861_v35 = vadd.s32 3, %v857_v19  ;;  %8748 = vcosq.f32 %v2208_v5  ;;  %vm656_vm6 = vcmp.eq.s32.totalorder %v654_v24, 0 }
 0x24a   : > { %v938_v25 = vsub.s32 0, %v10538_v38  ;;  %v660_v61 = vxor.u32 2147483648, %v8735_v55  ;;  %v748_v63 = vxor.u32 2147483648, %v747_v28  ;;  %v959_v37 = vsel %vm15349_vm13, %v958_v41, %v934_v26  ;;  %v10550_v44 = vpop.eup %8738  ;;  %v15629_v26 = vld [vmem:[#allocation21_spill] sm:$0xff] }
 0x24b   : > { %v657_v29 = vxor.u32 2147483648, %v8737_v45  ;;  %v1169_v36 = vsel %vm9780_vm15, 0, %v1167_v50  ;;  %8750 = vsinq.f32 %v2208_v5  ;;  %vm659_vm12 = vcmp.eq.s32.totalorder %v654_v24, 2  ;;  %v10553_v33 = vpop.eup %8740 }
 0x24c   : > { %v8035_v46 = vmin.u32 %v938_v25, %v10538_v38  ;;  %v1173_v27 = vadd.s32 3, %v1169_v36  ;;  %vm15628_vm11 = vcmp.lt.s32.totalorder %v9176_v49, 0  ;;  %v862_v59 = vand.u32 3, %v861_v35 }
 0x24d   : > { %v749_v0 = vsel %vm15628_vm11, %v748_v63, %v747_v28  ;;  %v1177_v60 = vxor.u32 2147483648, %v9964_v51  ;;  %v1374_v39 = vsub.s32 4, %v15629_v26  ;;  %v961_v5 = vsel %vm10527_vm0, 0, %v959_v37 }
 0x24e   : > { %v752_v17 = vsel %vm10459_vm8, %v9176_v49, %v749_v0  ;;  %v940_v19 = vclz %v8035_v46  ;;  %v661_v12 = vsel %vm659_vm12, %v660_v61, %v8737_v45  ;;  %v658_v41 = vsel %vm656_vm6, %v8735_v55, %v657_v29  ;;  %v15632_v29 = vld [vmem:[#allocation30_spill] sm:$0xff] }
 0x24f   : > { %v8743_v3 = vpop.eup %8742  ;;  %8752 = vcosq.f32 %v752_v17  ;;  %v1174_v50 = vand.u32 3, %v1173_v27  ;;  %vm15630_vm15 = vcmp.lt.s32.totalorder %v9472_v1, 0  ;;  %v965_v37 = vadd.s32 3, %v961_v5 }
 0x250   : > { %v1375_v28 = vsel %vm15630_vm15, %v1374_v39, %v15629_v26  ;;  %v8745_v35 = vpop.eup %8744  ;;  %8754 = vsinq.f32 %v752_v17  ;;  %v8036_v25 = vadd.s32 4294967294, %v940_v19  ;;  %v868_v15 = vxor.u32 2147483648, %v8743_v3 }
 0x251   : > { %v1377_v63 = vsel %vm9924_vm4, 0, %v1375_v28  ;;  %vm863_vm12 = vcmp.lt.s32.totalorder %v862_v59, 2  ;;  %vm864_vm13 = vcmp.eq.s32.totalorder %v862_v59, 0  ;;  %v865_v55 = vxor.u32 2147483648, %v8745_v35  ;;  %v10572_v45 = vpop.eup %8746 }
 0x252   : > { %vm8037_vm6 = vcmp.lt.s32.totalorder %v8036_v25, 0  ;;  %vm15631_vm9 = vcmp.lt.s32.totalorder %v654_v24, 2  ;;  %vm867_vm15 = vcmp.eq.s32.totalorder %v862_v59, 2  ;;  %v1180_v36 = vxor.u32 2147483648, %v15632_v29  ;;  %v15635_v59 = vld [vmem:[#allocation4_spill] sm:$0xff] }
 0x253   : > { %v662_v61 = vsel %vm15631_vm9, %v658_v41, %v661_v12  ;;  %v943_v46 = vsel %vm8037_vm6, 0, %v8036_v25  ;;  %vm1176_vm11 = vcmp.eq.s32.totalorder %v1174_v50, 0  ;;  %v1381_v27 = vadd.s32 3, %v1377_v63  ;;  %v10577_v0 = vpop.eup %8748 }
 0x254   : > { %v1385_v48 = vxor.u32 2147483648, %v10120_v2  ;;  %v944_v26 = vsub.s32 32, %v943_v46  ;;  %v948_v39 = vsub.s32 4294967266, %v943_v46  ;;  %v866_v17 = vsel %vm864_vm13, %v8743_v3, %v865_v55 }
 0x255   : > { %v869_v19 = vsel %vm867_vm15, %v868_v15, %v8745_v35  ;;  %vm1172_vm4 = vweird.f32 %v9294_v34  ;;  %v1178_v5 = vsel %vm1176_vm11, %v15632_v29, %v1177_v60  ;;  %vm1179_vm8 = vcmp.eq.s32.totalorder %v1174_v50, 2  ;;  %v10582_v41 = vpop.eup %8750 }
 0x256   : > { %v1382_v24 = vand.u32 3, %v1381_v27  ;;  %v1388_v12 = vxor.u32 2147483648, %v10107_v23  ;;  %v945_v28 = vshll.u32 %v10538_v38, %v943_v46  ;;  %v946_v25 = vshrl.u32 %v928_v62, %v944_v26 }
 0x257   : > { %v949_v63 = vadd.s32 127, %v948_v39  ;;  %v1062_v9 = vsub.s32 4, %v15633_v6  ;;  %vm760_vm9 = vcmp.eq.s32.totalorder %v10536_v52, 0  ;;  %v870_v3 = vsel %vm863_vm12, %v866_v17, %v869_v19 }
 0x258   : > { %v1181_v60 = vsel %vm1179_vm8, %v1180_v36, %v9964_v51  ;;  %vm1384_vm11 = vcmp.eq.s32.totalorder %v1382_v24, 0  ;;  %vm1387_vm6 = vcmp.eq.s32.totalorder %v1382_v24, 2  ;;  %v947_v35 = vor.u32 %v946_v25, %v945_v28  ;;  %v15642_v25 = vld [vmem:[#allocation27_spill] sm:$0xff] }
 0x259   : > { %v950_v15 = vshll.u32 %v949_v63, 23  ;;  %v1386_v55 = vsel %vm1384_vm11, %v10107_v23, %v1385_v48  ;;  %v1389_v38 = vsel %vm1387_vm6, %v1388_v12, %v10120_v2  ;;  %v8753_v62 = vpop.eup %8752  ;;  %v10592_v29 = vand.u32 3, %v965_v37 }
 0x25a   : > { %vm15634_vm15 = vweird.f32 %v9174_v47  ;;  %vm1175_vm13 = vcmp.lt.s32.totalorder %v1174_v50, 2  ;;  %vm15636_vm12 = vcmp.lt.s32.totalorder %v15635_v59, 0  ;;  %v8755_v36 = vpop.eup %8754  ;;  %vm15637_vm8 = vweird.f32 %v15588_v43  ;;  %v15640_v43 = vld [vmem:[#allocation13_spill] sm:$0xff] }
 0x25b   : > { %v10596_v46 = vsel %vm15634_vm15, nan, %v662_v61  ;;  %v1063_v51 = vsel %vm15636_vm12, %v1062_v9, %v15633_v6  ;;  %v951_v27 = vor.u32 4788187, %v950_v15  ;;  %v10603_v26 = vsel %vm15637_vm8, nan, %v870_v3  ;;  %v15639_v61 = vld [vmem:[#allocation20_spill] sm:$0xff]  ;;  %v15644_v15 = vld [vmem:[#allocation26_spill] sm:$0xff] }
 0x25c   : > { %v1182_v23 = vsel %vm1175_vm13, %v1178_v5, %v1181_v60  ;;  %vm1383_vm11 = vcmp.lt.s32.totalorder %v1382_v24, 2  ;;  %v764_v2 = vxor.u32 2147483648, %v8753_v62  ;;  %v1065_v47 = vsel %vm9675_vm10, 0, %v1063_v51  ;;  %v15651_v3 = vld [vmem:[#allocation38_spill] sm:$0xff] }
 0x25d   : > { %v1390_v37 = vsel %vm1383_vm11, %v1386_v55, %v1389_v38  ;;  %v1270_v39 = vsub.s32 4, %v15639_v61  ;;  %v761_v50 = vxor.u32 2147483648, %v8755_v36  ;;  %v952_v17 = vand.u32 2147483647, %v951_v27  ;;  %v15645_v38 = vld [vmem:[#allocation25_spill] sm:$0xff] }
 0x25e   : > { %v954_v19 = vcvt.s32.f32 %v947_v35  ;;  %v1069_v12 = vadd.s32 3, %v1065_v47  ;;  %vm759_vm6 = vcmp.lt.s32.totalorder %v10536_v52, 2  ;;  %v8343_v9 = vpack.c.bf16 %v10603_v26, %v10596_v46 }
 0x25f   : > { %v10613_v6 = vsel %vm1172_vm4, nan, %v1182_v23  ;;  %vm1380_vm13 = vweird.f32 %v9472_v1  ;;  %vm15641_vm10 = vcmp.lt.s32.totalorder %v15640_v43, 0  ;;  %v1073_v63 = vxor.u32 2147483648, %v15642_v25 }
 0x260   : > { %v1271_v5 = vsel %vm15641_vm10, %v1270_v39, %v15639_v61  ;;  %v955_v24 = vmul.f32 %v954_v19, %v952_v17  ;;  %v1070_v28 = vand.u32 3, %v1069_v12  ;;  %v10622_v35 = vsel %vm1380_vm13, nan, %v1390_v37  ;;  %v15650_v19 = vld [vmem:[#allocation40_spill] sm:$0xff] }
 0x261   : > { %v1273_v60 = vsel %vm9868_vm14, 0, %v1271_v5  ;;  %v1076_v55 = vxor.u32 2147483648, %v15644_v15  ;;  %v1582_v51 = vsub.s32 4, %v15645_v38  ;;  %v762_v1 = vsel %vm760_vm9, %v8753_v62, %v761_v50 }
 0x262   : > { %v1277_v34 = vadd.s32 3, %v1273_v60  ;;  %vm15646_vm4 = vcmp.eq.s32.totalorder %v10536_v52, 2  ;;  %v956_v23 = vxor.u32 2147483648, %v955_v24  ;;  %v1281_v48 = vxor.u32 2147483648, %v10102_v8  ;;  %v15652_v60 = vld [vmem:[#allocation31_spill] sm:$0xff] }
 0x263   : > { %v765_v27 = vsel %vm15646_vm4, %v764_v2, %v8755_v36  ;;  %vm1072_vm15 = vcmp.eq.s32.totalorder %v1070_v28, 0  ;;  %v1284_v61 = vxor.u32 2147483648, %v9967_v11  ;;  %vm15647_vm14 = vcmp.lt.s32.totalorder %v9614_v30, 0 }
 0x264   : > { %v1278_v47 = vand.u32 3, %v1277_v34  ;;  %v1583_v37 = vsel %vm15647_vm14, %v1582_v51, %v15645_v38  ;;  %vm15648_vm12 = vcmp.lt.s32.totalorder %v15597_v58, 0  ;;  %v1074_v17 = vsel %vm1072_vm15, %v15644_v15, %v1073_v63  ;;  %v15654_v38 = vld [vmem:[#allocation24_spill] sm:$0xff] }
 0x265   : > { %v957_v39 = vsel %vm15648_vm12, %v956_v23, %v955_v24  ;;  %vm1075_vm9 = vcmp.eq.s32.totalorder %v1070_v28, 2  ;;  %v1585_v36 = vsel %vm10031_vm7, 0, %v1583_v37  ;;  %vm1068_vm8 = vweird.f32 %v15635_v59 }
 0x266   : > { %v960_v2 = vsel %vm10527_vm0, %v15597_v58, %v957_v39  ;;  %v1077_v50 = vsel %vm1075_vm9, %v1076_v55, %v15642_v25  ;;  %vm1280_vm11 = vcmp.eq.s32.totalorder %v1278_v47, 0  ;;  %v1593_v12 = vxor.u32 2147483648, %v15650_v19 }
 0x267   : > { %vm756_vm13 = vweird.f32 %v9176_v49  ;;  %8756 = vcosq.f32 %v960_v2  ;;  %v1282_v5 = vsel %vm1280_vm11, %v9967_v11, %v1281_v48  ;;  %vm1283_vm10 = vcmp.eq.s32.totalorder %v1278_v47, 2 }
 0x268   : > { %v1589_v24 = vadd.s32 3, %v1585_v36  ;;  %8758 = vsinq.f32 %v960_v2  ;;  %v1285_v63 = vsel %vm1283_vm10, %v1284_v61, %v10102_v8  ;;  %v1596_v32 = vxor.u32 2147483648, %v15651_v3 }
 0x269   : > { %v1790_v15 = vsub.s32 4, %v15652_v60  ;;  %v766_v25 = vsel %vm759_vm6, %v762_v1, %v765_v27  ;;  %vm1276_vm7 = vweird.f32 %v15640_v43  ;;  %vm1279_vm0 = vcmp.lt.s32.totalorder %v1278_v47, 2  ;;  %v15655_v27 = vld [vmem:[#allocation19_spill] sm:$0xff] }
 0x26a   : > { %v1590_v55 = vand.u32 3, %v1589_v24  ;;  %vm1071_vm4 = vcmp.lt.s32.totalorder %v1070_v28, 2  ;;  %v1286_v34 = vsel %vm1279_vm0, %v1282_v5, %v1285_v63  ;;  %vm15653_vm15 = vcmp.lt.s32.totalorder %v9839_v10, 0  ;;  %v15659_v24 = vld [vmem:[#allocation39_spill] sm:$0xff] }
 0x26b   : > { %v1791_v11 = vsel %vm15653_vm15, %v1790_v15, %v15652_v60  ;;  %v1478_v51 = vsub.s32 4, %v15654_v38  ;;  %vm971_vm14 = vcmp.eq.s32.totalorder %v10592_v29, 2  ;;  %v1078_v8 = vsel %vm1071_vm4, %v1074_v17, %v1077_v50  ;;  %v15658_v50 = vld [vmem:[#allocation29_spill] sm:$0xff]  ;;  %v15660_v60 = vld [vmem:[#allocation23_spill] sm:$0xff] }
 0x26c   : > { %vm1591_vm12 = vcmp.lt.s32.totalorder %v1590_v55, 2  ;;  %vm1592_vm9 = vcmp.eq.s32.totalorder %v1590_v55, 0  ;;  %vm1595_vm11 = vcmp.eq.s32.totalorder %v1590_v55, 2  ;;  %vm968_vm6 = vcmp.eq.s32.totalorder %v10592_v29, 0  ;;  %v15662_v55 = vld [vmem:[#allocation37_spill] sm:$0xff] }
 0x26d   : > { %v1594_v52 = vsel %vm1592_vm9, %v15651_v3, %v1593_v12  ;;  %v1597_v1 = vsel %vm1595_vm11, %v1596_v32, %v15650_v19  ;;  %v1793_v28 = vsel %vm10225_vm2, 0, %v1791_v11  ;;  %vm15656_vm10 = vcmp.lt.s32.totalorder %v15655_v27, 0  ;;  %v15663_v11 = vld [vmem:[#allocation35_spill] sm:$0xff] }
 0x26e   : > { %v1479_v23 = vsel %vm15656_vm10, %v1478_v51, %v15654_v38  ;;  %vm967_vm0 = vcmp.lt.s32.totalorder %v10592_v29, 2  ;;  %v10670_v48 = vsel %vm1276_vm7, nan, %v1286_v34  ;;  %v1598_v47 = vsel %vm1591_vm12, %v1594_v52, %v1597_v1  ;;  %v15664_v1 = vld [vmem:[#allocation42_spill] sm:$0xff] }
 0x26f   : > { %v1797_v61 = vadd.s32 3, %v1793_v28  ;;  %v1481_v39 = vsel %vm10021_vm5, 0, %v1479_v23  ;;  %vm964_vm4 = vweird.f32 %v15597_v58  ;;  %v8345_v21 = vpack.c.bf16 %v10622_v35, %v10613_v6 }
 0x270   : > { %v1801_v17 = vxor.u32 2147483648, %v10406_v7  ;;  %v1804_v62 = vxor.u32 2147483648, %v10402_v22  ;;  %v1485_v36 = vadd.s32 3, %v1481_v39  ;;  %v10681_v43 = vsel %vm1068_vm8, nan, %v1078_v8 }
 0x271   : > { %vm1588_vm2 = vweird.f32 %v9614_v30  ;;  %v1798_v2 = vand.u32 3, %v1797_v61  ;;  %v1686_v19 = vsub.s32 4, %v15658_v50  ;;  %v767_v12 = vsel %vm756_vm13, nan, %v766_v25  ;;  %v8757_v5 = vpop.eup %8756 }
 0x272   : > { %v8347_v6 = vpack.c.bf16 %v10670_v48, %v10681_v43  ;;  %v10689_v35 = vsel %vm1588_vm2, nan, %v1598_v47  ;;  %vm1796_vm5 = vweird.f32 %v9839_v10  ;;  %v1486_v59 = vand.u32 3, %v1485_v36  ;;  %v8759_v30 = vpop.eup %8758  ;;  %v15668_v10 = vld [vmem:[#allocation34_spill] sm:$0xff] }
 0x273   : > { %vm1800_vm7 = vcmp.eq.s32.totalorder %v1798_v2, 0  ;;  %vm1803_vm15 = vcmp.eq.s32.totalorder %v1798_v2, 2  ;;  %v1998_v63 = vsub.s32 4, %v15659_v24  ;;  %v972_v3 = vxor.u32 2147483648, %v8757_v5 }
 0x274   : > { %v1802_v32 = vsel %vm1800_vm7, %v10402_v22, %v1801_v17  ;;  %v1805_v49 = vsel %vm1803_vm15, %v1804_v62, %v10406_v7  ;;  %vm15661_vm8 = vcmp.lt.s32.totalorder %v15660_v60, 0  ;;  %v969_v25 = vxor.u32 2147483648, %v8759_v30 }
 0x275   : > { %v1687_v15 = vsel %vm15661_vm8, %v1686_v19, %v15658_v50  ;;  %vm1799_vm13 = vcmp.lt.s32.totalorder %v1798_v2, 2  ;;  %v1489_v34 = vxor.u32 2147483648, %v15662_v55  ;;  %v1492_v38 = vxor.u32 2147483648, %v15663_v11 }
 0x276   : > { %v973_v51 = vsel %vm971_vm14, %v972_v3, %v8759_v30  ;;  %v1806_v8 = vsel %vm1799_vm13, %v1802_v32, %v1805_v49  ;;  %v1697_v52 = vxor.u32 2147483648, %v10262_v14  ;;  %v1700_v22 = vxor.u32 2147483648, %v15664_v1 }
 0x277   : > { %v970_v7 = vsel %vm968_vm6, %v8757_v5, %v969_v25  ;;  %vm1487_vm12 = vcmp.lt.s32.totalorder %v1486_v59, 2  ;;  %vm1488_vm9 = vcmp.eq.s32.totalorder %v1486_v59, 0  ;;  %v1689_v23 = vsel %vm10130_vm3, 0, %v1687_v15 }
 0x278   : > { %v974_v47 = vsel %vm967_vm0, %v970_v7, %v973_v51  ;;  %vm1491_vm11 = vcmp.eq.s32.totalorder %v1486_v59, 2  ;;  %v1693_v61 = vadd.s32 3, %v1689_v23  ;;  %vm15666_vm14 = vcmp.lt.s32.totalorder %v9993_v16, 0 }
 0x279   : > { %v1999_v37 = vsel %vm15666_vm14, %v1998_v63, %v15659_v24  ;;  %v975_v39 = vsel %vm964_vm4, nan, %v974_v47  ;;  %v1807_v17 = vsel %vm1796_vm5, nan, %v1806_v8  ;;  %vm1484_vm6 = vweird.f32 %v15655_v27 }
 0x27a   : > { %v1490_v62 = vsel %vm1488_vm9, %v15663_v11, %v1489_v34  ;;  %vm15667_vm3 = vnez %v15596_v56  ;;  %v8341_v36 = vpack.c.bf16 %v975_v39, %v767_v12  ;;  %v1694_v2 = vand.u32 3, %v1693_v61 }
 0x27b   : > { %v2001_v29 = vsel %vm15667_vm3, 0, %v1999_v37  ;;  %v2206_v19 = vsub.s32 4, %v10335_v40  ;;  %v1493_v5 = vsel %vm1491_vm11, %v1492_v38, %v15662_v55  ;;  %v2009_v58 = vxor.u32 2147483648, %v10550_v44  ;;  %v15671_v55 = vld [vmem:[#allocation6_spill] sm:$0xff] }
 0x27c   : > { %v2005_v50 = vadd.s32 3, %v2001_v29  ;;  %v2012_v24 = vxor.u32 2147483648, %v10519_v57  ;;  %v1894_v63 = vsub.s32 4, %v15668_v10  ;;  %8342 = vmatprep.subr.bf16.mxu1 %v8341_v36  ;;  %vm1695_vm10 = vcmp.lt.s32.totalorder %v1694_v2, 2  ;;  %v2229_v36 = vld [vmem:[%s15241_s3 + $0x28] sm:$0xff] }
 0x27d   : > { %vm1696_vm0 = vcmp.eq.s32.totalorder %v1694_v2, 0  ;;  %vm1699_vm4 = vcmp.eq.s32.totalorder %v1694_v2, 2  ;;  %8344 = vmatpush1.bf16.msra.mxu1 %v8343_v9  ;;  %vm15669_vm2 = vcmp.lt.s32.totalorder %v10100_v53, 0  ;;  %vm15670_vm5 = vcmp.lt.s32.totalorder %v9843_v20, 0  ;;  %v2230_v2 = vld [vmem:[%s15241_s3 + $0x30] sm:$0xff] }
 0x27e   : > { %v2006_v30 = vand.u32 3, %v2005_v50  ;;  %v1698_v56 = vsel %vm1696_vm0, %v15664_v1, %v1697_v52  ;;  %v1701_v12 = vsel %vm1699_vm4, %v1700_v22, %v10262_v14  ;;  %v2207_v3 = vsel %vm15669_vm2, %v2206_v19, %v10335_v40  ;;  %8346 = vmatprep.subr.bf16.mxu1 %v8345_v21  ;;  %v2231_v50 = vld [vmem:[%s15241_s3 + $0x38] sm:$0xff]  ;;  %v2243_v19 = vpop.permute.xlu0 %2242 }
 0x27f   : > { %v1895_v32 = vsel %vm15670_vm5, %v1894_v63, %v15668_v10  ;;  %v8349_v49 = vpack.c.bf16 %v1807_v17, %v10689_v35  ;;  %v1494_v15 = vsel %vm1487_vm12, %v1490_v62, %v1493_v5  ;;  %vm1692_vm7 = vweird.f32 %v15660_v60  ;;  %v15673_v60 = vld [vmem:[#allocation41_spill] sm:$0xff]  ;;  %v2224_v62 = vld [vmem:[%s15241_s3] sm:$0xff] }
 0x280   : > { %v1702_v46 = vsel %vm1695_vm10, %v1698_v56, %v1701_v12  ;;  %vm2008_vm15 = vcmp.eq.s32.totalorder %v2006_v30, 0  ;;  %vm2011_vm8 = vcmp.eq.s32.totalorder %v2006_v30, 2  ;;  %v2209_v14 = vsel %vm10508_vm1, 0, %v2207_v3  ;;  %v2248_v56 = vpop.permute.xlu1 %2247 }
 0x281   : > { %v1703_v26 = vsel %vm1692_vm7, nan, %v1702_v46  ;;  %v2010_v40 = vsel %vm2008_vm15, %v10519_v57, %v2009_v58  ;;  %v2013_v9 = vsel %vm2011_vm8, %v2012_v24, %v10550_v44  ;;  %v2213_v25 = vadd.s32 3, %v2209_v14  ;;  %8348 = vmatpush1.bf16.msra.mxu1 %v8347_v6 }
 0x282   : > { %vm15672_vm13 = vnez %v15671_v55  ;;  %vm2004_vm12 = vweird.f32 %v9993_v16  ;;  %v2217_v35 = vxor.u32 2147483648, %v10582_v41  ;;  %v2220_v59 = vxor.u32 2147483648, %v10577_v0  ;;  %8350 = vmatprep.subr.bf16.mxu1 %v8349_v49 }
 0x283   : > { %v1897_v21 = vsel %vm15672_vm13, 0, %v1895_v32  ;;  %v1495_v57 = vsel %vm1484_vm6, nan, %v1494_v15  ;;  %vm2007_vm1 = vcmp.lt.s32.totalorder %v2006_v30, 2  ;;  %v2214_v44 = vand.u32 3, %v2213_v25 }
 0x284   : > { %v1901_v4 = vadd.s32 3, %v1897_v21  ;;  %v2102_v34 = vsub.s32 4, %v15673_v60  ;;  %v8351_v11 = vpack.c.bf16 %v1703_v26, %v1495_v57  ;;  %v2014_v38 = vsel %vm2007_vm1, %v2010_v40, %v2013_v9 }
 0x285   : > { %v1905_v48 = vxor.u32 2147483648, %v10449_v54  ;;  %vm2216_vm9 = vcmp.eq.s32.totalorder %v2214_v44, 0  ;;  %vm2219_vm11 = vcmp.eq.s32.totalorder %v2214_v44, 2  ;;  %v1908_v43 = vxor.u32 2147483648, %v10414_v42 }
 0x286   : > { %v1902_v51 = vand.u32 3, %v1901_v4  ;;  %vm15674_vm14 = vcmp.lt.s32.totalorder %v10070_v18, 0  ;;  %8352 = vmatpush1.bf16.msra.mxu1 %v8351_v11  ;;  %vm2212_vm6 = vweird.f32 %v10100_v53  ;;  %vm2215_vm3 = vcmp.lt.s32.totalorder %v2214_v44, 2 }
 0x287   : > { %v2103_v6 = vsel %vm15674_vm14, %v2102_v34, %v15673_v60  ;;  %v2218_v27 = vsel %vm2216_vm9, %v10577_v0, %v2217_v35  ;;  %v2221_v8 = vsel %vm2219_vm11, %v2220_v59, %v10582_v41  ;;  %v2015_v52 = vsel %vm2004_vm12, nan, %v2014_v38 }
 0x288   : > { %v2222_v1 = vsel %vm2215_vm3, %v2218_v27, %v2221_v8  ;;  %vm15675_vm10 = vnez %v15604_v13  ;;  %v2113_v7 = vxor.u32 2147483648, %v10572_v45  ;;  %vm1904_vm0 = vcmp.eq.s32.totalorder %v1902_v51, 0 }
 0x289   : > { %v2105_v22 = vsel %vm15675_vm10, 0, %v2103_v6  ;;  %v2223_v28 = vsel %vm2212_vm6, nan, %v2222_v1  ;;  %vm1907_vm4 = vcmp.eq.s32.totalorder %v1902_v51, 2  ;;  %v1906_v53 = vsel %vm1904_vm0, %v10414_v42, %v1905_v48 }
 0x28a   : > { %v2109_v23 = vadd.s32 3, %v2105_v22  ;;  %v8353_v47 = vpack.c.bf16 %v2223_v28, %v2015_v52  ;;  %v1909_v0 = vsel %vm1907_vm4, %v1908_v43, %v10449_v54  ;;  %v2116_v41 = vxor.u32 2147483648, %v10553_v33 }
 0x28b   : > { %vm1903_vm2 = vcmp.lt.s32.totalorder %v1902_v51, 2  ;;  %vm1900_vm8 = vweird.f32 %v9843_v20  ;;  %vm2108_vm13 = vweird.f32 %v10070_v18  ;;  %vm15385_vm12 = vcmask 523264   ;;  %v2225_v20 = vld [vmem:[%s15241_s3 + $0x8] sm:$0xff]  ;;  %v2226_v18 = vld [vmem:[%s15241_s3 + $0x10] sm:$0xff] }
 0x28c   : > { %v2110_v61 = vand.u32 3, %v2109_v23  ;;  %8354 = vmatprep.subr.bf16.mxu1 %v8353_v47  ;;  %v1910_v16 = vsel %vm1903_vm2, %v1906_v53, %v1909_v0  ;;  %v15676_v29 = vmov 0.0   ;;  %v15679_v53 = vmov 2475754826  }
 0x28d   : > { %v1911_v39 = vsel %vm1900_vm8, nan, %v1910_v16  ;;  %v15681_v16 = vmov 2102212464  }
 0x28e   : > { %vm2112_vm5 = vcmp.eq.s32.totalorder %v2110_v61, 0  ;;  %vm2115_vm7 = vcmp.eq.s32.totalorder %v2110_v61, 2  ;;  %vm2111_vm15 = vcmp.lt.s32.totalorder %v2110_v61, 2 }
 0x28f   : > { %v2114_v13 = vsel %vm2112_vm5, %v10553_v33, %v2113_v7  ;;  %v2117_v37 = vsel %vm2115_vm7, %v2116_v41, %v10572_v45  ;;  %v2227_v33 = vld [vmem:[%s15241_s3 + $0x18] sm:$0xff]  ;;  %v2228_v45 = vld [vmem:[%s15241_s3 + $0x20] sm:$0xff]  ;;  %v15680_v41 = vmov 2131351028  }
 0x290   : > { %v2118_v42 = vsel %vm2111_vm15, %v2114_v13, %v2117_v37  ;;  %v15682_v37 = vmov 920167782  }
 0x291   : > { %v2119_v54 = vsel %vm2108_vm13, nan, %v2118_v42 }
 0x292   : > { %v8355_v17 = vpack.c.bf16 %v2119_v54, %v1911_v39 }
 0x294   : > { %8356 = vmatpush1.bf16.msra.mxu1 %v8355_v17 }
 0x297   : > { %8086 = vmatmul.mubr.msk.f32.vlgmr.msra.gmra.mrb[0].mxu1 %vm15385_vm12, %v2224_v62 }
 0x298   : > { %2375 = vmatprep.mubr.f32.mxu1 %v15676_v29 }
 0x29b   : > { %8087 = vmatmul.mubr.msk.f32.gmra.mrb[2].mxu1 %vm15385_vm12, %v2225_v20 }
 0x29c   : > { %2381 = vmatprep.mubr.f32.mxu1 %v15676_v29 }
 0x29f   : > { %8088 = vmatmul.mubr.msk.f32.gmra.mrb[4].mxu1 %vm15385_vm12, %v2226_v18  ;;  %v15683_v18 = vmov 1326507024  }
 0x2a0   : > { %2387 = vmatprep.mubr.f32.mxu1 %v15676_v29 }
 0x2a3   : > { %8089 = vmatmul.mubr.msk.f32.gmra.mrb[6].mxu1 %vm15385_vm12, %v2227_v33 }
 0x2a4   : > { %2393 = vmatprep.mubr.f32.mxu1 %v15676_v29 }
 0x2a7   : > { %8090 = vmatmul.mubr.msk.f32.gmra.mrb[8].mxu1 %vm15385_vm12, %v2228_v45 }
 0x2a8   : > { %2399 = vmatprep.mubr.f32.mxu1 %v15676_v29 }
 0x2ab   : > { %8091 = vmatmul.mubr.msk.f32.gmra.mrb[10].mxu1 %vm15385_vm12, %v2229_v36 }
 0x2ac   : > { %2405 = vmatprep.mubr.f32.mxu1 %v15676_v29 }
 0x2af   : > { %8092 = vmatmul.mubr.msk.f32.gmra.mrb[12].mxu1 %vm15385_vm12, %v2230_v2 }
 0x2b0   : > { %2411 = vmatprep.mubr.f32.mxu1 %v15676_v29 }
 0x2b3   : > { %8093 = vmatmul.mubr.msk.f32.gmra.mrb[14].mxu1 %vm15385_vm12, %v2231_v50 }
 0x2b4   : > { %6087 = vmatprep.mubr.f32.mxu1 %v15676_v29 }
 0x36a   : > { %v2371_v5 = vpop.f32.mrb[0].mxu1 }
 0x36b   : > { %v10815_v58 = vadd.f32 %v2371_v5, %v2243_v19  ;;  %v2373_v24 = vpop.f32.mrb[1].mxu1 }
 0x36c   : > { %v10817_v10 = vadd.f32 %v2373_v24, %v2243_v19 }
 0x36d   : > { %15677 = vst [vmem:[#allocation2_spill] sm:$0xff] %v10815_v58  ;;  %v2418_v63 = vand.u32 2147483647, %v10815_v58  ;;  %v2421_v30 = vand.u32 2139095040, %v10815_v58 }
 0x36e   : > { %v2522_v12 = vand.u32 2147483647, %v10817_v10  ;;  %v2525_v3 = vand.u32 2139095040, %v10817_v10  ;;  %v2377_v32 = vpop.f32.mrb[2].mxu1 }
 0x36f   : > { %v2422_v49 = vshrl.u32 %v2421_v30, 23  ;;  %v10823_v15 = vadd.f32 %v2377_v32, %v2248_v56  ;;  %v2379_v46 = vpop.f32.mrb[3].mxu1  ;;  %v2425_v26 = vand.u32 8388607, %v2418_v63 }
 0x370   : > { %v2526_v14 = vshrl.u32 %v2525_v3, 23  ;;  %v2529_v40 = vand.u32 8388607, %v2522_v12  ;;  %v10836_v6 = vadd.f32 %v2379_v46, %v2248_v56 }
 0x371   : > { %15678 = vst [vmem:[#allocation8_spill] sm:$0xff] %v10823_v15  ;;  %v8094_v9 = vadd.s32 4294967169, %v2422_v49  ;;  %v2629_v55 = vand.u32 2139095040, %v10823_v15  ;;  %v2426_v59 = vor.u32 8388608, %v2425_v26  ;;  %v15356_v22 = vand.u32 2147483647, %v10823_v15 }
 0x372   : > { %v8098_v25 = vadd.s32 4294967169, %v2526_v14  ;;  %v10830_v21 = vpop.f32.mrb[4].mxu1  ;;  %v2530_v4 = vor.u32 8388608, %v2529_v40 }
 0x373   : > { %v2428_v35 = vadd.s32 1, %v8094_v9  ;;  %v2630_v44 = vshrl.u32 %v2629_v55, 23  ;;  %v10832_v60 = vpop.f32.mrb[5].mxu1  ;;  %v10840_v8 = vshll.u32 %v2426_v59, 8 }
 0x374   : > { %v2532_v57 = vadd.s32 1, %v8098_v25  ;;  %v10844_v1 = vshll.u32 %v2530_v4, 8 }
 0x375   : > { %vm2429_vm1 = vcmp.gt.s32.totalorder %v2428_v35, 0  ;;  %v8102_v11 = vadd.s32 4294967169, %v2630_v44 }
 0x376   : > { %v2430_v34 = vsel %vm2429_vm1, %v2428_v35, 0  ;;  %vm2533_vm9 = vcmp.gt.s32.totalorder %v2532_v57, 0  ;;  %v10834_v38 = vpop.f32.mrb[6].mxu1 }
 0x377   : > { %v2431_v51 = vshrl.u32 %v2430_v34, 5  ;;  %v2432_v48 = vand.u32 31, %v2430_v34  ;;  %v2534_v43 = vsel %vm2533_vm9, %v2532_v57, 0  ;;  %v10838_v27 = vpop.f32.mrb[7].mxu1  ;;  %v10848_v47 = vadd.s32 1, %v8102_v11 }
 0x378   : > { %v10842_v52 = vshrl.u32 %v2534_v43, 5  ;;  %v2536_v23 = vand.u32 31, %v2534_v43 }
 0x379   : > { %v2433_v7 = vsub.s32 32, %v2432_v48  ;;  %v2435_v28 = vshll.u32 %v15512_v31, %v2432_v48  ;;  %v2438_v0 = vshll.u32 %v15679_v53, %v2432_v48  ;;  %v2441_v61 = vshll.u32 %v15680_v41, %v2432_v48 }
 0x37a   : > { %v2444_v13 = vshll.u32 %v15681_v16, %v2432_v48  ;;  %v2447_v42 = vshll.u32 %v15682_v37, %v2432_v48  ;;  %vm2450_vm11 = vcmp.lt.s32.totalorder %v2431_v51, 1  ;;  %vm2451_vm14 = vcmp.lt.s32.totalorder %v2431_v51, 2  ;;  %v10860_v19 = vpop.f32.mrb[8].mxu1 }
 0x37b   : > { %v2436_v39 = vshrl.u32 %v15679_v53, %v2433_v7  ;;  %v2439_v54 = vshrl.u32 %v15680_v41, %v2433_v7  ;;  %v2442_v17 = vshrl.u32 %v15681_v16, %v2433_v7  ;;  %v2434_v62 = vshrl.u32 %v15512_v31, %v2433_v7 }
 0x37c   : > { %v2445_v20 = vshrl.u32 %v15682_v37, %v2433_v7  ;;  %v2448_v33 = vshrl.u32 %v15683_v18, %v2433_v7  ;;  %v2537_v50 = vsub.s32 32, %v2536_v23  ;;  %vm2452_vm6 = vcmp.lt.s32.totalorder %v2431_v51, 3 }
 0x37d   : > { %v2437_v45 = vor.u32 %v2436_v39, %v2435_v28  ;;  %v2440_v36 = vor.u32 %v2439_v54, %v2438_v0  ;;  %v2443_v2 = vor.u32 %v2442_v17, %v2441_v61  ;;  %vm2453_vm3 = vcmp.lt.s32.totalorder %v2431_v51, 4 }
 0x37e   : > { %v2446_v5 = vor.u32 %v2445_v20, %v2444_v13  ;;  %v2449_v24 = vor.u32 %v2448_v33, %v2447_v42  ;;  %v2539_v14 = vshll.u32 %v15512_v31, %v2536_v23  ;;  %v2540_v25 = vshrl.u32 %v15679_v53, %v2537_v50 }
 0x37f   : > { %v2454_v30 = vsel %vm2450_vm11, %v2434_v62, %v2437_v45  ;;  %v2455_v56 = vsel %vm2453_vm3, %v2443_v2, 2102212464  ;;  %v2458_v3 = vsel %vm2450_vm11, %v2437_v45, %v2440_v36  ;;  %v2462_v32 = vsel %vm2450_vm11, %v2440_v36, %v2443_v2 }
 0x380   : > { %v2456_v49 = vsel %vm2452_vm6, %v2440_v36, %v2455_v56  ;;  %v2459_v46 = vsel %vm2453_vm3, %v2446_v5, 920167782  ;;  %v2463_v26 = vsel %vm2453_vm3, %v2449_v24, 1326507024  ;;  %v2542_v55 = vshll.u32 %v15679_v53, %v2536_v23 }
 0x381   : > { %v2460_v40 = vsel %vm2452_vm6, %v2443_v2, %v2459_v46  ;;  %v2464_v9 = vsel %vm2452_vm6, %v2446_v5, %v2463_v26  ;;  %v2457_v35 = vsel %vm2451_vm14, %v2454_v30, %v2456_v49  ;;  %v2543_v57 = vshrl.u32 %v15680_v41, %v2537_v50 }
 0x382   : > { %v2461_v59 = vsel %vm2451_vm14, %v2458_v3, %v2460_v40  ;;  %v2465_v4 = vsel %vm2451_vm14, %v2462_v32, %v2464_v9  ;;  %v2541_v43 = vor.u32 %v2540_v25, %v2539_v14  ;;  %v2545_v28 = vshll.u32 %v15680_v41, %v2536_v23 }
 0x383   : > { %v10873_v44 = vmul.u32.u64.low %v10840_v8, %v2465_v4  ;;  %v10874_v34 = vmul.u32.u64.high %v10840_v8, %v2465_v4, %v10873_v44  ;;  %v10877_v11 = vmul.u32.u64.low %v10840_v8, %v2461_v59  ;;  %v10878_v48 = vmul.u32.u64.high %v10840_v8, %v2461_v59, %v10877_v11 }
 0x384   : > { %v2544_v7 = vor.u32 %v2543_v57, %v2542_v55  ;;  %v2546_v0 = vshrl.u32 %v15681_v16, %v2537_v50  ;;  %v2538_v51 = vshrl.u32 %v15512_v31, %v2537_v50  ;;  %v2548_v61 = vshll.u32 %v15681_v16, %v2536_v23  ;;  %v10919_v44 = vpop.f32.mrb[9].mxu1 }
 0x385   : > { %v2549_v13 = vshrl.u32 %v15682_v37, %v2537_v50  ;;  %v2552_v42 = vshrl.u32 %v15683_v18, %v2537_v50  ;;  %v2473_v39 = vmul.u32 %v10840_v8, %v2457_v35  ;;  %v2551_v17 = vshll.u32 %v15682_v37, %v2536_v23 }
 0x386   : > { %v2547_v54 = vor.u32 %v2546_v0, %v2545_v28  ;;  %vm2554_vm10 = vcmp.lt.s32.totalorder %v10842_v52, 1  ;;  %vm2475_vm0 = vc.u32 %v10874_v34, %v10877_v11  ;;  %v2476_v62 = vadd.s32 1, %v10878_v48 }
 0x387   : > { %v2550_v20 = vor.u32 %v2549_v13, %v2548_v61  ;;  %vm2555_vm4 = vcmp.lt.s32.totalorder %v10842_v52, 2  ;;  %v2553_v33 = vor.u32 %v2552_v42, %v2551_v17  ;;  %vm2556_vm2 = vcmp.lt.s32.totalorder %v10842_v52, 3 }
 0x388   : > { %vm2557_vm5 = vcmp.lt.s32.totalorder %v10842_v52, 4  ;;  %v2562_v45 = vsel %vm2554_vm10, %v2541_v43, %v2544_v7  ;;  %v2477_v8 = vsel %vm2475_vm0, %v2476_v62, %v10878_v48  ;;  %v2566_v2 = vsel %vm2554_vm10, %v2544_v7, %v2547_v54 }
 0x389   : > { %v2559_v36 = vsel %vm2557_vm5, %v2547_v54, 2102212464  ;;  %v2563_v23 = vsel %vm2557_vm5, %v2550_v20, 920167782  ;;  %v2478_v50 = vadd.s32 %v2477_v8, %v2473_v39  ;;  %v2558_v5 = vsel %vm2554_vm10, %v2538_v51, %v2541_v43 }
 0x38a   : > { %v2564_v24 = vsel %vm2556_vm2, %v2547_v54, %v2563_v23  ;;  %v2567_v30 = vsel %vm2557_vm5, %v2553_v33, 1326507024  ;;  %v2560_v56 = vsel %vm2556_vm2, %v2544_v7, %v2559_v36  ;;  %vm2637_vm7 = vcmp.gt.s32.totalorder %v10848_v47, 0 }
 0x38b   : > { %v2565_v3 = vsel %vm2555_vm4, %v2562_v45, %v2564_v24  ;;  %v2568_v32 = vsel %vm2556_vm2, %v2550_v20, %v2567_v30  ;;  %v2479_v49 = vadd.s32 536870912, %v2478_v50  ;;  %v2633_v25 = vand.u32 8388607, %v15356_v22 }
 0x38c   : > { %v2569_v46 = vsel %vm2555_vm4, %v2566_v2, %v2568_v32  ;;  %v10903_v26 = vmul.u32.u64.low %v10844_v1, %v2565_v3  ;;  %v10904_v14 = vmul.u32.u64.high %v10844_v1, %v2565_v3, %v10903_v26  ;;  %v2638_v55 = vsel %vm2637_vm7, %v10848_v47, 0 }
 0x38d   : > { %v10908_v40 = vmul.u32.u64.low %v10844_v1, %v2569_v46  ;;  %v10909_v9 = vmul.u32.u64.high %v10844_v1, %v2569_v46, %v10908_v40  ;;  %v10914_v35 = vshrl.u32 %v2479_v49, 30  ;;  %v2561_v59 = vsel %vm2555_vm4, %v2558_v5, %v2560_v56 }
 0x38e   : > { %v2640_v4 = vand.u32 31, %v2638_v55  ;;  %v2733_v57 = vand.u32 2139095040, %v10836_v6  ;;  %v2580_v43 = vadd.s32 1, %v10904_v14  ;;  %v2577_v28 = vmul.u32 %v10844_v1, %v2561_v59 }
 0x38f   : > { %v2481_v48 = vshll.u32 %v10914_v35, 30  ;;  %vm2579_vm15 = vc.u32 %v10909_v9, %v10903_v26  ;;  %v2634_v47 = vor.u32 8388608, %v2633_v25  ;;  %v15355_v51 = vand.u32 2147483647, %v10836_v6 }
 0x390   : > { %v2641_v7 = vsub.s32 32, %v2640_v4  ;;  %v2581_v52 = vsel %vm2579_vm15, %v2580_v43, %v10904_v14  ;;  %v2734_v61 = vshrl.u32 %v2733_v57, 23  ;;  %v2643_v42 = vshll.u32 %v15512_v31, %v2640_v4 }
 0x391   : > { %v10926_v0 = vsub.s32 %v2478_v50, %v2481_v48  ;;  %v2582_v13 = vadd.s32 %v2581_v52, %v2577_v28  ;;  %v2639_v17 = vshrl.u32 %v2638_v55, 5  ;;  %v2646_v62 = vshll.u32 %v15679_v53, %v2640_v4 }
 0x392   : > { %v2644_v39 = vshrl.u32 %v15679_v53, %v2641_v7  ;;  %v2647_v54 = vshrl.u32 %v15680_v41, %v2641_v7  ;;  %v2650_v20 = vshrl.u32 %v15681_v16, %v2641_v7  ;;  %v2649_v8 = vshll.u32 %v15680_v41, %v2640_v4 }
 0x393   : > { %v2484_v1 = vsub.s32 0, %v10926_v0  ;;  %v2583_v33 = vadd.s32 536870912, %v2582_v13  ;;  %v10937_v36 = vshll.u32 %v2634_v47, 8  ;;  %v2652_v50 = vshll.u32 %v15681_v16, %v2640_v4 }
 0x394   : > { %v2645_v45 = vor.u32 %v2644_v39, %v2643_v42  ;;  %v2648_v2 = vor.u32 %v2647_v54, %v2646_v62  ;;  %v2653_v5 = vshrl.u32 %v15682_v37, %v2641_v7  ;;  %v2651_v30 = vor.u32 %v2650_v20, %v2649_v8 }
 0x395   : > { %v8095_v23 = vmin.u32 %v2484_v1, %v10926_v0  ;;  %v10942_v24 = vshrl.u32 %v2583_v33, 30  ;;  %v2655_v56 = vshll.u32 %v15682_v37, %v2640_v4  ;;  %v2656_v3 = vshrl.u32 %v15683_v18, %v2641_v7 }
 0x396   : > { %v2654_v49 = vor.u32 %v2653_v5, %v2652_v50  ;;  %vm2658_vm8 = vcmp.lt.s32.totalorder %v2639_v17, 1  ;;  %v8106_v46 = vadd.s32 4294967169, %v2734_v61  ;;  %vm2659_vm13 = vcmp.lt.s32.totalorder %v2639_v17, 2 }
 0x397   : > { %v2486_v32 = vclz %v8095_v23  ;;  %v2585_v14 = vshll.u32 %v10942_v24, 30  ;;  %v2657_v40 = vor.u32 %v2656_v3, %v2655_v56  ;;  %vm2661_vm1 = vcmp.lt.s32.totalorder %v2639_v17, 4 }
 0x398   : > { %vm2660_vm9 = vcmp.lt.s32.totalorder %v2639_v17, 3  ;;  %v2666_v55 = vsel %vm2658_vm8, %v2645_v45, %v2648_v2  ;;  %v2667_v59 = vsel %vm2661_vm1, %v2654_v49, 920167782  ;;  %v2663_v48 = vsel %vm2661_vm1, %v2651_v30, 2102212464 }
 0x399   : > { %v8096_v25 = vadd.s32 4294967294, %v2486_v32  ;;  %v10948_v57 = vsub.s32 %v2582_v13, %v2585_v14  ;;  %v2668_v4 = vsel %vm2660_vm9, %v2651_v30, %v2667_v59  ;;  %v2670_v43 = vsel %vm2658_vm8, %v2648_v2, %v2651_v30 }
 0x39a   : > { %v2642_v28 = vshrl.u32 %v15512_v31, %v2641_v7  ;;  %v2669_v47 = vsel %vm2659_vm13, %v2666_v55, %v2668_v4  ;;  %v2671_v52 = vsel %vm2661_vm1, %v2657_v40, 1326507024  ;;  %v2740_v54 = vadd.s32 1, %v8106_v46 }
 0x39b   : > { %vm8097_vm11 = vcmp.lt.s32.totalorder %v8096_v25, 0  ;;  %v2588_v42 = vsub.s32 0, %v10948_v57  ;;  %v2672_v39 = vsel %vm2660_vm9, %v2654_v49, %v2671_v52  ;;  %v2664_v62 = vsel %vm2660_vm9, %v2648_v2, %v2663_v48  ;;  %v10979_v52 = vpop.f32.mrb[10].mxu1 }
 0x39c   : > { %v2489_v61 = vsel %vm8097_vm11, 0, %v8096_v25  ;;  %v2662_v13 = vsel %vm2658_vm8, %v2642_v28, %v2645_v45  ;;  %v2673_v20 = vsel %vm2659_vm13, %v2670_v43, %v2672_v39  ;;  %vm2741_vm14 = vcmp.gt.s32.totalorder %v2740_v54, 0  ;;  %v2253_v43 = vpop.permute.xlu0 %2252 }
 0x39d   : > { %v2494_v1 = vsub.s32 4294967266, %v2489_v61  ;;  %v8099_v33 = vmin.u32 %v2588_v42, %v10948_v57  ;;  %v10961_v7 = vmul.u32.u64.low %v10937_v36, %v2673_v20  ;;  %v10962_v8 = vmul.u32.u64.high %v10937_v36, %v2673_v20, %v10961_v7 }
 0x39e   : > { %v10965_v23 = vmul.u32.u64.low %v10937_v36, %v2669_v47  ;;  %v10966_v50 = vmul.u32.u64.high %v10937_v36, %v2669_v47, %v10965_v23  ;;  %v2737_v45 = vand.u32 8388607, %v15355_v51  ;;  %v2742_v2 = vsel %vm2741_vm14, %v2740_v54, 0 }
 0x39f   : > { %v2495_v5 = vadd.s32 127, %v2494_v1  ;;  %v2590_v30 = vclz %v8099_v33  ;;  %v2490_v56 = vsub.s32 32, %v2489_v61  ;;  %v2665_v3 = vsel %vm2659_vm13, %v2662_v13, %v2664_v62 }
 0x3a0   : > { %v2744_v32 = vand.u32 31, %v2742_v2  ;;  %vm2683_vm6 = vc.u32 %v10962_v8, %v10965_v23  ;;  %v2474_v46 = vadd.s32 %v10877_v11, %v10874_v34  ;;  %v2684_v14 = vadd.s32 1, %v10966_v50 }
 0x3a1   : > { %v8100_v49 = vadd.s32 4294967294, %v2590_v30  ;;  %v2496_v40 = vshll.u32 %v2495_v5, 23  ;;  %v2681_v25 = vmul.u32 %v10937_v36, %v2665_v3  ;;  %v2738_v55 = vor.u32 8388608, %v2737_v45 }
 0x3a2   : > { %v2492_v59 = vshrl.u32 %v2474_v46, %v2490_v56  ;;  %v2685_v17 = vsel %vm2683_vm6, %v2684_v14, %v10966_v50  ;;  %v2745_v4 = vsub.s32 32, %v2744_v32  ;;  %v2491_v42 = vshll.u32 %v10926_v0, %v2489_v61 }
 0x3a3   : > { %vm8101_vm3 = vcmp.lt.s32.totalorder %v8100_v49, 0  ;;  %v2686_v47 = vadd.s32 %v2685_v17, %v2681_v25  ;;  %v2578_v34 = vadd.s32 %v10903_v26, %v10909_v9  ;;  %v10985_v11 = vadd.f32 %v10830_v21, %v2253_v43 }
 0x3a4   : > { %v2593_v48 = vsel %vm8101_vm3, 0, %v8100_v49  ;;  %v10988_v36 = vadd.f32 %v10832_v60, %v2253_v43  ;;  %v2497_v39 = vor.u32 4788187, %v2496_v40  ;;  %v10990_v13 = vshll.u32 %v2738_v55, 8 }
 0x3a5   : > { %v2598_v28 = vsub.s32 4294967266, %v2593_v48  ;;  %15684 = vst [vmem:[#allocation11_spill] sm:$0xff] %v10985_v11  ;;  %v2687_v1 = vadd.s32 536870912, %v2686_v47  ;;  %v2493_v62 = vor.u32 %v2492_v59, %v2491_v42  ;;  %v2743_v20 = vshrl.u32 %v2742_v2, 5 }
 0x3a6   : > { %15685 = vst [vmem:[#allocation12_spill] sm:$0xff] %v10988_v36  ;;  %v2748_v33 = vshrl.u32 %v15679_v53, %v2745_v4  ;;  %v2751_v0 = vshrl.u32 %v15680_v41, %v2745_v4  ;;  %v2747_v26 = vshll.u32 %v15512_v31, %v2744_v32  ;;  %v2754_v21 = vshrl.u32 %v15681_v16, %v2745_v4 }
 0x3a7   : > { %v2599_v54 = vadd.s32 127, %v2598_v28  ;;  %v10994_v61 = vshrl.u32 %v2687_v1, 30  ;;  %v2757_v60 = vshrl.u32 %v15682_v37, %v2745_v4  ;;  %v2594_v9 = vsub.s32 32, %v2593_v48 }
 0x3a8   : > { %v2750_v7 = vshll.u32 %v15679_v53, %v2744_v32  ;;  %v2756_v50 = vshll.u32 %v15681_v16, %v2744_v32  ;;  %v2760_v5 = vshrl.u32 %v15683_v18, %v2745_v4  ;;  %v2498_v30 = vand.u32 2147483647, %v2497_v39 }
 0x3a9   : > { %v2600_v45 = vshll.u32 %v2599_v54, 23  ;;  %v2689_v2 = vshll.u32 %v10994_v61, 30  ;;  %v2753_v56 = vshll.u32 %v15680_v41, %v2744_v32  ;;  %v2749_v3 = vor.u32 %v2748_v33, %v2747_v26 }
 0x3aa   : > { %v2752_v49 = vor.u32 %v2751_v0, %v2750_v7  ;;  %v2758_v46 = vor.u32 %v2757_v60, %v2756_v50  ;;  %v2759_v14 = vshll.u32 %v15682_v37, %v2744_v32  ;;  %v2500_v40 = vcvt.s32.f32 %v2493_v62 }
 0x3ab   : > { %v11005_v25 = vsub.s32 %v2686_v47, %v2689_v2  ;;  %v2755_v55 = vor.u32 %v2754_v21, %v2753_v56  ;;  %v15354_v59 = vand.u32 2147483647, %v10985_v11  ;;  %v2595_v17 = vshll.u32 %v10948_v57, %v2593_v48 }
 0x3ac   : > { %v2596_v43 = vshrl.u32 %v2578_v34, %v2594_v9  ;;  %v2746_v28 = vshrl.u32 %v15512_v31, %v2745_v4  ;;  %v2761_v42 = vor.u32 %v2760_v5, %v2759_v14  ;;  %v2601_v39 = vor.u32 4788187, %v2600_v45 }
 0x3ad   : > { %v2692_v54 = vsub.s32 0, %v11005_v25  ;;  %vm2762_vm10 = vcmp.lt.s32.totalorder %v2743_v20, 1  ;;  %vm2765_vm0 = vcmp.lt.s32.totalorder %v2743_v20, 4  ;;  %v2501_v1 = vmul.f32 %v2500_v40, %v2498_v30 }
 0x3ae   : > { %vm2764_vm4 = vcmp.lt.s32.totalorder %v2743_v20, 3  ;;  %v2770_v32 = vsel %vm2762_vm10, %v2749_v3, %v2752_v49  ;;  %v2771_v47 = vsel %vm2765_vm0, %v2758_v46, 920167782  ;;  %vm2763_vm2 = vcmp.lt.s32.totalorder %v2743_v20, 2 }
 0x3af   : > { %v8103_v62 = vmin.u32 %v2692_v54, %v11005_v25  ;;  %v2767_v33 = vsel %vm2765_vm0, %v2755_v55, 2102212464  ;;  %v2772_v0 = vsel %vm2764_vm4, %v2755_v55, %v2771_v47  ;;  %v2597_v57 = vor.u32 %v2596_v43, %v2595_v17 }
 0x3b0   : > { %v2773_v48 = vsel %vm2763_vm2, %v2770_v32, %v2772_v0  ;;  %v2774_v4 = vsel %vm2762_vm10, %v2752_v49, %v2755_v55  ;;  %v2775_v34 = vsel %vm2765_vm0, %v2761_v42, 1326507024  ;;  %v2602_v26 = vand.u32 2147483647, %v2601_v39 }
 0x3b1   : > { %v2694_v21 = vclz %v8103_v62  ;;  %v2766_v60 = vsel %vm2762_vm10, %v2746_v28, %v2749_v3  ;;  %v2776_v9 = vsel %vm2764_vm4, %v2758_v46, %v2775_v34  ;;  %v2768_v7 = vsel %vm2764_vm4, %v2752_v49, %v2767_v33  ;;  %v11028_v46 = vpop.f32.mrb[11].mxu1 }
 0x3b2   : > { %v2777_v50 = vsel %vm2763_vm2, %v2774_v4, %v2776_v9  ;;  %v11018_v5 = vmul.u32.u64.low %v10990_v13, %v2773_v48  ;;  %v11019_v30 = vmul.u32.u64.high %v10990_v13, %v2773_v48, %v11018_v5  ;;  %v2502_v45 = vxor.u32 2147483648, %v2501_v1 }
 0x3b3   : > { %v8104_v2 = vadd.s32 4294967294, %v2694_v21  ;;  %v11023_v56 = vmul.u32.u64.low %v10990_v13, %v2777_v50  ;;  %v11024_v14 = vmul.u32.u64.high %v10990_v13, %v2777_v50, %v11023_v56  ;;  %vm2420_vm5 = vcmp.lt.s32.totalorder %v10815_v58, 0 }
 0x3b4   : > { %v2604_v40 = vcvt.s32.f32 %v2597_v57  ;;  %v2837_v3 = vand.u32 2139095040, %v10985_v11  ;;  %v2504_v49 = vsub.s32 4, %v10914_v35  ;;  %v2769_v55 = vsel %vm2763_vm2, %v2766_v60, %v2768_v7 }
 0x3b5   : > { %vm8105_vm7 = vcmp.lt.s32.totalorder %v8104_v2, 0  ;;  %v2941_v17 = vand.u32 2139095040, %v10988_v36  ;;  %v2788_v42 = vadd.s32 1, %v11019_v30  ;;  %v2503_v54 = vsel %vm2420_vm5, %v2502_v45, %v2501_v1 }
 0x3b6   : > { %v2605_v43 = vmul.f32 %v2604_v40, %v2602_v26  ;;  %v11033_v28 = vsel %vm8105_vm7, 0, %v8104_v2  ;;  %v2838_v39 = vshrl.u32 %v2837_v3, 23  ;;  %v2841_v32 = vand.u32 8388607, %v15354_v59  ;;  %v11062_v26 = vpop.permute.xlu1 %2257 }
 0x3b7   : > { %v2702_v47 = vsub.s32 4294967266, %v11033_v28  ;;  %v2785_v62 = vmul.u32 %v10990_v13, %v2769_v55  ;;  %vm2787_vm15 = vc.u32 %v11024_v14, %v11018_v5  ;;  %vm11046_vm8 = vcmp.le.f32.partialorder %v2418_v63, 0.7853982 }
 0x3b8   : > { %v8110_v20 = vadd.s32 4294967169, %v2838_v39  ;;  %v2789_v0 = vsel %vm2787_vm15, %v2788_v42, %v11019_v30  ;;  %v2942_v1 = vshrl.u32 %v2941_v17, 23  ;;  %v11054_v57 = vsel %vm2420_vm5, %v2504_v49, %v10914_v35 }
 0x3b9   : > { %v2606_v48 = vxor.u32 2147483648, %v2605_v43  ;;  %v2790_v13 = vadd.s32 %v2789_v0, %v2785_v62  ;;  %v11059_v34 = vsel %vm11046_vm8, %v10815_v58, %v2503_v54  ;;  %vm2524_vm13 = vcmp.lt.s32.totalorder %v10817_v10, 0 }
 0x3ba   : > { %v2844_v4 = vadd.s32 1, %v8110_v20  ;;  %v2842_v63 = vor.u32 8388608, %v2841_v32  ;;  %v2703_v21 = vadd.s32 127, %v2702_v47  ;;  %v8114_v9 = vadd.s32 4294967169, %v2942_v1 }
 0x3bb   : > { %v2791_v60 = vadd.s32 536870912, %v2790_v13  ;;  %v2682_v7 = vadd.s32 %v10965_v23, %v10962_v8  ;;  %v11071_v30 = vadd.f32 %v10834_v38, %v11062_v26  ;;  %8760 = vcosq.f32 %v11059_v34 }
 0x3bc   : > { %vm2845_vm1 = vcmp.gt.s32.totalorder %v2844_v4, 0  ;;  %v11076_v45 = vsel %vm2524_vm13, %v2606_v48, %v2605_v43  ;;  %v2698_v40 = vsub.s32 32, %v11033_v28  ;;  %v2699_v3 = vshll.u32 %v11005_v25, %v11033_v28 }
 0x3bd   : > { %v2846_v50 = vsel %vm2845_vm1, %v2844_v4, 0  ;;  %15688 = vst [vmem:[#allocation9_spill] sm:$0xff] %v11071_v30  ;;  %v11078_v2 = vshrl.u32 %v2791_v60, 30  ;;  %v11083_v8 = vshll.u32 %v2842_v63, 8  ;;  %v15353_v23 = vand.u32 2147483647, %v10988_v36 }
 0x3be   : > { %v2848_v56 = vand.u32 31, %v2846_v50  ;;  %v2704_v38 = vshll.u32 %v2703_v21, 23  ;;  %v2948_v17 = vadd.s32 1, %v8114_v9  ;;  %v2847_v42 = vshrl.u32 %v2846_v50, 5 }
 0x3bf   : > { %v2793_v49 = vshll.u32 %v11078_v2, 30  ;;  %v2700_v48 = vshrl.u32 %v2682_v7, %v2698_v40  ;;  %vm11102_vm9 = vcmp.le.f32.partialorder %v2522_v12, 0.7853982  ;;  %8762 = vsinq.f32 %v11059_v34 }
 0x3c0   : > { %v2849_v55 = vsub.s32 32, %v2848_v56  ;;  %v2851_v43 = vshll.u32 %v15512_v31, %v2848_v56  ;;  %v2854_v39 = vshll.u32 %v15679_v53, %v2848_v56  ;;  %v2857_v54 = vshll.u32 %v15680_v41, %v2848_v56 }
 0x3c1   : > { %v11090_v32 = vsub.s32 %v2790_v13, %v2793_v49  ;;  %v2860_v47 = vshll.u32 %v15681_v16, %v2848_v56  ;;  %v2863_v0 = vshll.u32 %v15682_v37, %v2848_v56  ;;  %v11108_v49 = vand.u32 8388607, %v15353_v23 }
 0x3c2   : > { %v2852_v25 = vshrl.u32 %v15679_v53, %v2849_v55  ;;  %v2855_v28 = vshrl.u32 %v15680_v41, %v2849_v55  ;;  %v2858_v62 = vshrl.u32 %v15681_v16, %v2849_v55  ;;  %v2861_v20 = vshrl.u32 %v15682_v37, %v2849_v55 }
 0x3c3   : > { %v2864_v1 = vshrl.u32 %v15683_v18, %v2849_v55  ;;  %v2796_v4 = vsub.s32 0, %v11090_v32  ;;  %v2705_v56 = vor.u32 4788187, %v2704_v38  ;;  %vm2866_vm11 = vcmp.lt.s32.totalorder %v2847_v42, 1 }
 0x3c4   : > { %v2853_v63 = vor.u32 %v2852_v25, %v2851_v43  ;;  %v2856_v13 = vor.u32 %v2855_v28, %v2854_v39  ;;  %v2859_v60 = vor.u32 %v2858_v62, %v2857_v54  ;;  %v2862_v9 = vor.u32 %v2861_v20, %v2860_v47 }
 0x3c5   : > { %v2865_v50 = vor.u32 %v2864_v1, %v2863_v0  ;;  %v8107_v7 = vmin.u32 %v2796_v4, %v11090_v32  ;;  %vm2949_vm14 = vcmp.gt.s32.totalorder %v2948_v17, 0  ;;  %v2850_v40 = vshrl.u32 %v15512_v31, %v2849_v55  ;;  %v11112_v43 = vpop.eup %8760 }
 0x3c6   : > { %vm2867_vm6 = vcmp.lt.s32.totalorder %v2847_v42, 2  ;;  %vm2869_vm3 = vcmp.lt.s32.totalorder %v2847_v42, 4  ;;  %v2874_v12 = vsel %vm2866_vm11, %v2853_v63, %v2856_v13  ;;  %15691 = vst [vmem:[#allocation3_spill] sm:$0xff] %v11112_v43  ;;  %vm2868_vm10 = vcmp.lt.s32.totalorder %v2847_v42, 3 }
 0x3c7   : > { %v2798_v39 = vclz %v8107_v7  ;;  %v2871_v54 = vsel %vm2869_vm3, %v2859_v60, 2102212464  ;;  %v2875_v25 = vsel %vm2869_vm3, %v2862_v9, 920167782  ;;  %v2870_v28 = vsel %vm2866_vm11, %v2850_v40, %v2853_v63 }
 0x3c8   : > { %v2876_v47 = vsel %vm2868_vm10, %v2859_v60, %v2875_v25  ;;  %v2878_v62 = vsel %vm2866_vm11, %v2856_v13, %v2859_v60  ;;  %v2879_v20 = vsel %vm2869_vm3, %v2865_v50, 1326507024  ;;  %v2872_v0 = vsel %vm2868_vm10, %v2856_v13, %v2871_v54 }
 0x3c9   : > { %v8108_v38 = vadd.s32 4294967294, %v2798_v39  ;;  %v2877_v1 = vsel %vm2867_vm6, %v2874_v12, %v2876_v47  ;;  %v2880_v4 = vsel %vm2868_vm10, %v2862_v9, %v2879_v20  ;;  %v2701_v23 = vor.u32 %v2700_v48, %v2699_v3  ;;  %v11164_v58 = vpop.eup %8762 }
 0x3ca   : > { %v2881_v55 = vsel %vm2867_vm6, %v2878_v62, %v2880_v4  ;;  %v11117_v59 = vmul.u32.u64.low %v11083_v8, %v2877_v1  ;;  %v11118_v35 = vmul.u32.u64.high %v11083_v8, %v2877_v1, %v11117_v59  ;;  %v2950_v60 = vsel %vm2949_vm14, %v2948_v17, 0  ;;  %15692 = vst [vmem:[#allocation10_spill] sm:$0xff] %v11164_v58 }
 0x3cb   : > { %vm8109_vm0 = vcmp.lt.s32.totalorder %v8108_v38, 0  ;;  %v11122_v7 = vmul.u32.u64.low %v11083_v8, %v2881_v55  ;;  %v11123_v63 = vmul.u32.u64.high %v11083_v8, %v2881_v55, %v11122_v7  ;;  %v2873_v13 = vsel %vm2867_vm6, %v2870_v28, %v2872_v0 }
 0x3cc   : > { %v11126_v50 = vsel %vm8109_vm0, 0, %v8108_v38  ;;  %v2952_v9 = vand.u32 31, %v2950_v60  ;;  %v3045_v3 = vand.u32 2139095040, %v11071_v30  ;;  %v11135_v48 = vsel %vm11102_vm9, %v10817_v10, %v11076_v45  ;;  %v11145_v45 = vpop.f32.mrb[12].mxu1 }
 0x3cd   : > { %v2706_v40 = vand.u32 2147483647, %v2705_v56  ;;  %v2806_v17 = vsub.s32 4294967266, %v11126_v50  ;;  %v2892_v39 = vadd.s32 1, %v11118_v35  ;;  %v2708_v25 = vcvt.s32.f32 %v2701_v23 }
 0x3ce   : > { %v2953_v42 = vsub.s32 32, %v2952_v9  ;;  %v2889_v28 = vmul.u32 %v11083_v8, %v2873_v13  ;;  %vm2891_vm4 = vc.u32 %v11123_v63, %v11117_v59  ;;  %v2946_v34 = vor.u32 8388608, %v11108_v49 }
 0x3cf   : > { %v2893_v56 = vsel %vm2891_vm4, %v2892_v39, %v11118_v35  ;;  %v3046_v20 = vshrl.u32 %v3045_v3, 23  ;;  %v2709_v38 = vmul.f32 %v2708_v25, %v2706_v40  ;;  %v2802_v0 = vsub.s32 32, %v11126_v50 }
 0x3d0   : > { %v2956_v47 = vshrl.u32 %v15679_v53, %v2953_v42  ;;  %v2959_v62 = vshrl.u32 %v15680_v41, %v2953_v42  ;;  %v2894_v23 = vadd.s32 %v2893_v56, %v2889_v28  ;;  %v2951_v1 = vshrl.u32 %v2950_v60, 5 }
 0x3d1   : > { %v2807_v8 = vadd.s32 127, %v2806_v17  ;;  %v2955_v4 = vshll.u32 %v15512_v31, %v2952_v9  ;;  %v2958_v55 = vshll.u32 %v15679_v53, %v2952_v9  ;;  %v2962_v49 = vshrl.u32 %v15681_v16, %v2953_v42 }
 0x3d2   : > { %v2895_v7 = vadd.s32 536870912, %v2894_v23  ;;  %v2961_v35 = vshll.u32 %v15680_v41, %v2952_v9  ;;  %v2964_v13 = vshll.u32 %v15681_v16, %v2952_v9  ;;  %v2965_v39 = vshrl.u32 %v15682_v37, %v2953_v42 }
 0x3d3   : > { %v2957_v3 = vor.u32 %v2956_v47, %v2955_v4  ;;  %v2960_v40 = vor.u32 %v2959_v62, %v2958_v55  ;;  %v2967_v25 = vshll.u32 %v15682_v37, %v2952_v9  ;;  %v2968_v60 = vshrl.u32 %v15683_v18, %v2953_v42 }
 0x3d4   : > { %vm2628_vm2 = vcmp.lt.s32.totalorder %v10823_v15, 0  ;;  %v2786_v17 = vadd.s32 %v11018_v5, %v11024_v14  ;;  %v11162_v28 = vshrl.u32 %v2895_v7, 30  ;;  %v2963_v56 = vor.u32 %v2962_v49, %v2961_v35 }
 0x3d5   : > { %v2966_v51 = vor.u32 %v2965_v39, %v2964_v13  ;;  %v2710_v12 = vxor.u32 2147483648, %v2709_v38  ;;  %v2969_v54 = vor.u32 %v2968_v60, %v2967_v25  ;;  %v2986_v22 = vshll.u32 %v2946_v34, 8 }
 0x3d6   : > { %v8118_v29 = vadd.s32 4294967169, %v3046_v20  ;;  %v2808_v47 = vshll.u32 %v2807_v8, 23  ;;  %v2897_v9 = vshll.u32 %v11162_v28, 30  ;;  %vm2970_vm5 = vcmp.lt.s32.totalorder %v2951_v1, 1 }
 0x3d7   : > { %vm2973_vm7 = vcmp.lt.s32.totalorder %v2951_v1, 4  ;;  %v15693_v62 = vand.u32 2147483647, %v10823_v15  ;;  %v2803_v5 = vshll.u32 %v11090_v32, %v11126_v50  ;;  %v2804_v14 = vshrl.u32 %v2786_v17, %v2802_v0 }
 0x3d8   : > { %v2978_v34 = vsel %vm2970_vm5, %v2957_v3, %v2960_v40  ;;  %v2979_v20 = vsel %vm2973_vm7, %v2966_v51, 920167782  ;;  %v11176_v55 = vsub.s32 %v2894_v23, %v2897_v9  ;;  %v2954_v8 = vshrl.u32 %v15512_v31, %v2953_v42 }
 0x3d9   : > { %vm11169_vm15 = vcmp.le.f32.partialorder %v15693_v62, 0.7853982  ;;  %vm2972_vm1 = vcmp.lt.s32.totalorder %v2951_v1, 3  ;;  %v2975_v49 = vsel %vm2973_vm7, %v2963_v56, 2102212464  ;;  %vm2971_vm11 = vcmp.lt.s32.totalorder %v2951_v1, 2 }
 0x3da   : > { %v2980_v7 = vsel %vm2972_vm1, %v2963_v56, %v2979_v20  ;;  %v2982_v35 = vsel %vm2970_vm5, %v2960_v40, %v2963_v56  ;;  %v2983_v13 = vsel %vm2973_vm7, %v2969_v54, 1326507024  ;;  %v2809_v39 = vor.u32 4788187, %v2808_v47 }
 0x3db   : > { %v2900_v25 = vsub.s32 0, %v11176_v55  ;;  %v2974_v32 = vsel %vm2970_vm5, %v2954_v8, %v2957_v3  ;;  %v2981_v50 = vsel %vm2971_vm11, %v2978_v34, %v2980_v7  ;;  %v2976_v0 = vsel %vm2972_vm1, %v2960_v40, %v2975_v49 }
 0x3dc   : > { %v2984_v60 = vsel %vm2972_vm1, %v2966_v51, %v2983_v13  ;;  %v11183_v23 = vmul.u32.u64.low %v2986_v22, %v2981_v50  ;;  %v11184_v17 = vmul.u32.u64.high %v2986_v22, %v2981_v50, %v11183_v23  ;;  %v2805_v42 = vor.u32 %v2804_v14, %v2803_v5 }
 0x3dd   : > { %v8111_v9 = vmin.u32 %v2900_v25, %v11176_v55  ;;  %v2985_v62 = vsel %vm2971_vm11, %v2982_v35, %v2984_v60  ;;  %v3052_v56 = vadd.s32 1, %v8118_v29  ;;  %v2711_v54 = vsel %vm2628_vm2, %v2710_v12, %v2709_v38 }
 0x3de   : > { %v11191_v47 = vmul.u32.u64.low %v2986_v22, %v2985_v62  ;;  %v11192_v20 = vmul.u32.u64.high %v2986_v22, %v2985_v62, %v11191_v47  ;;  %v15696_v3 = vand.u32 2147483647, %v11071_v30  ;;  %v2810_v51 = vand.u32 2147483647, %v2809_v39  ;;  %v11215_v39 = vpop.f32.mrb[13].mxu1 }
 0x3df   : > { %v2902_v34 = vclz %v8111_v9  ;;  %v2977_v8 = vsel %vm2971_vm11, %v2974_v32, %v2976_v0  ;;  %vm3053_vm14 = vcmp.gt.s32.totalorder %v3052_v56, 0  ;;  %8764 = vcosq.f32 %v11135_v48 }
 0x3e0   : > { %v3049_v40 = vand.u32 8388607, %v15696_v3  ;;  %v15697_v5 = vsub.s32 4, %v10994_v61  ;;  %v2996_v12 = vadd.s32 1, %v11184_v17  ;;  %v3054_v38 = vsel %vm3053_vm14, %v3052_v56, 0 }
 0x3e1   : > { %v11209_v14 = vsel %vm11169_vm15, %v10823_v15, %v2711_v54  ;;  %v2812_v1 = vcvt.s32.f32 %v2805_v42  ;;  %v8112_v49 = vadd.s32 4294967294, %v2902_v34  ;;  %v3056_v7 = vand.u32 31, %v3054_v38 }
 0x3e2   : > { %v11203_v29 = vsel %vm2628_vm2, %v15697_v5, %v10994_v61  ;;  %v2890_v35 = vadd.s32 %v11117_v59, %v11123_v63  ;;  %v2993_v13 = vmul.u32 %v2986_v22, %v2977_v8  ;;  %vm2995_vm6 = vc.u32 %v11192_v20, %v11183_v23 }
 0x3e3   : > { %v3050_v61 = vor.u32 8388608, %v3049_v40  ;;  %v11217_v25 = vmul.f32 %v2812_v1, %v2810_v51  ;;  %vm8113_vm3 = vcmp.lt.s32.totalorder %v8112_v49, 0  ;;  %v2997_v32 = vsel %vm2995_vm6, %v2996_v12, %v11184_v17 }
 0x3e4   : > { %v3057_v50 = vsub.s32 32, %v3056_v7  ;;  %v2905_v0 = vsel %vm8113_vm3, 0, %v8112_v49  ;;  %v2998_v60 = vadd.s32 %v2997_v32, %v2993_v13  ;;  %v11220_v42 = vshrl.u32 %v3054_v38, 5 }
 0x3e5   : > { %v11224_v59 = vadd.f32 %v10838_v27, %v11062_v26  ;;  %v2910_v22 = vsub.s32 4294967266, %v2905_v0  ;;  %v3059_v63 = vshll.u32 %v15512_v31, %v3056_v7  ;;  %v3062_v9 = vshll.u32 %v15679_v53, %v3056_v7 }
 0x3e6   : > { %v3065_v62 = vshll.u32 %v15680_v41, %v3056_v7  ;;  %v2999_v56 = vadd.s32 536870912, %v2998_v60  ;;  %v3060_v54 = vshrl.u32 %v15679_v53, %v3057_v50  ;;  %v3063_v17 = vshrl.u32 %v15680_v41, %v3057_v50 }
 0x3e7   : > { %v3066_v47 = vshrl.u32 %v15681_v16, %v3057_v50  ;;  %v2906_v3 = vsub.s32 32, %v2905_v0  ;;  %v2911_v40 = vadd.s32 127, %v2910_v22  ;;  %v3068_v51 = vshll.u32 %v15681_v16, %v3056_v7 }
 0x3e8   : > { %v3069_v27 = vshrl.u32 %v15682_v37, %v3057_v50  ;;  %v2814_v26 = vxor.u32 2147483648, %v11217_v25  ;;  %v11235_v34 = vshrl.u32 %v2999_v56, 30  ;;  %v11237_v5 = vshll.u32 %v3050_v61, 8 }
 0x3e9   : > { %v3067_v8 = vor.u32 %v3066_v47, %v3065_v62  ;;  %v3061_v12 = vor.u32 %v3060_v54, %v3059_v63  ;;  %v3064_v38 = vor.u32 %v3063_v17, %v3062_v9  ;;  %v3149_v49 = vand.u32 2139095040, %v11224_v59  ;;  %v11240_v13 = vpop.eup %8764 }
 0x3ea   : > { %15698 = vst [vmem:[#allocation7_spill] sm:$0xff] %v11235_v34  ;;  %v3070_v1 = vor.u32 %v3069_v27, %v3068_v51  ;;  %v2912_v32 = vshll.u32 %v2911_v40, 23  ;;  %v3001_v22 = vshll.u32 %v11235_v34, 30  ;;  %v3071_v15 = vshll.u32 %v15682_v37, %v3056_v7 }
 0x3eb   : > { %v3072_v43 = vshrl.u32 %v15683_v18, %v3057_v50  ;;  %vm2732_vm10 = vcmp.lt.s32.totalorder %v10836_v6, 0  ;;  %v2907_v62 = vshll.u32 %v11176_v55, %v2905_v0  ;;  %v2908_v61 = vshrl.u32 %v2890_v35, %v2906_v3 }
 0x3ec   : > { %v3058_v63 = vshrl.u32 %v15512_v31, %v3057_v50  ;;  %vm3077_vm0 = vcmp.lt.s32.totalorder %v11220_v42, 4  ;;  %v11249_v9 = vsub.s32 %v2998_v60, %v3001_v22  ;;  %vm3074_vm4 = vcmp.lt.s32.totalorder %v11220_v42, 1 }
 0x3ed   : > { %v3073_v56 = vor.u32 %v3072_v43, %v3071_v15  ;;  %v3079_v54 = vsel %vm3077_vm0, %v3067_v8, 2102212464  ;;  %vm3075_vm2 = vcmp.lt.s32.totalorder %v11220_v42, 2  ;;  %vm3076_vm5 = vcmp.lt.s32.totalorder %v11220_v42, 3 }
 0x3ee   : > { %v3082_v7 = vsel %vm3074_vm4, %v3061_v12, %v3064_v38  ;;  %v3083_v55 = vsel %vm3077_vm0, %v3070_v1, 920167782  ;;  %v15699_v35 = vand.u32 2147483647, %v10836_v6  ;;  %v2913_v15 = vor.u32 4788187, %v2912_v32 }
 0x3ef   : > { %v3004_v43 = vsub.s32 0, %v11249_v9  ;;  %v3084_v0 = vsel %vm3076_vm5, %v3067_v8, %v3083_v55  ;;  %v3086_v60 = vsel %vm3074_vm4, %v3064_v38, %v3067_v8  ;;  %v3078_v17 = vsel %vm3074_vm4, %v3058_v63, %v3061_v12 }
 0x3f0   : > { %vm11260_vm7 = vcmp.le.f32.partialorder %v15699_v35, 0.7853982  ;;  %v3080_v47 = vsel %vm3076_vm5, %v3064_v38, %v3079_v54  ;;  %v3085_v3 = vsel %vm3075_vm2, %v3082_v7, %v3084_v0  ;;  %v3087_v40 = vsel %vm3077_vm0, %v3073_v56, 1326507024  ;;  %v2263_v7 = vpop.permute.xlu0 %2262 }
 0x3f1   : > { %v8115_v51 = vmin.u32 %v3004_v43, %v11249_v9  ;;  %v3088_v27 = vsel %vm3076_vm5, %v3070_v1, %v3087_v40  ;;  %v11271_v22 = vmul.u32.u64.low %v11237_v5, %v3085_v3  ;;  %v11272_v35 = vmul.u32.u64.high %v11237_v5, %v3085_v3, %v11271_v22  ;;  %v11314_v40 = vpop.f32.mrb[14].mxu1 }
 0x3f2   : > { %v15702_v8 = vsel %vm11046_vm8, 0, %v11054_v57  ;;  %8766 = vsinq.f32 %v11135_v48  ;;  %v3089_v38 = vsel %vm3075_vm2, %v3086_v60, %v3088_v27  ;;  %v3150_v32 = vshrl.u32 %v3149_v49, 23 }
 0x3f3   : > { %v11279_v12 = vadd.s32 3, %v15702_v8  ;;  %v2909_v63 = vor.u32 %v2908_v61, %v2907_v62  ;;  %v3006_v56 = vclz %v8115_v51  ;;  %v2715_v33 = vsel %vm11169_vm15, 0, %v11203_v29 }
 0x3f4   : > { %v11285_v1 = vmul.u32.u64.low %v11237_v5, %v3089_v38  ;;  %v11286_v54 = vmul.u32.u64.high %v11237_v5, %v3089_v38, %v11285_v1  ;;  %8768 = vcosq.f32 %v11209_v14  ;;  %v3081_v57 = vsel %vm3075_vm2, %v3078_v17, %v3080_v47 }
 0x3f5   : > { %15703 = vst [vmem:[#allocation15_spill] sm:$0xff] %v11279_v12  ;;  %v8122_v48 = vadd.s32 4294967169, %v3150_v32  ;;  %v2815_v49 = vsel %vm2732_vm10, %v2814_v26, %v11217_v25  ;;  %v2914_v62 = vand.u32 2147483647, %v2913_v15  ;;  %v8116_v61 = vadd.s32 4294967294, %v3006_v56 }
 0x3f6   : > { %v3100_v55 = vadd.s32 1, %v11272_v35  ;;  %v2920_v43 = vsub.s32 4, %v11162_v28  ;;  %v15361_v4 = vand.u32 2147483647, %v11224_v59  ;;  %v11301_v0 = vadd.f32 %v10860_v19, %v2263_v7 }
 0x3f7   : > { %v3156_v29 = vadd.s32 1, %v8122_v48  ;;  %v2916_v42 = vcvt.s32.f32 %v2909_v63  ;;  %vm8117_vm8 = vcmp.lt.s32.totalorder %v8116_v61, 0  ;;  %v3097_v60 = vmul.u32 %v11237_v5, %v3081_v57 }
 0x3f8   : > { %15704 = vst [vmem:[#allocation17_spill] sm:$0xff] %v11301_v0  ;;  %vm3099_vm15 = vc.u32 %v11286_v54, %v11271_v22  ;;  %v11309_v25 = vsel %vm11260_vm7, %v10836_v6, %v2815_v49  ;;  %v3009_v26 = vsel %vm8117_vm8, 0, %v8116_v61  ;;  %8770 = vsinq.f32 %v11209_v14 }
 0x3f9   : > { %v3101_v15 = vsel %vm3099_vm15, %v3100_v55, %v11272_v35  ;;  %vm3157_vm1 = vcmp.gt.s32.totalorder %v3156_v29, 0  ;;  %v11312_v17 = vmul.f32 %v2916_v42, %v2914_v62  ;;  %v3010_v19 = vsub.s32 32, %v3009_v26 }
 0x3fa   : > { %v3014_v47 = vsub.s32 4294967266, %v3009_v26  ;;  %v3102_v3 = vadd.s32 %v3101_v15, %v3097_v60  ;;  %vm2836_vm11 = vcmp.lt.s32.totalorder %v10985_v11, 0  ;;  %v3153_v5 = vand.u32 8388607, %v15361_v4 }
 0x3fb   : > { %v3158_v51 = vsel %vm3157_vm1, %v3156_v29, 0  ;;  %v2994_v27 = vadd.s32 %v11183_v23, %v11192_v20  ;;  %v3253_v38 = vand.u32 2139095040, %v11301_v0  ;;  %v11325_v63 = vadd.s32 3, %v2715_v33 }
 0x3fc   : > { %v3015_v35 = vadd.s32 127, %v3014_v47  ;;  %v3103_v8 = vadd.s32 536870912, %v3102_v3  ;;  %v11323_v32 = vpop.eup %8766  ;;  %8772 = vcosq.f32 %v11309_v25  ;;  %v11331_v14 = vsel %vm2836_vm11, %v2920_v43, %v11162_v28 }
 0x3fd   : > { %15705 = vst [vmem:[#allocation5_spill] sm:$0xff] %v11325_v63  ;;  %v3160_v56 = vand.u32 31, %v3158_v51  ;;  %v3012_v57 = vshrl.u32 %v2994_v27, %v3010_v19  ;;  %v11337_v20 = vadd.f32 %v10919_v44, %v2263_v7  ;;  %v3011_v33 = vshll.u32 %v11249_v9, %v3009_v26 }
 0x3fe   : > { %v11334_v23 = vshrl.u32 %v3103_v8, 30  ;;  %v11339_v48 = vpop.eup %8768  ;;  %v3154_v49 = vor.u32 8388608, %v3153_v5  ;;  %v3016_v55 = vshll.u32 %v3015_v35, 23  ;;  %v3254_v29 = vshrl.u32 %v3253_v38, 23 }
 0x3ff   : > { %15706 = vst [vmem:[#allocation14_spill] sm:$0xff] %v11339_v48  ;;  %v3161_v62 = vsub.s32 32, %v3160_v56  ;;  %v3163_v43 = vshll.u32 %v15512_v31, %v3160_v56  ;;  %v3166_v60 = vshll.u32 %v15679_v53, %v3160_v56  ;;  %v3013_v15 = vor.u32 %v3012_v57, %v3011_v33 }
 0x400   : > { %v3105_v28 = vshll.u32 %v11334_v23, 30  ;;  %v3159_v26 = vshrl.u32 %v3158_v51, 5  ;;  %v3169_v19 = vshll.u32 %v15680_v41, %v3160_v56  ;;  %v3098_v47 = vadd.s32 %v11271_v22, %v11286_v54 }
 0x401   : > { %v3164_v42 = vshrl.u32 %v15679_v53, %v3161_v62  ;;  %v3167_v44 = vshrl.u32 %v15680_v41, %v3161_v62  ;;  %v3170_v7 = vshrl.u32 %v15681_v16, %v3161_v62  ;;  %v11354_v35 = vshll.u32 %v3154_v49, 8 }
 0x402   : > { %v11349_v9 = vsub.s32 %v3102_v3, %v3105_v28  ;;  %v3172_v4 = vshll.u32 %v15681_v16, %v3160_v56  ;;  %v3173_v1 = vshrl.u32 %v15682_v37, %v3161_v62  ;;  %v11359_v57 = vpop.eup %8770  ;;  %v3017_v3 = vor.u32 4788187, %v3016_v55 }
 0x403   : > { %v3165_v5 = vor.u32 %v3164_v42, %v3163_v43  ;;  %v3168_v27 = vor.u32 %v3167_v44, %v3166_v60  ;;  %v3171_v38 = vor.u32 %v3170_v7, %v3169_v19  ;;  %15707 = vst [vmem:[#allocation18_spill] sm:$0xff] %v11359_v57  ;;  %v3175_v51 = vshll.u32 %v15682_v37, %v3160_v56 }
 0x404   : > { %v3108_v8 = vsub.s32 0, %v11349_v9  ;;  %v3176_v33 = vshrl.u32 %v15683_v18, %v3161_v62  ;;  %v8126_v28 = vadd.s32 4294967169, %v3254_v29  ;;  %v3020_v22 = vcvt.s32.f32 %v3013_v15 }
 0x405   : > { %v3174_v49 = vor.u32 %v3173_v1, %v3172_v4  ;;  %vm3178_vm14 = vcmp.lt.s32.totalorder %v3159_v26, 1  ;;  %v3162_v42 = vshrl.u32 %v15512_v31, %v3161_v62  ;;  %vm3181_vm6 = vcmp.lt.s32.totalorder %v3159_v26, 4 }
 0x406   : > { %v8119_v54 = vmin.u32 %v3108_v8, %v11349_v9  ;;  %v11364_v43 = vpop.eup %8772  ;;  %v3177_v60 = vor.u32 %v3176_v33, %v3175_v51  ;;  %v3186_v44 = vsel %vm3178_vm14, %v3165_v5, %v3168_v27  ;;  %vm3180_vm3 = vcmp.lt.s32.totalorder %v3159_v26, 3 }
 0x407   : > { %v3183_v55 = vsel %vm3181_vm6, %v3171_v38, 2102212464  ;;  %v3187_v19 = vsel %vm3181_vm6, %v3174_v49, 920167782  ;;  %v3018_v56 = vand.u32 2147483647, %v3017_v3  ;;  %v3190_v29 = vsel %vm3178_vm14, %v3168_v27, %v3171_v38 }
 0x408   : > { %v3110_v7 = vclz %v8119_v54  ;;  %vm3179_vm0 = vcmp.lt.s32.totalorder %v3159_v26, 2  ;;  %v3188_v61 = vsel %vm3180_vm3, %v3171_v38, %v3187_v19  ;;  %v3182_v34 = vsel %vm3178_vm14, %v3162_v42, %v3165_v5  ;;  %v11376_v38 = vpop.f32.mrb[15].mxu1 }
 0x409   : > { %v3189_v4 = vsel %vm3179_vm0, %v3186_v44, %v3188_v61  ;;  %v3191_v1 = vsel %vm3181_vm6, %v3177_v60, 1326507024  ;;  %v3184_v8 = vsel %vm3180_vm3, %v3168_v27, %v3183_v55  ;;  %v15708_v3 = vand.u32 2147483647, %v11301_v0 }
 0x40a   : > { %v8120_v15 = vadd.s32 4294967294, %v3110_v7  ;;  %v3192_v48 = vsel %vm3180_vm3, %v3174_v49, %v3191_v1  ;;  %v11369_v62 = vmul.u32.u64.low %v11354_v35, %v3189_v4  ;;  %v11370_v51 = vmul.u32.u64.high %v11354_v35, %v3189_v4, %v11369_v62 }
 0x40b   : > { %v3193_v33 = vsel %vm3179_vm0, %v3190_v29, %v3192_v48  ;;  %v3257_v54 = vand.u32 8388607, %v15708_v3  ;;  %v3260_v19 = vadd.s32 1, %v8126_v28  ;;  %v11378_v5 = vmul.f32 %v3020_v22, %v3018_v56 }
 0x40c   : > { %vm8121_vm4 = vcmp.lt.s32.totalorder %v8120_v15, 0  ;;  %v11381_v27 = vmul.u32.u64.low %v11354_v35, %v3193_v33  ;;  %v11382_v49 = vmul.u32.u64.high %v11354_v35, %v3193_v33, %v11381_v27  ;;  %v3185_v44 = vsel %vm3179_vm0, %v3182_v34, %v3184_v8 }
 0x40d   : > { %v3113_v61 = vsel %vm8121_vm4, 0, %v8120_v15  ;;  %vm3261_vm2 = vcmp.gt.s32.totalorder %v3260_v19, 0  ;;  %8774 = vsinq.f32 %v11309_v25  ;;  %v15709_v48 = vxor.u32 2147483648, %v11312_v17 }
 0x40e   : > { %v3114_v42 = vsub.s32 32, %v3113_v61  ;;  %v3118_v60 = vsub.s32 4294967266, %v3113_v61  ;;  %v3204_v22 = vadd.s32 1, %v11370_v51  ;;  %v3262_v7 = vsel %vm3261_vm2, %v3260_v19, 0 }
 0x40f   : > { %v11391_v28 = vsel %vm2836_vm11, %v15709_v48, %v11312_v17  ;;  %v3258_v29 = vor.u32 8388608, %v3257_v54  ;;  %v3264_v15 = vand.u32 31, %v3262_v7  ;;  %v3115_v34 = vshll.u32 %v11349_v9, %v3113_v61 }
 0x410   : > { %v3116_v55 = vshrl.u32 %v3098_v47, %v3114_v42  ;;  %v3119_v56 = vadd.s32 127, %v3118_v60  ;;  %v3201_v25 = vmul.u32 %v11354_v35, %v3185_v44  ;;  %vm3203_vm5 = vc.u32 %v11382_v49, %v11369_v62 }
 0x411   : > { %v3205_v17 = vsel %vm3203_vm5, %v3204_v22, %v11370_v51  ;;  %v3265_v1 = vsub.s32 32, %v3264_v15  ;;  %v3357_v8 = vand.u32 2139095040, %v11337_v20  ;;  %v3263_v3 = vshrl.u32 %v3262_v7, 5 }
 0x412   : > { %v3120_v4 = vshll.u32 %v3119_v56, 23  ;;  %v3117_v33 = vor.u32 %v3116_v55, %v3115_v34  ;;  %v3206_v47 = vadd.s32 %v3205_v17, %v3201_v25  ;;  %v3267_v54 = vshll.u32 %v15512_v31, %v3264_v15 }
 0x413   : > { %v3268_v27 = vshrl.u32 %v15679_v53, %v3265_v1  ;;  %v3270_v9 = vshll.u32 %v15679_v53, %v3264_v15  ;;  %v3273_v35 = vshll.u32 %v15680_v41, %v3264_v15  ;;  %v15710_v61 = vand.u32 2147483647, %v10985_v11 }
 0x414   : > { %v3121_v19 = vor.u32 4788187, %v3120_v4  ;;  %v3207_v51 = vadd.s32 536870912, %v3206_v47  ;;  %v3271_v60 = vshrl.u32 %v15680_v41, %v3265_v1  ;;  %v3274_v44 = vshrl.u32 %v15681_v16, %v3265_v1 }
 0x415   : > { %vm11407_vm8 = vcmp.le.f32.partialorder %v15710_v61, 0.7853982  ;;  %v3276_v48 = vshll.u32 %v15681_v16, %v3264_v15  ;;  %v3269_v7 = vor.u32 %v3268_v27, %v3267_v54  ;;  %v3277_v55 = vshrl.u32 %v15682_v37, %v3265_v1 }
 0x416   : > { %v3122_v22 = vand.u32 2147483647, %v3121_v19  ;;  %v3279_v56 = vshll.u32 %v15682_v37, %v3264_v15  ;;  %vm2940_vm15 = vcmp.lt.s32.totalorder %v10988_v36, 0  ;;  %v11417_v34 = vshrl.u32 %v3207_v51, 30 }
 0x417   : > { %v3272_v25 = vor.u32 %v3271_v60, %v3270_v9  ;;  %v3275_v4 = vor.u32 %v3274_v44, %v3273_v35  ;;  %v3280_v17 = vshrl.u32 %v15683_v18, %v3265_v1  ;;  %v3124_v61 = vcvt.s32.f32 %v3117_v33  ;;  %v11420_v58 = vpop.eup %8774 }
 0x418   : > { %15713 = vst [vmem:[#allocation21_spill] sm:$0xff] %v11417_v34  ;;  %v3278_v26 = vor.u32 %v3277_v55, %v3276_v48  ;;  %v3298_v57 = vshll.u32 %v3258_v29, 8  ;;  %v3358_v63 = vshrl.u32 %v3357_v8, 23  ;;  %v3209_v54 = vshll.u32 %v11417_v34, 30 }
 0x419   : > { %v3281_v19 = vor.u32 %v3280_v17, %v3279_v56  ;;  %vm3282_vm1 = vcmp.lt.s32.totalorder %v3263_v3, 1  ;;  %vm3285_vm11 = vcmp.lt.s32.totalorder %v3263_v3, 4  ;;  %v15714_v15 = vand.u32 2147483647, %v10988_v36 }
 0x41a   : > { %v15715_v27 = vmov 0  ;;  %v3125_v9 = vmul.f32 %v3124_v61, %v3122_v22  ;;  %v3266_v35 = vshrl.u32 %v15512_v31, %v3265_v1  ;;  %v3287_v33 = vsel %vm3285_vm11, %v3275_v4, 2102212464 }
 0x41b   : > { %vm11425_vm14 = vcmp.le.f32.partialorder %v15714_v15, 0.7853982  ;;  %v3290_v51 = vsel %vm3282_vm1, %v3269_v7, %v3272_v25  ;;  %vm3044_vm6 = vcmp.lt.s32.totalorder %v11071_v30, 0  ;;  %v11431_v29 = vsub.s32 %v3206_v47, %v3209_v54 }
 0x41c   : > { %v15716_v27 = vsel %vm11425_vm14, 4294967295, %v15715_v27  ;;  %vm3284_vm3 = vcmp.lt.s32.totalorder %v3263_v3, 3  ;;  %v3291_v8 = vsel %vm3285_vm11, %v3278_v26, 920167782  ;;  %v3294_v60 = vsel %vm3282_vm1, %v3272_v25, %v3275_v4 }
 0x41d   : > { %15717 = vst [vmem:[#allocation30_spill] sm:$0xff] %v15716_v27  ;;  %vm3283_vm0 = vcmp.lt.s32.totalorder %v3263_v3, 2  ;;  %v3286_v44 = vsel %vm3282_vm1, %v3266_v35, %v3269_v7  ;;  %v3292_v48 = vsel %vm3284_vm3, %v3275_v4, %v3291_v8  ;;  %v3295_v55 = vsel %vm3285_vm11, %v3281_v19, 1326507024 }
 0x41e   : > { %v3212_v56 = vsub.s32 0, %v11431_v29  ;;  %v3288_v17 = vsel %vm3284_vm3, %v3272_v25, %v3287_v33  ;;  %v3293_v22 = vsel %vm3283_vm0, %v3290_v51, %v3292_v48  ;;  %v3296_v61 = vsel %vm3284_vm3, %v3278_v26, %v3295_v55 }
 0x41f   : > { %v2922_v1 = vsel %vm11407_vm8, %v10985_v11, %v11391_v28  ;;  %v3297_v47 = vsel %vm3283_vm0, %v3294_v60, %v3296_v61  ;;  %v11440_v54 = vmul.u32.u64.low %v3298_v57, %v3293_v22  ;;  %v11441_v15 = vmul.u32.u64.high %v3298_v57, %v3293_v22, %v11440_v54  ;;  %v11455_v28 = vpop.permute.xlu1 %2267 }
 0x420   : > { %v15718_v7 = vand.u32 2147483647, %v11071_v30  ;;  %v8123_v25 = vmin.u32 %v3212_v56, %v11431_v29  ;;  %v11451_v26 = vmul.u32.u64.low %v3298_v57, %v3297_v47  ;;  %v11452_v19 = vmul.u32.u64.high %v3298_v57, %v3297_v47, %v11451_v26 }
 0x421   : > { %v15367_v35 = vand.u32 2147483647, %v11337_v20  ;;  %v15721_v33 = vxor.u32 2147483648, %v11378_v5  ;;  %v3126_v8 = vxor.u32 2147483648, %v3125_v9  ;;  %v3289_v60 = vsel %vm3283_vm0, %v3286_v44, %v3288_v17 }
 0x422   : > { %vm11446_vm4 = vcmp.le.f32.partialorder %v15718_v7, 0.7853982  ;;  %v8130_v48 = vadd.s32 4294967169, %v3358_v63  ;;  %v2923_v55 = vsel %vm11407_vm8, 0, %v11331_v14  ;;  %8776 = vcosq.f32 %v2922_v1 }
 0x423   : > { %v3023_v51 = vsel %vm2940_vm15, %v15721_v33, %v11378_v5  ;;  %v3214_v56 = vclz %v8123_v25  ;;  %v11468_v22 = vadd.f32 %v10979_v52, %v11455_v28  ;;  %8778 = vsinq.f32 %v2922_v1 }
 0x424   : > { %v3128_v61 = vsub.s32 4, %v11334_v23  ;;  %v3308_v47 = vadd.s32 1, %v11441_v15  ;;  %v3364_v5 = vadd.s32 1, %v8130_v48  ;;  %v3026_v63 = vsel %vm11425_vm14, %v10988_v36, %v3023_v51 }
 0x425   : > { %15722 = vst [vmem:[#allocation16_spill] sm:$0xff] %v11468_v22  ;;  %v8124_v3 = vadd.s32 4294967294, %v3214_v56  ;;  %v3305_v44 = vmul.u32 %v3298_v57, %v3289_v60  ;;  %vm3307_vm2 = vc.u32 %v11452_v19, %v11440_v54  ;;  %v3127_v14 = vsel %vm3044_vm6, %v3126_v8, %v3125_v9 }
 0x426   : > { %v3309_v52 = vsel %vm3307_vm2, %v3308_v47, %v11441_v15  ;;  %v3361_v42 = vand.u32 8388607, %v15367_v35  ;;  %vm3365_vm5 = vcmp.gt.s32.totalorder %v3364_v5, 0  ;;  %v3461_v7 = vand.u32 2139095040, %v11468_v22 }
 0x427   : > { %vm8125_vm8 = vcmp.lt.s32.totalorder %v8124_v3, 0  ;;  %v3310_v17 = vadd.s32 %v3309_v52, %v3305_v44  ;;  %v3366_v1 = vsel %vm3365_vm5, %v3364_v5, 0  ;;  %v11483_v25 = vadd.s32 3, %v2923_v55 }
 0x428   : > { %8780 = vcosq.f32 %v3026_v63  ;;  %v3217_v57 = vsel %vm8125_vm8, 0, %v8124_v3  ;;  %v3368_v26 = vand.u32 31, %v3366_v1  ;;  %v11488_v9 = vsel %vm3044_vm6, %v3128_v61, %v11334_v23 }
 0x429   : > { %15723 = vst [vmem:[#allocation4_spill] sm:$0xff] %v11483_v25  ;;  %8782 = vsinq.f32 %v3026_v63  ;;  %v3222_v15 = vsub.s32 4294967266, %v3217_v57  ;;  %v3311_v33 = vadd.s32 536870912, %v3310_v17  ;;  %v11493_v51 = vsel %vm11446_vm4, %v11071_v30, %v3127_v14 }
 0x42a   : > { %v3202_v8 = vadd.s32 %v11369_v62, %v11382_v49  ;;  %v3218_v60 = vsub.s32 32, %v3217_v57  ;;  %v3369_v48 = vsub.s32 32, %v3368_v26  ;;  %v3362_v47 = vor.u32 8388608, %v3361_v42 }
 0x42b   : > { %v3223_v55 = vadd.s32 127, %v3222_v15  ;;  %v11497_v56 = vshrl.u32 %v3311_v33, 30  ;;  %v3462_v5 = vshrl.u32 %v3461_v7, 23  ;;  %v3367_v63 = vshrl.u32 %v3366_v1, 5 }
 0x42c   : > { %v3372_v23 = vshrl.u32 %v15679_v53, %v3369_v48  ;;  %v3375_v61 = vshrl.u32 %v15680_v41, %v3369_v48  ;;  %v3378_v3 = vshrl.u32 %v15681_v16, %v3369_v48  ;;  %v11502_v44 = vpop.eup %8776  ;;  %v3219_v14 = vshll.u32 %v11431_v29, %v3217_v57 }
 0x42d   : > { %15724 = vst [vmem:[#allocation22_spill] sm:$0xff] %v11502_v44  ;;  %v3313_v62 = vshll.u32 %v11497_v56, 30  ;;  %v3371_v49 = vshll.u32 %v15512_v31, %v3368_v26  ;;  %v3377_v52 = vshll.u32 %v15680_v41, %v3368_v26  ;;  %v11508_v15 = vpop.eup %8778  ;;  %v3220_v42 = vshrl.u32 %v3202_v8, %v3218_v60 }
 0x42e   : > { %15725 = vst [vmem:[#allocation20_spill] sm:$0xff] %v11508_v15  ;;  %v3374_v1 = vshll.u32 %v15679_v53, %v3368_v26  ;;  %v3380_v7 = vshll.u32 %v15681_v16, %v3368_v26  ;;  %v3381_v33 = vshrl.u32 %v15682_v37, %v3369_v48  ;;  %v3224_v35 = vshll.u32 %v3223_v55, 23 }
 0x42f   : > { %v11513_v30 = vsub.s32 %v3310_v17, %v3313_v62  ;;  %v3373_v11 = vor.u32 %v3372_v23, %v3371_v49  ;;  %v3379_v29 = vor.u32 %v3378_v3, %v3377_v52  ;;  %v3383_v25 = vshll.u32 %v15682_v37, %v3368_v26 }
 0x430   : > { %v3376_v57 = vor.u32 %v3375_v61, %v3374_v1  ;;  %v3382_v44 = vor.u32 %v3381_v33, %v3380_v7  ;;  %v3384_v27 = vshrl.u32 %v15683_v18, %v3369_v48  ;;  %v3402_v8 = vshll.u32 %v3362_v47, 8 }
 0x431   : > { %v3316_v15 = vsub.s32 0, %v11513_v30  ;;  %v15378_v60 = vand.u32 2147483647, %v11468_v22  ;;  %v8134_v34 = vadd.s32 4294967169, %v3462_v5  ;;  %v3221_v12 = vor.u32 %v3220_v42, %v3219_v14 }
 0x432   : > { %v11519_v36 = vpop.eup %8780  ;;  %v3370_v17 = vshrl.u32 %v15512_v31, %v3369_v48  ;;  %v3385_v55 = vor.u32 %v3384_v27, %v3383_v25  ;;  %vm3389_vm1 = vcmp.lt.s32.totalorder %v3367_v63, 4  ;;  %v3225_v61 = vor.u32 4788187, %v3224_v35 }
 0x433   : > { %v11522_v23 = vpop.eup %8782  ;;  %v8127_v26 = vmin.u32 %v3316_v15, %v11513_v30  ;;  %vm3386_vm11 = vcmp.lt.s32.totalorder %v3367_v63, 1  ;;  %v3391_v3 = vsel %vm3389_vm1, %v3379_v29, 2102212464  ;;  %vm3387_vm6 = vcmp.lt.s32.totalorder %v3367_v63, 2 }
 0x434   : > { %vm3388_vm3 = vcmp.lt.s32.totalorder %v3367_v63, 3  ;;  %v3394_v47 = vsel %vm3386_vm11, %v3373_v11, %v3376_v57  ;;  %v3395_v5 = vsel %vm3389_vm1, %v3382_v44, 920167782  ;;  %v3390_v49 = vsel %vm3386_vm11, %v3370_v17, %v3373_v11 }
 0x435   : > { %v3318_v62 = vclz %v8127_v26  ;;  %v3396_v14 = vsel %vm3388_vm3, %v3379_v29, %v3395_v5  ;;  %v3398_v52 = vsel %vm3386_vm11, %v3376_v57, %v3379_v29  ;;  %v3392_v48 = vsel %vm3388_vm3, %v3376_v57, %v3391_v3 }
 0x436   : > { %v3397_v27 = vsel %vm3387_vm6, %v3394_v47, %v3396_v14  ;;  %v3399_v25 = vsel %vm3389_vm1, %v3385_v55, 1326507024  ;;  %v3468_v35 = vadd.s32 1, %v8134_v34  ;;  %v11531_v1 = vand.u32 8388607, %v15378_v60 }
 0x437   : > { %v8128_v42 = vadd.s32 4294967294, %v3318_v62  ;;  %v3400_v15 = vsel %vm3388_vm3, %v3382_v44, %v3399_v25  ;;  %v11535_v7 = vadd.f32 %v11028_v46, %v11455_v28  ;;  %v3226_v33 = vand.u32 2147483647, %v3225_v61 }
 0x438   : > { %v3401_v11 = vsel %vm3387_vm6, %v3398_v52, %v3400_v15  ;;  %v11538_v29 = vmul.u32.u64.low %v3402_v8, %v3397_v27  ;;  %v11539_v57 = vmul.u32.u64.high %v3402_v8, %v3397_v27, %v11538_v29  ;;  %v3393_v34 = vsel %vm3387_vm6, %v3390_v49, %v3392_v48 }
 0x439   : > { %vm8129_vm0 = vcmp.lt.s32.totalorder %v8128_v42, 0  ;;  %v11543_v17 = vmul.u32.u64.low %v3402_v8, %v3401_v11  ;;  %v11544_v44 = vmul.u32.u64.high %v3402_v8, %v3401_v11, %v11543_v17  ;;  %v3228_v55 = vcvt.s32.f32 %v3221_v12 }
 0x43a   : > { %v3306_v26 = vadd.s32 %v11440_v54, %v11452_v19  ;;  %v3321_v3 = vsel %vm8129_vm0, 0, %v8128_v42  ;;  %vm3469_vm2 = vcmp.gt.s32.totalorder %v3468_v35, 0  ;;  %v3466_v61 = vor.u32 8388608, %v11531_v1 }
 0x43b   : > { %v3322_v46 = vsub.s32 32, %v3321_v3  ;;  %v3326_v28 = vsub.s32 4294967266, %v3321_v3  ;;  %v3470_v47 = vsel %vm3469_vm2, %v3468_v35, 0  ;;  %v11549_v5 = vmul.f32 %v3228_v55, %v3226_v33 }
 0x43c   : > { %v3409_v62 = vmul.u32 %v3402_v8, %v3393_v34  ;;  %v3412_v63 = vadd.s32 1, %v11539_v57  ;;  %v3472_v49 = vand.u32 31, %v3470_v47  ;;  %v3323_v14 = vshll.u32 %v11513_v30, %v3321_v3 }
 0x43d   : > { %v3324_v52 = vshrl.u32 %v3306_v26, %v3322_v46  ;;  %v3327_v12 = vadd.s32 127, %v3326_v28  ;;  %vm3411_vm5 = vc.u32 %v11544_v44, %v11538_v29  ;;  %v3471_v19 = vshrl.u32 %v3470_v47, 5 }
 0x43e   : > { %v3413_v54 = vsel %vm3411_vm5, %v3412_v63, %v11539_v57  ;;  %v3473_v48 = vsub.s32 32, %v3472_v49  ;;  %v3475_v27 = vshll.u32 %v15512_v31, %v3472_v49  ;;  %v3478_v8 = vshll.u32 %v15679_v53, %v3472_v49 }
 0x43f   : > { %v3325_v25 = vor.u32 %v3324_v52, %v3323_v14  ;;  %v3328_v35 = vshll.u32 %v3327_v12, 23  ;;  %v3414_v42 = vadd.s32 %v3413_v54, %v3409_v62  ;;  %v3481_v1 = vshll.u32 %v15680_v41, %v3472_v49 }
 0x440   : > { %v3476_v15 = vshrl.u32 %v15679_v53, %v3473_v48  ;;  %v3479_v30 = vshrl.u32 %v15680_v41, %v3473_v48  ;;  %v3482_v33 = vshrl.u32 %v15681_v16, %v3473_v48  ;;  %v3484_v17 = vshll.u32 %v15681_v16, %v3472_v49 }
 0x441   : > { %v3329_v11 = vor.u32 4788187, %v3328_v35  ;;  %v3332_v34 = vcvt.s32.f32 %v3325_v25  ;;  %v3415_v57 = vadd.s32 536870912, %v3414_v42  ;;  %vm15396_vm8 = vcmp.lt.s32.totalorder %v11224_v59, 0 }
 0x442   : > { %v3477_v55 = vor.u32 %v3476_v15, %v3475_v27  ;;  %v3480_v26 = vor.u32 %v3479_v30, %v3478_v8  ;;  %v3483_v3 = vor.u32 %v3482_v33, %v3481_v1  ;;  %v3485_v46 = vshrl.u32 %v15682_v37, %v3473_v48 }
 0x443   : > { %v3330_v28 = vand.u32 2147483647, %v3329_v11  ;;  %v11565_v47 = vshrl.u32 %v3415_v57, 30  ;;  %v3487_v62 = vshll.u32 %v15682_v37, %v3472_v49  ;;  %v3488_v63 = vshrl.u32 %v15683_v18, %v3473_v48 }
 0x444   : > { %v3230_v14 = vxor.u32 2147483648, %v11549_v5  ;;  %vm3252_vm1 = vcmp.lt.s32.totalorder %v11301_v0, 0  ;;  %v3474_v52 = vshrl.u32 %v15512_v31, %v3473_v48  ;;  %v3486_v12 = vor.u32 %v3485_v46, %v3484_v17 }
 0x445   : > { %15726 = vst [vmem:[#allocation13_spill] sm:$0xff] %v11565_v47  ;;  %vm3490_vm11 = vcmp.lt.s32.totalorder %v3471_v19, 1  ;;  %v15727_v54 = vand.u32 2147483647, %v11224_v59  ;;  %v15728_v27 = vmov 0  ;;  %v3333_v25 = vmul.f32 %v3332_v34, %v3330_v28 }
 0x446   : > { %v3417_v35 = vshll.u32 %v11565_v47, 30  ;;  %v3489_v49 = vor.u32 %v3488_v63, %v3487_v62  ;;  %vm3493_vm3 = vcmp.lt.s32.totalorder %v3471_v19, 4  ;;  %vm3492_vm0 = vcmp.lt.s32.totalorder %v3471_v19, 3 }
 0x447   : > { %vm11574_vm6 = vcmp.le.f32.partialorder %v15727_v54, 0.7853982  ;;  %v3495_v8 = vsel %vm3493_vm3, %v3483_v3, 2102212464  ;;  %v3498_v15 = vsel %vm3490_vm11, %v3477_v55, %v3480_v26  ;;  %v3499_v30 = vsel %vm3493_vm3, %v3486_v12, 920167782 }
 0x448   : > { %v15729_v27 = vsel %vm11574_vm6, 4294967295, %v15728_v27  ;;  %v11580_v1 = vsub.s32 %v3414_v42, %v3417_v35  ;;  %vm3491_vm2 = vcmp.lt.s32.totalorder %v3471_v19, 2  ;;  %v3500_v48 = vsel %vm3492_vm0, %v3483_v3, %v3499_v30 }
 0x449   : > { %15730 = vst [vmem:[#allocation27_spill] sm:$0xff] %v15729_v27  ;;  %v3506_v33 = vshll.u32 %v3466_v61, 8  ;;  %v3494_v11 = vsel %vm3490_vm11, %v3474_v52, %v3477_v55  ;;  %v3501_v57 = vsel %vm3491_vm2, %v3498_v15, %v3500_v48  ;;  %v3502_v34 = vsel %vm3490_vm11, %v3480_v26, %v3483_v3 }
 0x44a   : > { %v3503_v17 = vsel %vm3493_vm3, %v3489_v49, 1326507024  ;;  %v3334_v46 = vxor.u32 2147483648, %v3333_v25  ;;  %v3420_v28 = vsub.s32 0, %v11580_v1  ;;  %v3496_v62 = vsel %vm3492_vm0, %v3480_v26, %v3495_v8 }
 0x44b   : > { %v3504_v63 = vsel %vm3492_vm0, %v3486_v12, %v3503_v17  ;;  %v3336_v54 = vsub.s32 4, %v11497_v56  ;;  %v11588_v35 = vmul.u32.u64.low %v3506_v33, %v3501_v57  ;;  %v11589_v60 = vmul.u32.u64.high %v3506_v33, %v3501_v57, %v11588_v35  ;;  %v2273_v57 = vpop.permute.xlu0 %2272 }
 0x44c   : > { %v3505_v42 = vsel %vm3491_vm2, %v3502_v34, %v3504_v63  ;;  %v3231_v61 = vsel %vm15396_vm8, %v3230_v14, %v11549_v5  ;;  %v8131_v55 = vmin.u32 %v3420_v28, %v11580_v1  ;;  %8784 = vcosq.f32 %v11493_v51 }
 0x44d   : > { %v11596_v3 = vmul.u32.u64.low %v3506_v33, %v3505_v42  ;;  %v11597_v52 = vmul.u32.u64.high %v3506_v33, %v3505_v42, %v11596_v3  ;;  %v15731_v26 = vand.u32 2147483647, %v11301_v0  ;;  %v3497_v49 = vsel %vm3491_vm2, %v3494_v11, %v3496_v62 }
 0x44e   : > { %v3565_v8 = vand.u32 2139095040, %v11535_v7  ;;  %v3131_v5 = vsel %vm11446_vm4, 0, %v11488_v9  ;;  %8786 = vsinq.f32 %v11493_v51  ;;  %v3335_v14 = vsel %vm3252_vm1, %v3334_v46, %v3333_v25 }
 0x44f   : > { %vm11602_vm5 = vcmp.le.f32.partialorder %v15731_v26, 0.7853982  ;;  %v3422_v15 = vclz %v8131_v55  ;;  %v3234_v30 = vsel %vm11574_vm6, %v11224_v59, %v3231_v61  ;;  %v3337_v19 = vsel %vm3252_vm1, %v3336_v54, %v11497_v56 }
 0x450   : > { %v3516_v48 = vadd.s32 1, %v11589_v60  ;;  %v3566_v11 = vshrl.u32 %v3565_v8, 23  ;;  %v3513_v9 = vmul.u32 %v3506_v33, %v3497_v49  ;;  %vm3515_vm4 = vc.u32 %v11597_v52, %v11588_v35 }
 0x451   : > { %v8132_v4 = vadd.s32 4294967294, %v3422_v15  ;;  %v15380_v51 = vand.u32 2147483647, %v11535_v7  ;;  %v3338_v25 = vsel %vm11602_vm5, %v11301_v0, %v3335_v14  ;;  %v11629_v56 = vadd.f32 %v11145_v45, %v2273_v57 }
 0x452   : > { %v3517_v34 = vsel %vm3515_vm4, %v3516_v48, %v11589_v60  ;;  %v8138_v17 = vadd.s32 4294967169, %v3566_v11  ;;  %8788 = vcosq.f32 %v3234_v30  ;;  %v3339_v46 = vsel %vm11602_vm5, 0, %v3337_v19 }
 0x453   : > { %vm8133_vm1 = vcmp.lt.s32.totalorder %v8132_v4, 0  ;;  %v3518_v33 = vadd.s32 %v3517_v34, %v3513_v9  ;;  %8790 = vsinq.f32 %v3234_v30  ;;  %v3410_v28 = vadd.s32 %v11538_v29, %v11544_v44  ;;  %v11649_v30 = vpop.permute.xlu1 %2277 }
 0x454   : > { %v3425_v62 = vsel %vm8133_vm1, 0, %v8132_v4  ;;  %v3572_v63 = vadd.s32 1, %v8138_v17  ;;  %8792 = vcosq.f32 %v3338_v25  ;;  %v3569_v45 = vand.u32 8388607, %v15380_v51 }
 0x455   : > { %v3426_v54 = vsub.s32 32, %v3425_v62  ;;  %v3430_v42 = vsub.s32 4294967266, %v3425_v62  ;;  %v3519_v60 = vadd.s32 536870912, %v3518_v33  ;;  %v15379_v61 = vand.u32 2147483647, %v11629_v56 }
 0x456   : > { %vm3573_vm11 = vcmp.gt.s32.totalorder %v3572_v63, 0  ;;  %v3669_v55 = vand.u32 2139095040, %v11629_v56  ;;  %v11641_v29 = vpop.eup %8784  ;;  %v11643_v44 = vadd.s32 3, %v3131_v5  ;;  %8794 = vsinq.f32 %v3338_v25 }
 0x457   : > { %v3428_v3 = vshrl.u32 %v3410_v28, %v3426_v54  ;;  %v3431_v26 = vadd.s32 127, %v3430_v42  ;;  %v11639_v12 = vshrl.u32 %v3519_v60, 30  ;;  %v3574_v49 = vsel %vm3573_vm11, %v3572_v63, 0  ;;  %15734 = vst [vmem:[#allocation28_spill] sm:$0xff] %v11641_v29 }
 0x458   : > { %15735 = vst [vmem:[#allocation26_spill] sm:$0xff] %v11643_v44  ;;  %v11645_v8 = vadd.s32 3, %v3339_v46  ;;  %v3576_v14 = vand.u32 31, %v3574_v49  ;;  %v11647_v15 = vpop.eup %8786  ;;  %v3427_v19 = vshll.u32 %v11580_v1, %v3425_v62  ;;  %v11654_v4 = vadd.f32 %v11215_v39, %v2273_v57 }
 0x459   : > { %15737 = vst [vmem:[#allocation33_spill] sm:$0xff] %v11647_v15  ;;  %v3432_v48 = vshll.u32 %v3431_v26, 23  ;;  %v3521_v11 = vshll.u32 %v11639_v12, 30  ;;  %v3570_v9 = vor.u32 8388608, %v3569_v45  ;;  %v11658_v5 = vand.u32 8388607, %v15379_v61 }
 0x45a   : > { %15736 = vst [vmem:[#allocation25_spill] sm:$0xff] %v11645_v8  ;;  %v3577_v34 = vsub.s32 32, %v3576_v14  ;;  %v11662_v25 = vadd.f32 %v11314_v40, %v11649_v30  ;;  %v3429_v17 = vor.u32 %v3428_v3, %v3427_v19  ;;  %v11666_v1 = vshrl.u32 %v3574_v49, 5 }
 0x45b   : > { %v11664_v46 = vsub.s32 %v3518_v33, %v3521_v11  ;;  %v3670_v28 = vshrl.u32 %v3669_v55, 23  ;;  %vm3460_vm3 = vcmp.lt.s32.totalorder %v11468_v22, 0  ;;  %v3579_v39 = vshll.u32 %v15512_v31, %v3576_v14 }
 0x45c   : > { %v3580_v57 = vshrl.u32 %v15679_v53, %v3577_v34  ;;  %v3582_v62 = vshll.u32 %v15679_v53, %v3576_v14  ;;  %v3583_v63 = vshrl.u32 %v15680_v41, %v3577_v34  ;;  %v11673_v54 = vpop.eup %8788  ;;  %v3433_v40 = vor.u32 4788187, %v3432_v48 }
 0x45d   : > { %15738 = vst [vmem:[#allocation40_spill] sm:$0xff] %v11673_v54  ;;  %v3524_v42 = vsub.s32 0, %v11664_v46  ;;  %v3585_v33 = vshll.u32 %v15680_v41, %v3576_v14  ;;  %v3586_v60 = vshrl.u32 %v15681_v16, %v3577_v34  ;;  %v11678_v45 = vpop.eup %8790  ;;  %v3588_v26 = vshll.u32 %v15681_v16, %v3576_v14 }
 0x45e   : > { %15739 = vst [vmem:[#allocation38_spill] sm:$0xff] %v11678_v45  ;;  %v3581_v55 = vor.u32 %v3580_v57, %v3579_v39  ;;  %v3584_v3 = vor.u32 %v3583_v63, %v3582_v62  ;;  %v3589_v49 = vshrl.u32 %v15682_v37, %v3577_v34  ;;  %v11682_v19 = vpop.eup %8792  ;;  %v11685_v61 = vshll.u32 %v3570_v9, 8 }
 0x45f   : > { %15740 = vst [vmem:[#allocation31_spill] sm:$0xff] %v11682_v19  ;;  %v8135_v11 = vmin.u32 %v3524_v42, %v11664_v46  ;;  %v8142_v48 = vadd.s32 4294967169, %v3670_v28  ;;  %v3674_v51 = vor.u32 8388608, %v11658_v5  ;;  %v3587_v0 = vor.u32 %v3586_v60, %v3585_v33 }
 0x460   : > { %v3590_v8 = vor.u32 %v3589_v49, %v3588_v26  ;;  %v3591_v47 = vshll.u32 %v15682_v37, %v3576_v14  ;;  %v3592_v39 = vshrl.u32 %v15683_v18, %v3577_v34  ;;  %v3436_v57 = vcvt.s32.f32 %v3429_v17  ;;  %v11698_v28 = vpop.eup %8794 }
 0x461   : > { %v15741_v62 = vand.u32 2147483647, %v11468_v22  ;;  %v3526_v19 = vclz %v8135_v11  ;;  %v3544_v9 = vsub.s32 4, %v11639_v12  ;;  %vm3594_vm2 = vcmp.lt.s32.totalorder %v11666_v1, 1  ;;  %15744 = vst [vmem:[#allocation24_spill] sm:$0xff] %v11698_v28 }
 0x462   : > { %v3434_v5 = vand.u32 2147483647, %v3433_v40  ;;  %v3593_v42 = vor.u32 %v3592_v39, %v3591_v47  ;;  %vm3597_vm5 = vcmp.lt.s32.totalorder %v11666_v1, 4  ;;  %v3602_v14 = vsel %vm3594_vm2, %v3581_v55, %v3584_v3 }
 0x463   : > { %vm11692_vm0 = vcmp.le.f32.partialorder %v15741_v62, 0.7853982  ;;  %v8136_v17 = vadd.s32 4294967294, %v3526_v19  ;;  %v3578_v33 = vshrl.u32 %v15512_v31, %v3577_v34  ;;  %vm3596_vm4 = vcmp.lt.s32.totalorder %v11666_v1, 3 }
 0x464   : > { %v3603_v60 = vsel %vm3597_vm5, %v3590_v8, 920167782  ;;  %vm3595_vm1 = vcmp.lt.s32.totalorder %v11666_v1, 2  ;;  %v3599_v26 = vsel %vm3597_vm5, %v3587_v0, 2102212464  ;;  %v3606_v47 = vsel %vm3594_vm2, %v3584_v3, %v3587_v0 }
 0x465   : > { %v3604_v49 = vsel %vm3596_vm4, %v3587_v0, %v3603_v60  ;;  %vm15395_vm11 = vcmp.lt.s32.totalorder %v11337_v20, 0  ;;  %vm8137_vm12 = vcmp.lt.s32.totalorder %v8136_v17, 0  ;;  %v3545_v40 = vsel %vm3460_vm3, %v3544_v9, %v11639_v12 }
 0x466   : > { %v3605_v34 = vsel %vm3595_vm1, %v3602_v14, %v3604_v49  ;;  %v3607_v19 = vsel %vm3597_vm5, %v3593_v42, 1326507024  ;;  %v3437_v11 = vmul.f32 %v3436_v57, %v3434_v5  ;;  %v3529_v39 = vsel %vm8137_vm12, 0, %v8136_v17 }
 0x467   : > { %v3598_v62 = vsel %vm3594_vm2, %v3578_v33, %v3581_v55  ;;  %v3608_v60 = vsel %vm3596_vm4, %v3590_v8, %v3607_v19  ;;  %v3530_v0 = vsub.s32 32, %v3529_v39  ;;  %v3534_v28 = vsub.s32 4294967266, %v3529_v39 }
 0x468   : > { %v3600_v29 = vsel %vm3596_vm4, %v3584_v3, %v3599_v26  ;;  %v3609_v12 = vsel %vm3595_vm1, %v3606_v47, %v3608_v60  ;;  %v11729_v57 = vmul.u32.u64.low %v11685_v61, %v3605_v34  ;;  %v11730_v5 = vmul.u32.u64.high %v11685_v61, %v3605_v34, %v11729_v57 }
 0x469   : > { %v11725_v9 = vmul.u32.u64.low %v11685_v61, %v3609_v12  ;;  %v11726_v14 = vmul.u32.u64.high %v11685_v61, %v3609_v12, %v11725_v9  ;;  %v3514_v8 = vadd.s32 %v11588_v35, %v11597_v52  ;;  %v3535_v55 = vadd.s32 127, %v3534_v28 }
 0x46a   : > { %v3676_v42 = vadd.s32 1, %v8142_v48  ;;  %v11737_v3 = vadd.f32 %v11376_v38, %v11649_v30  ;;  %v3438_v17 = vxor.u32 2147483648, %v3437_v11  ;;  %v3547_v33 = vsel %vm11692_vm0, 0, %v3545_v40 }
 0x46b   : > { %v3601_v26 = vsel %vm3595_vm1, %v3598_v62, %v3600_v29  ;;  %v15388_v49 = vand.u32 2147483647, %v11654_v4  ;;  %v3532_v47 = vshrl.u32 %v3514_v8, %v3530_v0  ;;  %v11744_v34 = vshll.u32 %v3674_v51, 8 }
 0x46c   : > { %vm3677_vm12 = vcmp.gt.s32.totalorder %v3676_v42, 0  ;;  %v3773_v35 = vand.u32 2139095040, %v11654_v4  ;;  %v3536_v52 = vshll.u32 %v3535_v55, 23  ;;  %vm3619_vm2 = vc.u32 %v11726_v14, %v11729_v57 }
 0x46d   : > { %v3620_v38 = vadd.s32 1, %v11730_v5  ;;  %v3678_v30 = vsel %vm3677_vm12, %v3676_v42, 0  ;;  %v3531_v48 = vshll.u32 %v11664_v46, %v3529_v39  ;;  %v11751_v28 = vadd.s32 3, %v3547_v33 }
 0x46e   : > { %v3617_v29 = vmul.u32 %v11685_v61, %v3601_v26  ;;  %v3680_v1 = vand.u32 31, %v3678_v30  ;;  %v3439_v51 = vsel %vm15395_vm11, %v3438_v17, %v3437_v11  ;;  %v11759_v19 = vand.u32 8388607, %v15388_v49 }
 0x46f   : > { %15745 = vst [vmem:[#allocation19_spill] sm:$0xff] %v11751_v28  ;;  %v3621_v40 = vsel %vm3619_vm2, %v3620_v38, %v11730_v5  ;;  %v3533_v60 = vor.u32 %v3532_v47, %v3531_v48  ;;  %v3774_v46 = vshrl.u32 %v3773_v35, 23  ;;  %v3537_v39 = vor.u32 4788187, %v3536_v52 }
 0x470   : > { %v3622_v0 = vadd.s32 %v3621_v40, %v3617_v29  ;;  %v3681_v12 = vsub.s32 32, %v3680_v1  ;;  %v3679_v9 = vshrl.u32 %v3678_v30, 5  ;;  %v3683_v61 = vshll.u32 %v15512_v31, %v3680_v1 }
 0x471   : > { %v3686_v8 = vshll.u32 %v15679_v53, %v3680_v1  ;;  %v3689_v5 = vshll.u32 %v15680_v41, %v3680_v1  ;;  %v3692_v42 = vshll.u32 %v15681_v16, %v3680_v1  ;;  %v15746_v17 = vand.u32 2147483647, %v11337_v20 }
 0x472   : > { %v3623_v55 = vadd.s32 536870912, %v3622_v0  ;;  %v3684_v11 = vshrl.u32 %v15679_v53, %v3681_v12  ;;  %v3687_v26 = vshrl.u32 %v15680_v41, %v3681_v12  ;;  %v3690_v47 = vshrl.u32 %v15681_v16, %v3681_v12 }
 0x473   : > { %vm11769_vm5 = vcmp.le.f32.partialorder %v15746_v17, 0.7853982  ;;  %v3693_v35 = vshrl.u32 %v15682_v37, %v3681_v12  ;;  %v3696_v52 = vshrl.u32 %v15683_v18, %v3681_v12  ;;  %v3695_v48 = vshll.u32 %v15682_v37, %v3680_v1 }
 0x474   : > { %v11777_v38 = vshrl.u32 %v3623_v55, 30  ;;  %v3685_v30 = vor.u32 %v3684_v11, %v3683_v61  ;;  %v3877_v29 = vand.u32 2139095040, %v11662_v25  ;;  %v3538_v40 = vand.u32 2147483647, %v3537_v39 }
 0x475   : > { %v3688_v17 = vor.u32 %v3687_v26, %v3686_v8  ;;  %v3691_v49 = vor.u32 %v3690_v47, %v3689_v5  ;;  %v3694_v62 = vor.u32 %v3693_v35, %v3692_v42  ;;  %v3540_v28 = vcvt.s32.f32 %v3533_v60 }
 0x476   : > { %15749 = vst [vmem:[#allocation32_spill] sm:$0xff] %v11777_v38  ;;  %v3625_v15 = vshll.u32 %v11777_v38, 30  ;;  %v3697_v44 = vor.u32 %v3696_v52, %v3695_v48  ;;  %vm3698_vm4 = vcmp.lt.s32.totalorder %v3679_v9, 1  ;;  %v3682_v54 = vshrl.u32 %v15512_v31, %v3681_v12 }
 0x477   : > { %vm3701_vm1 = vcmp.lt.s32.totalorder %v3679_v9, 4  ;;  %v3706_v45 = vsel %vm3698_vm4, %v3685_v30, %v3688_v17  ;;  %v8146_v55 = vadd.s32 4294967169, %v3774_v46  ;;  %vm3700_vm12 = vcmp.lt.s32.totalorder %v3679_v9, 3 }
 0x478   : > { %v11783_v27 = vsub.s32 %v3622_v0, %v3625_v15  ;;  %v3703_v1 = vsel %vm3701_vm1, %v3691_v49, 2102212464  ;;  %v3707_v61 = vsel %vm3701_vm1, %v3694_v62, 920167782  ;;  %v3541_v11 = vmul.f32 %v3540_v28, %v3538_v40 }
 0x479   : > { %vm3699_vm2 = vcmp.lt.s32.totalorder %v3679_v9, 2  ;;  %v3708_v39 = vsel %vm3700_vm12, %v3691_v49, %v3707_v61  ;;  %v3710_v8 = vsel %vm3698_vm4, %v3688_v17, %v3691_v49  ;;  %v3702_v5 = vsel %vm3698_vm4, %v3682_v54, %v3685_v30 }
 0x47a   : > { %v3628_v60 = vsub.s32 0, %v11783_v27  ;;  %v3709_v42 = vsel %vm3699_vm2, %v3706_v45, %v3708_v39  ;;  %v3711_v26 = vsel %vm3701_vm1, %v3697_v44, 1326507024  ;;  %v3704_v47 = vsel %vm3700_vm12, %v3688_v17, %v3703_v1 }
 0x47b   : > { %v3712_v12 = vsel %vm3700_vm12, %v3694_v62, %v3711_v26  ;;  %v11788_v35 = vmul.u32.u64.low %v11744_v34, %v3709_v42  ;;  %v11789_v46 = vmul.u32.u64.high %v11744_v34, %v3709_v42, %v11788_v35  ;;  %v3442_v15 = vsel %vm11769_vm5, %v11337_v20, %v3439_v51 }
 0x47c   : > { %v8139_v28 = vmin.u32 %v3628_v60, %v11783_v27  ;;  %v3713_v49 = vsel %vm3699_vm2, %v3710_v8, %v3712_v12  ;;  %v3780_v0 = vadd.s32 1, %v8146_v55  ;;  %v3542_v54 = vxor.u32 2147483648, %v3541_v11 }
 0x47d   : > { %v11798_v45 = vmul.u32.u64.low %v11744_v34, %v3713_v49  ;;  %v11799_v44 = vmul.u32.u64.high %v11744_v34, %v3713_v49, %v11798_v45  ;;  %v3778_v62 = vor.u32 8388608, %v11759_v19  ;;  %v3705_v30 = vsel %vm3699_vm2, %v3702_v5, %v3704_v47 }
 0x47e   : > { %v3630_v52 = vclz %v8139_v28  ;;  %vm3781_vm4 = vcmp.gt.s32.totalorder %v3780_v0, 0  ;;  %v3878_v48 = vshrl.u32 %v3877_v29, 23  ;;  %8796 = vcosq.f32 %v3442_v15 }
 0x47f   : > { %v3724_v51 = vadd.s32 1, %v11789_v46  ;;  %v3782_v40 = vsel %vm3781_vm4, %v3780_v0, 0  ;;  %v15750_v17 = vand.u32 2147483647, %v11662_v25  ;;  %8798 = vsinq.f32 %v3442_v15 }
 0x480   : > { %v3618_v55 = vadd.s32 %v11729_v57, %v11726_v14  ;;  %v8140_v61 = vadd.s32 4294967294, %v3630_v52  ;;  %v3784_v39 = vand.u32 31, %v3782_v40  ;;  %v11812_v19 = vsel %vm3460_vm3, %v3542_v54, %v3541_v11 }
 0x481   : > { %v11806_v1 = vand.u32 8388607, %v15750_v17  ;;  %v3721_v9 = vmul.u32 %v11744_v34, %v3705_v30  ;;  %vm3723_vm1 = vc.u32 %v11799_v44, %v11788_v35  ;;  %v11817_v29 = vshll.u32 %v3778_v62, 8 }
 0x482   : > { %vm8141_vm12 = vcmp.lt.s32.totalorder %v8140_v61, 0  ;;  %v3725_v8 = vsel %vm3723_vm1, %v3724_v51, %v11789_v46  ;;  %v3785_v60 = vsub.s32 32, %v3784_v39  ;;  %v8150_v5 = vadd.s32 4294967169, %v3878_v48 }
 0x483   : > { %v3633_v42 = vsel %vm8141_vm12, 0, %v8140_v61  ;;  %v3726_v14 = vadd.s32 %v3725_v8, %v3721_v9  ;;  %v3783_v57 = vshrl.u32 %v3782_v40, 5  ;;  %v3787_v12 = vshll.u32 %v15512_v31, %v3784_v39 }
 0x484   : > { %v3634_v47 = vsub.s32 32, %v3633_v42  ;;  %v3638_v11 = vsub.s32 4294967266, %v3633_v42  ;;  %v3793_v34 = vshll.u32 %v15680_v41, %v3784_v39  ;;  %v3788_v28 = vshrl.u32 %v15679_v53, %v3785_v60 }
 0x485   : > { %v3727_v15 = vadd.s32 536870912, %v3726_v14  ;;  %v3791_v49 = vshrl.u32 %v15680_v41, %v3785_v60  ;;  %v3794_v46 = vshrl.u32 %v15681_v16, %v3785_v60  ;;  %v3635_v0 = vshll.u32 %v11783_v27, %v3633_v42 }
 0x486   : > { %v3636_v54 = vshrl.u32 %v3618_v55, %v3634_v47  ;;  %v3639_v45 = vadd.s32 127, %v3638_v11  ;;  %v3797_v62 = vshrl.u32 %v15682_v37, %v3785_v60  ;;  %v3790_v30 = vshll.u32 %v15679_v53, %v3784_v39 }
 0x487   : > { %v3728_v52 = vshrl.u32 %v3727_v15, 30  ;;  %v3796_v48 = vshll.u32 %v15681_v16, %v3784_v39  ;;  %v3884_v51 = vadd.s32 1, %v8150_v5  ;;  %v3789_v61 = vor.u32 %v3788_v28, %v3787_v12 }
 0x488   : > { %v3637_v40 = vor.u32 %v3636_v54, %v3635_v0  ;;  %v3640_v17 = vshll.u32 %v3639_v45, 23  ;;  %v3795_v9 = vor.u32 %v3794_v46, %v3793_v34  ;;  %v11830_v8 = vpop.eup %8796  ;;  %v3792_v38 = vor.u32 %v3791_v49, %v3790_v30 }
 0x489   : > { %v3729_v26 = vshll.u32 %v3728_v52, 30  ;;  %v3799_v27 = vshll.u32 %v15682_v37, %v3784_v39  ;;  %v3800_v55 = vshrl.u32 %v15683_v18, %v3785_v60  ;;  %v11834_v42 = vpop.eup %8798  ;;  %v3786_v11 = vshrl.u32 %v15512_v31, %v3785_v60 }
 0x48a   : > { %v3641_v47 = vor.u32 4788187, %v3640_v17  ;;  %v3798_v15 = vor.u32 %v3797_v62, %v3796_v48  ;;  %vm3802_vm3 = vcmp.lt.s32.totalorder %v3783_v57, 1  ;;  %vm15400_vm2 = vcmp.lt.s32.totalorder %v11535_v7, 0 }
 0x48b   : > { %v3644_v5 = vcvt.s32.f32 %v3637_v40  ;;  %vm3668_vm4 = vcmp.lt.s32.totalorder %v11629_v56, 0  ;;  %v11839_v12 = vsub.s32 %v3726_v14, %v3729_v26  ;;  %v3801_v34 = vor.u32 %v3800_v55, %v3799_v27 }
 0x48c   : > { %vm3805_vm1 = vcmp.lt.s32.totalorder %v3783_v57, 4  ;;  %v3642_v28 = vand.u32 2147483647, %v3641_v47  ;;  %vm3804_vm12 = vcmp.lt.s32.totalorder %v3783_v57, 3  ;;  %v3806_v39 = vsel %vm3802_vm3, %v3786_v11, %v3789_v61 }
 0x48d   : > { %v3807_v49 = vsel %vm3805_vm1, %v3795_v9, 2102212464  ;;  %v3732_v46 = vsub.s32 0, %v11839_v12  ;;  %v3752_v60 = vsub.s32 4, %v3728_v52  ;;  %v3810_v54 = vsel %vm3802_vm3, %v3789_v61, %v3792_v38 }
 0x48e   : > { %v3808_v0 = vsel %vm3804_vm12, %v3792_v38, %v3807_v49  ;;  %v3645_v45 = vmul.f32 %v3644_v5, %v3642_v28  ;;  %vm3803_vm11 = vcmp.lt.s32.totalorder %v3783_v57, 2  ;;  %v3811_v14 = vsel %vm3805_vm1, %v3798_v15, 920167782 }
 0x48f   : > { %v3814_v26 = vsel %vm3802_vm3, %v3792_v38, %v3795_v9  ;;  %v8143_v62 = vmin.u32 %v3732_v46, %v11839_v12  ;;  %v3809_v30 = vsel %vm3803_vm11, %v3806_v39, %v3808_v0  ;;  %v3812_v48 = vsel %vm3804_vm12, %v3795_v9, %v3811_v14 }
 0x490   : > { %v3815_v40 = vsel %vm3805_vm1, %v3801_v34, 1326507024  ;;  %v3646_v17 = vxor.u32 2147483648, %v3645_v45  ;;  %v3813_v27 = vsel %vm3803_vm11, %v3810_v54, %v3812_v48  ;;  %vm3885_vm8 = vcmp.gt.s32.totalorder %v3884_v51, 0 }
 0x491   : > { %v3816_v55 = vsel %vm3804_vm12, %v3798_v15, %v3815_v40  ;;  %v3734_v47 = vclz %v8143_v62  ;;  %v11853_v11 = vmul.u32.u64.low %v11817_v29, %v3813_v27  ;;  %v11854_v5 = vmul.u32.u64.high %v11817_v29, %v3813_v27, %v11853_v11 }
 0x492   : > { %v3817_v61 = vsel %vm3803_vm11, %v3814_v26, %v3816_v55  ;;  %v11861_v38 = vsel %vm11692_vm0, %v11468_v22, %v11812_v19  ;;  %v3886_v57 = vsel %vm3885_vm8, %v3884_v51, 0  ;;  %v3722_v15 = vadd.s32 %v11788_v35, %v11799_v44 }
 0x493   : > { %v11864_v9 = vmul.u32.u64.low %v11817_v29, %v3817_v61  ;;  %v11865_v34 = vmul.u32.u64.high %v11817_v29, %v3817_v61, %v11864_v9  ;;  %v8144_v28 = vadd.s32 4294967294, %v3734_v47  ;;  %v3888_v39 = vand.u32 31, %v3886_v57 }
 0x494   : > { %v11872_v46 = vsel %vm15400_vm2, %v3646_v17, %v3645_v45  ;;  %v11876_v63 = vsel %vm3668_vm4, %v3752_v60, %v3728_v52  ;;  %v3825_v19 = vmul.u32 %v11817_v29, %v3809_v30  ;;  %v15751_v0 = vor.u32 8388608, %v11806_v1 }
 0x495   : > { %vm8145_vm8 = vcmp.lt.s32.totalorder %v8144_v28, 0  ;;  %v3828_v35 = vadd.s32 1, %v11854_v5  ;;  %v11884_v44 = vshrl.u32 %v3886_v57, 5  ;;  %v3889_v54 = vsub.s32 32, %v3888_v39 }
 0x496   : > { %v11881_v51 = vshll.u32 %v15751_v0, 8  ;;  %v3737_v14 = vsel %vm8145_vm8, 0, %v8144_v28  ;;  %vm3827_vm0 = vc.u32 %v11865_v34, %v11853_v11  ;;  %v3981_v45 = vand.u32 2139095040, %v11737_v3 }
 0x497   : > { %v2608_v52 = vsub.s32 4, %v10942_v24  ;;  %v3738_v60 = vsub.s32 32, %v3737_v14  ;;  %v3742_v29 = vsub.s32 4294967266, %v3737_v14  ;;  %v3829_v1 = vsel %vm3827_vm0, %v3828_v35, %v11854_v5 }
 0x498   : > { %v3891_v26 = vshll.u32 %v15512_v31, %v3888_v39  ;;  %v3739_v62 = vshll.u32 %v11839_v12, %v3737_v14  ;;  %v3830_v30 = vadd.s32 %v3829_v1, %v3825_v19  ;;  %v3892_v48 = vshrl.u32 %v15679_v53, %v3889_v54 }
 0x499   : > { %v3894_v40 = vshll.u32 %v15679_v53, %v3888_v39  ;;  %v3740_v17 = vshrl.u32 %v3722_v15, %v3738_v60  ;;  %v3743_v27 = vadd.s32 127, %v3742_v29  ;;  %v3895_v55 = vshrl.u32 %v15680_v41, %v3889_v54 }
 0x49a   : > { %v3897_v47 = vshll.u32 %v15680_v41, %v3888_v39  ;;  %v3831_v61 = vadd.s32 536870912, %v3830_v30  ;;  %v3893_v9 = vor.u32 %v3892_v48, %v3891_v26  ;;  %v3898_v57 = vshrl.u32 %v15681_v16, %v3889_v54 }
 0x49b   : > { %v3900_v5 = vshll.u32 %v15681_v16, %v3888_v39  ;;  %v3741_v28 = vor.u32 %v3740_v17, %v3739_v62  ;;  %v3744_v0 = vshll.u32 %v3743_v27, 23  ;;  %v3896_v12 = vor.u32 %v3895_v55, %v3894_v40 }
 0x49c   : > { %v3901_v19 = vshrl.u32 %v15682_v37, %v3889_v54  ;;  %v11900_v35 = vshrl.u32 %v3831_v61, 30  ;;  %v3899_v14 = vor.u32 %v3898_v57, %v3897_v47  ;;  %v3903_v15 = vshll.u32 %v15682_v37, %v3888_v39 }
 0x49d   : > { %v3904_v60 = vshrl.u32 %v15683_v18, %v3889_v54  ;;  %v3745_v29 = vor.u32 4788187, %v3744_v0  ;;  %v3748_v1 = vcvt.s32.f32 %v3741_v28  ;;  %v3890_v26 = vshrl.u32 %v15512_v31, %v3889_v54 }
 0x49e   : > { %15752 = vst [vmem:[#allocation29_spill] sm:$0xff] %v11900_v35  ;;  %v3902_v48 = vor.u32 %v3901_v19, %v3900_v5  ;;  %v15753_v49 = vand.u32 2147483647, %v11535_v7  ;;  %v15756_v40 = vand.u32 2147483647, %v11629_v56  ;;  %v3833_v39 = vshll.u32 %v11900_v35, 30 }
 0x49f   : > { %v3905_v27 = vor.u32 %v3904_v60, %v3903_v15  ;;  %vm3906_vm1 = vcmp.lt.s32.totalorder %v11884_v44, 1  ;;  %vm3907_vm12 = vcmp.lt.s32.totalorder %v11884_v44, 2  ;;  %v3746_v54 = vand.u32 2147483647, %v3745_v29 }
 0x4a0   : > { %vm11907_vm11 = vcmp.le.f32.partialorder %v15753_v49, 0.7853982  ;;  %vm11913_vm3 = vcmp.le.f32.partialorder %v15756_v40, 0.7853982  ;;  %vm3908_vm8 = vcmp.lt.s32.totalorder %v11884_v44, 3  ;;  %vm3909_vm0 = vcmp.lt.s32.totalorder %v11884_v44, 4 }
 0x4a1   : > { %v3914_v49 = vsel %vm3906_vm1, %v3893_v9, %v3896_v12  ;;  %v11922_v55 = vsub.s32 %v3830_v30, %v3833_v39  ;;  %v3911_v47 = vsel %vm3909_vm0, %v3899_v14, 2102212464  ;;  %v3915_v61 = vsel %vm3909_vm0, %v3902_v48, 920167782 }
 0x4a2   : > { %v3918_v57 = vsel %vm3906_vm1, %v3896_v12, %v3899_v14  ;;  %v3749_v5 = vmul.f32 %v3748_v1, %v3746_v54  ;;  %v3910_v28 = vsel %vm3906_vm1, %v3890_v26, %v3893_v9  ;;  %v3916_v0 = vsel %vm3908_vm8, %v3899_v14, %v3915_v61 }
 0x4a3   : > { %v3919_v19 = vsel %vm3909_vm0, %v3905_v27, 1326507024  ;;  %v3836_v15 = vsub.s32 0, %v11922_v55  ;;  %v3912_v60 = vsel %vm3908_vm8, %v3896_v12, %v3911_v47  ;;  %v3917_v29 = vsel %vm3907_vm12, %v3914_v49, %v3916_v0 }
 0x4a4   : > { %v3920_v40 = vsel %vm3908_vm8, %v3902_v48, %v3919_v19  ;;  %v3750_v22 = vxor.u32 2147483648, %v3749_v5  ;;  %v11930_v30 = vmul.u32.u64.low %v11881_v51, %v3917_v29  ;;  %v11931_v39 = vmul.u32.u64.high %v11881_v51, %v3917_v29, %v11930_v30 }
 0x4a5   : > { %v3921_v35 = vsel %vm3907_vm12, %v3918_v57, %v3920_v40  ;;  %v8147_v1 = vmin.u32 %v3836_v15, %v11922_v55  ;;  %v15759_v12 = vand.u32 2147483647, %v11737_v3  ;;  %8800 = vcosq.f32 %v11861_v38 }
 0x4a6   : > { %v11935_v9 = vmul.u32.u64.low %v11881_v51, %v3921_v35  ;;  %v11936_v14 = vmul.u32.u64.high %v11881_v51, %v3921_v35, %v11935_v9  ;;  %v3913_v48 = vsel %vm3907_vm12, %v3910_v28, %v3912_v60  ;;  %v3982_v27 = vshrl.u32 %v3981_v45, 23 }
 0x4a7   : > { %v3985_v26 = vand.u32 8388607, %v15759_v12  ;;  %v2609_v54 = vsel %vm2524_vm13, %v2608_v52, %v10942_v24  ;;  %8802 = vsinq.f32 %v11861_v38  ;;  %v3751_v49 = vsel %vm3668_vm4, %v3750_v22, %v3749_v5 }
 0x4a8   : > { %v3838_v35 = vclz %v8147_v1  ;;  %v2611_v47 = vsel %vm11102_vm9, 0, %v2609_v54  ;;  %v3650_v44 = vsel %vm11907_vm11, %v11535_v7, %v11872_v46  ;;  %v3755_v45 = vsel %vm11913_vm3, 0, %v11876_v63 }
 0x4a9   : > { %v3932_v24 = vadd.s32 1, %v11931_v39  ;;  %v8154_v52 = vadd.s32 4294967169, %v3982_v27  ;;  %v3929_v61 = vmul.u32 %v11881_v51, %v3913_v48  ;;  %vm3931_vm13 = vc.u32 %v11936_v14, %v11930_v30 }
 0x4aa   : > { %v8148_v38 = vadd.s32 4294967294, %v3838_v35  ;;  %v3986_v22 = vor.u32 8388608, %v3985_v26  ;;  %v3754_v21 = vsel %vm11913_vm3, %v11629_v56, %v3751_v49  ;;  %v2615_v5 = vadd.s32 3, %v2611_v47 }
 0x4ab   : > { %v3933_v57 = vsel %vm3931_vm13, %v3932_v24, %v11931_v39  ;;  %v3988_v46 = vadd.s32 1, %v8154_v52  ;;  %8804 = vcosq.f32 %v3650_v44  ;;  %v11965_v28 = vadd.s32 3, %v3755_v45 }
 0x4ac   : > { %vm8149_vm9 = vcmp.lt.s32.totalorder %v8148_v38, 0  ;;  %v3934_v63 = vadd.s32 %v3933_v57, %v3929_v61  ;;  %8806 = vsinq.f32 %v3650_v44  ;;  %v3826_v51 = vadd.s32 %v11853_v11, %v11865_v34 }
 0x4ad   : > { %v3841_v0 = vsel %vm8149_vm9, 0, %v8148_v38  ;;  %vm3989_vm4 = vcmp.gt.s32.totalorder %v3988_v46, 0  ;;  %8808 = vcosq.f32 %v3754_v21  ;;  %v11969_v29 = vshll.u32 %v3986_v22, 8 }
 0x4ae   : > { %v3842_v19 = vsub.s32 32, %v3841_v0  ;;  %v3846_v15 = vsub.s32 4294967266, %v3841_v0  ;;  %v3935_v17 = vadd.s32 536870912, %v3934_v63  ;;  %v3990_v60 = vsel %vm3989_vm4, %v3988_v46, 0 }
 0x4af   : > { %v11971_v40 = vand.u32 3, %v2615_v5  ;;  %v2619_v39 = vxor.u32 2147483648, %v11323_v32  ;;  %v3843_v1 = vshll.u32 %v11922_v55, %v3841_v0  ;;  %v11977_v11 = vpop.eup %8800  ;;  %8810 = vsinq.f32 %v3754_v21 }
 0x4b0   : > { %v3844_v9 = vshrl.u32 %v3826_v51, %v3842_v19  ;;  %v3847_v12 = vadd.s32 127, %v3846_v15  ;;  %v11975_v26 = vshrl.u32 %v3935_v17, 30  ;;  %v11980_v34 = vadd.s32 %v11930_v30, %v11936_v14 }
 0x4b1   : > { %v3992_v48 = vand.u32 31, %v3990_v60  ;;  %v2622_v27 = vxor.u32 2147483648, %v11240_v13  ;;  %v11983_v54 = vpop.eup %8802  ;;  %v2816_v55 = vsub.s32 4, %v11078_v2  ;;  %v11987_v44 = vshrl.u32 %v3990_v60, 5 }
 0x4b2   : > { %v3845_v49 = vor.u32 %v3844_v9, %v3843_v1  ;;  %v3848_v35 = vshll.u32 %v3847_v12, 23  ;;  %v3937_v47 = vshll.u32 %v11975_v26, 30  ;;  %vm2618_vm3 = vcmp.eq.s32.totalorder %v11971_v40, 0 }
 0x4b3   : > { %v3993_v45 = vsub.s32 32, %v3992_v48  ;;  %vm2621_vm1 = vcmp.eq.s32.totalorder %v11971_v40, 2  ;;  %vm3772_vm12 = vcmp.lt.s32.totalorder %v11654_v4, 0  ;;  %v3995_v24 = vshll.u32 %v15512_v31, %v3992_v48 }
 0x4b4   : > { %v3849_v30 = vor.u32 4788187, %v3848_v35  ;;  %v11992_v14 = vsub.s32 %v3934_v63, %v3937_v47  ;;  %v11996_v52 = vsel %vm2618_vm3, %v11240_v13, %v2619_v39  ;;  %vm3876_vm8 = vcmp.lt.s32.totalorder %v11662_v25, 0 }
 0x4b5   : > { %v3996_v38 = vshrl.u32 %v15679_v53, %v3993_v45  ;;  %v3998_v61 = vshll.u32 %v15679_v53, %v3992_v48  ;;  %v3999_v22 = vshrl.u32 %v15680_v41, %v3993_v45  ;;  %v4001_v21 = vshll.u32 %v15680_v41, %v3992_v48  ;;  %v12003_v57 = vpop.eup %8804 }
 0x4b6   : > { %v3850_v46 = vand.u32 2147483647, %v3849_v30  ;;  %v3852_v5 = vcvt.s32.f32 %v3845_v49  ;;  %v3940_v63 = vsub.s32 0, %v11992_v14  ;;  %v4002_v51 = vshrl.u32 %v15681_v16, %v3993_v45  ;;  %v12007_v13 = vpop.eup %8806 }
 0x4b7   : > { %v15760_v0 = vand.u32 2147483647, %v11654_v4  ;;  %v3997_v15 = vor.u32 %v3996_v38, %v3995_v24  ;;  %v4000_v17 = vor.u32 %v3999_v22, %v3998_v61  ;;  %v4004_v60 = vshll.u32 %v15681_v16, %v3992_v48  ;;  %v12017_v1 = vpop.eup %8808 }
 0x4b8   : > { %v4005_v39 = vshrl.u32 %v15682_v37, %v3993_v45  ;;  %v3853_v9 = vmul.f32 %v3852_v5, %v3850_v46  ;;  %v8151_v12 = vmin.u32 %v3940_v63, %v11992_v14  ;;  %v4003_v49 = vor.u32 %v4002_v51, %v4001_v21 }
 0x4b9   : > { %vm12011_vm0 = vcmp.le.f32.partialorder %v15760_v0, 0.7853982  ;;  %v2623_v35 = vsel %vm2621_vm1, %v2622_v27, %v11323_v32  ;;  %v4007_v30 = vshll.u32 %v15682_v37, %v3992_v48  ;;  %v4008_v24 = vshrl.u32 %v15683_v18, %v3993_v45  ;;  %v12031_v21 = vpop.eup %8810 }
 0x4ba   : > { %v4006_v47 = vor.u32 %v4005_v39, %v4004_v60  ;;  %v2817_v38 = vsel %vm2732_vm10, %v2816_v55, %v11078_v2  ;;  %v3854_v61 = vxor.u32 2147483648, %v3853_v9  ;;  %v3942_v22 = vclz %v8151_v12 }
 0x4bb   : > { %v3960_v46 = vsub.s32 4, %v11975_v26  ;;  %vm4010_vm13 = vcmp.lt.s32.totalorder %v11987_v44, 1  ;;  %vm2617_vm9 = vcmp.lt.s32.totalorder %v11971_v40, 2  ;;  %v3994_v32 = vshrl.u32 %v15512_v31, %v3993_v45 }
 0x4bc   : > { %v4009_v27 = vor.u32 %v4008_v24, %v4007_v30  ;;  %vm4013_vm4 = vcmp.lt.s32.totalorder %v11987_v44, 4  ;;  %v4018_v48 = vsel %vm4010_vm13, %v3997_v15, %v4000_v17  ;;  %v8152_v5 = vadd.s32 4294967294, %v3942_v22 }
 0x4bd   : > { %vm4012_vm10 = vcmp.lt.s32.totalorder %v11987_v44, 3  ;;  %v4015_v2 = vsel %vm4013_vm4, %v4003_v49, 2102212464  ;;  %v4019_v55 = vsel %vm4013_vm4, %v4006_v47, 920167782  ;;  %v3855_v63 = vsel %vm3772_vm12, %v3854_v61, %v3853_v9 }
 0x4be   : > { %vm4011_vm3 = vcmp.lt.s32.totalorder %v11987_v44, 2  ;;  %v4020_v51 = vsel %vm4012_vm10, %v4003_v49, %v4019_v55  ;;  %v4022_v45 = vsel %vm4010_vm13, %v4000_v17, %v4003_v49  ;;  %vm2614_vm1 = vweird.f32 %v10817_v10  ;;  %v15767_v10 = vld [vmem:[#allocation10_spill] sm:$0xff] }
 0x4bf   : > { %vm8153_vm2 = vcmp.lt.s32.totalorder %v8152_v5, 0  ;;  %v12047_v0 = vsel %vm3876_vm8, %v3960_v46, %v11975_v26  ;;  %v4021_v60 = vsel %vm4011_vm3, %v4018_v48, %v4020_v51  ;;  %v4023_v39 = vsel %vm4013_vm4, %v4009_v27, 1326507024 }
 0x4c0   : > { %v3945_v12 = vsel %vm8153_vm2, 0, %v8152_v5  ;;  %v4014_v9 = vsel %vm4010_vm13, %v3994_v32, %v3997_v15  ;;  %v4016_v30 = vsel %vm4012_vm10, %v4000_v17, %v4015_v2  ;;  %v4024_v24 = vsel %vm4012_vm10, %v4006_v47, %v4023_v39 }
 0x4c1   : > { %v3858_v49 = vsel %vm12011_vm0, %v11654_v4, %v3855_v63  ;;  %v3946_v61 = vsub.s32 32, %v3945_v12  ;;  %v3950_v22 = vsub.s32 4294967266, %v3945_v12  ;;  %v4025_v26 = vsel %vm4011_vm3, %v4022_v45, %v4024_v24 }
 0x4c2   : > { %v12059_v46 = vmul.u32.u64.low %v11969_v29, %v4025_v26  ;;  %v12060_v55 = vmul.u32.u64.high %v11969_v29, %v4025_v26, %v12059_v46  ;;  %v12063_v27 = vmul.u32.u64.low %v11969_v29, %v4021_v60  ;;  %v12064_v48 = vmul.u32.u64.high %v11969_v29, %v4021_v60, %v12063_v27 }
 0x4c3   : > { %vm2822_vm2 = vweird.f32 %v10836_v6  ;;  %v3947_v15 = vshll.u32 %v11992_v14, %v3945_v12  ;;  %v3948_v17 = vshrl.u32 %v11980_v34, %v3946_v61  ;;  %v3951_v47 = vadd.s32 127, %v3950_v22  ;;  %v15771_v6 = vld [vmem:[#allocation2_spill] sm:$0xff] }
 0x4c4   : > { %v2819_v32 = vsel %vm11260_vm7, 0, %v2817_v38  ;;  %8812 = vcosq.f32 %v3858_v49  ;;  %v4017_v5 = vsel %vm4011_vm3, %v4014_v9, %v4016_v30  ;;  %v2624_v2 = vsel %vm2617_vm9, %v11996_v52, %v2623_v35  ;;  %v15763_v38 = vld [vmem:[#allocation15_spill] sm:$0xff] }
 0x4c5   : > { %v2823_v63 = vadd.s32 3, %v2819_v32  ;;  %v3949_v51 = vor.u32 %v3948_v17, %v3947_v15  ;;  %v3952_v45 = vshll.u32 %v3951_v47, 23  ;;  %v2827_v60 = vxor.u32 2147483648, %v11420_v58  ;;  %v15768_v15 = vld [vmem:[#allocation3_spill] sm:$0xff] }
 0x4c6   : > { %v2830_v14 = vxor.u32 2147483648, %v11364_v43  ;;  %vm4035_vm13 = vc.u32 %v12060_v55, %v12063_v27  ;;  %v4036_v50 = vadd.s32 1, %v12064_v48  ;;  %v2512_v39 = vand.u32 3, %v15763_v38 }
 0x4c7   : > { %v2824_v34 = vand.u32 3, %v2823_v63  ;;  %v3953_v44 = vor.u32 4788187, %v3952_v45  ;;  %v3956_v12 = vcvt.s32.f32 %v3949_v51  ;;  %v4033_v9 = vmul.u32 %v11969_v29, %v4017_v5 }
 0x4c8   : > { %v2625_v40 = vsel %vm2614_vm1, nan, %v2624_v2  ;;  %v15764_v52 = vand.u32 2147483647, %v11662_v25  ;;  %v4037_v30 = vsel %vm4035_vm13, %v4036_v50, %v12064_v48  ;;  %vm2514_vm3 = vcmp.eq.s32.totalorder %v2512_v39, 0 }
 0x4c9   : > { %vm2825_vm9 = vcmp.lt.s32.totalorder %v2824_v34, 2  ;;  %vm2826_vm4 = vcmp.eq.s32.totalorder %v2824_v34, 0  ;;  %vm2829_vm10 = vcmp.eq.s32.totalorder %v2824_v34, 2  ;;  %v3954_v24 = vand.u32 2147483647, %v3953_v44 }
 0x4ca   : > { %vm12086_vm7 = vcmp.le.f32.partialorder %v15764_v52, 0.7853982  ;;  %v4038_v61 = vadd.s32 %v4037_v30, %v4033_v9  ;;  %v2828_v22 = vsel %vm2826_vm4, %v11364_v43, %v2827_v60  ;;  %v2831_v29 = vsel %vm2829_vm10, %v2830_v14, %v11420_v58  ;;  %v15769_v43 = vld [vmem:[#allocation5_spill] sm:$0xff]  ;;  %v15770_v60 = vld [vmem:[#allocation18_spill] sm:$0xff]  ;;  %v15773_v52 = vld [vmem:[#allocation8_spill] sm:$0xff] }
 0x4cb   : > { %v2832_v26 = vsel %vm2825_vm9, %v2828_v22, %v2831_v29  ;;  %v2515_v46 = vxor.u32 2147483648, %v15767_v10  ;;  %v2518_v17 = vxor.u32 2147483648, %v15768_v15  ;;  %v3957_v47 = vmul.f32 %v3956_v12, %v3954_v24  ;;  %v15772_v12 = vld [vmem:[#allocation14_spill] sm:$0xff] }
 0x4cc   : > { %v4039_v32 = vadd.s32 536870912, %v4038_v61  ;;  %v2833_v48 = vsel %vm2822_vm2, nan, %v2832_v26  ;;  %vm2517_vm1 = vcmp.eq.s32.totalorder %v2512_v39, 2  ;;  %v2720_v51 = vand.u32 3, %v15769_v43 }
 0x4cd   : > { %v8357_v5 = vpack.c.bf16 %v2833_v48, %v2625_v40  ;;  %v2516_v2 = vsel %vm2514_vm3, %v15768_v15, %v2515_v46  ;;  %v2519_v63 = vsel %vm2517_vm1, %v2518_v17, %v15767_v10  ;;  %v3958_v58 = vxor.u32 2147483648, %v3957_v47  ;;  %v15775_v46 = vld [vmem:[#allocation12_spill] sm:$0xff] }
 0x4ce   : > { %v12100_v45 = vshrl.u32 %v4039_v32, 30  ;;  %vm2513_vm13 = vcmp.lt.s32.totalorder %v2512_v39, 2  ;;  %v2723_v14 = vxor.u32 2147483648, %v15770_v60  ;;  %v12103_v50 = vpop.eup %8812  ;;  %8814 = vsinq.f32 %v3858_v49  ;;  %v15774_v49 = vld [vmem:[#allocation7_spill] sm:$0xff] }
 0x4cf   : > { %8358 = vmatprep.subr.bf16.mxu0 %v8357_v5  ;;  %vm2510_vm2 = vweird.f32 %v15771_v6  ;;  %v2520_v34 = vsel %vm2513_vm13, %v2516_v2, %v2519_v63  ;;  %vm2722_vm9 = vcmp.eq.s32.totalorder %v2720_v51, 0  ;;  %v3959_v38 = vsel %vm3876_vm8, %v3958_v58, %v3957_v47 }
 0x4d0   : > { %v4041_v44 = vshll.u32 %v12100_v45, 30  ;;  %v2724_v9 = vsel %vm2722_vm9, %v15772_v12, %v2723_v14  ;;  %v2726_v40 = vxor.u32 2147483648, %v15772_v12  ;;  %v12112_v39 = vadd.s32 %v12063_v27, %v12060_v55  ;;  %v15776_v27 = vld [vmem:[#allocation21_spill] sm:$0xff]  ;;  %v15781_v12 = vld [vmem:[#allocation40_spill] sm:$0xff] }
 0x4d1   : > { %vm2718_vm4 = vweird.f32 %v15773_v52  ;;  %vm2725_vm10 = vcmp.eq.s32.totalorder %v2720_v51, 2  ;;  %v3024_v30 = vsub.s32 4, %v15774_v49  ;;  %v3962_v24 = vsel %vm12086_vm7, %v11662_v25, %v3959_v38 }
 0x4d2   : > { %v12119_v22 = vsub.s32 %v4038_v61, %v4041_v44  ;;  %vm2721_vm8 = vcmp.lt.s32.totalorder %v2720_v51, 2  ;;  %v2727_v29 = vsel %vm2725_vm10, %v2726_v40, %v15770_v60  ;;  %v2521_v26 = vsel %vm2510_vm2, nan, %v2520_v34  ;;  %v15780_v34 = vld [vmem:[#allocation38_spill] sm:$0xff]  ;;  %v15782_v40 = vld [vmem:[#allocation4_spill] sm:$0xff] }
 0x4d3   : > { %v2728_v10 = vsel %vm2721_vm8, %v2724_v9, %v2727_v29  ;;  %v3025_v55 = vsel %vm2940_vm15, %v3024_v30, %v15774_v49  ;;  %v3232_v15 = vsub.s32 4, %v15776_v27  ;;  %vm3030_vm3 = vweird.f32 %v15775_v46  ;;  %v15783_v49 = vld [vmem:[#allocation20_spill] sm:$0xff] }
 0x4d4   : > { %v4044_v17 = vsub.s32 0, %v12119_v22  ;;  %v2729_v47 = vsel %vm2718_vm4, nan, %v2728_v10  ;;  %v3027_v48 = vsel %vm11425_vm14, 0, %v3025_v55  ;;  %v3035_v61 = vxor.u32 2147483648, %v11522_v23 }
 0x4d5   : > { %8816 = vcosq.f32 %v3962_v24  ;;  %v8359_v5 = vpack.c.bf16 %v2729_v47, %v2521_v26  ;;  %v3031_v2 = vadd.s32 3, %v3027_v48  ;;  %vm15778_vm1 = vcmp.lt.s32.totalorder %v11224_v59, 0  ;;  %v15784_v26 = vld [vmem:[#allocation22_spill] sm:$0xff] }
 0x4d6   : > { %v3233_v63 = vsel %vm15778_vm1, %v3232_v15, %v15776_v27  ;;  %8818 = vsinq.f32 %v3962_v24  ;;  %v8155_v43 = vmin.u32 %v4044_v17, %v12119_v22  ;;  %v3038_v51 = vxor.u32 2147483648, %v11519_v36  ;;  %v15785_v47 = vld [vmem:[#allocation26_spill] sm:$0xff] }
 0x4d7   : > { %v3235_v60 = vsel %vm11574_vm6, 0, %v3233_v63  ;;  %8360 = vmatpush1.bf16.msra.mxu0 %v8359_v5  ;;  %v3032_v14 = vand.u32 3, %v3031_v2  ;;  %vm3238_vm15 = vweird.f32 %v11224_v59  ;;  %v3243_v38 = vxor.u32 2147483648, %v15780_v34 }
 0x4d8   : > { %v3239_v6 = vadd.s32 3, %v3235_v60  ;;  %v4046_v44 = vclz %v8155_v43  ;;  %v3246_v9 = vxor.u32 2147483648, %v15781_v12  ;;  %v2928_v52 = vand.u32 3, %v15782_v40  ;;  %v12143_v24 = vpop.eup %8814  ;;  %v15786_v60 = vld [vmem:[#allocation11_spill] sm:$0xff]  ;;  %v15788_v40 = vld [vmem:[#allocation28_spill] sm:$0xff] }
 0x4d9   : > { %v2931_v30 = vxor.u32 2147483648, %v15783_v49  ;;  %vm3034_vm14 = vcmp.eq.s32.totalorder %v3032_v14, 0  ;;  %vm3037_vm13 = vcmp.eq.s32.totalorder %v3032_v14, 2  ;;  %v2934_v10 = vxor.u32 2147483648, %v15784_v26 }
 0x4da   : > { %v3240_v29 = vand.u32 3, %v3239_v6  ;;  %v8156_v55 = vadd.s32 4294967294, %v4046_v44  ;;  %vm3033_vm6 = vcmp.lt.s32.totalorder %v3032_v14, 2  ;;  %v3036_v27 = vsel %vm3034_vm14, %v11519_v36, %v3035_v61 }
 0x4db   : > { %v3039_v15 = vsel %vm3037_vm13, %v3038_v51, %v11522_v23  ;;  %v3136_v32 = vand.u32 3, %v15785_v47  ;;  %vm2930_vm8 = vcmp.eq.s32.totalorder %v2928_v52, 0  ;;  %vm2933_vm1 = vcmp.eq.s32.totalorder %v2928_v52, 2 }
 0x4dc   : > { %v3040_v17 = vsel %vm3033_vm6, %v3036_v27, %v3039_v15  ;;  %vm3242_vm2 = vcmp.eq.s32.totalorder %v3240_v29, 0  ;;  %vm3245_vm9 = vcmp.eq.s32.totalorder %v3240_v29, 2  ;;  %vm8157_vm4 = vcmp.lt.s32.totalorder %v8156_v55, 0 }
 0x4dd   : > { %vm3241_vm10 = vcmp.lt.s32.totalorder %v3240_v29, 2  ;;  %v3244_v48 = vsel %vm3242_vm2, %v15781_v12, %v3243_v38  ;;  %v3247_v5 = vsel %vm3245_vm9, %v3246_v9, %v15780_v34  ;;  %v4049_v2 = vsel %vm8157_vm4, 0, %v8156_v55  ;;  %v15787_v12 = vld [vmem:[#allocation33_spill] sm:$0xff] }
 0x4de   : > { %v3041_v63 = vsel %vm3030_vm3, nan, %v3040_v17  ;;  %v3248_v43 = vsel %vm3241_vm10, %v3244_v48, %v3247_v5  ;;  %v4050_v36 = vsub.s32 32, %v4049_v2  ;;  %v4054_v61 = vsub.s32 4294967266, %v4049_v2 }
 0x4df   : > { %v3249_v23 = vsel %vm3238_vm15, nan, %v3248_v43  ;;  %v12155_v51 = vpop.eup %8816  ;;  %vm2926_vm14 = vweird.f32 %v15786_v60  ;;  %v2932_v14 = vsel %vm2930_vm8, %v15784_v26, %v2931_v30  ;;  %v2935_v6 = vsel %vm2933_vm1, %v2934_v10, %v15783_v49  ;;  %v15789_v30 = vld [vmem:[#allocation13_spill] sm:$0xff] }
 0x4e0   : > { %v8361_v58 = vpack.c.bf16 %v3249_v23, %v3041_v63  ;;  %v12160_v34 = vpop.eup %8818  ;;  %v4051_v46 = vshll.u32 %v12119_v22, %v4049_v2  ;;  %v4052_v38 = vshrl.u32 %v12112_v39, %v4050_v36  ;;  %v4055_v44 = vadd.s32 127, %v4054_v61  ;;  %v15790_v26 = vld [vmem:[#allocation9_spill] sm:$0xff]  ;;  %v15795_v2 = vld [vmem:[#allocation32_spill] sm:$0xff] }
 0x4e1   : > { %vm2929_vm3 = vcmp.lt.s32.totalorder %v2928_v52, 2  ;;  %vm3138_vm15 = vcmp.eq.s32.totalorder %v3136_v32, 0  ;;  %v3139_v9 = vxor.u32 2147483648, %v15787_v12  ;;  %v3142_v29 = vxor.u32 2147483648, %v15788_v40 }
 0x4e2   : > { %8362 = vmatprep.subr.bf16.mxu0 %v8361_v58  ;;  %v2936_v59 = vsel %vm2929_vm3, %v2932_v14, %v2935_v6  ;;  %v4053_v55 = vor.u32 %v4052_v38, %v4051_v46  ;;  %v4056_v27 = vshll.u32 %v4055_v44, 23  ;;  %vm3141_vm13 = vcmp.eq.s32.totalorder %v3136_v32, 2  ;;  %v15797_v6 = vld [vmem:[#allocation25_spill] sm:$0xff] }
 0x4e3   : > { %v3440_v49 = vsub.s32 4, %v15789_v30  ;;  %vm3980_vm6 = vcmp.lt.s32.totalorder %v11737_v3, 0  ;;  %vm3134_vm2 = vweird.f32 %v15790_v26  ;;  %vm3137_vm9 = vcmp.lt.s32.totalorder %v3136_v32, 2 }
 0x4e4   : > { %v3140_v39 = vsel %vm3138_vm15, %v15788_v40, %v3139_v9  ;;  %v3143_v22 = vsel %vm3141_vm13, %v3142_v29, %v15787_v12  ;;  %v15791_v52 = vand.u32 2147483647, %v11737_v3  ;;  %v4057_v15 = vor.u32 4788187, %v4056_v27  ;;  %v15798_v40 = vld [vmem:[#allocation24_spill] sm:$0xff] }
 0x4e5   : > { %v2937_v17 = vsel %vm2926_vm14, nan, %v2936_v59  ;;  %v3144_v47 = vsel %vm3137_vm9, %v3140_v39, %v3143_v22  ;;  %vm15794_vm10 = vcmp.lt.s32.totalorder %v11337_v20, 0  ;;  %vm3446_vm8 = vweird.f32 %v11337_v20  ;;  %v15799_v39 = vld [vmem:[#allocation31_spill] sm:$0xff] }
 0x4e6   : > { %vm12173_vm4 = vcmp.le.f32.partialorder %v15791_v52, 0.7853982  ;;  %v3441_v48 = vsel %vm15794_vm10, %v3440_v49, %v15789_v30  ;;  %v3145_v32 = vsel %vm3134_vm2, nan, %v3144_v47  ;;  %v3648_v63 = vsub.s32 4, %v15795_v2 }
 0x4e7   : > { %v3443_v5 = vsel %vm11769_vm5, 0, %v3441_v48  ;;  %v4058_v43 = vand.u32 2147483647, %v4057_v15  ;;  %v4060_v36 = vcvt.s32.f32 %v4053_v55  ;;  %v8363_v61 = vpack.c.bf16 %v3145_v32, %v2937_v17  ;;  %v15800_v48 = vld [vmem:[#allocation19_spill] sm:$0xff] }
 0x4e8   : > { %v3447_v23 = vadd.s32 3, %v3443_v5  ;;  %v3451_v58 = vxor.u32 2147483648, %v11834_v42  ;;  %v3454_v60 = vxor.u32 2147483648, %v11830_v8  ;;  %vm15796_vm1 = vcmp.lt.s32.totalorder %v11535_v7, 0 }
 0x4e9   : > { %v3649_v14 = vsel %vm15796_vm1, %v3648_v63, %v15795_v2  ;;  %v3344_v46 = vand.u32 3, %v15797_v6  ;;  %v4061_v33 = vmul.f32 %v4060_v36, %v4058_v43  ;;  %8364 = vmatpush1.bf16.msra.mxu0 %v8363_v61  ;;  %vm3654_vm5 = vweird.f32 %v11535_v7  ;;  %v15801_v61 = vld [vmem:[#allocation29_spill] sm:$0xff] }
 0x4ea   : > { %v3448_v38 = vand.u32 3, %v3447_v23  ;;  %v3651_v44 = vsel %vm11907_vm11, 0, %v3649_v14  ;;  %v3659_v59 = vxor.u32 2147483648, %v12007_v13  ;;  %v3662_v9 = vxor.u32 2147483648, %v12003_v57  ;;  %v15803_v14 = vld [vmem:[#allocation16_spill] sm:$0xff] }
 0x4eb   : > { %v3655_v12 = vadd.s32 3, %v3651_v44  ;;  %vm3345_vm14 = vcmp.lt.s32.totalorder %v3344_v46, 2  ;;  %v3347_v29 = vxor.u32 2147483648, %v15798_v40  ;;  %v4062_v55 = vxor.u32 2147483648, %v4061_v33 }
 0x4ec   : > { %vm3450_vm3 = vcmp.eq.s32.totalorder %v3448_v38, 0  ;;  %vm3453_vm15 = vcmp.eq.s32.totalorder %v3448_v38, 2  ;;  %vm3346_vm13 = vcmp.eq.s32.totalorder %v3344_v46, 0  ;;  %vm3449_vm2 = vcmp.lt.s32.totalorder %v3448_v38, 2 }
 0x4ed   : > { %v3452_v27 = vsel %vm3450_vm3, %v11830_v8, %v3451_v58  ;;  %v3455_v62 = vsel %vm3453_vm15, %v3454_v60, %v11834_v42  ;;  %v3656_v30 = vand.u32 3, %v3655_v12  ;;  %v4063_v49 = vsel %vm3980_vm6, %v4062_v55, %v4061_v33  ;;  %v15802_v60 = vld [vmem:[#allocation17_spill] sm:$0xff] }
 0x4ee   : > { %v3456_v26 = vsel %vm3449_vm2, %v3452_v27, %v3455_v62  ;;  %vm3349_vm11 = vcmp.eq.s32.totalorder %v3344_v46, 2  ;;  %v3350_v22 = vxor.u32 2147483648, %v15799_v39  ;;  %v4066_v52 = vsel %vm12173_vm4, %v11737_v3, %v4063_v49 }
 0x4ef   : > { %v3457_v15 = vsel %vm3446_vm8, nan, %v3456_v26  ;;  %vm3658_vm9 = vcmp.eq.s32.totalorder %v3656_v30, 0  ;;  %v3348_v8 = vsel %vm3346_vm13, %v15799_v39, %v3347_v29  ;;  %8820 = vcosq.f32 %v4066_v52 }
 0x4f0   : > { %v3660_v42 = vsel %vm3658_vm9, %v12003_v57, %v3659_v59  ;;  %vm3661_vm10 = vcmp.eq.s32.totalorder %v3656_v30, 2  ;;  %v3351_v17 = vsel %vm3349_vm11, %v3350_v22, %v15798_v40  ;;  %8822 = vsinq.f32 %v4066_v52 }
 0x4f1   : > { %vm3657_vm1 = vcmp.lt.s32.totalorder %v3656_v30, 2  ;;  %v3663_v47 = vsel %vm3661_vm10, %v3662_v9, %v12007_v13  ;;  %v3552_v32 = vand.u32 3, %v15800_v48  ;;  %v3352_v2 = vsel %vm3345_vm14, %v3348_v8, %v3351_v17 }
 0x4f2   : > { %v3664_v5 = vsel %vm3657_vm1, %v3660_v42, %v3663_v47  ;;  %v3555_v20 = vxor.u32 2147483648, %v11983_v54  ;;  %v3558_v63 = vxor.u32 2147483648, %v11977_v11  ;;  %v3856_v23 = vsub.s32 4, %v15801_v61 }
 0x4f3   : > { %v3665_v43 = vsel %vm3654_vm5, nan, %v3664_v5  ;;  %vm3553_vm8 = vcmp.lt.s32.totalorder %v3552_v32, 2  ;;  %vm3554_vm3 = vcmp.eq.s32.totalorder %v3552_v32, 0  ;;  %vm3557_vm15 = vcmp.eq.s32.totalorder %v3552_v32, 2 }
 0x4f4   : > { %v8365_v57 = vpack.c.bf16 %v3665_v43, %v3457_v15  ;;  %v3556_v36 = vsel %vm3554_vm3, %v11977_v11, %v3555_v20  ;;  %v3559_v13 = vsel %vm3557_vm15, %v3558_v63, %v11983_v54  ;;  %v3963_v58 = vsel %vm12086_vm7, 0, %v12047_v0  ;;  %v8158_v63 = vld [vmem:[%s15241_s3 + $0x40] sm:$0xff] }
 0x4f5   : > { %vm3342_vm14 = vweird.f32 %v15802_v60  ;;  %vm3550_vm13 = vweird.f32 %v15803_v14  ;;  %v3560_v7 = vsel %vm3553_vm8, %v3556_v36, %v3559_v13  ;;  %v3857_v11 = vsel %vm3772_vm12, %v3856_v23, %v15801_v61  ;;  %v8162_v43 = vld [vmem:[%s15241_s3 + $0x60] sm:$0xff]  ;;  %v8164_v36 = vld [vmem:[%s15241_s3 + $0x70] sm:$0xff]  ;;  %v8165_v13 = vld [vmem:[%s15241_s3 + $0x78] sm:$0xff]  ;;  %v4103_v61 = vpop.permute.xlu0 %4102 }
 0x4f6   : > { %8366 = vmatprep.subr.bf16.mxu0 %v8365_v57  ;;  %v3353_v6 = vsel %vm3342_vm14, nan, %v3352_v2  ;;  %v3561_v46 = vsel %vm3550_vm13, nan, %v3560_v7  ;;  %v4064_v54 = vsub.s32 4, %v12100_v45  ;;  %v3859_v38 = vsel %vm12011_vm0, 0, %v3857_v11  ;;  %v8163_v57 = vld [vmem:[%s15241_s3 + $0x68] sm:$0xff] }
 0x4f7   : > { %v8367_v33 = vpack.c.bf16 %v3561_v46, %v3353_v6  ;;  %v3760_v0 = vand.u32 3, %v11965_v28  ;;  %v3967_v35 = vadd.s32 3, %v3963_v58  ;;  %v3863_v44 = vadd.s32 3, %v3859_v38  ;;  %v4108_v46 = vpop.permute.xlu1 %4107 }
 0x4f8   : > { %v4065_v59 = vsel %vm3980_vm6, %v4064_v54, %v12100_v45  ;;  %v3867_v12 = vxor.u32 2147483648, %v12143_v24  ;;  %v3870_v9 = vxor.u32 2147483648, %v12103_v50  ;;  %vm3862_vm12 = vweird.f32 %v11654_v4 }
 0x4f9   : > { %8368 = vmatpush1.bf16.msra.mxu0 %v8367_v33  ;;  %v4067_v40 = vsel %vm12173_vm4, 0, %v4065_v59  ;;  %v8821_v29 = vpop.eup %8820  ;;  %v3864_v19 = vand.u32 3, %v3863_v44  ;;  %v3763_v28 = vxor.u32 2147483648, %v12031_v21  ;;  %vm3762_vm0 = vcmp.eq.s32.totalorder %v3760_v0, 0 }
 0x4fa   : > { %v4071_v55 = vadd.s32 3, %v4067_v40  ;;  %v8823_v27 = vpop.eup %8822  ;;  %v4078_v62 = vxor.u32 2147483648, %v8821_v29  ;;  %vm3765_vm7 = vcmp.eq.s32.totalorder %v3760_v0, 2  ;;  %v3766_v45 = vxor.u32 2147483648, %v12017_v1 }
 0x4fb   : > { %vm3866_vm6 = vcmp.eq.s32.totalorder %v3864_v19, 0  ;;  %vm3869_vm5 = vcmp.eq.s32.totalorder %v3864_v19, 2  ;;  %v3968_v49 = vand.u32 3, %v3967_v35  ;;  %vm3865_vm2 = vcmp.lt.s32.totalorder %v3864_v19, 2 }
 0x4fc   : > { %v4072_v30 = vand.u32 3, %v4071_v55  ;;  %v3868_v10 = vsel %vm3866_vm6, %v12103_v50, %v3867_v12  ;;  %v3871_v26 = vsel %vm3869_vm5, %v3870_v9, %v12143_v24  ;;  %v4075_v39 = vxor.u32 2147483648, %v8823_v27 }
 0x4fd   : > { %v3872_v22 = vsel %vm3865_vm2, %v3868_v10, %v3871_v26  ;;  %v3764_v52 = vsel %vm3762_vm0, %v12017_v1, %v3763_v28  ;;  %v3767_v42 = vsel %vm3765_vm7, %v3766_v45, %v12031_v21  ;;  %vm4070_vm10 = vweird.f32 %v11737_v3 }
 0x4fe   : > { %vm4074_vm4 = vcmp.eq.s32.totalorder %v4072_v30, 0  ;;  %vm4077_vm11 = vcmp.eq.s32.totalorder %v4072_v30, 2  ;;  %vm4073_vm9 = vcmp.lt.s32.totalorder %v4072_v30, 2  ;;  %vm3761_vm1 = vcmp.lt.s32.totalorder %v3760_v0, 2 }
 0x4ff   : > { %v4076_v15 = vsel %vm4074_vm4, %v8821_v29, %v4075_v39  ;;  %v4079_v8 = vsel %vm4077_vm11, %v4078_v62, %v8823_v27  ;;  %v3971_v50 = vxor.u32 2147483648, %v12160_v34  ;;  %v3873_v24 = vsel %vm3862_vm12, nan, %v3872_v22 }
 0x500   : > { %v4080_v17 = vsel %vm4073_vm9, %v4076_v15, %v4079_v8  ;;  %vm3970_vm8 = vcmp.eq.s32.totalorder %v3968_v49, 0  ;;  %v3974_v48 = vxor.u32 2147483648, %v12155_v51  ;;  %v3768_v32 = vsel %vm3761_vm1, %v3764_v52, %v3767_v42 }
 0x501   : > { %v4081_v47 = vsel %vm4070_vm10, nan, %v4080_v17  ;;  %v3972_v5 = vsel %vm3970_vm8, %v12155_v51, %v3971_v50  ;;  %vm3973_vm3 = vcmp.eq.s32.totalorder %v3968_v49, 2  ;;  %vm3969_vm15 = vcmp.lt.s32.totalorder %v3968_v49, 2 }
 0x502   : > { %v8369_v1 = vpack.c.bf16 %v4081_v47, %v3873_v24  ;;  %v3975_v21 = vsel %vm3973_vm3, %v3974_v48, %v12160_v34  ;;  %vm3758_vm14 = vweird.f32 %v11629_v56  ;;  %vm3966_vm13 = vweird.f32 %v11662_v25  ;;  %v8159_v34 = vld [vmem:[%s15241_s3 + $0x48] sm:$0xff]  ;;  %v8160_v56 = vld [vmem:[%s15241_s3 + $0x50] sm:$0xff]  ;;  %v8161_v25 = vld [vmem:[%s15241_s3 + $0x58] sm:$0xff] }
 0x503   : > { %v3976_v3 = vsel %vm3969_vm15, %v3972_v5, %v3975_v21  ;;  %v3769_v4 = vsel %vm3758_vm14, nan, %v3768_v32  ;;  %vm15804_vm12 = vcmask 523264   ;;  %v15805_v51 = vmov 0.0  }
 0x504   : > { %8370 = vmatprep.subr.bf16.mxu0 %v8369_v1  ;;  %v3977_v2 = vsel %vm3966_vm13, nan, %v3976_v3  ;;  %vm15806_vm0 = vmmov %vm15804_vm12 }
 0x505   : > { %v8371_v20 = vpack.c.bf16 %v3977_v2, %v3769_v4  ;;  %vm15807_vm7 = vmmov %vm15806_vm0 }
 0x506   : > { %vm15808_vm6 = vmmov %vm15806_vm0 }
 0x507   : > { %8372 = vmatpush1.bf16.msra.mxu0 %v8371_v20  ;;  %vm15809_vm5 = vmmov %vm15806_vm0 }
 0x508   : > { %vm15810_vm2 = vmmov %vm15806_vm0 }
 0x509   : > { %vm15811_vm4 = vmmov %vm15806_vm0 }
 0x50a   : > { %8174 = vmatmul.mubr.msk.f32.vlgmr.msra.gmra.mrb[16].mxu0 %vm15804_vm12, %v8158_v63  ;;  %vm15812_vm11 = vmmov %vm15806_vm0 }
 0x50b   : > { %4234 = vmatprep.mubr.f32.mxu0 %v15805_v51 }
 0x50e   : > { %8175 = vmatmul.mubr.msk.f32.gmra.mrb[18].mxu0 %vm15806_vm0, %v8159_v34 }
 0x50f   : > { %4240 = vmatprep.mubr.f32.mxu0 %v15805_v51 }
 0x512   : > { %8176 = vmatmul.mubr.msk.f32.gmra.mrb[20].mxu0 %vm15807_vm7, %v8160_v56 }
 0x513   : > { %4246 = vmatprep.mubr.f32.mxu0 %v15805_v51 }
 0x516   : > { %8177 = vmatmul.mubr.msk.f32.gmra.mrb[22].mxu0 %vm15808_vm6, %v8161_v25 }
 0x517   : > { %4252 = vmatprep.mubr.f32.mxu0 %v15805_v51 }
 0x51a   : > { %8178 = vmatmul.mubr.msk.f32.gmra.mrb[24].mxu0 %vm15809_vm5, %v8162_v43 }
 0x51b   : > { %4258 = vmatprep.mubr.f32.mxu0 %v15805_v51 }
 0x51e   : > { %8179 = vmatmul.mubr.msk.f32.gmra.mrb[26].mxu0 %vm15810_vm2, %v8163_v57 }
 0x51f   : > { %4264 = vmatprep.mubr.f32.mxu0 %v15805_v51 }
 0x522   : > { %8180 = vmatmul.mubr.msk.f32.gmra.mrb[28].mxu0 %vm15811_vm4, %v8164_v36 }
 0x523   : > { %4270 = vmatprep.mubr.f32.mxu0 %v15805_v51 }
 0x526   : > { %8181 = vmatmul.mubr.msk.f32.gmra.mrb[30].mxu0 %vm15812_vm11, %v8165_v13 }
 0x527   : > { %7874 = vmatprep.mubr.f32.mxu0 %v15805_v51 }
 0x5dd   : > { %v4230_v23 = vpop.f32.mrb[16].mxu0 }
 0x5de   : > { %v12297_v58 = vadd.f32 %v4230_v23, %v4103_v61  ;;  %v4232_v60 = vpop.f32.mrb[17].mxu0 }
 0x5df   : > { %v12299_v14 = vadd.f32 %v4232_v60, %v4103_v61 }
 0x5e0   : > { %15813 = vst [vmem:[#allocation39_spill] sm:$0xff] %v12297_v58  ;;  %v4277_v7 = vand.u32 2147483647, %v12297_v58  ;;  %v4280_v6 = vand.u32 2139095040, %v12297_v58 }
 0x5e1   : > { %v4381_v11 = vand.u32 2147483647, %v12299_v14  ;;  %v4384_v54 = vand.u32 2139095040, %v12299_v14  ;;  %v4236_v33 = vpop.f32.mrb[18].mxu0 }
 0x5e2   : > { %v4281_v38 = vshrl.u32 %v4280_v6, 23  ;;  %v12305_v0 = vadd.f32 %v4236_v33, %v4108_v46  ;;  %v4238_v35 = vpop.f32.mrb[19].mxu0  ;;  %v4284_v44 = vand.u32 8388607, %v4277_v7 }
 0x5e3   : > { %v4385_v59 = vshrl.u32 %v4384_v54, 23  ;;  %v4388_v12 = vand.u32 8388607, %v4381_v11  ;;  %v12318_v15 = vadd.f32 %v4238_v35, %v4108_v46 }
 0x5e4   : > { %15814 = vst [vmem:[#allocation23_spill] sm:$0xff] %v12305_v0  ;;  %v8182_v9 = vadd.s32 4294967169, %v4281_v38  ;;  %v4488_v29 = vand.u32 2139095040, %v12305_v0  ;;  %v4285_v28 = vor.u32 8388608, %v4284_v44  ;;  %v15404_v24 = vand.u32 2147483647, %v12305_v0 }
 0x5e5   : > { %v8186_v40 = vadd.s32 4294967169, %v4385_v59  ;;  %v12312_v19 = vpop.f32.mrb[20].mxu0  ;;  %v4389_v27 = vor.u32 8388608, %v4388_v12 }
 0x5e6   : > { %v4287_v55 = vadd.s32 1, %v8182_v9  ;;  %v4489_v45 = vshrl.u32 %v4488_v29, 23  ;;  %v12314_v30 = vpop.f32.mrb[21].mxu0  ;;  %v12322_v42 = vshll.u32 %v4285_v28, 8 }
 0x5e7   : > { %v4391_v62 = vadd.s32 1, %v8186_v40  ;;  %v12326_v50 = vshll.u32 %v4389_v27, 8 }
 0x5e8   : > { %vm4288_vm9 = vcmp.gt.s32.totalorder %v4287_v55, 0  ;;  %v8190_v10 = vadd.s32 4294967169, %v4489_v45 }
 0x5e9   : > { %v4289_v49 = vsel %vm4288_vm9, %v4287_v55, 0  ;;  %vm4392_vm10 = vcmp.gt.s32.totalorder %v4391_v62, 0  ;;  %v12316_v26 = vpop.f32.mrb[22].mxu0 }
 0x5ea   : > { %v4290_v39 = vshrl.u32 %v4289_v49, 5  ;;  %v4291_v22 = vand.u32 31, %v4289_v49  ;;  %v4393_v52 = vsel %vm4392_vm10, %v4391_v62, 0  ;;  %v12320_v8 = vpop.f32.mrb[23].mxu0  ;;  %v12330_v32 = vadd.s32 1, %v8190_v10 }
 0x5eb   : > { %v12324_v17 = vshrl.u32 %v4393_v52, 5  ;;  %v4395_v1 = vand.u32 31, %v4393_v52 }
 0x5ec   : > { %v4292_v47 = vsub.s32 32, %v4291_v22  ;;  %v4294_v48 = vshll.u32 %v15512_v31, %v4291_v22  ;;  %v4297_v5 = vshll.u32 %v15679_v53, %v4291_v22  ;;  %v4300_v21 = vshll.u32 %v15680_v41, %v4291_v22 }
 0x5ed   : > { %v4303_v3 = vshll.u32 %v15681_v16, %v4291_v22  ;;  %v4306_v4 = vshll.u32 %v15682_v37, %v4291_v22  ;;  %vm4309_vm1 = vcmp.lt.s32.totalorder %v4290_v39, 1  ;;  %vm4310_vm8 = vcmp.lt.s32.totalorder %v4290_v39, 2  ;;  %v12342_v61 = vpop.f32.mrb[24].mxu0 }
 0x5ee   : > { %v4295_v2 = vshrl.u32 %v15679_v53, %v4292_v47  ;;  %v4298_v20 = vshrl.u32 %v15680_v41, %v4292_v47  ;;  %v4301_v63 = vshrl.u32 %v15681_v16, %v4292_v47  ;;  %v4293_v34 = vshrl.u32 %v15512_v31, %v4292_v47 }
 0x5ef   : > { %v4304_v56 = vshrl.u32 %v15682_v37, %v4292_v47  ;;  %v4307_v25 = vshrl.u32 %v15683_v18, %v4292_v47  ;;  %v4396_v13 = vsub.s32 32, %v4395_v1  ;;  %vm4311_vm3 = vcmp.lt.s32.totalorder %v4290_v39, 3 }
 0x5f0   : > { %v4296_v43 = vor.u32 %v4295_v2, %v4294_v48  ;;  %v4299_v57 = vor.u32 %v4298_v20, %v4297_v5  ;;  %v4302_v36 = vor.u32 %v4301_v63, %v4300_v21  ;;  %vm4312_vm15 = vcmp.lt.s32.totalorder %v4290_v39, 4 }
 0x5f1   : > { %v4305_v23 = vor.u32 %v4304_v56, %v4303_v3  ;;  %v4308_v60 = vor.u32 %v4307_v25, %v4306_v4  ;;  %v4398_v59 = vshll.u32 %v15512_v31, %v4395_v1  ;;  %v4399_v40 = vshrl.u32 %v15679_v53, %v4396_v13 }
 0x5f2   : > { %v4313_v6 = vsel %vm4309_vm1, %v4293_v34, %v4296_v43  ;;  %v4314_v46 = vsel %vm4312_vm15, %v4302_v36, 2102212464  ;;  %v4317_v54 = vsel %vm4309_vm1, %v4296_v43, %v4299_v57  ;;  %v4321_v33 = vsel %vm4309_vm1, %v4299_v57, %v4302_v36 }
 0x5f3   : > { %v4315_v38 = vsel %vm4311_vm3, %v4299_v57, %v4314_v46  ;;  %v4318_v35 = vsel %vm4312_vm15, %v4305_v23, 920167782  ;;  %v4322_v44 = vsel %vm4312_vm15, %v4308_v60, 1326507024  ;;  %v4401_v29 = vshll.u32 %v15679_v53, %v4395_v1 }
 0x5f4   : > { %v4319_v12 = vsel %vm4311_vm3, %v4302_v36, %v4318_v35  ;;  %v4323_v9 = vsel %vm4311_vm3, %v4305_v23, %v4322_v44  ;;  %v4316_v55 = vsel %vm4310_vm8, %v4313_v6, %v4315_v38  ;;  %v4402_v62 = vshrl.u32 %v15680_v41, %v4396_v13 }
 0x5f5   : > { %v4320_v28 = vsel %vm4310_vm8, %v4317_v54, %v4319_v12  ;;  %v4324_v27 = vsel %vm4310_vm8, %v4321_v33, %v4323_v9  ;;  %v4400_v52 = vor.u32 %v4399_v40, %v4398_v59  ;;  %v4404_v48 = vshll.u32 %v15680_v41, %v4395_v1 }
 0x5f6   : > { %v12355_v45 = vmul.u32.u64.low %v12322_v42, %v4324_v27  ;;  %v12356_v49 = vmul.u32.u64.high %v12322_v42, %v4324_v27, %v12355_v45  ;;  %v12359_v10 = vmul.u32.u64.low %v12322_v42, %v4320_v28  ;;  %v12360_v22 = vmul.u32.u64.high %v12322_v42, %v4320_v28, %v12359_v10 }
 0x5f7   : > { %v4403_v47 = vor.u32 %v4402_v62, %v4401_v29  ;;  %v4405_v5 = vshrl.u32 %v15681_v16, %v4396_v13  ;;  %v4397_v39 = vshrl.u32 %v15512_v31, %v4396_v13  ;;  %v4407_v21 = vshll.u32 %v15681_v16, %v4395_v1  ;;  %v12401_v45 = vpop.f32.mrb[25].mxu0 }
 0x5f8   : > { %v4408_v3 = vshrl.u32 %v15682_v37, %v4396_v13  ;;  %v4411_v4 = vshrl.u32 %v15683_v18, %v4396_v13  ;;  %v4332_v2 = vmul.u32 %v12322_v42, %v4316_v55  ;;  %v4410_v63 = vshll.u32 %v15682_v37, %v4395_v1 }
 0x5f9   : > { %v4406_v20 = vor.u32 %v4405_v5, %v4404_v48  ;;  %vm4413_vm14 = vcmp.lt.s32.totalorder %v12324_v17, 1  ;;  %vm4334_vm13 = vc.u32 %v12356_v49, %v12359_v10  ;;  %v4335_v34 = vadd.s32 1, %v12360_v22 }
 0x5fa   : > { %v4409_v56 = vor.u32 %v4408_v3, %v4407_v21  ;;  %vm4414_vm12 = vcmp.lt.s32.totalorder %v12324_v17, 2  ;;  %v4412_v25 = vor.u32 %v4411_v4, %v4410_v63  ;;  %vm4415_vm0 = vcmp.lt.s32.totalorder %v12324_v17, 3 }
 0x5fb   : > { %vm4416_vm7 = vcmp.lt.s32.totalorder %v12324_v17, 4  ;;  %v4421_v43 = vsel %vm4413_vm14, %v4400_v52, %v4403_v47  ;;  %v4336_v42 = vsel %vm4334_vm13, %v4335_v34, %v12360_v22  ;;  %v4425_v36 = vsel %vm4413_vm14, %v4403_v47, %v4406_v20 }
 0x5fc   : > { %v4418_v57 = vsel %vm4416_vm7, %v4406_v20, 2102212464  ;;  %v4422_v1 = vsel %vm4416_vm7, %v4409_v56, 920167782  ;;  %v4337_v13 = vadd.s32 %v4336_v42, %v4332_v2  ;;  %v4417_v23 = vsel %vm4413_vm14, %v4397_v39, %v4400_v52 }
 0x5fd   : > { %v4423_v60 = vsel %vm4415_vm0, %v4406_v20, %v4422_v1  ;;  %v4426_v6 = vsel %vm4416_vm7, %v4412_v25, 1326507024  ;;  %v4419_v46 = vsel %vm4415_vm0, %v4403_v47, %v4418_v57  ;;  %vm4496_vm6 = vcmp.gt.s32.totalorder %v12330_v32, 0 }
 0x5fe   : > { %v4424_v54 = vsel %vm4414_vm12, %v4421_v43, %v4423_v60  ;;  %v4427_v33 = vsel %vm4415_vm0, %v4409_v56, %v4426_v6  ;;  %v4338_v38 = vadd.s32 536870912, %v4337_v13  ;;  %v4492_v40 = vand.u32 8388607, %v15404_v24 }
 0x5ff   : > { %v4428_v35 = vsel %vm4414_vm12, %v4425_v36, %v4427_v33  ;;  %v12385_v44 = vmul.u32.u64.low %v12326_v50, %v4424_v54  ;;  %v12386_v59 = vmul.u32.u64.high %v12326_v50, %v4424_v54, %v12385_v44  ;;  %v4497_v29 = vsel %vm4496_vm6, %v12330_v32, 0 }
 0x600   : > { %v12390_v12 = vmul.u32.u64.low %v12326_v50, %v4428_v35  ;;  %v12391_v9 = vmul.u32.u64.high %v12326_v50, %v4428_v35, %v12390_v12  ;;  %v12396_v55 = vshrl.u32 %v4338_v38, 30  ;;  %v4420_v28 = vsel %vm4414_vm12, %v4417_v23, %v4419_v46 }
 0x601   : > { %v4499_v27 = vand.u32 31, %v4497_v29  ;;  %v4592_v62 = vand.u32 2139095040, %v12318_v15  ;;  %v4439_v52 = vadd.s32 1, %v12386_v59  ;;  %v4436_v48 = vmul.u32 %v12326_v50, %v4420_v28 }
 0x602   : > { %v4340_v22 = vshll.u32 %v12396_v55, 30  ;;  %vm4438_vm5 = vc.u32 %v12391_v9, %v12385_v44  ;;  %v4493_v32 = vor.u32 8388608, %v4492_v40  ;;  %v15403_v39 = vand.u32 2147483647, %v12318_v15 }
 0x603   : > { %v4500_v47 = vsub.s32 32, %v4499_v27  ;;  %v4440_v17 = vsel %vm4438_vm5, %v4439_v52, %v12386_v59  ;;  %v4593_v21 = vshrl.u32 %v4592_v62, 23  ;;  %v4502_v4 = vshll.u32 %v15512_v31, %v4499_v27 }
 0x604   : > { %v12408_v5 = vsub.s32 %v4337_v13, %v4340_v22  ;;  %v4441_v3 = vadd.s32 %v4440_v17, %v4436_v48  ;;  %v4498_v63 = vshrl.u32 %v4497_v29, 5  ;;  %v4505_v34 = vshll.u32 %v15679_v53, %v4499_v27 }
 0x605   : > { %v4503_v2 = vshrl.u32 %v15679_v53, %v4500_v47  ;;  %v4506_v20 = vshrl.u32 %v15680_v41, %v4500_v47  ;;  %v4509_v56 = vshrl.u32 %v15681_v16, %v4500_v47  ;;  %v4508_v42 = vshll.u32 %v15680_v41, %v4499_v27 }
 0x606   : > { %v4343_v50 = vsub.s32 0, %v12408_v5  ;;  %v4442_v25 = vadd.s32 536870912, %v4441_v3  ;;  %v12419_v57 = vshll.u32 %v4493_v32, 8  ;;  %v4511_v13 = vshll.u32 %v15681_v16, %v4499_v27 }
 0x607   : > { %v4504_v43 = vor.u32 %v4503_v2, %v4502_v4  ;;  %v4507_v36 = vor.u32 %v4506_v20, %v4505_v34  ;;  %v4512_v23 = vshrl.u32 %v15682_v37, %v4500_v47  ;;  %v4510_v6 = vor.u32 %v4509_v56, %v4508_v42 }
 0x608   : > { %v8183_v1 = vmin.u32 %v4343_v50, %v12408_v5  ;;  %v12424_v60 = vshrl.u32 %v4442_v25, 30  ;;  %v4514_v46 = vshll.u32 %v15682_v37, %v4499_v27  ;;  %v4515_v54 = vshrl.u32 %v15683_v18, %v4500_v47 }
 0x609   : > { %v4513_v38 = vor.u32 %v4512_v23, %v4511_v13  ;;  %vm4517_vm2 = vcmp.lt.s32.totalorder %v4498_v63, 1  ;;  %v8194_v35 = vadd.s32 4294967169, %v4593_v21  ;;  %vm4518_vm4 = vcmp.lt.s32.totalorder %v4498_v63, 2 }
 0x60a   : > { %v4345_v33 = vclz %v8183_v1  ;;  %v4444_v59 = vshll.u32 %v12424_v60, 30  ;;  %v4516_v12 = vor.u32 %v4515_v54, %v4514_v46  ;;  %vm4520_vm11 = vcmp.lt.s32.totalorder %v4498_v63, 4 }
 0x60b   : > { %vm4519_vm9 = vcmp.lt.s32.totalorder %v4498_v63, 3  ;;  %v4525_v29 = vsel %vm4517_vm2, %v4504_v43, %v4507_v36  ;;  %v4526_v28 = vsel %vm4520_vm11, %v4513_v38, 920167782  ;;  %v4522_v22 = vsel %vm4520_vm11, %v4510_v6, 2102212464 }
 0x60c   : > { %v8184_v40 = vadd.s32 4294967294, %v4345_v33  ;;  %v12430_v62 = vsub.s32 %v4441_v3, %v4444_v59  ;;  %v4527_v27 = vsel %vm4519_vm9, %v4510_v6, %v4526_v28  ;;  %v4529_v52 = vsel %vm4517_vm2, %v4507_v36, %v4510_v6 }
 0x60d   : > { %v4501_v48 = vshrl.u32 %v15512_v31, %v4500_v47  ;;  %v4528_v32 = vsel %vm4518_vm4, %v4525_v29, %v4527_v27  ;;  %v4530_v17 = vsel %vm4520_vm11, %v4516_v12, 1326507024  ;;  %v4599_v20 = vadd.s32 1, %v8194_v35 }
 0x60e   : > { %vm8185_vm10 = vcmp.lt.s32.totalorder %v8184_v40, 0  ;;  %v4447_v4 = vsub.s32 0, %v12430_v62  ;;  %v4531_v2 = vsel %vm4519_vm9, %v4513_v38, %v4530_v17  ;;  %v4523_v34 = vsel %vm4519_vm9, %v4507_v36, %v4522_v22  ;;  %v12461_v17 = vpop.f32.mrb[26].mxu0 }
 0x60f   : > { %v4348_v21 = vsel %vm8185_vm10, 0, %v8184_v40  ;;  %v4521_v3 = vsel %vm4517_vm2, %v4501_v48, %v4504_v43  ;;  %v4532_v56 = vsel %vm4518_vm4, %v4529_v52, %v4531_v2  ;;  %vm4600_vm1 = vcmp.gt.s32.totalorder %v4599_v20, 0  ;;  %v4113_v52 = vpop.permute.xlu0 %4112 }
 0x610   : > { %v4353_v50 = vsub.s32 4294967266, %v4348_v21  ;;  %v8187_v25 = vmin.u32 %v4447_v4, %v12430_v62  ;;  %v12443_v47 = vmul.u32.u64.low %v12419_v57, %v4532_v56  ;;  %v12444_v42 = vmul.u32.u64.high %v12419_v57, %v4532_v56, %v12443_v47 }
 0x611   : > { %v12447_v1 = vmul.u32.u64.low %v12419_v57, %v4528_v32  ;;  %v12448_v13 = vmul.u32.u64.high %v12419_v57, %v4528_v32, %v12447_v1  ;;  %v4596_v43 = vand.u32 8388607, %v15403_v39  ;;  %v4601_v36 = vsel %vm4600_vm1, %v4599_v20, 0 }
 0x612   : > { %v4354_v23 = vadd.s32 127, %v4353_v50  ;;  %v4449_v6 = vclz %v8187_v25  ;;  %v4349_v46 = vsub.s32 32, %v4348_v21  ;;  %v4524_v54 = vsel %vm4518_vm4, %v4521_v3, %v4523_v34 }
 0x613   : > { %v4603_v33 = vand.u32 31, %v4601_v36  ;;  %vm4542_vm8 = vc.u32 %v12444_v42, %v12447_v1  ;;  %v4333_v35 = vadd.s32 %v12359_v10, %v12356_v49  ;;  %v4543_v59 = vadd.s32 1, %v12448_v13 }
 0x614   : > { %v8188_v38 = vadd.s32 4294967294, %v4449_v6  ;;  %v4355_v12 = vshll.u32 %v4354_v23, 23  ;;  %v4540_v40 = vmul.u32 %v12419_v57, %v4524_v54  ;;  %v4597_v29 = vor.u32 8388608, %v4596_v43 }
 0x615   : > { %v4351_v28 = vshrl.u32 %v4333_v35, %v4349_v46  ;;  %v4544_v63 = vsel %vm4542_vm8, %v4543_v59, %v12448_v13  ;;  %v4604_v27 = vsub.s32 32, %v4603_v33  ;;  %v4350_v4 = vshll.u32 %v12408_v5, %v4348_v21 }
 0x616   : > { %vm8189_vm3 = vcmp.lt.s32.totalorder %v8188_v38, 0  ;;  %v4545_v32 = vadd.s32 %v4544_v63, %v4540_v40  ;;  %v4437_v49 = vadd.s32 %v12385_v44, %v12391_v9  ;;  %v12467_v10 = vadd.f32 %v12312_v19, %v4113_v52 }
 0x617   : > { %v4452_v22 = vsel %vm8189_vm3, 0, %v8188_v38  ;;  %v12470_v57 = vadd.f32 %v12314_v30, %v4113_v52  ;;  %v4356_v2 = vor.u32 4788187, %v4355_v12  ;;  %v12472_v3 = vshll.u32 %v4597_v29, 8 }
 0x618   : > { %v4457_v48 = vsub.s32 4294967266, %v4452_v22  ;;  %15815 = vst [vmem:[#allocation37_spill] sm:$0xff] %v12467_v10  ;;  %v4546_v50 = vadd.s32 536870912, %v4545_v32  ;;  %v4352_v34 = vor.u32 %v4351_v28, %v4350_v4  ;;  %v4602_v56 = vshrl.u32 %v4601_v36, 5 }
 0x619   : > { %15816 = vst [vmem:[#allocation35_spill] sm:$0xff] %v12470_v57  ;;  %v4607_v25 = vshrl.u32 %v15679_v53, %v4604_v27  ;;  %v4610_v5 = vshrl.u32 %v15680_v41, %v4604_v27  ;;  %v4606_v44 = vshll.u32 %v15512_v31, %v4603_v33  ;;  %v4613_v19 = vshrl.u32 %v15681_v16, %v4604_v27 }
 0x61a   : > { %v4458_v20 = vadd.s32 127, %v4457_v48  ;;  %v12476_v21 = vshrl.u32 %v4546_v50, 30  ;;  %v4616_v30 = vshrl.u32 %v15682_v37, %v4604_v27  ;;  %v4453_v9 = vsub.s32 32, %v4452_v22 }
 0x61b   : > { %v4609_v47 = vshll.u32 %v15679_v53, %v4603_v33  ;;  %v4615_v13 = vshll.u32 %v15681_v16, %v4603_v33  ;;  %v4619_v23 = vshrl.u32 %v15683_v18, %v4604_v27  ;;  %v4357_v6 = vand.u32 2147483647, %v4356_v2 }
 0x61c   : > { %v4459_v43 = vshll.u32 %v4458_v20, 23  ;;  %v4548_v36 = vshll.u32 %v12476_v21, 30  ;;  %v4612_v46 = vshll.u32 %v15680_v41, %v4603_v33  ;;  %v4608_v54 = vor.u32 %v4607_v25, %v4606_v44 }
 0x61d   : > { %v4611_v38 = vor.u32 %v4610_v5, %v4609_v47  ;;  %v4617_v35 = vor.u32 %v4616_v30, %v4615_v13  ;;  %v4618_v59 = vshll.u32 %v15682_v37, %v4603_v33  ;;  %v4359_v12 = vcvt.s32.f32 %v4352_v34 }
 0x61e   : > { %v12487_v40 = vsub.s32 %v4545_v32, %v4548_v36  ;;  %v4614_v29 = vor.u32 %v4613_v19, %v4612_v46  ;;  %v15402_v28 = vand.u32 2147483647, %v12467_v10  ;;  %v4454_v63 = vshll.u32 %v12430_v62, %v4452_v22 }
 0x61f   : > { %v4455_v52 = vshrl.u32 %v4437_v49, %v4453_v9  ;;  %v4605_v48 = vshrl.u32 %v15512_v31, %v4604_v27  ;;  %v4620_v4 = vor.u32 %v4619_v23, %v4618_v59  ;;  %v4460_v2 = vor.u32 4788187, %v4459_v43 }
 0x620   : > { %v4551_v20 = vsub.s32 0, %v12487_v40  ;;  %vm4621_vm15 = vcmp.lt.s32.totalorder %v4602_v56, 1  ;;  %vm4624_vm14 = vcmp.lt.s32.totalorder %v4602_v56, 4  ;;  %v4360_v50 = vmul.f32 %v4359_v12, %v4357_v6 }
 0x621   : > { %vm4623_vm13 = vcmp.lt.s32.totalorder %v4602_v56, 3  ;;  %v4629_v33 = vsel %vm4621_vm15, %v4608_v54, %v4611_v38  ;;  %v4630_v32 = vsel %vm4624_vm14, %v4617_v35, 920167782  ;;  %vm4622_vm12 = vcmp.lt.s32.totalorder %v4602_v56, 2 }
 0x622   : > { %v8191_v34 = vmin.u32 %v4551_v20, %v12487_v40  ;;  %v4626_v25 = vsel %vm4624_vm14, %v4614_v29, 2102212464  ;;  %v4631_v5 = vsel %vm4623_vm13, %v4614_v29, %v4630_v32  ;;  %v4456_v62 = vor.u32 %v4455_v52, %v4454_v63 }
 0x623   : > { %v4632_v22 = vsel %vm4622_vm12, %v4629_v33, %v4631_v5  ;;  %v4633_v27 = vsel %vm4621_vm15, %v4611_v38, %v4614_v29  ;;  %v4634_v49 = vsel %vm4624_vm14, %v4620_v4, 1326507024  ;;  %v4461_v44 = vand.u32 2147483647, %v4460_v2 }
 0x624   : > { %v4553_v19 = vclz %v8191_v34  ;;  %v4625_v30 = vsel %vm4621_vm15, %v4605_v48, %v4608_v54  ;;  %v4635_v9 = vsel %vm4623_vm13, %v4617_v35, %v4634_v49  ;;  %v4627_v47 = vsel %vm4623_vm13, %v4611_v38, %v4626_v25  ;;  %v12510_v35 = vpop.f32.mrb[27].mxu0 }
 0x625   : > { %v4636_v13 = vsel %vm4622_vm12, %v4633_v27, %v4635_v9  ;;  %v12500_v23 = vmul.u32.u64.low %v12472_v3, %v4632_v22  ;;  %v12501_v6 = vmul.u32.u64.high %v12472_v3, %v4632_v22, %v12500_v23  ;;  %v4361_v43 = vxor.u32 2147483648, %v4360_v50 }
 0x626   : > { %v8192_v36 = vadd.s32 4294967294, %v4553_v19  ;;  %v12505_v46 = vmul.u32.u64.low %v12472_v3, %v4636_v13  ;;  %v12506_v59 = vmul.u32.u64.high %v12472_v3, %v4636_v13, %v12505_v46  ;;  %vm4279_vm0 = vcmp.lt.s32.totalorder %v12297_v58, 0 }
 0x627   : > { %v4463_v12 = vcvt.s32.f32 %v4456_v62  ;;  %v4696_v54 = vand.u32 2139095040, %v12467_v10  ;;  %v4363_v38 = vsub.s32 4, %v12396_v55  ;;  %v4628_v29 = vsel %vm4622_vm12, %v4625_v30, %v4627_v47 }
 0x628   : > { %vm8193_vm7 = vcmp.lt.s32.totalorder %v8192_v36, 0  ;;  %v4800_v63 = vand.u32 2139095040, %v12470_v57  ;;  %v4647_v4 = vadd.s32 1, %v12501_v6  ;;  %v4362_v20 = vsel %vm4279_vm0, %v4361_v43, %v4360_v50 }
 0x629   : > { %v4464_v52 = vmul.f32 %v4463_v12, %v4461_v44  ;;  %v12515_v48 = vsel %vm8193_vm7, 0, %v8192_v36  ;;  %v4697_v2 = vshrl.u32 %v4696_v54, 23  ;;  %v4700_v33 = vand.u32 8388607, %v15402_v28  ;;  %v12544_v44 = vpop.permute.xlu1 %4117 }
 0x62a   : > { %v4561_v32 = vsub.s32 4294967266, %v12515_v48  ;;  %v4644_v34 = vmul.u32 %v12472_v3, %v4628_v29  ;;  %vm4646_vm6 = vc.u32 %v12506_v59, %v12500_v23  ;;  %vm12528_vm5 = vcmp.le.f32.partialorder %v4277_v7, 0.7853982 }
 0x62b   : > { %v8198_v56 = vadd.s32 4294967169, %v4697_v2  ;;  %v4648_v5 = vsel %vm4646_vm6, %v4647_v4, %v12501_v6  ;;  %v4801_v50 = vshrl.u32 %v4800_v63, 23  ;;  %v12536_v62 = vsel %vm4279_vm0, %v4363_v38, %v12396_v55 }
 0x62c   : > { %v4465_v22 = vxor.u32 2147483648, %v4464_v52  ;;  %v4649_v3 = vadd.s32 %v4648_v5, %v4644_v34  ;;  %v12541_v49 = vsel %vm12528_vm5, %v12297_v58, %v4362_v20  ;;  %vm4383_vm2 = vcmp.lt.s32.totalorder %v12299_v14, 0 }
 0x62d   : > { %v4703_v27 = vadd.s32 1, %v8198_v56  ;;  %v4701_v7 = vor.u32 8388608, %v4700_v33  ;;  %v4562_v19 = vadd.s32 127, %v4561_v32  ;;  %v8202_v9 = vadd.s32 4294967169, %v4801_v50 }
 0x62e   : > { %v4650_v30 = vadd.s32 536870912, %v4649_v3  ;;  %v4541_v47 = vadd.s32 %v12447_v1, %v12444_v42  ;;  %v12553_v6 = vadd.f32 %v12316_v26, %v12544_v44  ;;  %8824 = vcosq.f32 %v12541_v49 }
 0x62f   : > { %vm4704_vm4 = vcmp.gt.s32.totalorder %v4703_v27, 0  ;;  %v12558_v43 = vsel %vm4383_vm2, %v4465_v22, %v4464_v52  ;;  %v4557_v12 = vsub.s32 32, %v12515_v48  ;;  %v4558_v54 = vshll.u32 %v12487_v40, %v12515_v48 }
 0x630   : > { %v4705_v13 = vsel %vm4704_vm4, %v4703_v27, 0  ;;  %15819 = vst [vmem:[#allocation42_spill] sm:$0xff] %v12553_v6  ;;  %v12560_v36 = vshrl.u32 %v4650_v30, 30  ;;  %v12565_v42 = vshll.u32 %v4701_v7, 8  ;;  %v15401_v1 = vand.u32 2147483647, %v12470_v57 }
 0x631   : > { %v4707_v46 = vand.u32 31, %v4705_v13  ;;  %v4563_v26 = vshll.u32 %v4562_v19, 23  ;;  %v4807_v63 = vadd.s32 1, %v8202_v9  ;;  %v4706_v4 = vshrl.u32 %v4705_v13, 5 }
 0x632   : > { %v4652_v38 = vshll.u32 %v12560_v36, 30  ;;  %v4559_v22 = vshrl.u32 %v4541_v47, %v4557_v12  ;;  %vm12584_vm11 = vcmp.le.f32.partialorder %v4381_v11, 0.7853982  ;;  %8826 = vsinq.f32 %v12541_v49 }
 0x633   : > { %v4708_v29 = vsub.s32 32, %v4707_v46  ;;  %v4710_v52 = vshll.u32 %v15512_v31, %v4707_v46  ;;  %v4713_v2 = vshll.u32 %v15679_v53, %v4707_v46  ;;  %v4716_v20 = vshll.u32 %v15680_v41, %v4707_v46 }
 0x634   : > { %v12572_v33 = vsub.s32 %v4649_v3, %v4652_v38  ;;  %v4719_v32 = vshll.u32 %v15681_v16, %v4707_v46  ;;  %v4722_v5 = vshll.u32 %v15682_v37, %v4707_v46  ;;  %v12590_v38 = vand.u32 8388607, %v15401_v1 }
 0x635   : > { %v4711_v40 = vshrl.u32 %v15679_v53, %v4708_v29  ;;  %v4714_v48 = vshrl.u32 %v15680_v41, %v4708_v29  ;;  %v4717_v34 = vshrl.u32 %v15681_v16, %v4708_v29  ;;  %v4720_v56 = vshrl.u32 %v15682_v37, %v4708_v29 }
 0x636   : > { %v4723_v50 = vshrl.u32 %v15683_v18, %v4708_v29  ;;  %v4655_v27 = vsub.s32 0, %v12572_v33  ;;  %v4564_v46 = vor.u32 4788187, %v4563_v26  ;;  %vm4725_vm9 = vcmp.lt.s32.totalorder %v4706_v4, 1 }
 0x637   : > { %v4712_v7 = vor.u32 %v4711_v40, %v4710_v52  ;;  %v4715_v3 = vor.u32 %v4714_v48, %v4713_v2  ;;  %v4718_v30 = vor.u32 %v4717_v34, %v4716_v20  ;;  %v4721_v9 = vor.u32 %v4720_v56, %v4719_v32 }
 0x638   : > { %v4724_v13 = vor.u32 %v4723_v50, %v4722_v5  ;;  %v8195_v47 = vmin.u32 %v4655_v27, %v12572_v33  ;;  %vm4808_vm10 = vcmp.gt.s32.totalorder %v4807_v63, 0  ;;  %v4709_v12 = vshrl.u32 %v15512_v31, %v4708_v29  ;;  %v12594_v52 = vpop.eup %8824 }
 0x639   : > { %vm4726_vm1 = vcmp.lt.s32.totalorder %v4706_v4, 2  ;;  %vm4728_vm8 = vcmp.lt.s32.totalorder %v4706_v4, 4  ;;  %v4733_v11 = vsel %vm4725_vm9, %v4712_v7, %v4715_v3  ;;  %15822 = vst [vmem:[#allocation36_spill] sm:$0xff] %v12594_v52  ;;  %vm4727_vm3 = vcmp.lt.s32.totalorder %v4706_v4, 3 }
 0x63a   : > { %v4657_v2 = vclz %v8195_v47  ;;  %v4730_v20 = vsel %vm4728_vm8, %v4718_v30, 2102212464  ;;  %v4734_v40 = vsel %vm4728_vm8, %v4721_v9, 920167782  ;;  %v4729_v48 = vsel %vm4725_vm9, %v4709_v12, %v4712_v7 }
 0x63b   : > { %v4735_v32 = vsel %vm4727_vm3, %v4718_v30, %v4734_v40  ;;  %v4737_v34 = vsel %vm4725_vm9, %v4715_v3, %v4718_v30  ;;  %v4738_v56 = vsel %vm4728_vm8, %v4724_v13, 1326507024  ;;  %v4731_v5 = vsel %vm4727_vm3, %v4715_v3, %v4730_v20 }
 0x63c   : > { %v8196_v26 = vadd.s32 4294967294, %v4657_v2  ;;  %v4736_v50 = vsel %vm4726_vm1, %v4733_v11, %v4735_v32  ;;  %v4739_v27 = vsel %vm4727_vm3, %v4721_v9, %v4738_v56  ;;  %v4560_v1 = vor.u32 %v4559_v22, %v4558_v54  ;;  %v12646_v58 = vpop.eup %8826 }
 0x63d   : > { %v4740_v29 = vsel %vm4726_vm1, %v4737_v34, %v4739_v27  ;;  %v12599_v28 = vmul.u32.u64.low %v12565_v42, %v4736_v50  ;;  %v12600_v55 = vmul.u32.u64.high %v12565_v42, %v4736_v50, %v12599_v28  ;;  %v4809_v30 = vsel %vm4808_vm10, %v4807_v63, 0  ;;  %15823 = vst [vmem:[#allocation34_spill] sm:$0xff] %v12646_v58 }
 0x63e   : > { %vm8197_vm15 = vcmp.lt.s32.totalorder %v8196_v26, 0  ;;  %v12604_v47 = vmul.u32.u64.low %v12565_v42, %v4740_v29  ;;  %v12605_v7 = vmul.u32.u64.high %v12565_v42, %v4740_v29, %v12604_v47  ;;  %v4732_v3 = vsel %vm4726_vm1, %v4729_v48, %v4731_v5 }
 0x63f   : > { %v12608_v13 = vsel %vm8197_vm15, 0, %v8196_v26  ;;  %v4811_v9 = vand.u32 31, %v4809_v30  ;;  %v4904_v54 = vand.u32 2139095040, %v12553_v6  ;;  %v12617_v22 = vsel %vm12584_vm11, %v12299_v14, %v12558_v43  ;;  %v12627_v43 = vpop.f32.mrb[28].mxu0 }
 0x640   : > { %v4565_v12 = vand.u32 2147483647, %v4564_v46  ;;  %v4665_v63 = vsub.s32 4294967266, %v12608_v13  ;;  %v4751_v2 = vadd.s32 1, %v12600_v55  ;;  %v4567_v40 = vcvt.s32.f32 %v4560_v1 }
 0x641   : > { %v4812_v4 = vsub.s32 32, %v4811_v9  ;;  %v4748_v48 = vmul.u32 %v12565_v42, %v4732_v3  ;;  %vm4750_vm14 = vc.u32 %v12605_v7, %v12599_v28  ;;  %v4805_v49 = vor.u32 8388608, %v12590_v38 }
 0x642   : > { %v4752_v46 = vsel %vm4750_vm14, %v4751_v2, %v12600_v55  ;;  %v4905_v56 = vshrl.u32 %v4904_v54, 23  ;;  %v4568_v26 = vmul.f32 %v4567_v40, %v4565_v12  ;;  %v4661_v5 = vsub.s32 32, %v12608_v13 }
 0x643   : > { %v4815_v32 = vshrl.u32 %v15679_v53, %v4812_v4  ;;  %v4818_v34 = vshrl.u32 %v15680_v41, %v4812_v4  ;;  %v4753_v1 = vadd.s32 %v4752_v46, %v4748_v48  ;;  %v4810_v50 = vshrl.u32 %v4809_v30, 5 }
 0x644   : > { %v4666_v42 = vadd.s32 127, %v4665_v63  ;;  %v4814_v27 = vshll.u32 %v15512_v31, %v4811_v9  ;;  %v4817_v29 = vshll.u32 %v15679_v53, %v4811_v9  ;;  %v4821_v38 = vshrl.u32 %v15681_v16, %v4812_v4 }
 0x645   : > { %v4754_v47 = vadd.s32 536870912, %v4753_v1  ;;  %v4820_v55 = vshll.u32 %v15680_v41, %v4811_v9  ;;  %v4823_v3 = vshll.u32 %v15681_v16, %v4811_v9  ;;  %v4824_v2 = vshrl.u32 %v15682_v37, %v4812_v4 }
 0x646   : > { %v4816_v54 = vor.u32 %v4815_v32, %v4814_v27  ;;  %v4819_v12 = vor.u32 %v4818_v34, %v4817_v29  ;;  %v4826_v40 = vshll.u32 %v15682_v37, %v4811_v9  ;;  %v4827_v30 = vshrl.u32 %v15683_v18, %v4812_v4 }
 0x647   : > { %vm4487_vm13 = vcmp.lt.s32.totalorder %v12305_v0, 0  ;;  %v4645_v63 = vadd.s32 %v12500_v23, %v12506_v59  ;;  %v12644_v48 = vshrl.u32 %v4754_v47, 30  ;;  %v4822_v46 = vor.u32 %v4821_v38, %v4820_v55 }
 0x648   : > { %v4825_v39 = vor.u32 %v4824_v2, %v4823_v3  ;;  %v4569_v11 = vxor.u32 2147483648, %v4568_v26  ;;  %v4828_v20 = vor.u32 %v4827_v30, %v4826_v40  ;;  %v4845_v24 = vshll.u32 %v4805_v49, 8 }
 0x649   : > { %v8206_v51 = vadd.s32 4294967169, %v4905_v56  ;;  %v4667_v32 = vshll.u32 %v4666_v42, 23  ;;  %v4756_v9 = vshll.u32 %v12644_v48, 30  ;;  %vm4829_vm12 = vcmp.lt.s32.totalorder %v4810_v50, 1 }
 0x64a   : > { %vm4832_vm0 = vcmp.lt.s32.totalorder %v4810_v50, 4  ;;  %v15824_v34 = vand.u32 2147483647, %v12305_v0  ;;  %v4662_v23 = vshll.u32 %v12572_v33, %v12608_v13  ;;  %v4663_v59 = vshrl.u32 %v4645_v63, %v4661_v5 }
 0x64b   : > { %v4837_v49 = vsel %vm4829_vm12, %v4816_v54, %v4819_v12  ;;  %v4838_v56 = vsel %vm4832_vm0, %v4825_v39, 920167782  ;;  %v12658_v29 = vsub.s32 %v4753_v1, %v4756_v9  ;;  %v4813_v42 = vshrl.u32 %v15512_v31, %v4812_v4 }
 0x64c   : > { %vm12651_vm7 = vcmp.le.f32.partialorder %v15824_v34, 0.7853982  ;;  %vm4831_vm6 = vcmp.lt.s32.totalorder %v4810_v50, 3  ;;  %v4834_v38 = vsel %vm4832_vm0, %v4822_v46, 2102212464  ;;  %vm4830_vm4 = vcmp.lt.s32.totalorder %v4810_v50, 2 }
 0x64d   : > { %v4839_v47 = vsel %vm4831_vm6, %v4822_v46, %v4838_v56  ;;  %v4841_v55 = vsel %vm4829_vm12, %v4819_v12, %v4822_v46  ;;  %v4842_v3 = vsel %vm4832_vm0, %v4828_v20, 1326507024  ;;  %v4668_v2 = vor.u32 4788187, %v4667_v32 }
 0x64e   : > { %v4759_v40 = vsub.s32 0, %v12658_v29  ;;  %v4833_v33 = vsel %vm4829_vm12, %v4813_v42, %v4816_v54  ;;  %v4840_v13 = vsel %vm4830_vm4, %v4837_v49, %v4839_v47  ;;  %v4835_v5 = vsel %vm4831_vm6, %v4819_v12, %v4834_v38 }
 0x64f   : > { %v4843_v30 = vsel %vm4831_vm6, %v4825_v39, %v4842_v3  ;;  %v12665_v1 = vmul.u32.u64.low %v4845_v24, %v4840_v13  ;;  %v12666_v63 = vmul.u32.u64.high %v4845_v24, %v4840_v13, %v12665_v1  ;;  %v4664_v4 = vor.u32 %v4663_v59, %v4662_v23 }
 0x650   : > { %v8199_v9 = vmin.u32 %v4759_v40, %v12658_v29  ;;  %v4844_v34 = vsel %vm4830_vm4, %v4841_v55, %v4843_v30  ;;  %v4911_v46 = vadd.s32 1, %v8206_v51  ;;  %v4570_v20 = vsel %vm4487_vm13, %v4569_v11, %v4568_v26 }
 0x651   : > { %v12673_v32 = vmul.u32.u64.low %v4845_v24, %v4844_v34  ;;  %v12674_v56 = vmul.u32.u64.high %v4845_v24, %v4844_v34, %v12673_v32  ;;  %v15827_v54 = vand.u32 2147483647, %v12553_v6  ;;  %v4669_v39 = vand.u32 2147483647, %v4668_v2  ;;  %v12697_v2 = vpop.f32.mrb[29].mxu0 }
 0x652   : > { %v4761_v49 = vclz %v8199_v9  ;;  %v4836_v42 = vsel %vm4830_vm4, %v4833_v33, %v4835_v5  ;;  %vm4912_vm9 = vcmp.gt.s32.totalorder %v4911_v46, 0  ;;  %8828 = vcosq.f32 %v12617_v22 }
 0x653   : > { %v4908_v12 = vand.u32 8388607, %v15827_v54  ;;  %v15828_v23 = vsub.s32 4, %v12476_v21  ;;  %v4855_v11 = vadd.s32 1, %v12666_v63  ;;  %v4913_v26 = vsel %vm4912_vm9, %v4911_v46, 0 }
 0x654   : > { %v12691_v59 = vsel %vm12651_vm7, %v12305_v0, %v4570_v20  ;;  %v4671_v50 = vcvt.s32.f32 %v4664_v4  ;;  %v8200_v38 = vadd.s32 4294967294, %v4761_v49  ;;  %v4915_v47 = vand.u32 31, %v4913_v26 }
 0x655   : > { %v12685_v51 = vsel %vm4487_vm13, %v15828_v23, %v12476_v21  ;;  %v4749_v55 = vadd.s32 %v12599_v28, %v12605_v7  ;;  %v4852_v3 = vmul.u32 %v4845_v24, %v4836_v42  ;;  %vm4854_vm10 = vc.u32 %v12674_v56, %v12665_v1 }
 0x656   : > { %v4909_v21 = vor.u32 8388608, %v4908_v12  ;;  %v12699_v40 = vmul.f32 %v4671_v50, %v4669_v39  ;;  %vm8201_vm1 = vcmp.lt.s32.totalorder %v8200_v38, 0  ;;  %v4856_v33 = vsel %vm4854_vm10, %v4855_v11, %v12666_v63 }
 0x657   : > { %v4916_v13 = vsub.s32 32, %v4915_v47  ;;  %v4764_v5 = vsel %vm8201_vm1, 0, %v8200_v38  ;;  %v4857_v30 = vadd.s32 %v4856_v33, %v4852_v3  ;;  %v12702_v4 = vshrl.u32 %v4913_v26, 5 }
 0x658   : > { %v12706_v28 = vadd.f32 %v12320_v8, %v12544_v44  ;;  %v4769_v24 = vsub.s32 4294967266, %v4764_v5  ;;  %v4918_v7 = vshll.u32 %v15512_v31, %v4915_v47  ;;  %v4921_v9 = vshll.u32 %v15679_v53, %v4915_v47 }
 0x659   : > { %v4924_v34 = vshll.u32 %v15680_v41, %v4915_v47  ;;  %v4858_v46 = vadd.s32 536870912, %v4857_v30  ;;  %v4919_v20 = vshrl.u32 %v15679_v53, %v4916_v13  ;;  %v4922_v63 = vshrl.u32 %v15680_v41, %v4916_v13 }
 0x65a   : > { %v4925_v32 = vshrl.u32 %v15681_v16, %v4916_v13  ;;  %v4765_v54 = vsub.s32 32, %v4764_v5  ;;  %v4770_v12 = vadd.s32 127, %v4769_v24  ;;  %v4927_v39 = vshll.u32 %v15681_v16, %v4915_v47 }
 0x65b   : > { %v4928_v8 = vshrl.u32 %v15682_v37, %v4916_v13  ;;  %v4673_v44 = vxor.u32 2147483648, %v12699_v40  ;;  %v12717_v49 = vshrl.u32 %v4858_v46, 30  ;;  %v12719_v23 = vshll.u32 %v4909_v21, 8 }
 0x65c   : > { %v4926_v42 = vor.u32 %v4925_v32, %v4924_v34  ;;  %v4920_v11 = vor.u32 %v4919_v20, %v4918_v7  ;;  %v4923_v26 = vor.u32 %v4922_v63, %v4921_v9  ;;  %v5008_v38 = vand.u32 2139095040, %v12706_v28  ;;  %v12722_v3 = vpop.eup %8828 }
 0x65d   : > { %15829 = vst [vmem:[#allocation6_spill] sm:$0xff] %v12717_v49  ;;  %v4929_v50 = vor.u32 %v4928_v8, %v4927_v39  ;;  %v4771_v33 = vshll.u32 %v4770_v12, 23  ;;  %v4860_v24 = vshll.u32 %v12717_v49, 30  ;;  %v4930_v0 = vshll.u32 %v15682_v37, %v4915_v47 }
 0x65e   : > { %v4931_v52 = vshrl.u32 %v15683_v18, %v4916_v13  ;;  %vm4591_vm8 = vcmp.lt.s32.totalorder %v12318_v15, 0  ;;  %v4766_v34 = vshll.u32 %v12658_v29, %v4764_v5  ;;  %v4767_v21 = vshrl.u32 %v4749_v55, %v4765_v54 }
 0x65f   : > { %v4917_v7 = vshrl.u32 %v15512_v31, %v4916_v13  ;;  %vm4936_vm3 = vcmp.lt.s32.totalorder %v12702_v4, 4  ;;  %v12731_v9 = vsub.s32 %v4857_v30, %v4860_v24  ;;  %vm4933_vm15 = vcmp.lt.s32.totalorder %v12702_v4, 1 }
 0x660   : > { %v4932_v46 = vor.u32 %v4931_v52, %v4930_v0  ;;  %v4938_v20 = vsel %vm4936_vm3, %v4926_v42, 2102212464  ;;  %vm4934_vm14 = vcmp.lt.s32.totalorder %v12702_v4, 2  ;;  %vm4935_vm13 = vcmp.lt.s32.totalorder %v12702_v4, 3 }
 0x661   : > { %v4941_v47 = vsel %vm4933_vm15, %v4920_v11, %v4923_v26  ;;  %v4942_v29 = vsel %vm4936_vm3, %v4929_v50, 920167782  ;;  %v15830_v55 = vand.u32 2147483647, %v12318_v15  ;;  %v4772_v0 = vor.u32 4788187, %v4771_v33 }
 0x662   : > { %v4863_v52 = vsub.s32 0, %v12731_v9  ;;  %v4943_v5 = vsel %vm4935_vm13, %v4926_v42, %v4942_v29  ;;  %v4945_v30 = vsel %vm4933_vm15, %v4923_v26, %v4926_v42  ;;  %v4937_v63 = vsel %vm4933_vm15, %v4917_v7, %v4920_v11 }
 0x663   : > { %vm12742_vm12 = vcmp.le.f32.partialorder %v15830_v55, 0.7853982  ;;  %v4939_v32 = vsel %vm4935_vm13, %v4923_v26, %v4938_v20  ;;  %v4944_v54 = vsel %vm4934_vm14, %v4941_v47, %v4943_v5  ;;  %v4946_v12 = vsel %vm4936_vm3, %v4932_v46, 1326507024  ;;  %v4123_v47 = vpop.permute.xlu0 %4122 }
 0x664   : > { %v8203_v39 = vmin.u32 %v4863_v52, %v12731_v9  ;;  %v4947_v8 = vsel %vm4935_vm13, %v4929_v50, %v4946_v12  ;;  %v12753_v24 = vmul.u32.u64.low %v12719_v23, %v4944_v54  ;;  %v12754_v55 = vmul.u32.u64.high %v12719_v23, %v4944_v54, %v12753_v24  ;;  %v12796_v12 = vpop.f32.mrb[30].mxu0 }
 0x665   : > { %v15833_v42 = vsel %vm12528_vm5, 0, %v12536_v62  ;;  %8830 = vsinq.f32 %v12617_v22  ;;  %v4948_v26 = vsel %vm4934_vm14, %v4945_v30, %v4947_v8  ;;  %v5009_v33 = vshrl.u32 %v5008_v38, 23 }
 0x666   : > { %v12761_v11 = vadd.s32 3, %v15833_v42  ;;  %v4768_v7 = vor.u32 %v4767_v21, %v4766_v34  ;;  %v4865_v46 = vclz %v8203_v39  ;;  %v4574_v25 = vsel %vm12651_vm7, 0, %v12685_v51 }
 0x667   : > { %v12767_v50 = vmul.u32.u64.low %v12719_v23, %v4948_v26  ;;  %v12768_v20 = vmul.u32.u64.high %v12719_v23, %v4948_v26, %v12767_v50  ;;  %8832 = vcosq.f32 %v12691_v59  ;;  %v4940_v62 = vsel %vm4934_vm14, %v4937_v63, %v4939_v32 }
 0x668   : > { %15834 = vst [vmem:[#allocation41_spill] sm:$0xff] %v12761_v11  ;;  %v8210_v22 = vadd.s32 4294967169, %v5009_v33  ;;  %v4674_v38 = vsel %vm4591_vm8, %v4673_v44, %v12699_v40  ;;  %v4773_v34 = vand.u32 2147483647, %v4772_v0  ;;  %v8204_v21 = vadd.s32 4294967294, %v4865_v46 }
 0x669   : > { %v4959_v29 = vadd.s32 1, %v12754_v55  ;;  %v4779_v52 = vsub.s32 4, %v12644_v48  ;;  %v15409_v27 = vand.u32 2147483647, %v12706_v28  ;;  %v12783_v5 = vadd.f32 %v12342_v61, %v4123_v47 }
 0x66a   : > { %v5015_v51 = vadd.s32 1, %v8210_v22  ;;  %v4775_v4 = vcvt.s32.f32 %v4768_v7  ;;  %vm8205_vm5 = vcmp.lt.s32.totalorder %v8204_v21, 0  ;;  %v4956_v30 = vmul.u32 %v12719_v23, %v4940_v62 }
 0x66b   : > { %15835 = vst [vmem:[#allocation15_spill] sm:$0xff] %v12783_v5  ;;  %vm4958_vm0 = vc.u32 %v12768_v20, %v12753_v24  ;;  %v12791_v40 = vsel %vm12742_vm12, %v12318_v15, %v4674_v38  ;;  %v4868_v44 = vsel %vm8205_vm5, 0, %v8204_v21  ;;  %8834 = vsinq.f32 %v12691_v59 }
 0x66c   : > { %v4960_v0 = vsel %vm4958_vm0, %v4959_v29, %v12754_v55  ;;  %vm5016_vm7 = vcmp.gt.s32.totalorder %v5015_v51, 0  ;;  %v12794_v63 = vmul.f32 %v4775_v4, %v4773_v34  ;;  %v4869_v61 = vsub.s32 32, %v4868_v44 }
 0x66d   : > { %v4873_v32 = vsub.s32 4294967266, %v4868_v44  ;;  %v4961_v54 = vadd.s32 %v4960_v0, %v4956_v30  ;;  %vm4695_vm6 = vcmp.lt.s32.totalorder %v12467_v10, 0  ;;  %v5012_v23 = vand.u32 8388607, %v15409_v27 }
 0x66e   : > { %v5017_v39 = vsel %vm5016_vm7, %v5015_v51, 0  ;;  %v4853_v8 = vadd.s32 %v12665_v1, %v12674_v56  ;;  %v5112_v26 = vand.u32 2139095040, %v12783_v5  ;;  %v12807_v7 = vadd.s32 3, %v4574_v25 }
 0x66f   : > { %v4874_v55 = vadd.s32 127, %v4873_v32  ;;  %v4962_v42 = vadd.s32 536870912, %v4961_v54  ;;  %v12805_v33 = vpop.eup %8830  ;;  %8836 = vcosq.f32 %v12791_v40  ;;  %v12813_v59 = vsel %vm4695_vm6, %v4779_v52, %v12644_v48 }
 0x670   : > { %15836 = vst [vmem:[#allocation10_spill] sm:$0xff] %v12807_v7  ;;  %v5019_v46 = vand.u32 31, %v5017_v39  ;;  %v4871_v62 = vshrl.u32 %v4853_v8, %v4869_v61  ;;  %v12819_v56 = vadd.f32 %v12401_v45, %v4123_v47  ;;  %v4870_v25 = vshll.u32 %v12731_v9, %v4868_v44 }
 0x671   : > { %v12816_v1 = vshrl.u32 %v4962_v42, 30  ;;  %v12821_v22 = vpop.eup %8832  ;;  %v5013_v38 = vor.u32 8388608, %v5012_v23  ;;  %v4875_v29 = vshll.u32 %v4874_v55, 23  ;;  %v5113_v51 = vshrl.u32 %v5112_v26, 23 }
 0x672   : > { %15837 = vst [vmem:[#allocation3_spill] sm:$0xff] %v12821_v22  ;;  %v5020_v34 = vsub.s32 32, %v5019_v46  ;;  %v5022_v52 = vshll.u32 %v15512_v31, %v5019_v46  ;;  %v5025_v30 = vshll.u32 %v15679_v53, %v5019_v46  ;;  %v4872_v0 = vor.u32 %v4871_v62, %v4870_v25 }
 0x673   : > { %v4964_v48 = vshll.u32 %v12816_v1, 30  ;;  %v5018_v44 = vshrl.u32 %v5017_v39, 5  ;;  %v5028_v61 = vshll.u32 %v15680_v41, %v5019_v46  ;;  %v4957_v32 = vadd.s32 %v12753_v24, %v12768_v20 }
 0x674   : > { %v5023_v4 = vshrl.u32 %v15679_v53, %v5020_v34  ;;  %v5026_v45 = vshrl.u32 %v15680_v41, %v5020_v34  ;;  %v5029_v47 = vshrl.u32 %v15681_v16, %v5020_v34  ;;  %v12836_v55 = vshll.u32 %v5013_v38, 8 }
 0x675   : > { %v12831_v9 = vsub.s32 %v4961_v54, %v4964_v48  ;;  %v5031_v27 = vshll.u32 %v15681_v16, %v5019_v46  ;;  %v5032_v50 = vshrl.u32 %v15682_v37, %v5020_v34  ;;  %v12841_v62 = vpop.eup %8834  ;;  %v4876_v54 = vor.u32 4788187, %v4875_v29 }
 0x676   : > { %v5024_v23 = vor.u32 %v5023_v4, %v5022_v52  ;;  %v5027_v8 = vor.u32 %v5026_v45, %v5025_v30  ;;  %v5030_v26 = vor.u32 %v5029_v47, %v5028_v61  ;;  %15838 = vst [vmem:[#allocation5_spill] sm:$0xff] %v12841_v62  ;;  %v5034_v39 = vshll.u32 %v15682_v37, %v5019_v46 }
 0x677   : > { %v4967_v42 = vsub.s32 0, %v12831_v9  ;;  %v5035_v25 = vshrl.u32 %v15683_v18, %v5020_v34  ;;  %v8214_v48 = vadd.s32 4294967169, %v5113_v51  ;;  %v4879_v24 = vcvt.s32.f32 %v4872_v0 }
 0x678   : > { %v5033_v38 = vor.u32 %v5032_v50, %v5031_v27  ;;  %vm5037_vm4 = vcmp.lt.s32.totalorder %v5018_v44, 1  ;;  %v5021_v4 = vshrl.u32 %v15512_v31, %v5020_v34  ;;  %vm5040_vm9 = vcmp.lt.s32.totalorder %v5018_v44, 4 }
 0x679   : > { %v8207_v20 = vmin.u32 %v4967_v42, %v12831_v9  ;;  %v12846_v52 = vpop.eup %8836  ;;  %v5036_v30 = vor.u32 %v5035_v25, %v5034_v39  ;;  %v5045_v45 = vsel %vm5037_vm4, %v5024_v23, %v5027_v8  ;;  %vm5039_vm10 = vcmp.lt.s32.totalorder %v5018_v44, 3 }
 0x67a   : > { %v5042_v29 = vsel %vm5040_vm9, %v5030_v26, 2102212464  ;;  %v5046_v61 = vsel %vm5040_vm9, %v5033_v38, 920167782  ;;  %v4877_v46 = vand.u32 2147483647, %v4876_v54  ;;  %v5049_v51 = vsel %vm5037_vm4, %v5027_v8, %v5030_v26 }
 0x67b   : > { %v4969_v47 = vclz %v8207_v20  ;;  %vm5038_vm1 = vcmp.lt.s32.totalorder %v5018_v44, 2  ;;  %v5047_v21 = vsel %vm5039_vm10, %v5030_v26, %v5046_v61  ;;  %v5041_v49 = vsel %vm5037_vm4, %v5021_v4, %v5024_v23  ;;  %v12858_v26 = vpop.f32.mrb[31].mxu0 }
 0x67c   : > { %v5048_v27 = vsel %vm5038_vm1, %v5045_v45, %v5047_v21  ;;  %v5050_v50 = vsel %vm5040_vm9, %v5036_v30, 1326507024  ;;  %v5043_v42 = vsel %vm5039_vm10, %v5027_v8, %v5042_v29  ;;  %v15839_v54 = vand.u32 2147483647, %v12783_v5 }
 0x67d   : > { %v8208_v0 = vadd.s32 4294967294, %v4969_v47  ;;  %v5051_v22 = vsel %vm5039_vm10, %v5033_v38, %v5050_v50  ;;  %v12851_v34 = vmul.u32.u64.low %v12836_v55, %v5048_v27  ;;  %v12852_v39 = vmul.u32.u64.high %v12836_v55, %v5048_v27, %v12851_v34 }
 0x67e   : > { %v5052_v25 = vsel %vm5038_vm1, %v5049_v51, %v5051_v22  ;;  %v5116_v20 = vand.u32 8388607, %v15839_v54  ;;  %v5119_v61 = vadd.s32 1, %v8214_v48  ;;  %v12860_v23 = vmul.f32 %v4879_v24, %v4877_v46 }
 0x67f   : > { %vm8209_vm3 = vcmp.lt.s32.totalorder %v8208_v0, 0  ;;  %v12863_v8 = vmul.u32.u64.low %v12836_v55, %v5052_v25  ;;  %v12864_v38 = vmul.u32.u64.high %v12836_v55, %v5052_v25, %v12863_v8  ;;  %v5044_v45 = vsel %vm5038_vm1, %v5041_v49, %v5043_v42 }
 0x680   : > { %v4972_v21 = vsel %vm8209_vm3, 0, %v8208_v0  ;;  %vm5120_vm15 = vcmp.gt.s32.totalorder %v5119_v61, 0  ;;  %8838 = vsinq.f32 %v12791_v40  ;;  %v15840_v22 = vxor.u32 2147483648, %v12794_v63 }
 0x681   : > { %v4973_v4 = vsub.s32 32, %v4972_v21  ;;  %v4977_v30 = vsub.s32 4294967266, %v4972_v21  ;;  %v5063_v24 = vadd.s32 1, %v12852_v39  ;;  %v5121_v47 = vsel %vm5120_vm15, %v5119_v61, 0 }
 0x682   : > { %v12873_v48 = vsel %vm4695_vm6, %v15840_v22, %v12794_v63  ;;  %v5117_v51 = vor.u32 8388608, %v5116_v20  ;;  %v5123_v0 = vand.u32 31, %v5121_v47  ;;  %v4974_v49 = vshll.u32 %v12831_v9, %v4972_v21 }
 0x683   : > { %v4975_v29 = vshrl.u32 %v4957_v32, %v4973_v4  ;;  %v4978_v46 = vadd.s32 127, %v4977_v30  ;;  %v5060_v40 = vmul.u32 %v12836_v55, %v5044_v45  ;;  %vm5062_vm14 = vc.u32 %v12864_v38, %v12851_v34 }
 0x684   : > { %v5064_v63 = vsel %vm5062_vm14, %v5063_v24, %v12852_v39  ;;  %v5124_v50 = vsub.s32 32, %v5123_v0  ;;  %v5216_v42 = vand.u32 2139095040, %v12819_v56  ;;  %v5122_v54 = vshrl.u32 %v5121_v47, 5 }
 0x685   : > { %v4979_v27 = vshll.u32 %v4978_v46, 23  ;;  %v4976_v25 = vor.u32 %v4975_v29, %v4974_v49  ;;  %v5065_v32 = vadd.s32 %v5064_v63, %v5060_v40  ;;  %v5126_v20 = vshll.u32 %v15512_v31, %v5123_v0 }
 0x686   : > { %v5127_v8 = vshrl.u32 %v15679_v53, %v5124_v50  ;;  %v5129_v9 = vshll.u32 %v15679_v53, %v5123_v0  ;;  %v5132_v55 = vshll.u32 %v15680_v41, %v5123_v0  ;;  %v15841_v21 = vand.u32 2147483647, %v12467_v10 }
 0x687   : > { %v4980_v61 = vor.u32 4788187, %v4979_v27  ;;  %v5066_v39 = vadd.s32 536870912, %v5065_v32  ;;  %v5130_v30 = vshrl.u32 %v15680_v41, %v5124_v50  ;;  %v5133_v45 = vshrl.u32 %v15681_v16, %v5124_v50 }
 0x688   : > { %vm12889_vm13 = vcmp.le.f32.partialorder %v15841_v21, 0.7853982  ;;  %v5135_v22 = vshll.u32 %v15681_v16, %v5123_v0  ;;  %v5128_v47 = vor.u32 %v5127_v8, %v5126_v20  ;;  %v5136_v29 = vshrl.u32 %v15682_v37, %v5124_v50 }
 0x689   : > { %v4981_v24 = vand.u32 2147483647, %v4980_v61  ;;  %v5138_v46 = vshll.u32 %v15682_v37, %v5123_v0  ;;  %vm4799_vm5 = vcmp.lt.s32.totalorder %v12470_v57, 0  ;;  %v12899_v49 = vshrl.u32 %v5066_v39, 30 }
 0x68a   : > { %v5131_v40 = vor.u32 %v5130_v30, %v5129_v9  ;;  %v5134_v27 = vor.u32 %v5133_v45, %v5132_v55  ;;  %v5139_v63 = vshrl.u32 %v15683_v18, %v5124_v50  ;;  %v4983_v21 = vcvt.s32.f32 %v4976_v25  ;;  %v12902_v58 = vpop.eup %8838 }
 0x68b   : > { %15844 = vst [vmem:[#allocation18_spill] sm:$0xff] %v12899_v49  ;;  %v5137_v44 = vor.u32 %v5136_v29, %v5135_v22  ;;  %v5157_v62 = vshll.u32 %v5117_v51, 8  ;;  %v5217_v7 = vshrl.u32 %v5216_v42, 23  ;;  %v5068_v20 = vshll.u32 %v12899_v49, 30 }
 0x68c   : > { %v5140_v61 = vor.u32 %v5139_v63, %v5138_v46  ;;  %vm5141_vm0 = vcmp.lt.s32.totalorder %v5122_v54, 1  ;;  %vm5144_vm7 = vcmp.lt.s32.totalorder %v5122_v54, 4  ;;  %v15845_v0 = vand.u32 2147483647, %v12470_v57 }
 0x68d   : > { %v15846_v8 = vmov 0  ;;  %v4984_v9 = vmul.f32 %v4983_v21, %v4981_v24  ;;  %v5125_v55 = vshrl.u32 %v15512_v31, %v5124_v50  ;;  %v5146_v25 = vsel %vm5144_vm7, %v5134_v27, 2102212464 }
 0x68e   : > { %vm12907_vm6 = vcmp.le.f32.partialorder %v15845_v0, 0.7853982  ;;  %v5149_v39 = vsel %vm5141_vm0, %v5128_v47, %v5131_v40  ;;  %vm4903_vm4 = vcmp.lt.s32.totalorder %v12553_v6, 0  ;;  %v12913_v51 = vsub.s32 %v5065_v32, %v5068_v20 }
 0x68f   : > { %v15847_v8 = vsel %vm12907_vm6, 4294967295, %v15846_v8  ;;  %vm5143_vm9 = vcmp.lt.s32.totalorder %v5122_v54, 3  ;;  %v5150_v42 = vsel %vm5144_vm7, %v5137_v44, 920167782  ;;  %v5153_v30 = vsel %vm5141_vm0, %v5131_v40, %v5134_v27 }
 0x690   : > { %15848 = vst [vmem:[#allocation2_spill] sm:$0xff] %v15847_v8  ;;  %vm5142_vm10 = vcmp.lt.s32.totalorder %v5122_v54, 2  ;;  %v5145_v45 = vsel %vm5141_vm0, %v5125_v55, %v5128_v47  ;;  %v5151_v22 = vsel %vm5143_vm9, %v5134_v27, %v5150_v42  ;;  %v5154_v29 = vsel %vm5144_vm7, %v5140_v61, 1326507024 }
 0x691   : > { %v5071_v46 = vsub.s32 0, %v12913_v51  ;;  %v5147_v63 = vsel %vm5143_vm9, %v5131_v40, %v5146_v25  ;;  %v5152_v24 = vsel %vm5142_vm10, %v5149_v39, %v5151_v22  ;;  %v5155_v21 = vsel %vm5143_vm9, %v5137_v44, %v5154_v29 }
 0x692   : > { %v4781_v50 = vsel %vm12889_vm13, %v12467_v10, %v12873_v48  ;;  %v5156_v32 = vsel %vm5142_vm10, %v5153_v30, %v5155_v21  ;;  %v12922_v20 = vmul.u32.u64.low %v5157_v62, %v5152_v24  ;;  %v12923_v0 = vmul.u32.u64.high %v5157_v62, %v5152_v24, %v12922_v20  ;;  %v12937_v48 = vpop.permute.xlu1 %4127 }
 0x693   : > { %v15849_v47 = vand.u32 2147483647, %v12553_v6  ;;  %v8211_v40 = vmin.u32 %v5071_v46, %v12913_v51  ;;  %v12933_v44 = vmul.u32.u64.low %v5157_v62, %v5156_v32  ;;  %v12934_v61 = vmul.u32.u64.high %v5157_v62, %v5156_v32, %v12933_v44 }
 0x694   : > { %v15415_v55 = vand.u32 2147483647, %v12819_v56  ;;  %v15852_v25 = vxor.u32 2147483648, %v12860_v23  ;;  %v4985_v42 = vxor.u32 2147483648, %v4984_v9  ;;  %v5148_v30 = vsel %vm5142_vm10, %v5145_v45, %v5147_v63 }
 0x695   : > { %vm12928_vm1 = vcmp.le.f32.partialorder %v15849_v47, 0.7853982  ;;  %v8218_v22 = vadd.s32 4294967169, %v5217_v7  ;;  %v4782_v29 = vsel %vm12889_vm13, 0, %v12813_v59  ;;  %8840 = vcosq.f32 %v4781_v50 }
 0x696   : > { %v4882_v39 = vsel %vm4799_vm5, %v15852_v25, %v12860_v23  ;;  %v5073_v46 = vclz %v8211_v40  ;;  %v12950_v24 = vadd.f32 %v12461_v17, %v12937_v48  ;;  %8842 = vsinq.f32 %v4781_v50 }
 0x697   : > { %v4987_v21 = vsub.s32 4, %v12816_v1  ;;  %v5167_v32 = vadd.s32 1, %v12923_v0  ;;  %v5223_v23 = vadd.s32 1, %v8218_v22  ;;  %v4885_v7 = vsel %vm12907_vm6, %v12470_v57, %v4882_v39 }
 0x698   : > { %15853 = vst [vmem:[#allocation14_spill] sm:$0xff] %v12950_v24  ;;  %v8212_v54 = vadd.s32 4294967294, %v5073_v46  ;;  %v5164_v45 = vmul.u32 %v5157_v62, %v5148_v30  ;;  %vm5166_vm3 = vc.u32 %v12934_v61, %v12922_v20  ;;  %v4986_v59 = vsel %vm4903_vm4, %v4985_v42, %v4984_v9 }
 0x699   : > { %v5168_v17 = vsel %vm5166_vm3, %v5167_v32, %v12923_v0  ;;  %v5220_v4 = vand.u32 8388607, %v15415_v55  ;;  %vm5224_vm15 = vcmp.gt.s32.totalorder %v5223_v23, 0  ;;  %v5320_v47 = vand.u32 2139095040, %v12950_v24 }
 0x69a   : > { %vm8213_vm14 = vcmp.lt.s32.totalorder %v8212_v54, 0  ;;  %v5169_v63 = vadd.s32 %v5168_v17, %v5164_v45  ;;  %v5225_v50 = vsel %vm5224_vm15, %v5223_v23, 0  ;;  %v12965_v40 = vadd.s32 3, %v4782_v29 }
 0x69b   : > { %8844 = vcosq.f32 %v4885_v7  ;;  %v5076_v62 = vsel %vm8213_vm14, 0, %v8212_v54  ;;  %v5227_v44 = vand.u32 31, %v5225_v50  ;;  %v12970_v9 = vsel %vm4903_vm4, %v4987_v21, %v12816_v1 }
 0x69c   : > { %15854 = vst [vmem:[#allocation8_spill] sm:$0xff] %v12965_v40  ;;  %8846 = vsinq.f32 %v4885_v7  ;;  %v5081_v0 = vsub.s32 4294967266, %v5076_v62  ;;  %v5170_v25 = vadd.s32 536870912, %v5169_v63  ;;  %v12975_v39 = vsel %vm12928_vm1, %v12553_v6, %v4986_v59 }
 0x69d   : > { %v5061_v42 = vadd.s32 %v12851_v34, %v12864_v38  ;;  %v5077_v30 = vsub.s32 32, %v5076_v62  ;;  %v5228_v22 = vsub.s32 32, %v5227_v44  ;;  %v5221_v32 = vor.u32 8388608, %v5220_v4 }
 0x69e   : > { %v5082_v29 = vadd.s32 127, %v5081_v0  ;;  %v12979_v46 = vshrl.u32 %v5170_v25, 30  ;;  %v5321_v23 = vshrl.u32 %v5320_v47, 23  ;;  %v5226_v7 = vshrl.u32 %v5225_v50, 5 }
 0x69f   : > { %v5231_v1 = vshrl.u32 %v15679_v53, %v5228_v22  ;;  %v5234_v21 = vshrl.u32 %v15680_v41, %v5228_v22  ;;  %v5237_v54 = vshrl.u32 %v15681_v16, %v5228_v22  ;;  %v12984_v45 = vpop.eup %8840  ;;  %v5078_v59 = vshll.u32 %v12913_v51, %v5076_v62 }
 0x6a0   : > { %15855 = vst [vmem:[#allocation7_spill] sm:$0xff] %v12984_v45  ;;  %v5172_v34 = vshll.u32 %v12979_v46, 30  ;;  %v5230_v38 = vshll.u32 %v15512_v31, %v5227_v44  ;;  %v5236_v17 = vshll.u32 %v15680_v41, %v5227_v44  ;;  %v12990_v0 = vpop.eup %8842  ;;  %v5079_v4 = vshrl.u32 %v5061_v42, %v5077_v30 }
 0x6a1   : > { %15856 = vst [vmem:[#allocation12_spill] sm:$0xff] %v12990_v0  ;;  %v5233_v50 = vshll.u32 %v15679_v53, %v5227_v44  ;;  %v5239_v47 = vshll.u32 %v15681_v16, %v5227_v44  ;;  %v5240_v25 = vshrl.u32 %v15682_v37, %v5228_v22  ;;  %v5083_v55 = vshll.u32 %v5082_v29, 23 }
 0x6a2   : > { %v12995_v6 = vsub.s32 %v5169_v63, %v5172_v34  ;;  %v5232_v10 = vor.u32 %v5231_v1, %v5230_v38  ;;  %v5238_v51 = vor.u32 %v5237_v54, %v5236_v17  ;;  %v5242_v40 = vshll.u32 %v15682_v37, %v5227_v44 }
 0x6a3   : > { %v5235_v62 = vor.u32 %v5234_v21, %v5233_v50  ;;  %v5241_v45 = vor.u32 %v5240_v25, %v5239_v47  ;;  %v5243_v8 = vshrl.u32 %v15683_v18, %v5228_v22  ;;  %v5261_v42 = vshll.u32 %v5221_v32, 8 }
 0x6a4   : > { %v5175_v0 = vsub.s32 0, %v12995_v6  ;;  %v15426_v30 = vand.u32 2147483647, %v12950_v24  ;;  %v8222_v49 = vadd.s32 4294967169, %v5321_v23  ;;  %v5080_v11 = vor.u32 %v5079_v4, %v5078_v59 }
 0x6a5   : > { %v13001_v57 = vpop.eup %8844  ;;  %v5229_v63 = vshrl.u32 %v15512_v31, %v5228_v22  ;;  %v5244_v29 = vor.u32 %v5243_v8, %v5242_v40  ;;  %vm5248_vm13 = vcmp.lt.s32.totalorder %v5226_v7, 4  ;;  %v5084_v21 = vor.u32 4788187, %v5083_v55 }
 0x6a6   : > { %v13004_v1 = vpop.eup %8846  ;;  %v8215_v44 = vmin.u32 %v5175_v0, %v12995_v6  ;;  %vm5245_vm0 = vcmp.lt.s32.totalorder %v5226_v7, 1  ;;  %v5250_v54 = vsel %vm5248_vm13, %v5238_v51, 2102212464  ;;  %vm5246_vm7 = vcmp.lt.s32.totalorder %v5226_v7, 2 }
 0x6a7   : > { %vm5247_vm4 = vcmp.lt.s32.totalorder %v5226_v7, 3  ;;  %v5253_v32 = vsel %vm5245_vm0, %v5232_v10, %v5235_v62  ;;  %v5254_v23 = vsel %vm5248_vm13, %v5241_v45, 920167782  ;;  %v5249_v38 = vsel %vm5245_vm0, %v5229_v63, %v5232_v10 }
 0x6a8   : > { %v5177_v34 = vclz %v8215_v44  ;;  %v5255_v59 = vsel %vm5247_vm4, %v5238_v51, %v5254_v23  ;;  %v5257_v17 = vsel %vm5245_vm0, %v5235_v62, %v5238_v51  ;;  %v5251_v22 = vsel %vm5247_vm4, %v5235_v62, %v5250_v54 }
 0x6a9   : > { %v5256_v8 = vsel %vm5246_vm7, %v5253_v32, %v5255_v59  ;;  %v5258_v40 = vsel %vm5248_vm13, %v5244_v29, 1326507024  ;;  %v5327_v55 = vadd.s32 1, %v8222_v49  ;;  %v13013_v50 = vand.u32 8388607, %v15426_v30 }
 0x6aa   : > { %v8216_v4 = vadd.s32 4294967294, %v5177_v34  ;;  %v5259_v0 = vsel %vm5247_vm4, %v5241_v45, %v5258_v40  ;;  %v13017_v47 = vadd.f32 %v12510_v35, %v12937_v48  ;;  %v5085_v25 = vand.u32 2147483647, %v5084_v21 }
 0x6ab   : > { %v5260_v10 = vsel %vm5246_vm7, %v5257_v17, %v5259_v0  ;;  %v13020_v51 = vmul.u32.u64.low %v5261_v42, %v5256_v8  ;;  %v13021_v62 = vmul.u32.u64.high %v5261_v42, %v5256_v8, %v13020_v51  ;;  %v5252_v49 = vsel %vm5246_vm7, %v5249_v38, %v5251_v22 }
 0x6ac   : > { %vm8217_vm9 = vcmp.lt.s32.totalorder %v8216_v4, 0  ;;  %v13025_v63 = vmul.u32.u64.low %v5261_v42, %v5260_v10  ;;  %v13026_v45 = vmul.u32.u64.high %v5261_v42, %v5260_v10, %v13025_v63  ;;  %v5087_v29 = vcvt.s32.f32 %v5080_v11 }
 0x6ad   : > { %v5165_v44 = vadd.s32 %v12922_v20, %v12934_v61  ;;  %v5180_v54 = vsel %vm8217_vm9, 0, %v8216_v4  ;;  %vm5328_vm10 = vcmp.gt.s32.totalorder %v5327_v55, 0  ;;  %v5325_v21 = vor.u32 8388608, %v13013_v50 }
 0x6ae   : > { %v5181_v35 = vsub.s32 32, %v5180_v54  ;;  %v5185_v48 = vsub.s32 4294967266, %v5180_v54  ;;  %v5329_v32 = vsel %vm5328_vm10, %v5327_v55, 0  ;;  %v13031_v23 = vmul.f32 %v5087_v29, %v5085_v25 }
 0x6af   : > { %v5268_v34 = vmul.u32 %v5261_v42, %v5252_v49  ;;  %v5271_v7 = vadd.s32 1, %v13021_v62  ;;  %v5331_v38 = vand.u32 31, %v5329_v32  ;;  %v5182_v59 = vshll.u32 %v12995_v6, %v5180_v54 }
 0x6b0   : > { %v5183_v17 = vshrl.u32 %v5165_v44, %v5181_v35  ;;  %v5186_v11 = vadd.s32 127, %v5185_v48  ;;  %vm5270_vm3 = vc.u32 %v13026_v45, %v13020_v51  ;;  %v5330_v61 = vshrl.u32 %v5329_v32, 5 }
 0x6b1   : > { %v5272_v20 = vsel %vm5270_vm3, %v5271_v7, %v13021_v62  ;;  %v5332_v22 = vsub.s32 32, %v5331_v38  ;;  %v5334_v8 = vshll.u32 %v15512_v31, %v5331_v38  ;;  %v5337_v42 = vshll.u32 %v15679_v53, %v5331_v38 }
 0x6b2   : > { %v5184_v40 = vor.u32 %v5183_v17, %v5182_v59  ;;  %v5187_v55 = vshll.u32 %v5186_v11, 23  ;;  %v5273_v4 = vadd.s32 %v5272_v20, %v5268_v34  ;;  %v5340_v50 = vshll.u32 %v15680_v41, %v5331_v38 }
 0x6b3   : > { %v5335_v0 = vshrl.u32 %v15679_v53, %v5332_v22  ;;  %v5338_v6 = vshrl.u32 %v15680_v41, %v5332_v22  ;;  %v5341_v25 = vshrl.u32 %v15681_v16, %v5332_v22  ;;  %v5343_v63 = vshll.u32 %v15681_v16, %v5331_v38 }
 0x6b4   : > { %v5188_v10 = vor.u32 4788187, %v5187_v55  ;;  %v5191_v49 = vcvt.s32.f32 %v5184_v40  ;;  %v5274_v62 = vadd.s32 536870912, %v5273_v4  ;;  %vm15443_vm15 = vcmp.lt.s32.totalorder %v12706_v28, 0 }
 0x6b5   : > { %v5336_v29 = vor.u32 %v5335_v0, %v5334_v8  ;;  %v5339_v44 = vor.u32 %v5338_v6, %v5337_v42  ;;  %v5342_v54 = vor.u32 %v5341_v25, %v5340_v50  ;;  %v5344_v35 = vshrl.u32 %v15682_v37, %v5332_v22 }
 0x6b6   : > { %v5189_v48 = vand.u32 2147483647, %v5188_v10  ;;  %v13047_v32 = vshrl.u32 %v5274_v62, 30  ;;  %v5346_v34 = vshll.u32 %v15682_v37, %v5331_v38  ;;  %v5347_v7 = vshrl.u32 %v15683_v18, %v5332_v22 }
 0x6b7   : > { %v5089_v59 = vxor.u32 2147483648, %v13031_v23  ;;  %vm5111_vm14 = vcmp.lt.s32.totalorder %v12783_v5, 0  ;;  %v5333_v17 = vshrl.u32 %v15512_v31, %v5332_v22  ;;  %v5345_v11 = vor.u32 %v5344_v35, %v5343_v63 }
 0x6b8   : > { %15857 = vst [vmem:[#allocation21_spill] sm:$0xff] %v13047_v32  ;;  %vm5349_vm13 = vcmp.lt.s32.totalorder %v5330_v61, 1  ;;  %v15858_v20 = vand.u32 2147483647, %v12706_v28  ;;  %v15859_v8 = vmov 0  ;;  %v5192_v40 = vmul.f32 %v5191_v49, %v5189_v48 }
 0x6b9   : > { %v5276_v55 = vshll.u32 %v13047_v32, 30  ;;  %v5348_v38 = vor.u32 %v5347_v7, %v5346_v34  ;;  %vm5352_vm7 = vcmp.lt.s32.totalorder %v5330_v61, 4  ;;  %vm5351_vm4 = vcmp.lt.s32.totalorder %v5330_v61, 3 }
 0x6ba   : > { %vm13056_vm0 = vcmp.le.f32.partialorder %v15858_v20, 0.7853982  ;;  %v5354_v42 = vsel %vm5352_vm7, %v5342_v54, 2102212464  ;;  %v5357_v0 = vsel %vm5349_vm13, %v5336_v29, %v5339_v44  ;;  %v5358_v6 = vsel %vm5352_vm7, %v5345_v11, 920167782 }
 0x6bb   : > { %v15860_v8 = vsel %vm13056_vm0, 4294967295, %v15859_v8  ;;  %v13062_v50 = vsub.s32 %v5273_v4, %v5276_v55  ;;  %vm5350_vm9 = vcmp.lt.s32.totalorder %v5330_v61, 2  ;;  %v5359_v22 = vsel %vm5351_vm4, %v5342_v54, %v5358_v6 }
 0x6bc   : > { %15861 = vst [vmem:[#allocation30_spill] sm:$0xff] %v15860_v8  ;;  %v5365_v25 = vshll.u32 %v5325_v21, 8  ;;  %v5353_v10 = vsel %vm5349_vm13, %v5333_v17, %v5336_v29  ;;  %v5360_v62 = vsel %vm5350_vm9, %v5357_v0, %v5359_v22  ;;  %v5361_v49 = vsel %vm5349_vm13, %v5339_v44, %v5342_v54 }
 0x6bd   : > { %v5362_v63 = vsel %vm5352_vm7, %v5348_v38, 1326507024  ;;  %v5193_v35 = vxor.u32 2147483648, %v5192_v40  ;;  %v5279_v48 = vsub.s32 0, %v13062_v50  ;;  %v5355_v34 = vsel %vm5351_vm4, %v5339_v44, %v5354_v42 }
 0x6be   : > { %v5363_v7 = vsel %vm5351_vm4, %v5345_v11, %v5362_v63  ;;  %v5195_v20 = vsub.s32 4, %v12979_v46  ;;  %v13070_v55 = vmul.u32.u64.low %v5365_v25, %v5360_v62  ;;  %v13071_v30 = vmul.u32.u64.high %v5365_v25, %v5360_v62, %v13070_v55  ;;  %v4133_v62 = vpop.permute.xlu0 %4132 }
 0x6bf   : > { %v5364_v4 = vsel %vm5350_vm9, %v5361_v49, %v5363_v7  ;;  %v5090_v21 = vsel %vm15443_vm15, %v5089_v59, %v13031_v23  ;;  %v8219_v29 = vmin.u32 %v5279_v48, %v13062_v50  ;;  %8848 = vcosq.f32 %v12975_v39 }
 0x6c0   : > { %v13078_v54 = vmul.u32.u64.low %v5365_v25, %v5364_v4  ;;  %v13079_v17 = vmul.u32.u64.high %v5365_v25, %v5364_v4, %v13078_v54  ;;  %v15862_v44 = vand.u32 2147483647, %v12783_v5  ;;  %v5356_v38 = vsel %vm5350_vm9, %v5353_v10, %v5355_v34 }
 0x6c1   : > { %v5424_v42 = vand.u32 2139095040, %v13017_v47  ;;  %v4990_v23 = vsel %vm12928_vm1, 0, %v12970_v9  ;;  %8850 = vsinq.f32 %v12975_v39  ;;  %v5194_v59 = vsel %vm5111_vm14, %v5193_v35, %v5192_v40 }
 0x6c2   : > { %vm13084_vm10 = vcmp.le.f32.partialorder %v15862_v44, 0.7853982  ;;  %v5281_v0 = vclz %v8219_v29  ;;  %v5093_v6 = vsel %vm13056_vm0, %v12706_v28, %v5090_v21  ;;  %v5196_v61 = vsel %vm5111_vm14, %v5195_v20, %v12979_v46 }
 0x6c3   : > { %v5375_v22 = vadd.s32 1, %v13071_v30  ;;  %v5425_v10 = vshrl.u32 %v5424_v42, 23  ;;  %v5372_v9 = vmul.u32 %v5365_v25, %v5356_v38  ;;  %vm5374_vm1 = vc.u32 %v13079_v17, %v13070_v55 }
 0x6c4   : > { %v8220_v27 = vadd.s32 4294967294, %v5281_v0  ;;  %v15428_v39 = vand.u32 2147483647, %v13017_v47  ;;  %v5197_v40 = vsel %vm13084_vm10, %v12783_v5, %v5194_v59  ;;  %v13111_v46 = vadd.f32 %v12627_v43, %v4133_v62 }
 0x6c5   : > { %v5376_v49 = vsel %vm5374_vm1, %v5375_v22, %v13071_v30  ;;  %v8226_v63 = vadd.s32 4294967169, %v5425_v10  ;;  %8852 = vcosq.f32 %v5093_v6  ;;  %v5198_v35 = vsel %vm13084_vm10, 0, %v5196_v61 }
 0x6c6   : > { %vm8221_vm3 = vcmp.lt.s32.totalorder %v8220_v27, 0  ;;  %v5377_v25 = vadd.s32 %v5376_v49, %v5372_v9  ;;  %8854 = vsinq.f32 %v5093_v6  ;;  %v5269_v48 = vadd.s32 %v13020_v51, %v13026_v45  ;;  %v13131_v6 = vpop.permute.xlu1 %4137 }
 0x6c7   : > { %v5284_v34 = vsel %vm8221_vm3, 0, %v8220_v27  ;;  %v5431_v7 = vadd.s32 1, %v8226_v63  ;;  %8856 = vcosq.f32 %v5197_v40  ;;  %v5428_v43 = vand.u32 8388607, %v15428_v39 }
 0x6c8   : > { %v5285_v20 = vsub.s32 32, %v5284_v34  ;;  %v5289_v4 = vsub.s32 4294967266, %v5284_v34  ;;  %v5378_v30 = vadd.s32 536870912, %v5377_v25  ;;  %v15427_v21 = vand.u32 2147483647, %v13111_v46 }
 0x6c9   : > { %vm5432_vm14 = vcmp.gt.s32.totalorder %v5431_v7, 0  ;;  %v5528_v29 = vand.u32 2139095040, %v13111_v46  ;;  %v13123_v51 = vpop.eup %8848  ;;  %v13125_v45 = vadd.s32 3, %v4990_v23  ;;  %8858 = vsinq.f32 %v5197_v40 }
 0x6ca   : > { %v5287_v54 = vshrl.u32 %v5269_v48, %v5285_v20  ;;  %v5290_v44 = vadd.s32 127, %v5289_v4  ;;  %v13121_v11 = vshrl.u32 %v5378_v30, 30  ;;  %v5433_v38 = vsel %vm5432_vm14, %v5431_v7, 0  ;;  %15865 = vst [vmem:[#allocation27_spill] sm:$0xff] %v13123_v51 }
 0x6cb   : > { %15866 = vst [vmem:[#allocation38_spill] sm:$0xff] %v13125_v45  ;;  %v13127_v42 = vadd.s32 3, %v5198_v35  ;;  %v5435_v59 = vand.u32 31, %v5433_v38  ;;  %v13129_v0 = vpop.eup %8850  ;;  %v5286_v61 = vshll.u32 %v13062_v50, %v5284_v34  ;;  %v13136_v27 = vadd.f32 %v12697_v2, %v4133_v62 }
 0x6cc   : > { %15868 = vst [vmem:[#allocation4_spill] sm:$0xff] %v13129_v0  ;;  %v5291_v22 = vshll.u32 %v5290_v44, 23  ;;  %v5380_v10 = vshll.u32 %v13121_v11, 30  ;;  %v5429_v9 = vor.u32 8388608, %v5428_v43  ;;  %v13140_v23 = vand.u32 8388607, %v15427_v21 }
 0x6cd   : > { %15867 = vst [vmem:[#allocation40_spill] sm:$0xff] %v13127_v42  ;;  %v5436_v49 = vsub.s32 32, %v5435_v59  ;;  %v13144_v40 = vadd.f32 %v12796_v12, %v13131_v6  ;;  %v5288_v63 = vor.u32 %v5287_v54, %v5286_v61  ;;  %v13148_v50 = vshrl.u32 %v5433_v38, 5 }
 0x6ce   : > { %v13146_v35 = vsub.s32 %v5377_v25, %v5380_v10  ;;  %v5529_v48 = vshrl.u32 %v5528_v29, 23  ;;  %vm5319_vm13 = vcmp.lt.s32.totalorder %v12950_v24, 0  ;;  %v5438_v2 = vshll.u32 %v15512_v31, %v5435_v59 }
 0x6cf   : > { %v5439_v62 = vshrl.u32 %v15679_v53, %v5436_v49  ;;  %v5441_v34 = vshll.u32 %v15679_v53, %v5435_v59  ;;  %v5442_v7 = vshrl.u32 %v15680_v41, %v5436_v49  ;;  %v13155_v20 = vpop.eup %8852  ;;  %v5292_v12 = vor.u32 4788187, %v5291_v22 }
 0x6d0   : > { %15869 = vst [vmem:[#allocation20_spill] sm:$0xff] %v13155_v20  ;;  %v5383_v4 = vsub.s32 0, %v13146_v35  ;;  %v5444_v25 = vshll.u32 %v15680_v41, %v5435_v59  ;;  %v5445_v30 = vshrl.u32 %v15681_v16, %v5436_v49  ;;  %v13160_v43 = vpop.eup %8854  ;;  %v5447_v44 = vshll.u32 %v15681_v16, %v5435_v59 }
 0x6d1   : > { %15870 = vst [vmem:[#allocation22_spill] sm:$0xff] %v13160_v43  ;;  %v5440_v29 = vor.u32 %v5439_v62, %v5438_v2  ;;  %v5443_v54 = vor.u32 %v5442_v7, %v5441_v34  ;;  %v5448_v38 = vshrl.u32 %v15682_v37, %v5436_v49  ;;  %v13164_v61 = vpop.eup %8856  ;;  %v13167_v21 = vshll.u32 %v5429_v9, 8 }
 0x6d2   : > { %15871 = vst [vmem:[#allocation26_spill] sm:$0xff] %v13164_v61  ;;  %v8223_v10 = vmin.u32 %v5383_v4, %v13146_v35  ;;  %v8230_v22 = vadd.s32 4294967169, %v5529_v48  ;;  %v5533_v39 = vor.u32 8388608, %v13140_v23  ;;  %v5446_v5 = vor.u32 %v5445_v30, %v5444_v25 }
 0x6d3   : > { %v5449_v42 = vor.u32 %v5448_v38, %v5447_v44  ;;  %v5450_v32 = vshll.u32 %v15682_v37, %v5435_v59  ;;  %v5451_v2 = vshrl.u32 %v15683_v18, %v5436_v49  ;;  %v5295_v62 = vcvt.s32.f32 %v5288_v63  ;;  %v13180_v48 = vpop.eup %8858 }
 0x6d4   : > { %v15872_v34 = vand.u32 2147483647, %v12950_v24  ;;  %v5385_v61 = vclz %v8223_v10  ;;  %v5403_v9 = vsub.s32 4, %v13121_v11  ;;  %vm5453_vm4 = vcmp.lt.s32.totalorder %v13148_v50, 1  ;;  %15875 = vst [vmem:[#allocation11_spill] sm:$0xff] %v13180_v48 }
 0x6d5   : > { %v5293_v23 = vand.u32 2147483647, %v5292_v12  ;;  %v5452_v4 = vor.u32 %v5451_v2, %v5450_v32  ;;  %vm5456_vm9 = vcmp.lt.s32.totalorder %v13148_v50, 4  ;;  %v5461_v59 = vsel %vm5453_vm4, %v5440_v29, %v5443_v54 }
 0x6d6   : > { %vm13174_vm7 = vcmp.le.f32.partialorder %v15872_v34, 0.7853982  ;;  %v8224_v63 = vadd.s32 4294967294, %v5385_v61  ;;  %v5437_v25 = vshrl.u32 %v15512_v31, %v5436_v49  ;;  %vm5455_vm10 = vcmp.lt.s32.totalorder %v13148_v50, 3 }
 0x6d7   : > { %v5462_v30 = vsel %vm5456_vm9, %v5449_v42, 920167782  ;;  %vm5454_vm1 = vcmp.lt.s32.totalorder %v13148_v50, 2  ;;  %v5458_v44 = vsel %vm5456_vm9, %v5446_v5, 2102212464  ;;  %v5465_v32 = vsel %vm5453_vm4, %v5443_v54, %v5446_v5 }
 0x6d8   : > { %v5463_v38 = vsel %vm5455_vm10, %v5446_v5, %v5462_v30  ;;  %vm15442_vm3 = vcmp.lt.s32.totalorder %v12819_v56, 0  ;;  %vm8225_vm14 = vcmp.lt.s32.totalorder %v8224_v63, 0  ;;  %v5404_v12 = vsel %vm5319_vm13, %v5403_v9, %v13121_v11 }
 0x6d9   : > { %v5464_v49 = vsel %vm5454_vm1, %v5461_v59, %v5463_v38  ;;  %v5466_v61 = vsel %vm5456_vm9, %v5452_v4, 1326507024  ;;  %v5296_v10 = vmul.f32 %v5295_v62, %v5293_v23  ;;  %v5388_v2 = vsel %vm8225_vm14, 0, %v8224_v63 }
 0x6da   : > { %v5457_v34 = vsel %vm5453_vm4, %v5437_v25, %v5440_v29  ;;  %v5467_v30 = vsel %vm5455_vm10, %v5449_v42, %v5466_v61  ;;  %v5389_v5 = vsub.s32 32, %v5388_v2  ;;  %v5393_v48 = vsub.s32 4294967266, %v5388_v2 }
 0x6db   : > { %v5459_v51 = vsel %vm5455_vm10, %v5443_v54, %v5458_v44  ;;  %v5468_v11 = vsel %vm5454_vm1, %v5465_v32, %v5467_v30  ;;  %v13211_v62 = vmul.u32.u64.low %v13167_v21, %v5464_v49  ;;  %v13212_v23 = vmul.u32.u64.high %v13167_v21, %v5464_v49, %v13211_v62 }
 0x6dc   : > { %v13207_v9 = vmul.u32.u64.low %v13167_v21, %v5468_v11  ;;  %v13208_v59 = vmul.u32.u64.high %v13167_v21, %v5468_v11, %v13207_v9  ;;  %v5373_v42 = vadd.s32 %v13070_v55, %v13079_v17  ;;  %v5394_v29 = vadd.s32 127, %v5393_v48 }
 0x6dd   : > { %v5535_v4 = vadd.s32 1, %v8230_v22  ;;  %v13219_v54 = vadd.f32 %v12858_v26, %v13131_v6  ;;  %v5297_v63 = vxor.u32 2147483648, %v5296_v10  ;;  %v5406_v25 = vsel %vm13174_vm7, 0, %v5404_v12 }
 0x6de   : > { %v5460_v44 = vsel %vm5454_vm1, %v5457_v34, %v5459_v51  ;;  %v15435_v38 = vand.u32 2147483647, %v13136_v27  ;;  %v5391_v32 = vshrl.u32 %v5373_v42, %v5389_v5  ;;  %v13226_v49 = vshll.u32 %v5533_v39, 8 }
 0x6df   : > { %vm5536_vm4 = vcmp.gt.s32.totalorder %v5535_v4, 0  ;;  %v5632_v55 = vand.u32 2139095040, %v13136_v27  ;;  %v5395_v17 = vshll.u32 %v5394_v29, 23  ;;  %vm5478_vm9 = vc.u32 %v13208_v59, %v13211_v62 }
 0x6e0   : > { %v5479_v26 = vadd.s32 1, %v13212_v23  ;;  %v5537_v6 = vsel %vm5536_vm4, %v5535_v4, 0  ;;  %v5390_v22 = vshll.u32 %v13146_v35, %v5388_v2  ;;  %v13233_v48 = vadd.s32 3, %v5406_v25 }
 0x6e1   : > { %v5476_v51 = vmul.u32 %v13167_v21, %v5460_v44  ;;  %v5539_v50 = vand.u32 31, %v5537_v6  ;;  %v5298_v39 = vsel %vm15442_vm3, %v5297_v63, %v5296_v10  ;;  %v13241_v61 = vand.u32 8388607, %v15435_v38 }
 0x6e2   : > { %15876 = vst [vmem:[#allocation33_spill] sm:$0xff] %v13233_v48  ;;  %v5480_v12 = vsel %vm5478_vm9, %v5479_v26, %v13212_v23  ;;  %v5392_v30 = vor.u32 %v5391_v32, %v5390_v22  ;;  %v5633_v35 = vshrl.u32 %v5632_v55, 23  ;;  %v5396_v2 = vor.u32 4788187, %v5395_v17 }
 0x6e3   : > { %v5481_v5 = vadd.s32 %v5480_v12, %v5476_v51  ;;  %v5540_v11 = vsub.s32 32, %v5539_v50  ;;  %v5538_v9 = vshrl.u32 %v5537_v6, 5  ;;  %v5542_v21 = vshll.u32 %v15512_v31, %v5539_v50 }
 0x6e4   : > { %v5545_v42 = vshll.u32 %v15679_v53, %v5539_v50  ;;  %v5548_v23 = vshll.u32 %v15680_v41, %v5539_v50  ;;  %v5551_v4 = vshll.u32 %v15681_v16, %v5539_v50  ;;  %v15877_v63 = vand.u32 2147483647, %v12819_v56 }
 0x6e5   : > { %v5482_v29 = vadd.s32 536870912, %v5481_v5  ;;  %v5543_v10 = vshrl.u32 %v15679_v53, %v5540_v11  ;;  %v5546_v44 = vshrl.u32 %v15680_v41, %v5540_v11  ;;  %v5549_v32 = vshrl.u32 %v15681_v16, %v5540_v11 }
 0x6e6   : > { %vm13251_vm10 = vcmp.le.f32.partialorder %v15877_v63, 0.7853982  ;;  %v5552_v55 = vshrl.u32 %v15682_v37, %v5540_v11  ;;  %v5555_v17 = vshrl.u32 %v15683_v18, %v5540_v11  ;;  %v5554_v22 = vshll.u32 %v15682_v37, %v5539_v50 }
 0x6e7   : > { %v13259_v26 = vshrl.u32 %v5482_v29, 30  ;;  %v5544_v6 = vor.u32 %v5543_v10, %v5542_v21  ;;  %v5736_v51 = vand.u32 2139095040, %v13144_v40  ;;  %v5397_v12 = vand.u32 2147483647, %v5396_v2 }
 0x6e8   : > { %v5547_v63 = vor.u32 %v5546_v44, %v5545_v42  ;;  %v5550_v38 = vor.u32 %v5549_v32, %v5548_v23  ;;  %v5553_v34 = vor.u32 %v5552_v55, %v5551_v4  ;;  %v5399_v48 = vcvt.s32.f32 %v5392_v30 }
 0x6e9   : > { %15880 = vst [vmem:[#allocation28_spill] sm:$0xff] %v13259_v26  ;;  %v5484_v0 = vshll.u32 %v13259_v26, 30  ;;  %v5556_v45 = vor.u32 %v5555_v17, %v5554_v22  ;;  %vm5557_vm1 = vcmp.lt.s32.totalorder %v5538_v9, 1  ;;  %v5541_v20 = vshrl.u32 %v15512_v31, %v5540_v11 }
 0x6ea   : > { %vm5560_vm14 = vcmp.lt.s32.totalorder %v5538_v9, 4  ;;  %v5565_v43 = vsel %vm5557_vm1, %v5544_v6, %v5547_v63  ;;  %v8234_v29 = vadd.s32 4294967169, %v5633_v35  ;;  %vm5559_vm4 = vcmp.lt.s32.totalorder %v5538_v9, 3 }
 0x6eb   : > { %v13265_v8 = vsub.s32 %v5481_v5, %v5484_v0  ;;  %v5562_v50 = vsel %vm5560_vm14, %v5550_v38, 2102212464  ;;  %v5566_v21 = vsel %vm5560_vm14, %v5553_v34, 920167782  ;;  %v5400_v10 = vmul.f32 %v5399_v48, %v5397_v12 }
 0x6ec   : > { %vm5558_vm9 = vcmp.lt.s32.totalorder %v5538_v9, 2  ;;  %v5567_v2 = vsel %vm5559_vm4, %v5550_v38, %v5566_v21  ;;  %v5569_v42 = vsel %vm5557_vm1, %v5547_v63, %v5550_v38  ;;  %v5561_v23 = vsel %vm5557_vm1, %v5541_v20, %v5544_v6 }
 0x6ed   : > { %v5487_v30 = vsub.s32 0, %v13265_v8  ;;  %v5568_v4 = vsel %vm5558_vm9, %v5565_v43, %v5567_v2  ;;  %v5570_v44 = vsel %vm5560_vm14, %v5556_v45, 1326507024  ;;  %v5563_v32 = vsel %vm5559_vm4, %v5547_v63, %v5562_v50 }
 0x6ee   : > { %v5571_v11 = vsel %vm5559_vm4, %v5553_v34, %v5570_v44  ;;  %v13270_v55 = vmul.u32.u64.low %v13226_v49, %v5568_v4  ;;  %v13271_v35 = vmul.u32.u64.high %v13226_v49, %v5568_v4, %v13270_v55  ;;  %v5301_v0 = vsel %vm13251_vm10, %v12819_v56, %v5298_v39 }
 0x6ef   : > { %v8227_v48 = vmin.u32 %v5487_v30, %v13265_v8  ;;  %v5572_v38 = vsel %vm5558_vm9, %v5569_v42, %v5571_v11  ;;  %v5639_v5 = vadd.s32 1, %v8234_v29  ;;  %v5401_v20 = vxor.u32 2147483648, %v5400_v10 }
 0x6f0   : > { %v13280_v43 = vmul.u32.u64.low %v13226_v49, %v5572_v38  ;;  %v13281_v45 = vmul.u32.u64.high %v13226_v49, %v5572_v38, %v13280_v43  ;;  %v5637_v34 = vor.u32 8388608, %v13241_v61  ;;  %v5564_v6 = vsel %vm5558_vm9, %v5561_v23, %v5563_v32 }
 0x6f1   : > { %v5489_v17 = vclz %v8227_v48  ;;  %vm5640_vm1 = vcmp.gt.s32.totalorder %v5639_v5, 0  ;;  %v5737_v22 = vshrl.u32 %v5736_v51, 23  ;;  %8860 = vcosq.f32 %v5301_v0 }
 0x6f2   : > { %v5583_v39 = vadd.s32 1, %v13271_v35  ;;  %v5641_v12 = vsel %vm5640_vm1, %v5639_v5, 0  ;;  %v15881_v63 = vand.u32 2147483647, %v13144_v40  ;;  %8862 = vsinq.f32 %v5301_v0 }
 0x6f3   : > { %v5477_v29 = vadd.s32 %v13211_v62, %v13208_v59  ;;  %v8228_v21 = vadd.s32 4294967294, %v5489_v17  ;;  %v5643_v2 = vand.u32 31, %v5641_v12  ;;  %v13294_v61 = vsel %vm5319_vm13, %v5401_v20, %v5400_v10 }
 0x6f4   : > { %v13288_v50 = vand.u32 8388607, %v15881_v63  ;;  %v5580_v9 = vmul.u32 %v13226_v49, %v5564_v6  ;;  %vm5582_vm14 = vc.u32 %v13281_v45, %v13270_v55  ;;  %v13299_v51 = vshll.u32 %v5637_v34, 8 }
 0x6f5   : > { %vm8229_vm4 = vcmp.lt.s32.totalorder %v8228_v21, 0  ;;  %v5584_v42 = vsel %vm5582_vm14, %v5583_v39, %v13271_v35  ;;  %v5644_v30 = vsub.s32 32, %v5643_v2  ;;  %v8238_v23 = vadd.s32 4294967169, %v5737_v22 }
 0x6f6   : > { %v5492_v4 = vsel %vm8229_vm4, 0, %v8228_v21  ;;  %v5585_v59 = vadd.s32 %v5584_v42, %v5580_v9  ;;  %v5642_v62 = vshrl.u32 %v5641_v12, 5  ;;  %v5646_v11 = vshll.u32 %v15512_v31, %v5643_v2 }
 0x6f7   : > { %v5493_v32 = vsub.s32 32, %v5492_v4  ;;  %v5497_v10 = vsub.s32 4294967266, %v5492_v4  ;;  %v5652_v49 = vshll.u32 %v15680_v41, %v5643_v2  ;;  %v5647_v48 = vshrl.u32 %v15679_v53, %v5644_v30 }
 0x6f8   : > { %v5586_v0 = vadd.s32 536870912, %v5585_v59  ;;  %v5650_v38 = vshrl.u32 %v15680_v41, %v5644_v30  ;;  %v5653_v35 = vshrl.u32 %v15681_v16, %v5644_v30  ;;  %v5494_v5 = vshll.u32 %v13265_v8, %v5492_v4 }
 0x6f9   : > { %v5495_v20 = vshrl.u32 %v5477_v29, %v5493_v32  ;;  %v5498_v43 = vadd.s32 127, %v5497_v10  ;;  %v5656_v34 = vshrl.u32 %v15682_v37, %v5644_v30  ;;  %v5649_v6 = vshll.u32 %v15679_v53, %v5643_v2 }
 0x6fa   : > { %v5587_v17 = vshrl.u32 %v5586_v0, 30  ;;  %v5655_v22 = vshll.u32 %v15681_v16, %v5643_v2  ;;  %v5743_v39 = vadd.s32 1, %v8238_v23  ;;  %v5648_v21 = vor.u32 %v5647_v48, %v5646_v11 }
 0x6fb   : > { %v5496_v12 = vor.u32 %v5495_v20, %v5494_v5  ;;  %v5499_v63 = vshll.u32 %v5498_v43, 23  ;;  %v5654_v9 = vor.u32 %v5653_v35, %v5652_v49  ;;  %v13312_v42 = vpop.eup %8860  ;;  %v5651_v26 = vor.u32 %v5650_v38, %v5649_v6 }
 0x6fc   : > { %v5588_v44 = vshll.u32 %v5587_v17, 30  ;;  %v5658_v8 = vshll.u32 %v15682_v37, %v5643_v2  ;;  %v5659_v29 = vshrl.u32 %v15683_v18, %v5644_v30  ;;  %v13316_v4 = vpop.eup %8862  ;;  %v5645_v10 = vshrl.u32 %v15512_v31, %v5644_v30 }
 0x6fd   : > { %v5500_v32 = vor.u32 4788187, %v5499_v63  ;;  %v5657_v0 = vor.u32 %v5656_v34, %v5655_v22  ;;  %vm5661_vm13 = vcmp.lt.s32.totalorder %v5642_v62, 1  ;;  %vm15447_vm9 = vcmp.lt.s32.totalorder %v13017_v47, 0 }
 0x6fe   : > { %v5503_v23 = vcvt.s32.f32 %v5496_v12  ;;  %vm5527_vm1 = vcmp.lt.s32.totalorder %v13111_v46, 0  ;;  %v13321_v11 = vsub.s32 %v5585_v59, %v5588_v44  ;;  %v5660_v49 = vor.u32 %v5659_v29, %v5658_v8 }
 0x6ff   : > { %vm5664_vm14 = vcmp.lt.s32.totalorder %v5642_v62, 4  ;;  %v5501_v48 = vand.u32 2147483647, %v5500_v32  ;;  %vm5663_vm4 = vcmp.lt.s32.totalorder %v5642_v62, 3  ;;  %v5665_v2 = vsel %vm5661_vm13, %v5645_v10, %v5648_v21 }
 0x700   : > { %v5666_v38 = vsel %vm5664_vm14, %v5654_v9, 2102212464  ;;  %v5591_v35 = vsub.s32 0, %v13321_v11  ;;  %v5611_v30 = vsub.s32 4, %v5587_v17  ;;  %v5669_v20 = vsel %vm5661_vm13, %v5648_v21, %v5651_v26 }
 0x701   : > { %v5667_v5 = vsel %vm5663_vm4, %v5651_v26, %v5666_v38  ;;  %v5504_v43 = vmul.f32 %v5503_v23, %v5501_v48  ;;  %vm5662_vm3 = vcmp.lt.s32.totalorder %v5642_v62, 2  ;;  %v5670_v59 = vsel %vm5664_vm14, %v5657_v0, 920167782 }
 0x702   : > { %v5673_v44 = vsel %vm5661_vm13, %v5651_v26, %v5654_v9  ;;  %v8231_v34 = vmin.u32 %v5591_v35, %v13321_v11  ;;  %v5668_v6 = vsel %vm5662_vm3, %v5665_v2, %v5667_v5  ;;  %v5671_v22 = vsel %vm5663_vm4, %v5654_v9, %v5670_v59 }
 0x703   : > { %v5674_v12 = vsel %vm5664_vm14, %v5660_v49, 1326507024  ;;  %v5505_v63 = vxor.u32 2147483648, %v5504_v43  ;;  %v5672_v8 = vsel %vm5662_vm3, %v5669_v20, %v5671_v22  ;;  %vm5744_vm15 = vcmp.gt.s32.totalorder %v5743_v39, 0 }
 0x704   : > { %v5675_v29 = vsel %vm5663_vm4, %v5657_v0, %v5674_v12  ;;  %v5593_v32 = vclz %v8231_v34  ;;  %v13335_v10 = vmul.u32.u64.low %v13299_v51, %v5672_v8  ;;  %v13336_v23 = vmul.u32.u64.high %v13299_v51, %v5672_v8, %v13335_v10 }
 0x705   : > { %v5676_v21 = vsel %vm5662_vm3, %v5673_v44, %v5675_v29  ;;  %v13343_v26 = vsel %vm13174_vm7, %v12950_v24, %v13294_v61  ;;  %v5745_v62 = vsel %vm5744_vm15, %v5743_v39, 0  ;;  %v5581_v0 = vadd.s32 %v13270_v55, %v13281_v45 }
 0x706   : > { %v13346_v9 = vmul.u32.u64.low %v13299_v51, %v5676_v21  ;;  %v13347_v49 = vmul.u32.u64.high %v13299_v51, %v5676_v21, %v13346_v9  ;;  %v8232_v48 = vadd.s32 4294967294, %v5593_v32  ;;  %v5747_v2 = vand.u32 31, %v5745_v62 }
 0x707   : > { %v13354_v35 = vsel %vm15447_vm9, %v5505_v63, %v5504_v43  ;;  %v13358_v7 = vsel %vm5527_vm1, %v5611_v30, %v5587_v17  ;;  %v5684_v61 = vmul.u32 %v13299_v51, %v5668_v6  ;;  %v15882_v5 = vor.u32 8388608, %v13288_v50 }
 0x708   : > { %vm8233_vm15 = vcmp.lt.s32.totalorder %v8232_v48, 0  ;;  %v5687_v55 = vadd.s32 1, %v13336_v23  ;;  %v13366_v45 = vshrl.u32 %v5745_v62, 5  ;;  %v5748_v20 = vsub.s32 32, %v5747_v2 }
 0x709   : > { %v13363_v39 = vshll.u32 %v15882_v5, 8  ;;  %v5596_v59 = vsel %vm8233_vm15, 0, %v8232_v48  ;;  %vm5686_vm7 = vc.u32 %v13347_v49, %v13335_v10  ;;  %v5840_v43 = vand.u32 2139095040, %v13219_v54 }
 0x70a   : > { %v4467_v17 = vsub.s32 4, %v12424_v60  ;;  %v5597_v30 = vsub.s32 32, %v5596_v59  ;;  %v5601_v51 = vsub.s32 4294967266, %v5596_v59  ;;  %v5688_v50 = vsel %vm5686_vm7, %v5687_v55, %v13336_v23 }
 0x70b   : > { %v5750_v44 = vshll.u32 %v15512_v31, %v5747_v2  ;;  %v5598_v34 = vshll.u32 %v13321_v11, %v5596_v59  ;;  %v5689_v6 = vadd.s32 %v5688_v50, %v5684_v61  ;;  %v5751_v22 = vshrl.u32 %v15679_v53, %v5748_v20 }
 0x70c   : > { %v5753_v12 = vshll.u32 %v15679_v53, %v5747_v2  ;;  %v5599_v63 = vshrl.u32 %v5581_v0, %v5597_v30  ;;  %v5602_v8 = vadd.s32 127, %v5601_v51  ;;  %v5754_v29 = vshrl.u32 %v15680_v41, %v5748_v20 }
 0x70d   : > { %v5756_v32 = vshll.u32 %v15680_v41, %v5747_v2  ;;  %v5690_v21 = vadd.s32 536870912, %v5689_v6  ;;  %v5752_v9 = vor.u32 %v5751_v22, %v5750_v44  ;;  %v5757_v62 = vshrl.u32 %v15681_v16, %v5748_v20 }
 0x70e   : > { %v5759_v23 = vshll.u32 %v15681_v16, %v5747_v2  ;;  %v5600_v48 = vor.u32 %v5599_v63, %v5598_v34  ;;  %v5603_v5 = vshll.u32 %v5602_v8, 23  ;;  %v5755_v11 = vor.u32 %v5754_v29, %v5753_v12 }
 0x70f   : > { %v5760_v61 = vshrl.u32 %v15682_v37, %v5748_v20  ;;  %v13382_v55 = vshrl.u32 %v5690_v21, 30  ;;  %v5758_v59 = vor.u32 %v5757_v62, %v5756_v32  ;;  %v5762_v0 = vshll.u32 %v15682_v37, %v5747_v2 }
 0x710   : > { %v5763_v30 = vshrl.u32 %v15683_v18, %v5748_v20  ;;  %v5604_v51 = vor.u32 4788187, %v5603_v5  ;;  %v5607_v50 = vcvt.s32.f32 %v5600_v48  ;;  %v5749_v44 = vshrl.u32 %v15512_v31, %v5748_v20 }
 0x711   : > { %15883 = vst [vmem:[#allocation13_spill] sm:$0xff] %v13382_v55  ;;  %v5761_v22 = vor.u32 %v5760_v61, %v5759_v23  ;;  %v15884_v38 = vand.u32 2147483647, %v13017_v47  ;;  %v15887_v12 = vand.u32 2147483647, %v13111_v46  ;;  %v5692_v2 = vshll.u32 %v13382_v55, 30 }
 0x712   : > { %v5764_v8 = vor.u32 %v5763_v30, %v5762_v0  ;;  %vm5765_vm14 = vcmp.lt.s32.totalorder %v13366_v45, 1  ;;  %vm5766_vm4 = vcmp.lt.s32.totalorder %v13366_v45, 2  ;;  %v5605_v20 = vand.u32 2147483647, %v5604_v51 }
 0x713   : > { %vm13389_vm3 = vcmp.le.f32.partialorder %v15884_v38, 0.7853982  ;;  %vm13395_vm13 = vcmp.le.f32.partialorder %v15887_v12, 0.7853982  ;;  %vm5767_vm15 = vcmp.lt.s32.totalorder %v13366_v45, 3  ;;  %vm5768_vm7 = vcmp.lt.s32.totalorder %v13366_v45, 4 }
 0x714   : > { %v5773_v38 = vsel %vm5765_vm14, %v5752_v9, %v5755_v11  ;;  %v13404_v29 = vsub.s32 %v5689_v6, %v5692_v2  ;;  %v5770_v32 = vsel %vm5768_vm7, %v5758_v59, 2102212464  ;;  %v5774_v21 = vsel %vm5768_vm7, %v5761_v22, 920167782 }
 0x715   : > { %v5777_v62 = vsel %vm5765_vm14, %v5755_v11, %v5758_v59  ;;  %v5608_v23 = vmul.f32 %v5607_v50, %v5605_v20  ;;  %v5769_v48 = vsel %vm5765_vm14, %v5749_v44, %v5752_v9  ;;  %v5775_v5 = vsel %vm5767_vm15, %v5758_v59, %v5774_v21 }
 0x716   : > { %v5778_v61 = vsel %vm5768_vm7, %v5764_v8, 1326507024  ;;  %v5695_v0 = vsub.s32 0, %v13404_v29  ;;  %v5771_v30 = vsel %vm5767_vm15, %v5755_v11, %v5770_v32  ;;  %v5776_v51 = vsel %vm5766_vm4, %v5773_v38, %v5775_v5 }
 0x717   : > { %v5779_v12 = vsel %vm5767_vm15, %v5761_v22, %v5778_v61  ;;  %v5609_v24 = vxor.u32 2147483648, %v5608_v23  ;;  %v13412_v6 = vmul.u32.u64.low %v13363_v39, %v5776_v51  ;;  %v13413_v2 = vmul.u32.u64.high %v13363_v39, %v5776_v51, %v13412_v6 }
 0x718   : > { %v5780_v55 = vsel %vm5766_vm4, %v5777_v62, %v5779_v12  ;;  %v8235_v50 = vmin.u32 %v5695_v0, %v13404_v29  ;;  %v15890_v11 = vand.u32 2147483647, %v13219_v54  ;;  %8864 = vcosq.f32 %v13343_v26 }
 0x719   : > { %v13417_v9 = vmul.u32.u64.low %v13363_v39, %v5780_v55  ;;  %v13418_v59 = vmul.u32.u64.high %v13363_v39, %v5780_v55, %v13417_v9  ;;  %v5772_v22 = vsel %vm5766_vm4, %v5769_v48, %v5771_v30  ;;  %v5841_v8 = vshrl.u32 %v5840_v43, 23 }
 0x71a   : > { %v5844_v44 = vand.u32 8388607, %v15890_v11  ;;  %v4468_v20 = vsel %vm4383_vm2, %v4467_v17, %v12424_v60  ;;  %8866 = vsinq.f32 %v13343_v26  ;;  %v5610_v38 = vsel %vm5527_vm1, %v5609_v24, %v5608_v23 }
 0x71b   : > { %v5697_v55 = vclz %v8235_v50  ;;  %v4470_v32 = vsel %vm12584_vm11, 0, %v4468_v20  ;;  %v5509_v45 = vsel %vm13389_vm3, %v13017_v47, %v13354_v35  ;;  %v5614_v43 = vsel %vm13395_vm13, 0, %v13358_v7 }
 0x71c   : > { %v5791_v60 = vadd.s32 1, %v13413_v2  ;;  %v8242_v17 = vadd.s32 4294967169, %v5841_v8  ;;  %v5788_v21 = vmul.u32 %v13363_v39, %v5772_v22  ;;  %vm5790_vm2 = vc.u32 %v13418_v59, %v13412_v6 }
 0x71d   : > { %v8236_v26 = vadd.s32 4294967294, %v5697_v55  ;;  %v5845_v24 = vor.u32 8388608, %v5844_v44  ;;  %v5613_v19 = vsel %vm13395_vm13, %v13111_v46, %v5610_v38  ;;  %v4474_v23 = vadd.s32 3, %v4470_v32 }
 0x71e   : > { %v5792_v62 = vsel %vm5790_vm2, %v5791_v60, %v13413_v2  ;;  %v5847_v35 = vadd.s32 1, %v8242_v17  ;;  %8868 = vcosq.f32 %v5509_v45  ;;  %v13447_v48 = vadd.s32 3, %v5614_v43 }
 0x71f   : > { %vm8237_vm11 = vcmp.lt.s32.totalorder %v8236_v26, 0  ;;  %v5793_v7 = vadd.s32 %v5792_v62, %v5788_v21  ;;  %8870 = vsinq.f32 %v5509_v45  ;;  %v5685_v39 = vadd.s32 %v13335_v10, %v13347_v49 }
 0x720   : > { %v5700_v5 = vsel %vm8237_vm11, 0, %v8236_v26  ;;  %vm5848_vm1 = vcmp.gt.s32.totalorder %v5847_v35, 0  ;;  %8872 = vcosq.f32 %v5613_v19  ;;  %v13451_v51 = vshll.u32 %v5845_v24, 8 }
 0x721   : > { %v5701_v61 = vsub.s32 32, %v5700_v5  ;;  %v5705_v0 = vsub.s32 4294967266, %v5700_v5  ;;  %v5794_v63 = vadd.s32 536870912, %v5793_v7  ;;  %v5849_v30 = vsel %vm5848_vm1, %v5847_v35, 0 }
 0x722   : > { %v13453_v12 = vand.u32 3, %v4474_v23  ;;  %v4478_v2 = vxor.u32 2147483648, %v12805_v33  ;;  %v5702_v50 = vshll.u32 %v13404_v29, %v5700_v5  ;;  %v13459_v10 = vpop.eup %8864  ;;  %8874 = vsinq.f32 %v5613_v19 }
 0x723   : > { %v5703_v9 = vshrl.u32 %v5685_v39, %v5701_v61  ;;  %v5706_v11 = vadd.s32 127, %v5705_v0  ;;  %v13457_v44 = vshrl.u32 %v5794_v63, 30  ;;  %v13462_v49 = vadd.s32 %v13412_v6, %v13418_v59 }
 0x724   : > { %v5851_v22 = vand.u32 31, %v5849_v30  ;;  %v4481_v8 = vxor.u32 2147483648, %v12722_v3  ;;  %v13465_v20 = vpop.eup %8866  ;;  %v4675_v29 = vsub.s32 4, %v12560_v36  ;;  %v13469_v45 = vshrl.u32 %v5849_v30, 5 }
 0x725   : > { %v5704_v38 = vor.u32 %v5703_v9, %v5702_v50  ;;  %v5707_v55 = vshll.u32 %v5706_v11, 23  ;;  %v5796_v32 = vshll.u32 %v13457_v44, 30  ;;  %vm4477_vm13 = vcmp.eq.s32.totalorder %v13453_v12, 0 }
 0x726   : > { %v5852_v43 = vsub.s32 32, %v5851_v22  ;;  %vm4480_vm14 = vcmp.eq.s32.totalorder %v13453_v12, 2  ;;  %vm5631_vm4 = vcmp.lt.s32.totalorder %v13136_v27, 0  ;;  %v5854_v60 = vshll.u32 %v15512_v31, %v5851_v22 }
 0x727   : > { %v5708_v6 = vor.u32 4788187, %v5707_v55  ;;  %v13474_v59 = vsub.s32 %v5793_v7, %v5796_v32  ;;  %v13478_v17 = vsel %vm4477_vm13, %v12722_v3, %v4478_v2  ;;  %vm5735_vm15 = vcmp.lt.s32.totalorder %v13144_v40, 0 }
 0x728   : > { %v5855_v26 = vshrl.u32 %v15679_v53, %v5852_v43  ;;  %v5857_v21 = vshll.u32 %v15679_v53, %v5851_v22  ;;  %v5858_v24 = vshrl.u32 %v15680_v41, %v5852_v43  ;;  %v5860_v19 = vshll.u32 %v15680_v41, %v5851_v22  ;;  %v13485_v62 = vpop.eup %8868 }
 0x729   : > { %v5709_v35 = vand.u32 2147483647, %v5708_v6  ;;  %v5711_v23 = vcvt.s32.f32 %v5704_v38  ;;  %v5799_v7 = vsub.s32 0, %v13474_v59  ;;  %v5861_v39 = vshrl.u32 %v15681_v16, %v5852_v43  ;;  %v13489_v3 = vpop.eup %8870 }
 0x72a   : > { %v15891_v5 = vand.u32 2147483647, %v13136_v27  ;;  %v5856_v0 = vor.u32 %v5855_v26, %v5854_v60  ;;  %v5859_v63 = vor.u32 %v5858_v24, %v5857_v21  ;;  %v5863_v30 = vshll.u32 %v15681_v16, %v5851_v22  ;;  %v13499_v50 = vpop.eup %8872 }
 0x72b   : > { %v5864_v2 = vshrl.u32 %v15682_v37, %v5852_v43  ;;  %v5712_v9 = vmul.f32 %v5711_v23, %v5709_v35  ;;  %v8239_v11 = vmin.u32 %v5799_v7, %v13474_v59  ;;  %v5862_v38 = vor.u32 %v5861_v39, %v5860_v19 }
 0x72c   : > { %vm13493_vm7 = vcmp.le.f32.partialorder %v15891_v5, 0.7853982  ;;  %v4482_v55 = vsel %vm4480_vm14, %v4481_v8, %v12805_v33  ;;  %v5866_v6 = vshll.u32 %v15682_v37, %v5851_v22  ;;  %v5867_v60 = vshrl.u32 %v15683_v18, %v5852_v43  ;;  %v13513_v19 = vpop.eup %8874 }
 0x72d   : > { %v5865_v32 = vor.u32 %v5864_v2, %v5863_v30  ;;  %v4676_v26 = vsel %vm4591_vm8, %v4675_v29, %v12560_v36  ;;  %v5713_v21 = vxor.u32 2147483648, %v5712_v9  ;;  %v5801_v24 = vclz %v8239_v11 }
 0x72e   : > { %v5819_v35 = vsub.s32 4, %v13457_v44  ;;  %vm5869_vm2 = vcmp.lt.s32.totalorder %v13469_v45, 1  ;;  %vm4476_vm11 = vcmp.lt.s32.totalorder %v13453_v12, 2  ;;  %v5853_v33 = vshrl.u32 %v15512_v31, %v5852_v43 }
 0x72f   : > { %v5868_v8 = vor.u32 %v5867_v60, %v5866_v6  ;;  %vm5872_vm1 = vcmp.lt.s32.totalorder %v13469_v45, 4  ;;  %v5877_v22 = vsel %vm5869_vm2, %v5856_v0, %v5859_v63  ;;  %v8240_v23 = vadd.s32 4294967294, %v5801_v24 }
 0x730   : > { %vm5871_vm8 = vcmp.lt.s32.totalorder %v13469_v45, 3  ;;  %v5874_v36 = vsel %vm5872_vm1, %v5862_v38, 2102212464  ;;  %v5878_v29 = vsel %vm5872_vm1, %v5865_v32, 920167782  ;;  %v5714_v7 = vsel %vm5631_vm4, %v5713_v21, %v5712_v9 }
 0x731   : > { %vm5870_vm13 = vcmp.lt.s32.totalorder %v13469_v45, 2  ;;  %v5879_v39 = vsel %vm5871_vm8, %v5862_v38, %v5878_v29  ;;  %v5881_v43 = vsel %vm5869_vm2, %v5859_v63, %v5862_v38  ;;  %vm4473_vm14 = vweird.f32 %v12299_v14  ;;  %v15898_v14 = vld [vmem:[#allocation34_spill] sm:$0xff] }
 0x732   : > { %vm8241_vm9 = vcmp.lt.s32.totalorder %v8240_v23, 0  ;;  %v13529_v5 = vsel %vm5735_vm15, %v5819_v35, %v13457_v44  ;;  %v5880_v30 = vsel %vm5870_vm13, %v5877_v22, %v5879_v39  ;;  %v5882_v2 = vsel %vm5872_vm1, %v5868_v8, 1326507024 }
 0x733   : > { %v5804_v11 = vsel %vm8241_vm9, 0, %v8240_v23  ;;  %v5873_v9 = vsel %vm5869_vm2, %v5853_v33, %v5856_v0  ;;  %v5875_v6 = vsel %vm5871_vm8, %v5859_v63, %v5874_v36  ;;  %v5883_v60 = vsel %vm5871_vm8, %v5865_v32, %v5882_v2 }
 0x734   : > { %v5717_v38 = vsel %vm13493_vm7, %v13136_v27, %v5714_v7  ;;  %v5805_v21 = vsub.s32 32, %v5804_v11  ;;  %v5809_v24 = vsub.s32 4294967266, %v5804_v11  ;;  %v5884_v44 = vsel %vm5870_vm13, %v5881_v43, %v5883_v60 }
 0x735   : > { %v13541_v35 = vmul.u32.u64.low %v13451_v51, %v5884_v44  ;;  %v13542_v29 = vmul.u32.u64.high %v13451_v51, %v5884_v44, %v13541_v35  ;;  %v13545_v8 = vmul.u32.u64.low %v13451_v51, %v5880_v30  ;;  %v13546_v22 = vmul.u32.u64.high %v13451_v51, %v5880_v30, %v13545_v8 }
 0x736   : > { %vm4681_vm9 = vweird.f32 %v12318_v15  ;;  %v5806_v0 = vshll.u32 %v13474_v59, %v5804_v11  ;;  %v5807_v63 = vshrl.u32 %v13462_v49, %v5805_v21  ;;  %v5810_v32 = vadd.s32 127, %v5809_v24  ;;  %v15902_v15 = vld [vmem:[#allocation39_spill] sm:$0xff] }
 0x737   : > { %v4678_v33 = vsel %vm12742_vm12, 0, %v4676_v26  ;;  %8876 = vcosq.f32 %v5717_v38  ;;  %v5876_v23 = vsel %vm5870_vm13, %v5873_v9, %v5875_v6  ;;  %v4483_v36 = vsel %vm4476_vm11, %v13478_v17, %v4482_v55  ;;  %v15894_v26 = vld [vmem:[#allocation41_spill] sm:$0xff] }
 0x738   : > { %v4682_v7 = vadd.s32 3, %v4678_v33  ;;  %v5808_v39 = vor.u32 %v5807_v63, %v5806_v0  ;;  %v5811_v43 = vshll.u32 %v5810_v32, 23  ;;  %v4686_v30 = vxor.u32 2147483648, %v12902_v58  ;;  %v15899_v0 = vld [vmem:[#allocation36_spill] sm:$0xff] }
 0x739   : > { %v4689_v59 = vxor.u32 2147483648, %v12846_v52  ;;  %vm5894_vm2 = vc.u32 %v13542_v29, %v13545_v8  ;;  %v5895_v13 = vadd.s32 1, %v13546_v22  ;;  %v4371_v2 = vand.u32 3, %v15894_v26 }
 0x73a   : > { %v4683_v49 = vand.u32 3, %v4682_v7  ;;  %v5812_v45 = vor.u32 4788187, %v5811_v43  ;;  %v5815_v11 = vcvt.s32.f32 %v5808_v39  ;;  %v5892_v9 = vmul.u32 %v13451_v51, %v5876_v23 }
 0x73b   : > { %v4484_v12 = vsel %vm4473_vm14, nan, %v4483_v36  ;;  %v15895_v17 = vand.u32 2147483647, %v13144_v40  ;;  %v5896_v6 = vsel %vm5894_vm2, %v5895_v13, %v13546_v22  ;;  %vm4373_vm13 = vcmp.eq.s32.totalorder %v4371_v2, 0 }
 0x73c   : > { %vm4684_vm11 = vcmp.lt.s32.totalorder %v4683_v49, 2  ;;  %vm4685_vm1 = vcmp.eq.s32.totalorder %v4683_v49, 0  ;;  %vm4688_vm8 = vcmp.eq.s32.totalorder %v4683_v49, 2  ;;  %v5813_v60 = vand.u32 2147483647, %v5812_v45 }
 0x73d   : > { %vm13568_vm12 = vcmp.le.f32.partialorder %v15895_v17, 0.7853982  ;;  %v5897_v21 = vadd.s32 %v5896_v6, %v5892_v9  ;;  %v4687_v24 = vsel %vm4685_vm1, %v12846_v52, %v4686_v30  ;;  %v4690_v51 = vsel %vm4688_vm8, %v4689_v59, %v12902_v58  ;;  %v15900_v52 = vld [vmem:[#allocation10_spill] sm:$0xff]  ;;  %v15901_v30 = vld [vmem:[#allocation5_spill] sm:$0xff]  ;;  %v15904_v17 = vld [vmem:[#allocation23_spill] sm:$0xff] }
 0x73e   : > { %v4691_v44 = vsel %vm4684_vm11, %v4687_v24, %v4690_v51  ;;  %v4374_v35 = vxor.u32 2147483648, %v15898_v14  ;;  %v4377_v63 = vxor.u32 2147483648, %v15899_v0  ;;  %v5816_v32 = vmul.f32 %v5815_v11, %v5813_v60  ;;  %v15903_v11 = vld [vmem:[#allocation3_spill] sm:$0xff] }
 0x73f   : > { %v5898_v33 = vadd.s32 536870912, %v5897_v21  ;;  %v4692_v22 = vsel %vm4681_vm9, nan, %v4691_v44  ;;  %vm4376_vm14 = vcmp.eq.s32.totalorder %v4371_v2, 2  ;;  %v4579_v39 = vand.u32 3, %v15900_v52 }
 0x740   : > { %v8373_v23 = vpack.c.bf16 %v4692_v22, %v4484_v12  ;;  %v4375_v36 = vsel %vm4373_vm13, %v15899_v0, %v4374_v35  ;;  %v4378_v7 = vsel %vm4376_vm14, %v4377_v63, %v15898_v14  ;;  %v5817_v58 = vxor.u32 2147483648, %v5816_v32  ;;  %v15906_v35 = vld [vmem:[#allocation35_spill] sm:$0xff] }
 0x741   : > { %v13582_v43 = vshrl.u32 %v5898_v33, 30  ;;  %vm4372_vm2 = vcmp.lt.s32.totalorder %v4371_v2, 2  ;;  %v4582_v59 = vxor.u32 2147483648, %v15901_v30  ;;  %v13585_v13 = vpop.eup %8876  ;;  %8878 = vsinq.f32 %v5717_v38  ;;  %v15905_v38 = vld [vmem:[#allocation6_spill] sm:$0xff] }
 0x742   : > { %8374 = vmatprep.subr.bf16.mxu1 %v8373_v23  ;;  %vm4369_vm9 = vweird.f32 %v15902_v15  ;;  %v4379_v49 = vsel %vm4372_vm2, %v4375_v36, %v4378_v7  ;;  %vm4581_vm11 = vcmp.eq.s32.totalorder %v4579_v39, 0  ;;  %v5818_v26 = vsel %vm5735_vm15, %v5817_v58, %v5816_v32 }
 0x743   : > { %v5900_v45 = vshll.u32 %v13582_v43, 30  ;;  %v4583_v9 = vsel %vm4581_vm11, %v15903_v11, %v4582_v59  ;;  %v4585_v12 = vxor.u32 2147483648, %v15903_v11  ;;  %v13594_v2 = vadd.s32 %v13545_v8, %v13542_v29  ;;  %v15907_v8 = vld [vmem:[#allocation18_spill] sm:$0xff]  ;;  %v15912_v11 = vld [vmem:[#allocation20_spill] sm:$0xff] }
 0x744   : > { %vm4577_vm1 = vweird.f32 %v15904_v17  ;;  %vm4584_vm8 = vcmp.eq.s32.totalorder %v4579_v39, 2  ;;  %v4883_v6 = vsub.s32 4, %v15905_v38  ;;  %v5821_v60 = vsel %vm13568_vm12, %v13144_v40, %v5818_v26 }
 0x745   : > { %v13601_v24 = vsub.s32 %v5897_v21, %v5900_v45  ;;  %vm4580_vm15 = vcmp.lt.s32.totalorder %v4579_v39, 2  ;;  %v4586_v51 = vsel %vm4584_vm8, %v4585_v12, %v15901_v30  ;;  %v4380_v44 = vsel %vm4369_vm9, nan, %v4379_v49  ;;  %v15911_v49 = vld [vmem:[#allocation22_spill] sm:$0xff]  ;;  %v15913_v12 = vld [vmem:[#allocation8_spill] sm:$0xff] }
 0x746   : > { %v4587_v14 = vsel %vm4580_vm15, %v4583_v9, %v4586_v51  ;;  %v4884_v29 = vsel %vm4799_vm5, %v4883_v6, %v15905_v38  ;;  %v5091_v0 = vsub.s32 4, %v15907_v8  ;;  %vm4889_vm13 = vweird.f32 %v15906_v35  ;;  %v15914_v38 = vld [vmem:[#allocation12_spill] sm:$0xff] }
 0x747   : > { %v5903_v63 = vsub.s32 0, %v13601_v24  ;;  %v4588_v32 = vsel %vm4577_vm1, nan, %v4587_v14  ;;  %v4886_v22 = vsel %vm12907_vm6, 0, %v4884_v29  ;;  %v4894_v21 = vxor.u32 2147483648, %v13004_v1 }
 0x748   : > { %8880 = vcosq.f32 %v5821_v60  ;;  %v8375_v23 = vpack.c.bf16 %v4588_v32, %v4380_v44  ;;  %v4890_v36 = vadd.s32 3, %v4886_v22  ;;  %vm15909_vm14 = vcmp.lt.s32.totalorder %v12706_v28, 0  ;;  %v15915_v44 = vld [vmem:[#allocation7_spill] sm:$0xff]  ;;  %v15916_v32 = vld [vmem:[#allocation38_spill] sm:$0xff] }
 0x749   : > { %v5092_v7 = vsel %vm15909_vm14, %v5091_v0, %v15907_v8  ;;  %8882 = vsinq.f32 %v5821_v60  ;;  %v8243_v52 = vmin.u32 %v5903_v63, %v13601_v24  ;;  %v4897_v39 = vxor.u32 2147483648, %v13001_v57 }
 0x74a   : > { %v5094_v30 = vsel %vm13056_vm0, 0, %v5092_v7  ;;  %8376 = vmatpush1.bf16.msra.mxu1 %v8375_v23  ;;  %v4891_v59 = vand.u32 3, %v4890_v36  ;;  %vm5097_vm5 = vweird.f32 %v12706_v28  ;;  %v5102_v26 = vxor.u32 2147483648, %v15911_v49 }
 0x74b   : > { %v5098_v15 = vadd.s32 3, %v5094_v30  ;;  %v5905_v45 = vclz %v8243_v52  ;;  %v5105_v9 = vxor.u32 2147483648, %v15912_v11  ;;  %v4787_v17 = vand.u32 3, %v15913_v12  ;;  %v13625_v60 = vpop.eup %8878  ;;  %v15917_v30 = vld [vmem:[#allocation37_spill] sm:$0xff]  ;;  %v15919_v12 = vld [vmem:[#allocation27_spill] sm:$0xff] }
 0x74c   : > { %v4790_v6 = vxor.u32 2147483648, %v15914_v38  ;;  %vm4893_vm6 = vcmp.eq.s32.totalorder %v4891_v59, 0  ;;  %vm4896_vm2 = vcmp.eq.s32.totalorder %v4891_v59, 2  ;;  %v4793_v14 = vxor.u32 2147483648, %v15915_v44 }
 0x74d   : > { %v5099_v51 = vand.u32 3, %v5098_v15  ;;  %v8244_v29 = vadd.s32 4294967294, %v5905_v45  ;;  %vm4892_vm0 = vcmp.lt.s32.totalorder %v4891_v59, 2  ;;  %v4895_v8 = vsel %vm4893_vm6, %v13001_v57, %v4894_v21 }
 0x74e   : > { %v4898_v0 = vsel %vm4896_vm2, %v4897_v39, %v13004_v1  ;;  %v4995_v33 = vand.u32 3, %v15916_v32  ;;  %vm4789_vm15 = vcmp.eq.s32.totalorder %v4787_v17, 0  ;;  %vm4792_vm14 = vcmp.eq.s32.totalorder %v4787_v17, 2 }
 0x74f   : > { %v4899_v63 = vsel %vm4892_vm0, %v4895_v8, %v4898_v0  ;;  %vm5101_vm9 = vcmp.eq.s32.totalorder %v5099_v51, 0  ;;  %vm5104_vm11 = vcmp.eq.s32.totalorder %v5099_v51, 2  ;;  %vm8245_vm1 = vcmp.lt.s32.totalorder %v8244_v29, 0 }
 0x750   : > { %vm5100_vm8 = vcmp.lt.s32.totalorder %v5099_v51, 2  ;;  %v5103_v22 = vsel %vm5101_vm9, %v15912_v11, %v5102_v26  ;;  %v5106_v23 = vsel %vm5104_vm11, %v5105_v9, %v15911_v49  ;;  %v5908_v36 = vsel %vm8245_vm1, 0, %v8244_v29  ;;  %v15918_v11 = vld [vmem:[#allocation4_spill] sm:$0xff] }
 0x751   : > { %v4900_v7 = vsel %vm4889_vm13, nan, %v4899_v63  ;;  %v5107_v52 = vsel %vm5100_vm8, %v5103_v22, %v5106_v23  ;;  %v5909_v57 = vsub.s32 32, %v5908_v36  ;;  %v5913_v21 = vsub.s32 4294967266, %v5908_v36 }
 0x752   : > { %v5108_v1 = vsel %vm5097_vm5, nan, %v5107_v52  ;;  %v13637_v39 = vpop.eup %8880  ;;  %vm4785_vm6 = vweird.f32 %v15917_v30  ;;  %v4791_v59 = vsel %vm4789_vm15, %v15915_v44, %v4790_v6  ;;  %v4794_v15 = vsel %vm4792_vm14, %v4793_v14, %v15914_v38  ;;  %v15920_v6 = vld [vmem:[#allocation21_spill] sm:$0xff]  ;;  %v15921_v44 = vld [vmem:[#allocation42_spill] sm:$0xff] }
 0x753   : > { %v8377_v58 = vpack.c.bf16 %v5108_v1, %v4900_v7  ;;  %v13642_v49 = vpop.eup %8882  ;;  %v5910_v35 = vshll.u32 %v13601_v24, %v5908_v36  ;;  %v5911_v26 = vshrl.u32 %v13594_v2, %v5909_v57  ;;  %v5914_v45 = vadd.s32 127, %v5913_v21  ;;  %v15926_v36 = vld [vmem:[#allocation28_spill] sm:$0xff] }
 0x754   : > { %vm4788_vm13 = vcmp.lt.s32.totalorder %v4787_v17, 2  ;;  %vm4997_vm5 = vcmp.eq.s32.totalorder %v4995_v33, 0  ;;  %v4998_v9 = vxor.u32 2147483648, %v15918_v11  ;;  %v5001_v51 = vxor.u32 2147483648, %v15919_v12 }
 0x755   : > { %8378 = vmatprep.subr.bf16.mxu1 %v8377_v58  ;;  %v4795_v28 = vsel %vm4788_vm13, %v4791_v59, %v4794_v15  ;;  %v5912_v29 = vor.u32 %v5911_v26, %v5910_v35  ;;  %v5915_v8 = vshll.u32 %v5914_v45, 23  ;;  %vm5000_vm2 = vcmp.eq.s32.totalorder %v4995_v33, 2  ;;  %v15928_v15 = vld [vmem:[#allocation40_spill] sm:$0xff] }
 0x756   : > { %v5299_v38 = vsub.s32 4, %v15920_v6  ;;  %vm5839_vm0 = vcmp.lt.s32.totalorder %v13219_v54, 0  ;;  %vm4993_vm9 = vweird.f32 %v15921_v44  ;;  %vm4996_vm11 = vcmp.lt.s32.totalorder %v4995_v33, 2 }
 0x757   : > { %v4999_v2 = vsel %vm4997_vm5, %v15919_v12, %v4998_v9  ;;  %v5002_v24 = vsel %vm5000_vm2, %v5001_v51, %v15918_v11  ;;  %v15922_v17 = vand.u32 2147483647, %v13219_v54  ;;  %v5916_v0 = vor.u32 4788187, %v5915_v8  ;;  %v15929_v12 = vld [vmem:[#allocation11_spill] sm:$0xff] }
 0x758   : > { %v4796_v63 = vsel %vm4785_vm6, nan, %v4795_v28  ;;  %v5003_v32 = vsel %vm4996_vm11, %v4999_v2, %v5002_v24  ;;  %vm15925_vm8 = vcmp.lt.s32.totalorder %v12819_v56, 0  ;;  %vm5305_vm15 = vweird.f32 %v12819_v56  ;;  %v15930_v2 = vld [vmem:[#allocation26_spill] sm:$0xff] }
 0x759   : > { %vm13655_vm1 = vcmp.le.f32.partialorder %v15922_v17, 0.7853982  ;;  %v5300_v22 = vsel %vm15925_vm8, %v5299_v38, %v15920_v6  ;;  %v5004_v33 = vsel %vm4993_vm9, nan, %v5003_v32  ;;  %v5507_v7 = vsub.s32 4, %v15926_v36 }
 0x75a   : > { %v5302_v23 = vsel %vm13251_vm10, 0, %v5300_v22  ;;  %v5917_v52 = vand.u32 2147483647, %v5916_v0  ;;  %v5919_v57 = vcvt.s32.f32 %v5912_v29  ;;  %v8379_v21 = vpack.c.bf16 %v5004_v33, %v4796_v63  ;;  %v15931_v22 = vld [vmem:[#allocation33_spill] sm:$0xff] }
 0x75b   : > { %v5306_v1 = vadd.s32 3, %v5302_v23  ;;  %v5310_v58 = vxor.u32 2147483648, %v13316_v4  ;;  %v5313_v30 = vxor.u32 2147483648, %v13312_v42  ;;  %vm15927_vm14 = vcmp.lt.s32.totalorder %v13017_v47, 0 }
 0x75c   : > { %v5508_v59 = vsel %vm15927_vm14, %v5507_v7, %v15926_v36  ;;  %v5203_v35 = vand.u32 3, %v15928_v15  ;;  %v5920_v25 = vmul.f32 %v5919_v57, %v5917_v52  ;;  %8380 = vmatpush1.bf16.msra.mxu1 %v8379_v21  ;;  %vm5513_vm10 = vweird.f32 %v13017_v47  ;;  %v15932_v21 = vld [vmem:[#allocation13_spill] sm:$0xff] }
 0x75d   : > { %v5307_v26 = vand.u32 3, %v5306_v1  ;;  %v5510_v45 = vsel %vm13389_vm3, 0, %v5508_v59  ;;  %v5518_v28 = vxor.u32 2147483648, %v13489_v3  ;;  %v5521_v9 = vxor.u32 2147483648, %v13485_v62  ;;  %v15934_v59 = vld [vmem:[#allocation14_spill] sm:$0xff] }
 0x75e   : > { %v5514_v11 = vadd.s32 3, %v5510_v45  ;;  %vm5204_vm6 = vcmp.lt.s32.totalorder %v5203_v35, 2  ;;  %v5206_v51 = vxor.u32 2147483648, %v15929_v12  ;;  %v5921_v29 = vxor.u32 2147483648, %v5920_v25 }
 0x75f   : > { %vm5309_vm13 = vcmp.eq.s32.totalorder %v5307_v26, 0  ;;  %vm5312_vm5 = vcmp.eq.s32.totalorder %v5307_v26, 2  ;;  %vm5205_vm2 = vcmp.eq.s32.totalorder %v5203_v35, 0  ;;  %vm5308_vm9 = vcmp.lt.s32.totalorder %v5307_v26, 2 }
 0x760   : > { %v5311_v8 = vsel %vm5309_vm13, %v13312_v42, %v5310_v58  ;;  %v5314_v34 = vsel %vm5312_vm5, %v5313_v30, %v13316_v4  ;;  %v5515_v6 = vand.u32 3, %v5514_v11  ;;  %v5922_v38 = vsel %vm5839_vm0, %v5921_v29, %v5920_v25  ;;  %v15933_v30 = vld [vmem:[#allocation15_spill] sm:$0xff] }
 0x761   : > { %v5315_v44 = vsel %vm5308_vm9, %v5311_v8, %v5314_v34  ;;  %vm5208_vm3 = vcmp.eq.s32.totalorder %v5203_v35, 2  ;;  %v5209_v24 = vxor.u32 2147483648, %v15930_v2  ;;  %v5925_v17 = vsel %vm13655_vm1, %v13219_v54, %v5922_v38 }
 0x762   : > { %v5316_v0 = vsel %vm5305_vm15, nan, %v5315_v44  ;;  %vm5517_vm11 = vcmp.eq.s32.totalorder %v5515_v6, 0  ;;  %v5207_v42 = vsel %vm5205_vm2, %v15930_v2, %v5206_v51  ;;  %8884 = vcosq.f32 %v5925_v17 }
 0x763   : > { %v5519_v4 = vsel %vm5517_vm11, %v13485_v62, %v5518_v28  ;;  %vm5520_vm8 = vcmp.eq.s32.totalorder %v5515_v6, 2  ;;  %v5210_v63 = vsel %vm5208_vm3, %v5209_v24, %v15929_v12  ;;  %8886 = vsinq.f32 %v5925_v17 }
 0x764   : > { %vm5516_vm14 = vcmp.lt.s32.totalorder %v5515_v6, 2  ;;  %v5522_v32 = vsel %vm5520_vm8, %v5521_v9, %v13489_v3  ;;  %v5411_v33 = vand.u32 3, %v15931_v22  ;;  %v5211_v36 = vsel %vm5204_vm6, %v5207_v42, %v5210_v63 }
 0x765   : > { %v5523_v23 = vsel %vm5516_vm14, %v5519_v4, %v5522_v32  ;;  %v5414_v56 = vxor.u32 2147483648, %v13465_v20  ;;  %v5417_v7 = vxor.u32 2147483648, %v13459_v10  ;;  %v5715_v1 = vsub.s32 4, %v15932_v21 }
 0x766   : > { %v5524_v52 = vsel %vm5513_vm10, nan, %v5523_v23  ;;  %vm5412_vm15 = vcmp.lt.s32.totalorder %v5411_v33, 2  ;;  %vm5413_vm13 = vcmp.eq.s32.totalorder %v5411_v33, 0  ;;  %vm5416_vm5 = vcmp.eq.s32.totalorder %v5411_v33, 2 }
 0x767   : > { %v8381_v62 = vpack.c.bf16 %v5524_v52, %v5316_v0  ;;  %v5415_v57 = vsel %vm5413_vm13, %v13459_v10, %v5414_v56  ;;  %v5418_v3 = vsel %vm5416_vm5, %v5417_v7, %v13465_v20  ;;  %v5822_v58 = vsel %vm13568_vm12, 0, %v13529_v5  ;;  %v8246_v7 = vld [vmem:[%s15241_s3 + $0x80] sm:$0xff] }
 0x768   : > { %vm5201_vm6 = vweird.f32 %v15933_v30  ;;  %vm5409_vm2 = vweird.f32 %v15934_v59  ;;  %v5419_v47 = vsel %vm5412_vm15, %v5415_v57, %v5418_v3  ;;  %v5716_v10 = vsel %vm5631_vm4, %v5715_v1, %v15932_v21  ;;  %v8250_v52 = vld [vmem:[%s15241_s3 + $0xa0] sm:$0xff]  ;;  %v8252_v57 = vld [vmem:[%s15241_s3 + $0xb0] sm:$0xff]  ;;  %v8253_v3 = vld [vmem:[%s15241_s3 + $0xb8] sm:$0xff]  ;;  %v5962_v21 = vpop.permute.xlu0 %5961 }
 0x769   : > { %8382 = vmatprep.subr.bf16.mxu1 %v8381_v62  ;;  %v5212_v15 = vsel %vm5201_vm6, nan, %v5211_v36  ;;  %v5420_v35 = vsel %vm5409_vm2, nan, %v5419_v47  ;;  %v5923_v20 = vsub.s32 4, %v13582_v43  ;;  %v5718_v26 = vsel %vm13493_vm7, 0, %v5716_v10  ;;  %v8251_v62 = vld [vmem:[%s15241_s3 + $0xa8] sm:$0xff] }
 0x76a   : > { %v8383_v25 = vpack.c.bf16 %v5420_v35, %v5212_v15  ;;  %v5619_v5 = vand.u32 3, %v13447_v48  ;;  %v5826_v55 = vadd.s32 3, %v5822_v58  ;;  %v5722_v45 = vadd.s32 3, %v5718_v26  ;;  %v5967_v35 = vpop.permute.xlu1 %5966 }
 0x76b   : > { %v5924_v28 = vsel %vm5839_vm0, %v5923_v20, %v13582_v43  ;;  %v5726_v11 = vxor.u32 2147483648, %v13625_v60  ;;  %v5729_v9 = vxor.u32 2147483648, %v13585_v13  ;;  %vm5721_vm4 = vweird.f32 %v13136_v27 }
 0x76c   : > { %8384 = vmatpush1.bf16.msra.mxu1 %v8383_v25  ;;  %v5926_v12 = vsel %vm13655_vm1, 0, %v5924_v28  ;;  %v8885_v51 = vpop.eup %8884  ;;  %v5723_v61 = vand.u32 3, %v5722_v45  ;;  %v5622_v48 = vxor.u32 2147483648, %v13513_v19  ;;  %vm5621_vm7 = vcmp.eq.s32.totalorder %v5619_v5, 0 }
 0x76d   : > { %v5930_v29 = vadd.s32 3, %v5926_v12  ;;  %v8887_v8 = vpop.eup %8886  ;;  %v5937_v34 = vxor.u32 2147483648, %v8885_v51  ;;  %vm5624_vm12 = vcmp.eq.s32.totalorder %v5619_v5, 2  ;;  %v5625_v43 = vxor.u32 2147483648, %v13499_v50 }
 0x76e   : > { %vm5725_vm0 = vcmp.eq.s32.totalorder %v5723_v61, 0  ;;  %vm5728_vm10 = vcmp.eq.s32.totalorder %v5723_v61, 2  ;;  %v5827_v38 = vand.u32 3, %v5826_v55  ;;  %vm5724_vm9 = vcmp.lt.s32.totalorder %v5723_v61, 2 }
 0x76f   : > { %v5931_v6 = vand.u32 3, %v5930_v29  ;;  %v5727_v14 = vsel %vm5725_vm0, %v13585_v13, %v5726_v11  ;;  %v5730_v44 = vsel %vm5728_vm10, %v5729_v9, %v13625_v60  ;;  %v5934_v2 = vxor.u32 2147483648, %v8887_v8 }
 0x770   : > { %v5731_v24 = vsel %vm5724_vm9, %v5727_v14, %v5730_v44  ;;  %v5623_v17 = vsel %vm5621_vm7, %v13499_v50, %v5622_v48  ;;  %v5626_v4 = vsel %vm5624_vm12, %v5625_v43, %v13513_v19  ;;  %vm5929_vm8 = vweird.f32 %v13219_v54 }
 0x771   : > { %vm5933_vm1 = vcmp.eq.s32.totalorder %v5931_v6, 0  ;;  %vm5936_vm3 = vcmp.eq.s32.totalorder %v5931_v6, 2  ;;  %vm5932_vm11 = vcmp.lt.s32.totalorder %v5931_v6, 2  ;;  %vm5620_vm14 = vcmp.lt.s32.totalorder %v5619_v5, 2 }
 0x772   : > { %v5935_v0 = vsel %vm5933_vm1, %v8885_v51, %v5934_v2  ;;  %v5938_v42 = vsel %vm5936_vm3, %v5937_v34, %v8887_v8  ;;  %v5830_v13 = vxor.u32 2147483648, %v13642_v49  ;;  %v5732_v60 = vsel %vm5721_vm4, nan, %v5731_v24 }
 0x773   : > { %v5939_v63 = vsel %vm5932_vm11, %v5935_v0, %v5938_v42  ;;  %vm5829_vm15 = vcmp.eq.s32.totalorder %v5827_v38, 0  ;;  %v5833_v22 = vxor.u32 2147483648, %v13637_v39  ;;  %v5627_v33 = vsel %vm5620_vm14, %v5623_v17, %v5626_v4 }
 0x774   : > { %v5940_v32 = vsel %vm5929_vm8, nan, %v5939_v63  ;;  %v5831_v23 = vsel %vm5829_vm15, %v13637_v39, %v5830_v13  ;;  %vm5832_vm13 = vcmp.eq.s32.totalorder %v5827_v38, 2  ;;  %vm5828_vm5 = vcmp.lt.s32.totalorder %v5827_v38, 2 }
 0x775   : > { %v8385_v50 = vpack.c.bf16 %v5940_v32, %v5732_v60  ;;  %v5834_v19 = vsel %vm5832_vm13, %v5833_v22, %v13642_v49  ;;  %vm5617_vm6 = vweird.f32 %v13111_v46  ;;  %vm5825_vm2 = vweird.f32 %v13144_v40  ;;  %v8247_v49 = vld [vmem:[%s15241_s3 + $0x88] sm:$0xff]  ;;  %v8248_v46 = vld [vmem:[%s15241_s3 + $0x90] sm:$0xff]  ;;  %v8249_v40 = vld [vmem:[%s15241_s3 + $0x98] sm:$0xff] }
 0x776   : > { %v5835_v54 = vsel %vm5828_vm5, %v5831_v23, %v5834_v19  ;;  %v5628_v27 = vsel %vm5617_vm6, nan, %v5627_v33  ;;  %vm15935_vm4 = vcmask 523264   ;;  %v15936_v39 = vmov 0.0  }
 0x777   : > { %8386 = vmatprep.subr.bf16.mxu1 %v8385_v50  ;;  %v5836_v36 = vsel %vm5825_vm2, nan, %v5835_v54  ;;  %vm15937_vm7 = vmmov %vm15935_vm4 }
 0x778   : > { %v8387_v56 = vpack.c.bf16 %v5836_v36, %v5628_v27  ;;  %vm15938_vm12 = vmmov %vm15935_vm4 }
 0x779   : > { %vm15939_vm0 = vmmov %vm15935_vm4 }
 0x77a   : > { %8388 = vmatpush1.bf16.msra.mxu1 %v8387_v56  ;;  %vm15940_vm10 = vmmov %vm15939_vm0 }
 0x77b   : > { %vm15941_vm9 = vmmov %vm15939_vm0 }
 0x77c   : > { %vm15942_vm1 = vmmov %vm15939_vm0 }
 0x77d   : > { %8262 = vmatmul.mubr.msk.f32.vlgmr.msra.gmra.mrb[16].mxu1 %vm15935_vm4, %v8246_v7  ;;  %vm15943_vm3 = vmmov %vm15939_vm0 }
 0x77e   : > { %6093 = vmatprep.mubr.f32.mxu1 %v15936_v39 }
 0x781   : > { %8263 = vmatmul.mubr.msk.f32.gmra.mrb[18].mxu1 %vm15937_vm7, %v8247_v49 }
 0x782   : > { %6099 = vmatprep.mubr.f32.mxu1 %v15936_v39 }
 0x785   : > { %8264 = vmatmul.mubr.msk.f32.gmra.mrb[20].mxu1 %vm15938_vm12, %v8248_v46 }
 0x786   : > { %6105 = vmatprep.mubr.f32.mxu1 %v15936_v39 }
 0x789   : > { %8265 = vmatmul.mubr.msk.f32.gmra.mrb[22].mxu1 %vm15939_vm0, %v8249_v40 }
 0x78a   : > { %6111 = vmatprep.mubr.f32.mxu1 %v15936_v39 }
 0x78d   : > { %8266 = vmatmul.mubr.msk.f32.gmra.mrb[24].mxu1 %vm15940_vm10, %v8250_v52 }
 0x78e   : > { %6117 = vmatprep.mubr.f32.mxu1 %v15936_v39 }
 0x791   : > { %8267 = vmatmul.mubr.msk.f32.gmra.mrb[26].mxu1 %vm15941_vm9, %v8251_v62 }
 0x792   : > { %6123 = vmatprep.mubr.f32.mxu1 %v15936_v39 }
 0x795   : > { %8268 = vmatmul.mubr.msk.f32.gmra.mrb[28].mxu1 %vm15942_vm1, %v8252_v57 }
 0x796   : > { %6129 = vmatprep.mubr.f32.mxu1 %v15936_v39 }
 0x799   : > { %8269 = vmatmul.mubr.msk.f32.gmra.mrb[30].mxu1 %vm15943_vm3, %v8253_v3 }
 0x850   : > { %v6089_v1 = vpop.f32.mrb[16].mxu1 }
 0x851   : > { %v13778_v58 = vadd.f32 %v6089_v1, %v5962_v21  ;;  %v6091_v30 = vpop.f32.mrb[17].mxu1 }
 0x852   : > { %v13780_v59 = vadd.f32 %v6091_v30, %v5962_v21 }
 0x853   : > { %15944 = vst [vmem:[#allocation9_spill] sm:$0xff] %v13778_v58  ;;  %v6136_v47 = vand.u32 2147483647, %v13778_v58  ;;  %v6139_v15 = vand.u32 2139095040, %v13778_v58 }
 0x854   : > { %v6240_v10 = vand.u32 2147483647, %v13780_v59  ;;  %v6243_v20 = vand.u32 2139095040, %v13780_v59  ;;  %v6095_v25 = vpop.f32.mrb[18].mxu1 }
 0x855   : > { %v6140_v26 = vshrl.u32 %v6139_v15, 23  ;;  %v13786_v5 = vadd.f32 %v6095_v25, %v5967_v35  ;;  %v6097_v55 = vpop.f32.mrb[19].mxu1  ;;  %v6143_v45 = vand.u32 8388607, %v6136_v47 }
 0x856   : > { %v6244_v28 = vshrl.u32 %v6243_v20, 23  ;;  %v6247_v11 = vand.u32 8388607, %v6240_v10  ;;  %v13799_v0 = vadd.f32 %v6097_v55, %v5967_v35 }
 0x857   : > { %15945 = vst [vmem:[#allocation32_spill] sm:$0xff] %v13786_v5  ;;  %v8270_v9 = vadd.s32 4294967169, %v6140_v26  ;;  %v6347_v51 = vand.u32 2139095040, %v13786_v5  ;;  %v6144_v48 = vor.u32 8388608, %v6143_v45  ;;  %v15451_v60 = vand.u32 2147483647, %v13786_v5 }
 0x858   : > { %v8274_v12 = vadd.s32 4294967169, %v6244_v28  ;;  %v13793_v61 = vpop.f32.mrb[20].mxu1  ;;  %v6248_v8 = vor.u32 8388608, %v6247_v11 }
 0x859   : > { %v6146_v29 = vadd.s32 1, %v8270_v9  ;;  %v6348_v43 = vshrl.u32 %v6347_v51, 23  ;;  %v13795_v6 = vpop.f32.mrb[21].mxu1  ;;  %v13803_v4 = vshll.u32 %v6144_v48, 8 }
 0x85a   : > { %v6250_v34 = vadd.s32 1, %v8274_v12  ;;  %v13807_v13 = vshll.u32 %v6248_v8, 8 }
 0x85b   : > { %vm6147_vm11 = vcmp.gt.s32.totalorder %v6146_v29, 0  ;;  %v8278_v14 = vadd.s32 4294967169, %v6348_v43 }
 0x85c   : > { %v6148_v38 = vsel %vm6147_vm11, %v6146_v29, 0  ;;  %vm6251_vm8 = vcmp.gt.s32.totalorder %v6250_v34, 0  ;;  %v13797_v44 = vpop.f32.mrb[22].mxu1 }
 0x85d   : > { %v6149_v2 = vshrl.u32 %v6148_v38, 5  ;;  %v6150_v24 = vand.u32 31, %v6148_v38  ;;  %v6252_v17 = vsel %vm6251_vm8, %v6250_v34, 0  ;;  %v13801_v42 = vpop.f32.mrb[23].mxu1  ;;  %v13811_v33 = vadd.s32 1, %v8278_v14 }
 0x85e   : > { %v13805_v63 = vshrl.u32 %v6252_v17, 5  ;;  %v6254_v50 = vand.u32 31, %v6252_v17 }
 0x85f   : > { %v6151_v32 = vsub.s32 32, %v6150_v24  ;;  %v6153_v22 = vshll.u32 %v15512_v31, %v6150_v24  ;;  %v6156_v23 = vshll.u32 %v15679_v53, %v6150_v24  ;;  %v6159_v19 = vshll.u32 %v15680_v41, %v6150_v24 }
 0x860   : > { %v6162_v54 = vshll.u32 %v15681_v16, %v6150_v24  ;;  %v6165_v27 = vshll.u32 %v15682_v37, %v6150_v24  ;;  %vm6168_vm14 = vcmp.lt.s32.totalorder %v6149_v2, 1  ;;  %vm6169_vm15 = vcmp.lt.s32.totalorder %v6149_v2, 2  ;;  %v13823_v3 = vpop.f32.mrb[24].mxu1 }
 0x861   : > { %v6154_v36 = vshrl.u32 %v15679_v53, %v6151_v32  ;;  %v6157_v56 = vshrl.u32 %v15680_v41, %v6151_v32  ;;  %v6160_v7 = vshrl.u32 %v15681_v16, %v6151_v32  ;;  %v6152_v39 = vshrl.u32 %v15512_v31, %v6151_v32 }
 0x862   : > { %v6163_v49 = vshrl.u32 %v15682_v37, %v6151_v32  ;;  %v6166_v46 = vshrl.u32 %v15683_v18, %v6151_v32  ;;  %v6255_v57 = vsub.s32 32, %v6254_v50  ;;  %vm6170_vm13 = vcmp.lt.s32.totalorder %v6149_v2, 3 }
 0x863   : > { %v6155_v40 = vor.u32 %v6154_v36, %v6153_v22  ;;  %v6158_v52 = vor.u32 %v6157_v56, %v6156_v23  ;;  %v6161_v62 = vor.u32 %v6160_v7, %v6159_v19  ;;  %vm6171_vm5 = vcmp.lt.s32.totalorder %v6149_v2, 4 }
 0x864   : > { %v6164_v21 = vor.u32 %v6163_v49, %v6162_v54  ;;  %v6167_v1 = vor.u32 %v6166_v46, %v6165_v27  ;;  %v6257_v45 = vshll.u32 %v15512_v31, %v6254_v50  ;;  %v6258_v9 = vshrl.u32 %v15679_v53, %v6255_v57 }
 0x865   : > { %v6172_v30 = vsel %vm6168_vm14, %v6152_v39, %v6155_v40  ;;  %v6173_v15 = vsel %vm6171_vm5, %v6161_v62, 2102212464  ;;  %v6176_v35 = vsel %vm6168_vm14, %v6155_v40, %v6158_v52  ;;  %v6180_v20 = vsel %vm6168_vm14, %v6158_v52, %v6161_v62 }
 0x866   : > { %v6174_v25 = vsel %vm6170_vm13, %v6158_v52, %v6173_v15  ;;  %v6177_v26 = vsel %vm6171_vm5, %v6164_v21, 920167782  ;;  %v6181_v55 = vsel %vm6171_vm5, %v6167_v1, 1326507024  ;;  %v6260_v12 = vshll.u32 %v15679_v53, %v6254_v50 }
 0x867   : > { %v6178_v28 = vsel %vm6170_vm13, %v6161_v62, %v6177_v26  ;;  %v6182_v11 = vsel %vm6170_vm13, %v6164_v21, %v6181_v55  ;;  %v6175_v51 = vsel %vm6169_vm15, %v6172_v30, %v6174_v25  ;;  %v6261_v8 = vshrl.u32 %v15680_v41, %v6255_v57 }
 0x868   : > { %v6179_v29 = vsel %vm6169_vm15, %v6176_v35, %v6178_v28  ;;  %v6183_v48 = vsel %vm6169_vm15, %v6180_v20, %v6182_v11  ;;  %v6259_v24 = vor.u32 %v6258_v9, %v6257_v45  ;;  %v6263_v32 = vshll.u32 %v15680_v41, %v6254_v50 }
 0x869   : > { %v13836_v34 = vmul.u32.u64.low %v13803_v4, %v6183_v48  ;;  %v13837_v43 = vmul.u32.u64.high %v13803_v4, %v6183_v48, %v13836_v34  ;;  %v13840_v38 = vmul.u32.u64.low %v13803_v4, %v6179_v29  ;;  %v13841_v14 = vmul.u32.u64.high %v13803_v4, %v6179_v29, %v13840_v38 }
 0x86a   : > { %v6262_v17 = vor.u32 %v6261_v8, %v6260_v12  ;;  %v6264_v22 = vshrl.u32 %v15681_v16, %v6255_v57  ;;  %v6256_v2 = vshrl.u32 %v15512_v31, %v6255_v57  ;;  %v6266_v23 = vshll.u32 %v15681_v16, %v6254_v50  ;;  %v13882_v8 = vpop.f32.mrb[25].mxu1 }
 0x86b   : > { %v6267_v19 = vshrl.u32 %v15682_v37, %v6255_v57  ;;  %v6270_v54 = vshrl.u32 %v15683_v18, %v6255_v57  ;;  %v6191_v27 = vmul.u32 %v13803_v4, %v6175_v51  ;;  %v6269_v56 = vshll.u32 %v15682_v37, %v6254_v50 }
 0x86c   : > { %v6265_v36 = vor.u32 %v6264_v22, %v6263_v32  ;;  %vm6272_vm6 = vcmp.lt.s32.totalorder %v13805_v63, 1  ;;  %vm6193_vm2 = vc.u32 %v13837_v43, %v13840_v38  ;;  %v6194_v7 = vadd.s32 1, %v13841_v14 }
 0x86d   : > { %v6268_v39 = vor.u32 %v6267_v19, %v6266_v23  ;;  %vm6273_vm4 = vcmp.lt.s32.totalorder %v13805_v63, 2  ;;  %v6271_v49 = vor.u32 %v6270_v54, %v6269_v56  ;;  %vm6274_vm7 = vcmp.lt.s32.totalorder %v13805_v63, 3 }
 0x86e   : > { %vm6275_vm12 = vcmp.lt.s32.totalorder %v13805_v63, 4  ;;  %v6280_v46 = vsel %vm6272_vm6, %v6259_v24, %v6262_v17  ;;  %v6195_v4 = vsel %vm6193_vm2, %v6194_v7, %v13841_v14  ;;  %v6284_v52 = vsel %vm6272_vm6, %v6262_v17, %v6265_v36 }
 0x86f   : > { %v6277_v40 = vsel %vm6275_vm12, %v6265_v36, 2102212464  ;;  %v6281_v50 = vsel %vm6275_vm12, %v6268_v39, 920167782  ;;  %v6196_v62 = vadd.s32 %v6195_v4, %v6191_v27  ;;  %v6276_v57 = vsel %vm6272_vm6, %v6256_v2, %v6259_v24 }
 0x870   : > { %v6282_v21 = vsel %vm6274_vm7, %v6265_v36, %v6281_v50  ;;  %v6285_v1 = vsel %vm6275_vm12, %v6271_v49, 1326507024  ;;  %v6278_v30 = vsel %vm6274_vm7, %v6262_v17, %v6277_v40  ;;  %vm6355_vm0 = vcmp.gt.s32.totalorder %v13811_v33, 0 }
 0x871   : > { %v6283_v15 = vsel %vm6273_vm4, %v6280_v46, %v6282_v21  ;;  %v6286_v35 = vsel %vm6274_vm7, %v6268_v39, %v6285_v1  ;;  %v6197_v20 = vadd.s32 536870912, %v6196_v62  ;;  %v6351_v11 = vand.u32 8388607, %v15451_v60 }
 0x872   : > { %v6287_v25 = vsel %vm6273_vm4, %v6284_v52, %v6286_v35  ;;  %v13866_v26 = vmul.u32.u64.low %v13807_v13, %v6283_v15  ;;  %v13867_v55 = vmul.u32.u64.high %v13807_v13, %v6283_v15, %v13866_v26  ;;  %v6356_v9 = vsel %vm6355_vm0, %v13811_v33, 0 }
 0x873   : > { %v13871_v45 = vmul.u32.u64.low %v13807_v13, %v6287_v25  ;;  %v13872_v28 = vmul.u32.u64.high %v13807_v13, %v6287_v25, %v13871_v45  ;;  %v13877_v12 = vshrl.u32 %v6197_v20, 30  ;;  %v6279_v51 = vsel %vm6273_vm4, %v6276_v57, %v6278_v30 }
 0x874   : > { %v6358_v29 = vand.u32 31, %v6356_v9  ;;  %v6451_v48 = vand.u32 2139095040, %v13799_v0  ;;  %v6298_v14 = vadd.s32 1, %v13867_v55  ;;  %v6295_v17 = vmul.u32 %v13807_v13, %v6279_v51 }
 0x875   : > { %v6199_v34 = vshll.u32 %v13877_v12, 30  ;;  %vm6297_vm10 = vc.u32 %v13872_v28, %v13866_v26  ;;  %v6352_v33 = vor.u32 8388608, %v6351_v11  ;;  %v15450_v22 = vand.u32 2147483647, %v13799_v0 }
 0x876   : > { %v6359_v24 = vsub.s32 32, %v6358_v29  ;;  %v6299_v63 = vsel %vm6297_vm10, %v6298_v14, %v13867_v55  ;;  %v6452_v2 = vshrl.u32 %v6451_v48, 23  ;;  %v6361_v19 = vshll.u32 %v15512_v31, %v6358_v29 }
 0x877   : > { %v13889_v32 = vsub.s32 %v6196_v62, %v6199_v34  ;;  %v6300_v23 = vadd.s32 %v6299_v63, %v6295_v17  ;;  %v6357_v36 = vshrl.u32 %v6356_v9, 5  ;;  %v6364_v56 = vshll.u32 %v15679_v53, %v6358_v29 }
 0x878   : > { %v6362_v54 = vshrl.u32 %v15679_v53, %v6359_v24  ;;  %v6365_v27 = vshrl.u32 %v15680_v41, %v6359_v24  ;;  %v6368_v7 = vshrl.u32 %v15681_v16, %v6359_v24  ;;  %v6367_v46 = vshll.u32 %v15680_v41, %v6358_v29 }
 0x879   : > { %v6202_v13 = vsub.s32 0, %v13889_v32  ;;  %v6301_v39 = vadd.s32 536870912, %v6300_v23  ;;  %v13900_v4 = vshll.u32 %v6352_v33, 8  ;;  %v6370_v52 = vshll.u32 %v15681_v16, %v6358_v29 }
 0x87a   : > { %v6363_v49 = vor.u32 %v6362_v54, %v6361_v19  ;;  %v6366_v50 = vor.u32 %v6365_v27, %v6364_v56  ;;  %v6371_v62 = vshrl.u32 %v15682_v37, %v6359_v24  ;;  %v6369_v21 = vor.u32 %v6368_v7, %v6367_v46 }
 0x87b   : > { %v8271_v40 = vmin.u32 %v6202_v13, %v13889_v32  ;;  %v13905_v57 = vshrl.u32 %v6301_v39, 30  ;;  %v6373_v1 = vshll.u32 %v15682_v37, %v6358_v29  ;;  %v6374_v30 = vshrl.u32 %v15683_v18, %v6359_v24 }
 0x87c   : > { %v6372_v35 = vor.u32 %v6371_v62, %v6370_v52  ;;  %vm6376_vm9 = vcmp.lt.s32.totalorder %v6357_v36, 1  ;;  %v8282_v20 = vadd.s32 4294967169, %v6452_v2  ;;  %vm6377_vm1 = vcmp.lt.s32.totalorder %v6357_v36, 2 }
 0x87d   : > { %v6204_v15 = vclz %v8271_v40  ;;  %v6303_v25 = vshll.u32 %v13905_v57, 30  ;;  %v6375_v55 = vor.u32 %v6374_v30, %v6373_v1  ;;  %vm6379_vm3 = vcmp.lt.s32.totalorder %v6357_v36, 4 }
 0x87e   : > { %vm6378_vm11 = vcmp.lt.s32.totalorder %v6357_v36, 3  ;;  %v6384_v11 = vsel %vm6376_vm9, %v6363_v49, %v6366_v50  ;;  %v6385_v9 = vsel %vm6379_vm3, %v6372_v35, 920167782  ;;  %v6381_v48 = vsel %vm6379_vm3, %v6369_v21, 2102212464 }
 0x87f   : > { %v8272_v45 = vadd.s32 4294967294, %v6204_v15  ;;  %v13911_v51 = vsub.s32 %v6300_v23, %v6303_v25  ;;  %v6386_v29 = vsel %vm6378_vm11, %v6369_v21, %v6385_v9  ;;  %v6388_v34 = vsel %vm6376_vm9, %v6366_v50, %v6369_v21 }
 0x880   : > { %v6360_v14 = vshrl.u32 %v15512_v31, %v6359_v24  ;;  %v6387_v17 = vsel %vm6377_vm1, %v6384_v11, %v6386_v29  ;;  %v6389_v33 = vsel %vm6379_vm3, %v6375_v55, 1326507024  ;;  %v6458_v54 = vadd.s32 1, %v8282_v20  ;;  %v5972_v29 = vpop.permute.xlu0 %5971 }
 0x881   : > { %vm8273_vm8 = vcmp.lt.s32.totalorder %v8272_v45, 0  ;;  %v6306_v2 = vsub.s32 0, %v13911_v51  ;;  %v6390_v19 = vsel %vm6378_vm11, %v6372_v35, %v6389_v33  ;;  %v6382_v13 = vsel %vm6378_vm11, %v6366_v50, %v6381_v48 }
 0x882   : > { %v6207_v63 = vsel %vm8273_vm8, 0, %v8272_v45  ;;  %v6380_v23 = vsel %vm6376_vm9, %v6360_v14, %v6363_v49  ;;  %v6391_v56 = vsel %vm6377_vm1, %v6388_v34, %v6390_v19  ;;  %vm6459_vm14 = vcmp.gt.s32.totalorder %v6458_v54, 0 }
 0x883   : > { %v6212_v27 = vsub.s32 4294967266, %v6207_v63  ;;  %v8275_v7 = vmin.u32 %v6306_v2, %v13911_v51  ;;  %v13924_v24 = vmul.u32.u64.low %v13900_v4, %v6391_v56  ;;  %v13925_v39 = vmul.u32.u64.high %v13900_v4, %v6391_v56, %v13924_v24 }
 0x884   : > { %v13928_v46 = vmul.u32.u64.low %v13900_v4, %v6387_v17  ;;  %v13929_v40 = vmul.u32.u64.high %v13900_v4, %v6387_v17, %v13928_v46  ;;  %v6455_v49 = vand.u32 8388607, %v15450_v22  ;;  %v6460_v50 = vsel %vm6459_vm14, %v6458_v54, 0  ;;  %v13942_v17 = vpop.f32.mrb[26].mxu1 }
 0x885   : > { %v6213_v52 = vadd.s32 127, %v6212_v27  ;;  %v6308_v62 = vclz %v8275_v7  ;;  %v6208_v21 = vsub.s32 32, %v6207_v63  ;;  %v6383_v1 = vsel %vm6377_vm1, %v6380_v23, %v6382_v13 }
 0x886   : > { %v6462_v30 = vand.u32 31, %v6460_v50  ;;  %vm6401_vm15 = vc.u32 %v13925_v39, %v13928_v46  ;;  %v6192_v35 = vadd.s32 %v13840_v38, %v13837_v43  ;;  %v6402_v20 = vadd.s32 1, %v13929_v40 }
 0x887   : > { %v8276_v15 = vadd.s32 4294967294, %v6308_v62  ;;  %v6214_v25 = vshll.u32 %v6213_v52, 23  ;;  %v6399_v55 = vmul.u32 %v13900_v4, %v6383_v1  ;;  %v6456_v45 = vor.u32 8388608, %v6455_v49 }
 0x888   : > { %v6210_v11 = vshrl.u32 %v6192_v35, %v6208_v21  ;;  %v6403_v36 = vsel %vm6401_vm15, %v6402_v20, %v13929_v40  ;;  %v6463_v48 = vsub.s32 32, %v6462_v30  ;;  %v6209_v33 = vshll.u32 %v13889_v32, %v6207_v63 }
 0x889   : > { %vm8277_vm13 = vcmp.lt.s32.totalorder %v8276_v15, 0  ;;  %v6404_v14 = vadd.s32 %v6403_v36, %v6399_v55  ;;  %v6296_v43 = vadd.s32 %v13866_v26, %v13872_v28  ;;  %v13948_v38 = vadd.f32 %v13793_v61, %v5972_v29 }
 0x88a   : > { %v6311_v9 = vsel %vm8277_vm13, 0, %v8276_v15  ;;  %v13951_v4 = vadd.f32 %v13795_v6, %v5972_v29  ;;  %v6215_v2 = vor.u32 4788187, %v6214_v25  ;;  %v13953_v27 = vshll.u32 %v6456_v45, 8 }
 0x88b   : > { %v6316_v34 = vsub.s32 4294967266, %v6311_v9  ;;  %15946 = vst [vmem:[#allocation25_spill] sm:$0xff] %v13948_v38  ;;  %v6405_v54 = vadd.s32 536870912, %v6404_v14  ;;  %v6211_v23 = vor.u32 %v6210_v11, %v6209_v33  ;;  %v6461_v13 = vshrl.u32 %v6460_v50, 5 }
 0x88c   : > { %15947 = vst [vmem:[#allocation24_spill] sm:$0xff] %v13951_v4  ;;  %v6466_v56 = vshrl.u32 %v15679_v53, %v6463_v48  ;;  %v6469_v32 = vshrl.u32 %v15680_v41, %v6463_v48  ;;  %v6465_v26 = vshll.u32 %v15512_v31, %v6462_v30  ;;  %v6472_v61 = vshrl.u32 %v15681_v16, %v6463_v48 }
 0x88d   : > { %v6317_v19 = vadd.s32 127, %v6316_v34  ;;  %v13957_v63 = vshrl.u32 %v6405_v54, 30  ;;  %v6475_v6 = vshrl.u32 %v15682_v37, %v6463_v48  ;;  %v6312_v28 = vsub.s32 32, %v6311_v9 }
 0x88e   : > { %v6468_v7 = vshll.u32 %v15679_v53, %v6462_v30  ;;  %v6474_v24 = vshll.u32 %v15681_v16, %v6462_v30  ;;  %v6478_v40 = vshrl.u32 %v15683_v18, %v6463_v48  ;;  %v6216_v52 = vand.u32 2147483647, %v6215_v2 }
 0x88f   : > { %v6318_v62 = vshll.u32 %v6317_v19, 23  ;;  %v6407_v49 = vshll.u32 %v13957_v63, 30  ;;  %v6471_v50 = vshll.u32 %v15680_v41, %v6462_v30  ;;  %v6467_v21 = vor.u32 %v6466_v56, %v6465_v26 }
 0x890   : > { %v6470_v1 = vor.u32 %v6469_v32, %v6468_v7  ;;  %v6476_v15 = vor.u32 %v6475_v6, %v6474_v24  ;;  %v6477_v35 = vshll.u32 %v15682_v37, %v6462_v30  ;;  %v6218_v20 = vcvt.s32.f32 %v6211_v23 }
 0x891   : > { %v13968_v25 = vsub.s32 %v6404_v14, %v6407_v49  ;;  %v6473_v55 = vor.u32 %v6472_v61, %v6471_v50  ;;  %v15449_v45 = vand.u32 2147483647, %v13948_v38  ;;  %v6313_v11 = vshll.u32 %v13911_v51, %v6311_v9 }
 0x892   : > { %v6314_v36 = vshrl.u32 %v6296_v43, %v6312_v28  ;;  %v6464_v29 = vshrl.u32 %v15512_v31, %v6463_v48  ;;  %v6479_v34 = vor.u32 %v6478_v40, %v6477_v35  ;;  %v6319_v33 = vor.u32 4788187, %v6318_v62 }
 0x893   : > { %v6410_v2 = vsub.s32 0, %v13968_v25  ;;  %vm6480_vm5 = vcmp.lt.s32.totalorder %v6461_v13, 1  ;;  %vm6483_vm6 = vcmp.lt.s32.totalorder %v6461_v13, 4  ;;  %v6219_v19 = vmul.f32 %v6218_v20, %v6216_v52 }
 0x894   : > { %vm6482_vm2 = vcmp.lt.s32.totalorder %v6461_v13, 3  ;;  %v6488_v30 = vsel %vm6480_vm5, %v6467_v21, %v6470_v1  ;;  %v6489_v14 = vsel %vm6483_vm6, %v6476_v15, 920167782  ;;  %vm6481_vm4 = vcmp.lt.s32.totalorder %v6461_v13, 2 }
 0x895   : > { %v8279_v54 = vmin.u32 %v6410_v2, %v13968_v25  ;;  %v6485_v23 = vsel %vm6483_vm6, %v6473_v55, 2102212464  ;;  %v6490_v56 = vsel %vm6482_vm2, %v6473_v55, %v6489_v14  ;;  %v6315_v51 = vor.u32 %v6314_v36, %v6313_v11 }
 0x896   : > { %v6491_v9 = vsel %vm6481_vm4, %v6488_v30, %v6490_v56  ;;  %v6492_v48 = vsel %vm6480_vm5, %v6470_v1, %v6473_v55  ;;  %v6493_v43 = vsel %vm6483_vm6, %v6479_v34, 1326507024  ;;  %v6320_v32 = vand.u32 2147483647, %v6319_v33 }
 0x897   : > { %v6412_v26 = vclz %v8279_v54  ;;  %v6484_v61 = vsel %vm6480_vm5, %v6464_v29, %v6467_v21  ;;  %v6494_v6 = vsel %vm6482_vm2, %v6476_v15, %v6493_v43  ;;  %v6486_v28 = vsel %vm6482_vm2, %v6470_v1, %v6485_v23  ;;  %v13991_v15 = vpop.f32.mrb[27].mxu1  ;;  %v14025_v43 = vpop.permute.xlu1 %5976 }
 0x898   : > { %v6495_v7 = vsel %vm6481_vm4, %v6492_v48, %v6494_v6  ;;  %v13981_v24 = vmul.u32.u64.low %v13953_v27, %v6491_v9  ;;  %v13982_v40 = vmul.u32.u64.high %v13953_v27, %v6491_v9, %v13981_v24  ;;  %v6220_v52 = vxor.u32 2147483648, %v6219_v19 }
 0x899   : > { %v8280_v62 = vadd.s32 4294967294, %v6412_v26  ;;  %v13986_v49 = vmul.u32.u64.low %v13953_v27, %v6495_v7  ;;  %v13987_v50 = vmul.u32.u64.high %v13953_v27, %v6495_v7, %v13986_v49  ;;  %vm6138_vm7 = vcmp.lt.s32.totalorder %v13778_v58, 0 }
 0x89a   : > { %v6322_v35 = vcvt.s32.f32 %v6315_v51  ;;  %v6555_v21 = vand.u32 2139095040, %v13948_v38  ;;  %v6222_v1 = vsub.s32 4, %v13877_v12  ;;  %v6487_v20 = vsel %vm6481_vm4, %v6484_v61, %v6486_v28 }
 0x89b   : > { %vm8281_vm12 = vcmp.lt.s32.totalorder %v8280_v62, 0  ;;  %v6659_v55 = vand.u32 2139095040, %v13951_v4  ;;  %v6506_v29 = vadd.s32 1, %v13982_v40  ;;  %v6221_v33 = vsel %vm6138_vm7, %v6220_v52, %v6219_v19 }
 0x89c   : > { %v6323_v11 = vmul.f32 %v6322_v35, %v6320_v32  ;;  %v13996_v36 = vsel %vm8281_vm12, 0, %v8280_v62  ;;  %v6556_v34 = vshrl.u32 %v6555_v21, 23  ;;  %v6559_v2 = vand.u32 8388607, %v15449_v45 }
 0x89d   : > { %v6420_v30 = vsub.s32 4294967266, %v13996_v36  ;;  %v6503_v14 = vmul.u32 %v13953_v27, %v6487_v20  ;;  %vm6505_vm0 = vc.u32 %v13987_v50, %v13981_v24  ;;  %vm14009_vm10 = vcmp.le.f32.partialorder %v6136_v47, 0.7853982 }
 0x89e   : > { %v8286_v13 = vadd.s32 4294967169, %v6556_v34  ;;  %v6507_v23 = vsel %vm6505_vm0, %v6506_v29, %v13982_v40  ;;  %v6660_v19 = vshrl.u32 %v6659_v55, 23  ;;  %v14017_v56 = vsel %vm6138_vm7, %v6222_v1, %v13877_v12 }
 0x89f   : > { %v6324_v51 = vxor.u32 2147483648, %v6323_v11  ;;  %v6508_v27 = vadd.s32 %v6507_v23, %v6503_v14  ;;  %v14022_v48 = vsel %vm14009_vm10, %v13778_v58, %v6221_v33  ;;  %vm6242_vm9 = vcmp.lt.s32.totalorder %v13780_v59, 0 }
 0x8a0   : > { %v6562_v9 = vadd.s32 1, %v8286_v13  ;;  %v6560_v47 = vor.u32 8388608, %v6559_v2  ;;  %v6421_v32 = vadd.s32 127, %v6420_v30  ;;  %v8290_v61 = vadd.s32 4294967169, %v6660_v19 }
 0x8a1   : > { %v6509_v26 = vadd.s32 536870912, %v6508_v27  ;;  %v6400_v6 = vadd.s32 %v13928_v46, %v13925_v39  ;;  %v14034_v7 = vadd.f32 %v13797_v44, %v14025_v43  ;;  %8888 = vcosq.f32 %v14022_v48 }
 0x8a2   : > { %vm6563_vm1 = vcmp.gt.s32.totalorder %v6562_v9, 0  ;;  %v14039_v40 = vsel %vm6242_vm9, %v6324_v51, %v6323_v11  ;;  %v6416_v49 = vsub.s32 32, %v13996_v36  ;;  %v6417_v35 = vshll.u32 %v13968_v25, %v13996_v36 }
 0x8a3   : > { %v6564_v28 = vsel %vm6563_vm1, %v6562_v9, 0  ;;  %15950 = vst [vmem:[#allocation31_spill] sm:$0xff] %v14034_v7  ;;  %v14041_v52 = vshrl.u32 %v6509_v26, 30  ;;  %v14046_v39 = vshll.u32 %v6560_v47, 8  ;;  %v15448_v46 = vand.u32 2147483647, %v13951_v4 }
 0x8a4   : > { %v6566_v62 = vand.u32 31, %v6564_v28  ;;  %v6422_v44 = vshll.u32 %v6421_v32, 23  ;;  %v6666_v20 = vadd.s32 1, %v8290_v61  ;;  %v6565_v55 = vshrl.u32 %v6564_v28, 5 }
 0x8a5   : > { %v6511_v21 = vshll.u32 %v14041_v52, 30  ;;  %v6418_v19 = vshrl.u32 %v6400_v6, %v6416_v49  ;;  %vm14065_vm3 = vcmp.le.f32.partialorder %v6240_v10, 0.7853982  ;;  %v14071_v28 = vand.u32 8388607, %v15448_v46 }
 0x8a6   : > { %v6567_v1 = vsub.s32 32, %v6566_v62  ;;  %v6569_v11 = vshll.u32 %v15512_v31, %v6566_v62  ;;  %v6572_v29 = vshll.u32 %v15679_v53, %v6566_v62  ;;  %v6575_v34 = vshll.u32 %v15680_v41, %v6566_v62 }
 0x8a7   : > { %v14053_v33 = vsub.s32 %v6508_v27, %v6511_v21  ;;  %v6578_v2 = vshll.u32 %v15681_v16, %v6566_v62  ;;  %v6581_v13 = vshll.u32 %v15682_v37, %v6566_v62  ;;  %v6423_v62 = vor.u32 4788187, %v6422_v44 }
 0x8a8   : > { %v6570_v25 = vshrl.u32 %v15679_v53, %v6567_v1  ;;  %v6573_v36 = vshrl.u32 %v15680_v41, %v6567_v1  ;;  %v6576_v30 = vshrl.u32 %v15681_v16, %v6567_v1  ;;  %v6579_v14 = vshrl.u32 %v15682_v37, %v6567_v1 }
 0x8a9   : > { %v6582_v23 = vshrl.u32 %v15683_v18, %v6567_v1  ;;  %v6514_v51 = vsub.s32 0, %v14053_v33  ;;  %vm6584_vm11 = vcmp.lt.s32.totalorder %v6565_v55, 1  ;;  %vm6667_vm8 = vcmp.gt.s32.totalorder %v6666_v20, 0 }
 0x8aa   : > { %v6571_v9 = vor.u32 %v6570_v25, %v6569_v11  ;;  %v6574_v27 = vor.u32 %v6573_v36, %v6572_v29  ;;  %v6577_v32 = vor.u32 %v6576_v30, %v6575_v34  ;;  %v6580_v26 = vor.u32 %v6579_v14, %v6578_v2 }
 0x8ab   : > { %v6583_v61 = vor.u32 %v6582_v23, %v6581_v13  ;;  %v8283_v6 = vmin.u32 %v6514_v51, %v14053_v33  ;;  %v6568_v49 = vshrl.u32 %v15512_v31, %v6567_v1  ;;  %vm6585_vm14 = vcmp.lt.s32.totalorder %v6565_v55, 2  ;;  %v14075_v21 = vpop.eup %8888 }
 0x8ac   : > { %vm6587_vm15 = vcmp.lt.s32.totalorder %v6565_v55, 4  ;;  %v6592_v10 = vsel %vm6584_vm11, %v6571_v9, %v6574_v27  ;;  %15953 = vst [vmem:[#allocation19_spill] sm:$0xff] %v14075_v21  ;;  %vm6586_vm13 = vcmp.lt.s32.totalorder %v6565_v55, 3  ;;  %v6596_v2 = vsel %vm6584_vm11, %v6574_v27, %v6577_v32 }
 0x8ad   : > { %v6516_v11 = vclz %v8283_v6  ;;  %v6589_v29 = vsel %vm6587_vm15, %v6577_v32, 2102212464  ;;  %v6593_v34 = vsel %vm6587_vm15, %v6580_v26, 920167782  ;;  %v6588_v25 = vsel %vm6584_vm11, %v6568_v49, %v6571_v9 }
 0x8ae   : > { %v6594_v36 = vsel %vm6586_vm13, %v6577_v32, %v6593_v34  ;;  %v6597_v30 = vsel %vm6587_vm15, %v6583_v61, 1326507024  ;;  %v6590_v14 = vsel %vm6586_vm13, %v6574_v27, %v6589_v29  ;;  %v6419_v51 = vor.u32 %v6418_v19, %v6417_v35 }
 0x8af   : > { %v8284_v44 = vadd.s32 4294967294, %v6516_v11  ;;  %v6595_v13 = vsel %vm6585_vm14, %v6592_v10, %v6594_v36  ;;  %v6598_v23 = vsel %vm6586_vm13, %v6580_v26, %v6597_v30  ;;  %v6668_v32 = vsel %vm6667_vm8, %v6666_v20, 0 }
 0x8b0   : > { %v6599_v1 = vsel %vm6585_vm14, %v6596_v2, %v6598_v23  ;;  %v14080_v46 = vmul.u32.u64.low %v14046_v39, %v6595_v13  ;;  %v14081_v45 = vmul.u32.u64.high %v14046_v39, %v6595_v13, %v14080_v46  ;;  %v6591_v27 = vsel %vm6585_vm14, %v6588_v25, %v6590_v14 }
 0x8b1   : > { %vm8285_vm5 = vcmp.lt.s32.totalorder %v8284_v44, 0  ;;  %v14085_v6 = vmul.u32.u64.low %v14046_v39, %v6599_v1  ;;  %v14086_v9 = vmul.u32.u64.high %v14046_v39, %v6599_v1, %v14085_v6  ;;  %v6670_v26 = vand.u32 31, %v6668_v32 }
 0x8b2   : > { %v14089_v61 = vsel %vm8285_vm5, 0, %v8284_v44  ;;  %v6763_v35 = vand.u32 2139095040, %v14034_v7  ;;  %8890 = vsinq.f32 %v14022_v48  ;;  %v14098_v19 = vsel %vm14065_vm3, %v13780_v59, %v14039_v40  ;;  %v14108_v40 = vpop.f32.mrb[28].mxu1 }
 0x8b3   : > { %v6424_v49 = vand.u32 2147483647, %v6423_v62  ;;  %v6524_v20 = vsub.s32 4294967266, %v14089_v61  ;;  %v6610_v11 = vadd.s32 1, %v14081_v45  ;;  %v6671_v55 = vsub.s32 32, %v6670_v26 }
 0x8b4   : > { %v6426_v34 = vcvt.s32.f32 %v6419_v51  ;;  %v6607_v25 = vmul.u32 %v14046_v39, %v6591_v27  ;;  %vm6609_vm6 = vc.u32 %v14086_v9, %v14080_v46  ;;  %v6664_v48 = vor.u32 8388608, %v14071_v28 }
 0x8b5   : > { %v6611_v62 = vsel %vm6609_vm6, %v6610_v11, %v14081_v45  ;;  %v6674_v36 = vshrl.u32 %v15679_v53, %v6671_v55  ;;  %v6677_v2 = vshrl.u32 %v15680_v41, %v6671_v55  ;;  %v6764_v30 = vshrl.u32 %v6763_v35, 23 }
 0x8b6   : > { %v6427_v44 = vmul.f32 %v6426_v34, %v6424_v49  ;;  %v6520_v14 = vsub.s32 32, %v14089_v61  ;;  %v6612_v13 = vadd.s32 %v6611_v62, %v6607_v25  ;;  %v6669_v23 = vshrl.u32 %v6668_v32, 5 }
 0x8b7   : > { %v6525_v39 = vadd.s32 127, %v6524_v20  ;;  %v6673_v51 = vshll.u32 %v15512_v31, %v6670_v26  ;;  %v6676_v1 = vshll.u32 %v15679_v53, %v6670_v26  ;;  %v6680_v28 = vshrl.u32 %v15681_v16, %v6671_v55 }
 0x8b8   : > { %v6613_v6 = vadd.s32 536870912, %v6612_v13  ;;  %v6679_v45 = vshll.u32 %v15680_v41, %v6670_v26  ;;  %v6682_v27 = vshll.u32 %v15681_v16, %v6670_v26  ;;  %v6683_v11 = vshrl.u32 %v15682_v37, %v6671_v55 }
 0x8b9   : > { %v6675_v35 = vor.u32 %v6674_v36, %v6673_v51  ;;  %v6678_v49 = vor.u32 %v6677_v2, %v6676_v1  ;;  %v6685_v34 = vshll.u32 %v15682_v37, %v6670_v26  ;;  %v6686_v32 = vshrl.u32 %v15683_v18, %v6671_v55 }
 0x8ba   : > { %vm6346_vm2 = vcmp.lt.s32.totalorder %v13786_v5, 0  ;;  %v6504_v20 = vadd.s32 %v13981_v24, %v13987_v50  ;;  %v14125_v25 = vshrl.u32 %v6613_v6, 30  ;;  %v6681_v62 = vor.u32 %v6680_v28, %v6679_v45 }
 0x8bb   : > { %v6684_v12 = vor.u32 %v6683_v11, %v6682_v27  ;;  %v6428_v22 = vxor.u32 2147483648, %v6427_v44  ;;  %v6687_v10 = vor.u32 %v6686_v32, %v6685_v34  ;;  %v6704_v29 = vshll.u32 %v6664_v48, 8 }
 0x8bc   : > { %v8294_v60 = vadd.s32 4294967169, %v6764_v30  ;;  %v14127_v58 = vpop.eup %8890  ;;  %v6526_v36 = vshll.u32 %v6525_v39, 23  ;;  %v6615_v26 = vshll.u32 %v14125_v25, 30  ;;  %vm6688_vm4 = vcmp.lt.s32.totalorder %v6669_v23, 1 }
 0x8bd   : > { %15954 = vst [vmem:[#allocation29_spill] sm:$0xff] %v14127_v58  ;;  %vm6691_vm7 = vcmp.lt.s32.totalorder %v6669_v23, 4  ;;  %v15955_v2 = vand.u32 2147483647, %v13786_v5  ;;  %v6521_v24 = vshll.u32 %v14053_v33, %v14089_v61  ;;  %v6522_v50 = vshrl.u32 %v6504_v20, %v6520_v14 }
 0x8be   : > { %v6696_v48 = vsel %vm6688_vm4, %v6675_v35, %v6678_v49  ;;  %v6697_v30 = vsel %vm6691_vm7, %v6684_v12, 920167782  ;;  %v14139_v1 = vsub.s32 %v6612_v13, %v6615_v26  ;;  %v6672_v39 = vshrl.u32 %v15512_v31, %v6671_v55 }
 0x8bf   : > { %vm14132_vm12 = vcmp.le.f32.partialorder %v15955_v2, 0.7853982  ;;  %vm6690_vm0 = vcmp.lt.s32.totalorder %v6669_v23, 3  ;;  %v6693_v28 = vsel %vm6691_vm7, %v6681_v62, 2102212464  ;;  %vm6689_vm1 = vcmp.lt.s32.totalorder %v6669_v23, 2 }
 0x8c0   : > { %v6698_v6 = vsel %vm6690_vm0, %v6681_v62, %v6697_v30  ;;  %v6700_v45 = vsel %vm6688_vm4, %v6678_v49, %v6681_v62  ;;  %v6701_v27 = vsel %vm6691_vm7, %v6687_v10, 1326507024  ;;  %v6527_v11 = vor.u32 4788187, %v6526_v36 }
 0x8c1   : > { %v6618_v34 = vsub.s32 0, %v14139_v1  ;;  %v6692_v33 = vsel %vm6688_vm4, %v6672_v39, %v6675_v35  ;;  %v6699_v61 = vsel %vm6689_vm1, %v6696_v48, %v6698_v6  ;;  %v6694_v14 = vsel %vm6690_vm0, %v6678_v49, %v6693_v28 }
 0x8c2   : > { %v6702_v32 = vsel %vm6690_vm0, %v6684_v12, %v6701_v27  ;;  %v14146_v13 = vmul.u32.u64.low %v6704_v29, %v6699_v61  ;;  %v14147_v20 = vmul.u32.u64.high %v6704_v29, %v6699_v61, %v14146_v13  ;;  %v6523_v55 = vor.u32 %v6522_v50, %v6521_v24 }
 0x8c3   : > { %v8287_v26 = vmin.u32 %v6618_v34, %v14139_v1  ;;  %v6703_v2 = vsel %vm6689_vm1, %v6700_v45, %v6702_v32  ;;  %v6770_v62 = vadd.s32 1, %v8294_v60  ;;  %v6429_v10 = vsel %vm6346_vm2, %v6428_v22, %v6427_v44 }
 0x8c4   : > { %v14154_v36 = vmul.u32.u64.low %v6704_v29, %v6703_v2  ;;  %v14155_v30 = vmul.u32.u64.high %v6704_v29, %v6703_v2, %v14154_v36  ;;  %v15958_v35 = vand.u32 2147483647, %v14034_v7  ;;  %v6528_v12 = vand.u32 2147483647, %v6527_v11  ;;  %v14178_v11 = vpop.f32.mrb[29].mxu1 }
 0x8c5   : > { %v6620_v48 = vclz %v8287_v26  ;;  %v6695_v39 = vsel %vm6689_vm1, %v6692_v33, %v6694_v14  ;;  %vm6771_vm11 = vcmp.gt.s32.totalorder %v6770_v62, 0  ;;  %8892 = vcosq.f32 %v14098_v19 }
 0x8c6   : > { %v6767_v49 = vand.u32 8388607, %v15958_v35  ;;  %v15959_v24 = vsub.s32 4, %v13957_v63  ;;  %v6714_v22 = vadd.s32 1, %v14147_v20  ;;  %v6772_v44 = vsel %vm6771_vm11, %v6770_v62, 0 }
 0x8c7   : > { %v14172_v50 = vsel %vm14132_vm12, %v13786_v5, %v6429_v10  ;;  %v6530_v23 = vcvt.s32.f32 %v6523_v55  ;;  %v8288_v28 = vadd.s32 4294967294, %v6620_v48  ;;  %v6774_v6 = vand.u32 31, %v6772_v44 }
 0x8c8   : > { %v14166_v60 = vsel %vm6346_vm2, %v15959_v24, %v13957_v63  ;;  %v6608_v45 = vadd.s32 %v14080_v46, %v14086_v9  ;;  %v6711_v27 = vmul.u32 %v6704_v29, %v6695_v39  ;;  %vm6713_vm8 = vc.u32 %v14155_v30, %v14146_v13 }
 0x8c9   : > { %v6768_v63 = vor.u32 8388608, %v6767_v49  ;;  %v14180_v34 = vmul.f32 %v6530_v23, %v6528_v12  ;;  %vm8289_vm14 = vcmp.lt.s32.totalorder %v8288_v28, 0  ;;  %v6715_v33 = vsel %vm6713_vm8, %v6714_v22, %v14147_v20 }
 0x8ca   : > { %v6775_v61 = vsub.s32 32, %v6774_v6  ;;  %v6623_v14 = vsel %vm8289_vm14, 0, %v8288_v28  ;;  %v6716_v32 = vadd.s32 %v6715_v33, %v6711_v27  ;;  %v14183_v55 = vshrl.u32 %v6772_v44, 5 }
 0x8cb   : > { %v14187_v46 = vadd.f32 %v13801_v42, %v14025_v43  ;;  %v6628_v9 = vsub.s32 4294967266, %v6623_v14  ;;  %v6777_v29 = vshll.u32 %v15512_v31, %v6774_v6  ;;  %v6780_v26 = vshll.u32 %v15679_v53, %v6774_v6 }
 0x8cc   : > { %v6783_v2 = vshll.u32 %v15680_v41, %v6774_v6  ;;  %v6717_v62 = vadd.s32 536870912, %v6716_v32  ;;  %v6778_v10 = vshrl.u32 %v15679_v53, %v6775_v61  ;;  %v6781_v20 = vshrl.u32 %v15680_v41, %v6775_v61 }
 0x8cd   : > { %v6784_v36 = vshrl.u32 %v15681_v16, %v6775_v61  ;;  %v6624_v35 = vsub.s32 32, %v6623_v14  ;;  %v6629_v49 = vadd.s32 127, %v6628_v9  ;;  %v6786_v12 = vshll.u32 %v15681_v16, %v6774_v6 }
 0x8ce   : > { %v6787_v42 = vshrl.u32 %v15682_v37, %v6775_v61  ;;  %v6532_v43 = vxor.u32 2147483648, %v14180_v34  ;;  %v14198_v48 = vshrl.u32 %v6717_v62, 30  ;;  %v14200_v24 = vshll.u32 %v6768_v63, 8 }
 0x8cf   : > { %v6785_v39 = vor.u32 %v6784_v36, %v6783_v2  ;;  %v6779_v22 = vor.u32 %v6778_v10, %v6777_v29  ;;  %v6782_v44 = vor.u32 %v6781_v20, %v6780_v26  ;;  %v6867_v28 = vand.u32 2139095040, %v14187_v46  ;;  %v14203_v27 = vpop.eup %8892 }
 0x8d0   : > { %15960 = vst [vmem:[#allocation17_spill] sm:$0xff] %v14198_v48  ;;  %v6788_v23 = vor.u32 %v6787_v42, %v6786_v12  ;;  %v6630_v33 = vshll.u32 %v6629_v49, 23  ;;  %v6719_v9 = vshll.u32 %v14198_v48, 30  ;;  %v6789_v5 = vshll.u32 %v15682_v37, %v6774_v6 }
 0x8d1   : > { %v6790_v21 = vshrl.u32 %v15683_v18, %v6775_v61  ;;  %vm6450_vm15 = vcmp.lt.s32.totalorder %v13799_v0, 0  ;;  %v6625_v2 = vshll.u32 %v14139_v1, %v6623_v14  ;;  %v6626_v63 = vshrl.u32 %v6608_v45, %v6624_v35 }
 0x8d2   : > { %v6776_v29 = vshrl.u32 %v15512_v31, %v6775_v61  ;;  %vm6795_vm13 = vcmp.lt.s32.totalorder %v14183_v55, 4  ;;  %v14212_v26 = vsub.s32 %v6716_v32, %v6719_v9  ;;  %vm6792_vm5 = vcmp.lt.s32.totalorder %v14183_v55, 1 }
 0x8d3   : > { %v6791_v62 = vor.u32 %v6790_v21, %v6789_v5  ;;  %v6797_v10 = vsel %vm6795_vm13, %v6785_v39, 2102212464  ;;  %vm6793_vm6 = vcmp.lt.s32.totalorder %v14183_v55, 2  ;;  %vm6794_vm2 = vcmp.lt.s32.totalorder %v14183_v55, 3 }
 0x8d4   : > { %v6800_v6 = vsel %vm6792_vm5, %v6779_v22, %v6782_v44  ;;  %v6801_v1 = vsel %vm6795_vm13, %v6788_v23, 920167782  ;;  %v15961_v45 = vand.u32 2147483647, %v13799_v0  ;;  %v6631_v5 = vor.u32 4788187, %v6630_v33 }
 0x8d5   : > { %v6722_v21 = vsub.s32 0, %v14212_v26  ;;  %v6802_v14 = vsel %vm6794_vm2, %v6785_v39, %v6801_v1  ;;  %v6804_v32 = vsel %vm6792_vm5, %v6782_v44, %v6785_v39  ;;  %v6796_v20 = vsel %vm6792_vm5, %v6776_v29, %v6779_v22 }
 0x8d6   : > { %vm14223_vm4 = vcmp.le.f32.partialorder %v15961_v45, 0.7853982  ;;  %v6798_v36 = vsel %vm6794_vm2, %v6782_v44, %v6797_v10  ;;  %v6803_v35 = vsel %vm6793_vm6, %v6800_v6, %v6802_v14  ;;  %v6805_v49 = vsel %vm6795_vm13, %v6791_v62, 1326507024  ;;  %v5982_v6 = vpop.permute.xlu0 %5981 }
 0x8d7   : > { %v8291_v12 = vmin.u32 %v6722_v21, %v14212_v26  ;;  %v6806_v42 = vsel %vm6794_vm2, %v6788_v23, %v6805_v49  ;;  %v14234_v9 = vmul.u32.u64.low %v14200_v24, %v6803_v35  ;;  %v14235_v45 = vmul.u32.u64.high %v14200_v24, %v6803_v35, %v14234_v9  ;;  %v14277_v49 = vpop.f32.mrb[30].mxu1 }
 0x8d8   : > { %v15964_v39 = vsel %vm14009_vm10, 0, %v14017_v56  ;;  %8894 = vsinq.f32 %v14098_v19  ;;  %v6807_v44 = vsel %vm6793_vm6, %v6804_v32, %v6806_v42  ;;  %v6868_v33 = vshrl.u32 %v6867_v28, 23 }
 0x8d9   : > { %v14242_v22 = vadd.s32 3, %v15964_v39  ;;  %v6627_v29 = vor.u32 %v6626_v63, %v6625_v2  ;;  %v6724_v62 = vclz %v8291_v12  ;;  %v6433_v54 = vsel %vm14132_vm12, 0, %v14166_v60 }
 0x8da   : > { %v14248_v23 = vmul.u32.u64.low %v14200_v24, %v6807_v44  ;;  %v14249_v10 = vmul.u32.u64.high %v14200_v24, %v6807_v44, %v14248_v23  ;;  %8896 = vcosq.f32 %v14172_v50  ;;  %v6799_v56 = vsel %vm6793_vm6, %v6796_v20, %v6798_v36 }
 0x8db   : > { %15965 = vst [vmem:[#allocation16_spill] sm:$0xff] %v14242_v22  ;;  %v8298_v19 = vadd.s32 4294967169, %v6868_v33  ;;  %v6533_v28 = vsel %vm6450_vm15, %v6532_v43, %v14180_v34  ;;  %v6632_v2 = vand.u32 2147483647, %v6631_v5  ;;  %v8292_v63 = vadd.s32 4294967294, %v6724_v62 }
 0x8dc   : > { %v6818_v1 = vadd.s32 1, %v14235_v45  ;;  %v6638_v21 = vsub.s32 4, %v14125_v25  ;;  %v15455_v51 = vand.u32 2147483647, %v14187_v46  ;;  %v14264_v14 = vadd.f32 %v13823_v3, %v5982_v6 }
 0x8dd   : > { %v6874_v60 = vadd.s32 1, %v8298_v19  ;;  %v6634_v55 = vcvt.s32.f32 %v6627_v29  ;;  %vm8293_vm10 = vcmp.lt.s32.totalorder %v8292_v63, 0  ;;  %v6815_v32 = vmul.u32 %v14200_v24, %v6799_v56 }
 0x8de   : > { %15966 = vst [vmem:[#allocation41_spill] sm:$0xff] %v14264_v14  ;;  %vm6817_vm7 = vc.u32 %v14249_v10, %v14234_v9  ;;  %v14272_v34 = vsel %vm14223_vm4, %v13799_v0, %v6533_v28  ;;  %v6727_v43 = vsel %vm8293_vm10, 0, %v8292_v63  ;;  %8898 = vsinq.f32 %v14172_v50 }
 0x8df   : > { %v6819_v5 = vsel %vm6817_vm7, %v6818_v1, %v14235_v45  ;;  %vm6875_vm12 = vcmp.gt.s32.totalorder %v6874_v60, 0  ;;  %v14275_v20 = vmul.f32 %v6634_v55, %v6632_v2  ;;  %v6728_v3 = vsub.s32 32, %v6727_v43 }
 0x8e0   : > { %v6732_v36 = vsub.s32 4294967266, %v6727_v43  ;;  %v6820_v35 = vadd.s32 %v6819_v5, %v6815_v32  ;;  %vm6554_vm0 = vcmp.lt.s32.totalorder %v13948_v38, 0  ;;  %v6871_v24 = vand.u32 8388607, %v15455_v51 }
 0x8e1   : > { %v6876_v12 = vsel %vm6875_vm12, %v6874_v60, 0  ;;  %v6712_v42 = vadd.s32 %v14146_v13, %v14155_v30  ;;  %v6971_v44 = vand.u32 2139095040, %v14264_v14  ;;  %v14288_v29 = vadd.s32 3, %v6433_v54 }
 0x8e2   : > { %v6733_v45 = vadd.s32 127, %v6732_v36  ;;  %v6821_v39 = vadd.s32 536870912, %v6820_v35  ;;  %v14286_v33 = vpop.eup %8894  ;;  %8900 = vcosq.f32 %v14272_v34  ;;  %v14294_v50 = vsel %vm6554_vm0, %v6638_v21, %v14125_v25 }
 0x8e3   : > { %15967 = vst [vmem:[#allocation34_spill] sm:$0xff] %v14288_v29  ;;  %v6878_v62 = vand.u32 31, %v6876_v12  ;;  %v6730_v56 = vshrl.u32 %v6712_v42, %v6728_v3  ;;  %v14300_v30 = vadd.f32 %v13882_v8, %v5982_v6  ;;  %v6729_v54 = vshll.u32 %v14212_v26, %v6727_v43 }
 0x8e4   : > { %v14297_v13 = vshrl.u32 %v6821_v39, 30  ;;  %v14302_v19 = vpop.eup %8896  ;;  %v6872_v28 = vor.u32 8388608, %v6871_v24  ;;  %v6734_v1 = vshll.u32 %v6733_v45, 23  ;;  %v6972_v60 = vshrl.u32 %v6971_v44, 23 }
 0x8e5   : > { %15968 = vst [vmem:[#allocation36_spill] sm:$0xff] %v14302_v19  ;;  %v6879_v2 = vsub.s32 32, %v6878_v62  ;;  %v6881_v21 = vshll.u32 %v15512_v31, %v6878_v62  ;;  %v6884_v32 = vshll.u32 %v15679_v53, %v6878_v62  ;;  %v6731_v5 = vor.u32 %v6730_v56, %v6729_v54 }
 0x8e6   : > { %v6823_v25 = vshll.u32 %v14297_v13, 30  ;;  %v6877_v43 = vshrl.u32 %v6876_v12, 5  ;;  %v6887_v3 = vshll.u32 %v15680_v41, %v6878_v62  ;;  %v6816_v36 = vadd.s32 %v14234_v9, %v14249_v10 }
 0x8e7   : > { %v6882_v55 = vshrl.u32 %v15679_v53, %v6879_v2  ;;  %v6885_v8 = vshrl.u32 %v15680_v41, %v6879_v2  ;;  %v6888_v6 = vshrl.u32 %v15681_v16, %v6879_v2  ;;  %v14317_v45 = vshll.u32 %v6872_v28, 8 }
 0x8e8   : > { %v14312_v26 = vsub.s32 %v6820_v35, %v6823_v25  ;;  %v6890_v51 = vshll.u32 %v15681_v16, %v6878_v62  ;;  %v6891_v23 = vshrl.u32 %v15682_v37, %v6879_v2  ;;  %v14322_v56 = vpop.eup %8898  ;;  %v6735_v35 = vor.u32 4788187, %v6734_v1 }
 0x8e9   : > { %v6883_v24 = vor.u32 %v6882_v55, %v6881_v21  ;;  %v6886_v42 = vor.u32 %v6885_v8, %v6884_v32  ;;  %v6889_v44 = vor.u32 %v6888_v6, %v6887_v3  ;;  %15969 = vst [vmem:[#allocation10_spill] sm:$0xff] %v14322_v56  ;;  %v6893_v12 = vshll.u32 %v15682_v37, %v6878_v62 }
 0x8ea   : > { %v6826_v39 = vsub.s32 0, %v14312_v26  ;;  %v6894_v54 = vshrl.u32 %v15683_v18, %v6879_v2  ;;  %v8302_v25 = vadd.s32 4294967169, %v6972_v60  ;;  %v6738_v9 = vcvt.s32.f32 %v6731_v5 }
 0x8eb   : > { %v6892_v28 = vor.u32 %v6891_v23, %v6890_v51  ;;  %vm6896_vm1 = vcmp.lt.s32.totalorder %v6877_v43, 1  ;;  %v6880_v55 = vshrl.u32 %v15512_v31, %v6879_v2  ;;  %vm6899_vm11 = vcmp.lt.s32.totalorder %v6877_v43, 4 }
 0x8ec   : > { %v8295_v10 = vmin.u32 %v6826_v39, %v14312_v26  ;;  %v14327_v21 = vpop.eup %8900  ;;  %v6895_v32 = vor.u32 %v6894_v54, %v6893_v12  ;;  %v6904_v8 = vsel %vm6896_vm1, %v6883_v24, %v6886_v42  ;;  %vm6898_vm8 = vcmp.lt.s32.totalorder %v6877_v43, 3 }
 0x8ed   : > { %v6901_v1 = vsel %vm6899_vm11, %v6889_v44, 2102212464  ;;  %v6905_v3 = vsel %vm6899_vm11, %v6892_v28, 920167782  ;;  %v6736_v62 = vand.u32 2147483647, %v6735_v35  ;;  %v6908_v60 = vsel %vm6896_vm1, %v6886_v42, %v6889_v44 }
 0x8ee   : > { %v6828_v6 = vclz %v8295_v10  ;;  %vm6897_vm14 = vcmp.lt.s32.totalorder %v6877_v43, 2  ;;  %v6906_v63 = vsel %vm6898_vm8, %v6889_v44, %v6905_v3  ;;  %v6900_v48 = vsel %vm6896_vm1, %v6880_v55, %v6883_v24  ;;  %v14339_v44 = vpop.f32.mrb[31].mxu1 }
 0x8ef   : > { %v6907_v51 = vsel %vm6897_vm14, %v6904_v8, %v6906_v63  ;;  %v6909_v23 = vsel %vm6899_vm11, %v6895_v32, 1326507024  ;;  %v6902_v39 = vsel %vm6898_vm8, %v6886_v42, %v6901_v1  ;;  %v15970_v35 = vand.u32 2147483647, %v14264_v14 }
 0x8f0   : > { %v8296_v5 = vadd.s32 4294967294, %v6828_v6  ;;  %v6910_v19 = vsel %vm6898_vm8, %v6892_v28, %v6909_v23  ;;  %v14332_v2 = vmul.u32.u64.low %v14317_v45, %v6907_v51  ;;  %v14333_v12 = vmul.u32.u64.high %v14317_v45, %v6907_v51, %v14332_v2 }
 0x8f1   : > { %v6911_v54 = vsel %vm6897_vm14, %v6908_v60, %v6910_v19  ;;  %v6975_v10 = vand.u32 8388607, %v15970_v35  ;;  %v6978_v3 = vadd.s32 1, %v8302_v25  ;;  %v14341_v24 = vmul.f32 %v6738_v9, %v6736_v62 }
 0x8f2   : > { %vm8297_vm13 = vcmp.lt.s32.totalorder %v8296_v5, 0  ;;  %v14344_v42 = vmul.u32.u64.low %v14317_v45, %v6911_v54  ;;  %v14345_v28 = vmul.u32.u64.high %v14317_v45, %v6911_v54, %v14344_v42  ;;  %v6903_v8 = vsel %vm6897_vm14, %v6900_v48, %v6902_v39 }
 0x8f3   : > { %v6831_v63 = vsel %vm8297_vm13, 0, %v8296_v5  ;;  %vm6979_vm5 = vcmp.gt.s32.totalorder %v6978_v3, 0  ;;  %8902 = vsinq.f32 %v14272_v34  ;;  %v15971_v19 = vxor.u32 2147483648, %v14275_v20 }
 0x8f4   : > { %v6832_v55 = vsub.s32 32, %v6831_v63  ;;  %v6836_v32 = vsub.s32 4294967266, %v6831_v63  ;;  %v6922_v9 = vadd.s32 1, %v14333_v12  ;;  %v6980_v6 = vsel %vm6979_vm5, %v6978_v3, 0 }
 0x8f5   : > { %v14354_v25 = vsel %vm6554_vm0, %v15971_v19, %v14275_v20  ;;  %v6976_v60 = vor.u32 8388608, %v6975_v10  ;;  %v6982_v5 = vand.u32 31, %v6980_v6  ;;  %v6833_v48 = vshll.u32 %v14312_v26, %v6831_v63 }
 0x8f6   : > { %v6834_v1 = vshrl.u32 %v6816_v36, %v6832_v55  ;;  %v6837_v62 = vadd.s32 127, %v6836_v32  ;;  %v6919_v34 = vmul.u32 %v14317_v45, %v6903_v8  ;;  %vm6921_vm6 = vc.u32 %v14345_v28, %v14332_v2 }
 0x8f7   : > { %v6923_v20 = vsel %vm6921_vm6, %v6922_v9, %v14333_v12  ;;  %v6983_v23 = vsub.s32 32, %v6982_v5  ;;  %v7075_v39 = vand.u32 2139095040, %v14300_v30  ;;  %v6981_v35 = vshrl.u32 %v6980_v6, 5 }
 0x8f8   : > { %v6838_v51 = vshll.u32 %v6837_v62, 23  ;;  %v6835_v54 = vor.u32 %v6834_v1, %v6833_v48  ;;  %v6924_v36 = vadd.s32 %v6923_v20, %v6919_v34  ;;  %v6985_v10 = vshll.u32 %v15512_v31, %v6982_v5 }
 0x8f9   : > { %v6986_v42 = vshrl.u32 %v15679_v53, %v6983_v23  ;;  %v6988_v26 = vshll.u32 %v15679_v53, %v6982_v5  ;;  %v6991_v45 = vshll.u32 %v15680_v41, %v6982_v5  ;;  %v15972_v63 = vand.u32 2147483647, %v13948_v38 }
 0x8fa   : > { %v6839_v3 = vor.u32 4788187, %v6838_v51  ;;  %v6925_v12 = vadd.s32 536870912, %v6924_v36  ;;  %v6989_v32 = vshrl.u32 %v15680_v41, %v6983_v23  ;;  %v6992_v8 = vshrl.u32 %v15681_v16, %v6983_v23 }
 0x8fb   : > { %vm14370_vm2 = vcmp.le.f32.partialorder %v15972_v63, 0.7853982  ;;  %v6994_v19 = vshll.u32 %v15681_v16, %v6982_v5  ;;  %v6987_v6 = vor.u32 %v6986_v42, %v6985_v10  ;;  %v6995_v1 = vshrl.u32 %v15682_v37, %v6983_v23 }
 0x8fc   : > { %v6840_v9 = vand.u32 2147483647, %v6839_v3  ;;  %v6997_v62 = vshll.u32 %v15682_v37, %v6982_v5  ;;  %vm6658_vm10 = vcmp.lt.s32.totalorder %v13951_v4, 0  ;;  %v14380_v48 = vshrl.u32 %v6925_v12, 30 }
 0x8fd   : > { %v6990_v34 = vor.u32 %v6989_v32, %v6988_v26  ;;  %v6993_v51 = vor.u32 %v6992_v8, %v6991_v45  ;;  %v6998_v20 = vshrl.u32 %v15683_v18, %v6983_v23  ;;  %v6842_v63 = vcvt.s32.f32 %v6835_v54  ;;  %v14383_v58 = vpop.eup %8902 }
 0x8fe   : > { %15975 = vst [vmem:[#allocation5_spill] sm:$0xff] %v14380_v48  ;;  %v6996_v43 = vor.u32 %v6995_v1, %v6994_v19  ;;  %v7016_v56 = vshll.u32 %v6976_v60, 8  ;;  %v7076_v29 = vshrl.u32 %v7075_v39, 23  ;;  %v6927_v10 = vshll.u32 %v14380_v48, 30 }
 0x8ff   : > { %v6999_v3 = vor.u32 %v6998_v20, %v6997_v62  ;;  %vm7000_vm7 = vcmp.lt.s32.totalorder %v6981_v35, 1  ;;  %vm7003_vm12 = vcmp.lt.s32.totalorder %v6981_v35, 4  ;;  %v15976_v5 = vand.u32 2147483647, %v13951_v4 }
 0x900   : > { %v15977_v42 = vmov 0  ;;  %v6843_v26 = vmul.f32 %v6842_v63, %v6840_v9  ;;  %v6984_v45 = vshrl.u32 %v15512_v31, %v6983_v23  ;;  %v7005_v54 = vsel %vm7003_vm12, %v6993_v51, 2102212464 }
 0x901   : > { %vm14388_vm0 = vcmp.le.f32.partialorder %v15976_v5, 0.7853982  ;;  %v7008_v12 = vsel %vm7000_vm7, %v6987_v6, %v6990_v34  ;;  %vm6762_vm1 = vcmp.lt.s32.totalorder %v14034_v7, 0  ;;  %v14394_v60 = vsub.s32 %v6924_v36, %v6927_v10 }
 0x902   : > { %v15978_v42 = vsel %vm14388_vm0, 4294967295, %v15977_v42  ;;  %vm7002_vm11 = vcmp.lt.s32.totalorder %v6981_v35, 3  ;;  %v7009_v39 = vsel %vm7003_vm12, %v6996_v43, 920167782  ;;  %v7012_v32 = vsel %vm7000_vm7, %v6990_v34, %v6993_v51 }
 0x903   : > { %15979 = vst [vmem:[#allocation39_spill] sm:$0xff] %v15978_v42  ;;  %vm7001_vm8 = vcmp.lt.s32.totalorder %v6981_v35, 2  ;;  %v7004_v8 = vsel %vm7000_vm7, %v6984_v45, %v6987_v6  ;;  %v7010_v19 = vsel %vm7002_vm11, %v6993_v51, %v7009_v39  ;;  %v7013_v1 = vsel %vm7003_vm12, %v6999_v3, 1326507024 }
 0x904   : > { %v6930_v62 = vsub.s32 0, %v14394_v60  ;;  %v7006_v20 = vsel %vm7002_vm11, %v6990_v34, %v7005_v54  ;;  %v7011_v9 = vsel %vm7001_vm8, %v7008_v12, %v7010_v19  ;;  %v7014_v63 = vsel %vm7002_vm11, %v6996_v43, %v7013_v1 }
 0x905   : > { %v6640_v23 = vsel %vm14370_vm2, %v13948_v38, %v14354_v25  ;;  %v7015_v36 = vsel %vm7001_vm8, %v7012_v32, %v7014_v63  ;;  %v14403_v10 = vmul.u32.u64.low %v7016_v56, %v7011_v9  ;;  %v14404_v5 = vmul.u32.u64.high %v7016_v56, %v7011_v9, %v14403_v10  ;;  %v14418_v25 = vpop.permute.xlu1 %5986 }
 0x906   : > { %v15980_v6 = vand.u32 2147483647, %v14034_v7  ;;  %v8299_v34 = vmin.u32 %v6930_v62, %v14394_v60  ;;  %v14414_v43 = vmul.u32.u64.low %v7016_v56, %v7015_v36  ;;  %v14415_v3 = vmul.u32.u64.high %v7016_v56, %v7015_v36, %v14414_v43 }
 0x907   : > { %v15461_v45 = vand.u32 2147483647, %v14300_v30  ;;  %v15983_v54 = vxor.u32 2147483648, %v14341_v24  ;;  %v6844_v39 = vxor.u32 2147483648, %v6843_v26  ;;  %v7007_v32 = vsel %vm7001_vm8, %v7004_v8, %v7006_v20 }
 0x908   : > { %vm14409_vm14 = vcmp.le.f32.partialorder %v15980_v6, 0.7853982  ;;  %v8306_v19 = vadd.s32 4294967169, %v7076_v29  ;;  %v6641_v1 = vsel %vm14370_vm2, 0, %v14294_v50  ;;  %8904 = vcosq.f32 %v6640_v23 }
 0x909   : > { %v6741_v12 = vsel %vm6658_vm10, %v15983_v54, %v14341_v24  ;;  %v6932_v62 = vclz %v8299_v34  ;;  %v14431_v9 = vadd.f32 %v13942_v17, %v14418_v25  ;;  %8906 = vsinq.f32 %v6640_v23 }
 0x90a   : > { %v6846_v63 = vsub.s32 4, %v14297_v13  ;;  %v7026_v36 = vadd.s32 1, %v14404_v5  ;;  %v7082_v24 = vadd.s32 1, %v8306_v19  ;;  %v6744_v29 = vsel %vm14388_vm0, %v13951_v4, %v6741_v12 }
 0x90b   : > { %15984 = vst [vmem:[#allocation3_spill] sm:$0xff] %v14431_v9  ;;  %v8300_v35 = vadd.s32 4294967294, %v6932_v62  ;;  %v7023_v8 = vmul.u32 %v7016_v56, %v7007_v32  ;;  %vm7025_vm13 = vc.u32 %v14415_v3, %v14403_v10  ;;  %v6845_v50 = vsel %vm6762_vm1, %v6844_v39, %v6843_v26 }
 0x90c   : > { %v7027_v17 = vsel %vm7025_vm13, %v7026_v36, %v14404_v5  ;;  %v7079_v55 = vand.u32 8388607, %v15461_v45  ;;  %vm7083_vm5 = vcmp.gt.s32.totalorder %v7082_v24, 0  ;;  %v7179_v6 = vand.u32 2139095040, %v14431_v9 }
 0x90d   : > { %vm8301_vm6 = vcmp.lt.s32.totalorder %v8300_v35, 0  ;;  %v7028_v20 = vadd.s32 %v7027_v17, %v7023_v8  ;;  %v7084_v23 = vsel %vm7083_vm5, %v7082_v24, 0  ;;  %v14446_v34 = vadd.s32 3, %v6641_v1 }
 0x90e   : > { %8908 = vcosq.f32 %v6744_v29  ;;  %v6935_v56 = vsel %vm8301_vm6, 0, %v8300_v35  ;;  %v7086_v43 = vand.u32 31, %v7084_v23  ;;  %v14451_v26 = vsel %vm6762_vm1, %v6846_v63, %v14297_v13 }
 0x90f   : > { %15985 = vst [vmem:[#allocation23_spill] sm:$0xff] %v14446_v34  ;;  %8910 = vsinq.f32 %v6744_v29  ;;  %v6940_v5 = vsub.s32 4294967266, %v6935_v56  ;;  %v7029_v54 = vadd.s32 536870912, %v7028_v20  ;;  %v14456_v12 = vsel %vm14409_vm14, %v14034_v7, %v6845_v50 }
 0x910   : > { %v6920_v39 = vadd.s32 %v14332_v2, %v14345_v28  ;;  %v6936_v32 = vsub.s32 32, %v6935_v56  ;;  %v7087_v19 = vsub.s32 32, %v7086_v43  ;;  %v7080_v36 = vor.u32 8388608, %v7079_v55 }
 0x911   : > { %v6941_v1 = vadd.s32 127, %v6940_v5  ;;  %v14460_v62 = vshrl.u32 %v7029_v54, 30  ;;  %v7180_v24 = vshrl.u32 %v7179_v6, 23  ;;  %v7085_v29 = vshrl.u32 %v7084_v23, 5 }
 0x912   : > { %v7090_v13 = vshrl.u32 %v15679_v53, %v7087_v19  ;;  %v7093_v63 = vshrl.u32 %v15680_v41, %v7087_v19  ;;  %v7096_v35 = vshrl.u32 %v15681_v16, %v7087_v19  ;;  %v14465_v8 = vpop.eup %8904  ;;  %v6937_v50 = vshll.u32 %v14394_v60, %v6935_v56 }
 0x913   : > { %15986 = vst [vmem:[#allocation6_spill] sm:$0xff] %v14465_v8  ;;  %v7031_v2 = vshll.u32 %v14460_v62, 30  ;;  %v7089_v28 = vshll.u32 %v15512_v31, %v7086_v43  ;;  %v7095_v17 = vshll.u32 %v15680_v41, %v7086_v43  ;;  %v14471_v5 = vpop.eup %8906  ;;  %v6938_v55 = vshrl.u32 %v6920_v39, %v6936_v32 }
 0x914   : > { %15987 = vst [vmem:[#allocation35_spill] sm:$0xff] %v14471_v5  ;;  %v7092_v23 = vshll.u32 %v15679_v53, %v7086_v43  ;;  %v7098_v6 = vshll.u32 %v15681_v16, %v7086_v43  ;;  %v7099_v54 = vshrl.u32 %v15682_v37, %v7087_v19  ;;  %v6942_v45 = vshll.u32 %v6941_v1, 23 }
 0x915   : > { %v14476_v7 = vsub.s32 %v7028_v20, %v7031_v2  ;;  %v7091_v38 = vor.u32 %v7090_v13, %v7089_v28  ;;  %v7097_v60 = vor.u32 %v7096_v35, %v7095_v17  ;;  %v7101_v34 = vshll.u32 %v15682_v37, %v7086_v43 }
 0x916   : > { %v7094_v56 = vor.u32 %v7093_v63, %v7092_v23  ;;  %v7100_v8 = vor.u32 %v7099_v54, %v7098_v6  ;;  %v7102_v42 = vshrl.u32 %v15683_v18, %v7087_v19  ;;  %v7120_v39 = vshll.u32 %v7080_v36, 8 }
 0x917   : > { %v7034_v5 = vsub.s32 0, %v14476_v7  ;;  %v15472_v32 = vand.u32 2147483647, %v14431_v9  ;;  %v8310_v48 = vadd.s32 4294967169, %v7180_v24  ;;  %v6939_v22 = vor.u32 %v6938_v55, %v6937_v50 }
 0x918   : > { %v14482_v4 = vpop.eup %8908  ;;  %v7088_v20 = vshrl.u32 %v15512_v31, %v7087_v19  ;;  %v7103_v1 = vor.u32 %v7102_v42, %v7101_v34  ;;  %vm7107_vm2 = vcmp.lt.s32.totalorder %v7085_v29, 4  ;;  %v6943_v63 = vor.u32 4788187, %v6942_v45 }
 0x919   : > { %v14485_v13 = vpop.eup %8910  ;;  %v8303_v43 = vmin.u32 %v7034_v5, %v14476_v7  ;;  %vm7104_vm7 = vcmp.lt.s32.totalorder %v7085_v29, 1  ;;  %v7109_v35 = vsel %vm7107_vm2, %v7097_v60, 2102212464  ;;  %vm7105_vm12 = vcmp.lt.s32.totalorder %v7085_v29, 2 }
 0x91a   : > { %vm7106_vm1 = vcmp.lt.s32.totalorder %v7085_v29, 3  ;;  %v7112_v36 = vsel %vm7104_vm7, %v7091_v38, %v7094_v56  ;;  %v7113_v24 = vsel %vm7107_vm2, %v7100_v8, 920167782  ;;  %v7108_v28 = vsel %vm7104_vm7, %v7088_v20, %v7091_v38 }
 0x91b   : > { %v7036_v2 = vclz %v8303_v43  ;;  %v7114_v50 = vsel %vm7106_vm1, %v7097_v60, %v7113_v24  ;;  %v7116_v17 = vsel %vm7104_vm7, %v7094_v56, %v7097_v60  ;;  %v7110_v19 = vsel %vm7106_vm1, %v7094_v56, %v7109_v35 }
 0x91c   : > { %v7115_v42 = vsel %vm7105_vm12, %v7112_v36, %v7114_v50  ;;  %v7117_v34 = vsel %vm7107_vm2, %v7103_v1, 1326507024  ;;  %v7186_v45 = vadd.s32 1, %v8310_v48  ;;  %v14494_v23 = vand.u32 8388607, %v15472_v32 }
 0x91d   : > { %v8304_v55 = vadd.s32 4294967294, %v7036_v2  ;;  %v7118_v5 = vsel %vm7106_vm1, %v7100_v8, %v7117_v34  ;;  %v14498_v6 = vadd.f32 %v13991_v15, %v14418_v25  ;;  %v6944_v54 = vand.u32 2147483647, %v6943_v63 }
 0x91e   : > { %v7119_v38 = vsel %vm7105_vm12, %v7116_v17, %v7118_v5  ;;  %v14501_v60 = vmul.u32.u64.low %v7120_v39, %v7115_v42  ;;  %v14502_v56 = vmul.u32.u64.high %v7120_v39, %v7115_v42, %v14501_v60  ;;  %v7111_v48 = vsel %vm7105_vm12, %v7108_v28, %v7110_v19 }
 0x91f   : > { %vm8305_vm11 = vcmp.lt.s32.totalorder %v8304_v55, 0  ;;  %v14506_v20 = vmul.u32.u64.low %v7120_v39, %v7119_v38  ;;  %v14507_v8 = vmul.u32.u64.high %v7120_v39, %v7119_v38, %v14506_v20  ;;  %v6946_v1 = vcvt.s32.f32 %v6939_v22 }
 0x920   : > { %v7024_v43 = vadd.s32 %v14403_v10, %v14415_v3  ;;  %v7039_v35 = vsel %vm8305_vm11, 0, %v8304_v55  ;;  %vm7187_vm8 = vcmp.gt.s32.totalorder %v7186_v45, 0  ;;  %v7184_v63 = vor.u32 8388608, %v14494_v23 }
 0x921   : > { %v7040_v15 = vsub.s32 32, %v7039_v35  ;;  %v7044_v25 = vsub.s32 4294967266, %v7039_v35  ;;  %v7188_v36 = vsel %vm7187_vm8, %v7186_v45, 0  ;;  %v14512_v24 = vmul.f32 %v6946_v1, %v6944_v54 }
 0x922   : > { %v7127_v2 = vmul.u32 %v7120_v39, %v7111_v48  ;;  %v7130_v29 = vadd.s32 1, %v14502_v56  ;;  %v7190_v28 = vand.u32 31, %v7188_v36  ;;  %v7041_v50 = vshll.u32 %v14476_v7, %v7039_v35 }
 0x923   : > { %v7042_v17 = vshrl.u32 %v7024_v43, %v7040_v15  ;;  %v7045_v22 = vadd.s32 127, %v7044_v25  ;;  %vm7129_vm13 = vc.u32 %v14507_v8, %v14501_v60  ;;  %v7189_v3 = vshrl.u32 %v7188_v36, 5 }
 0x924   : > { %v7131_v10 = vsel %vm7129_vm13, %v7130_v29, %v14502_v56  ;;  %v7191_v19 = vsub.s32 32, %v7190_v28  ;;  %v7193_v42 = vshll.u32 %v15512_v31, %v7190_v28  ;;  %v7196_v39 = vshll.u32 %v15679_v53, %v7190_v28 }
 0x925   : > { %v7043_v34 = vor.u32 %v7042_v17, %v7041_v50  ;;  %v7046_v45 = vshll.u32 %v7045_v22, 23  ;;  %v7132_v55 = vadd.s32 %v7131_v10, %v7127_v2  ;;  %v7199_v23 = vshll.u32 %v15680_v41, %v7190_v28 }
 0x926   : > { %v7194_v5 = vshrl.u32 %v15679_v53, %v7191_v19  ;;  %v7197_v7 = vshrl.u32 %v15680_v41, %v7191_v19  ;;  %v7200_v54 = vshrl.u32 %v15681_v16, %v7191_v19  ;;  %v7202_v20 = vshll.u32 %v15681_v16, %v7190_v28 }
 0x927   : > { %v7047_v38 = vor.u32 4788187, %v7046_v45  ;;  %v7050_v48 = vcvt.s32.f32 %v7043_v34  ;;  %v7133_v56 = vadd.s32 536870912, %v7132_v55  ;;  %vm15489_vm5 = vcmp.lt.s32.totalorder %v14187_v46, 0 }
 0x928   : > { %v7195_v1 = vor.u32 %v7194_v5, %v7193_v42  ;;  %v7198_v43 = vor.u32 %v7197_v7, %v7196_v39  ;;  %v7201_v35 = vor.u32 %v7200_v54, %v7199_v23  ;;  %v7203_v15 = vshrl.u32 %v15682_v37, %v7191_v19 }
 0x929   : > { %v7048_v25 = vand.u32 2147483647, %v7047_v38  ;;  %v14528_v36 = vshrl.u32 %v7133_v56, 30  ;;  %v7205_v2 = vshll.u32 %v15682_v37, %v7190_v28  ;;  %v7206_v29 = vshrl.u32 %v15683_v18, %v7191_v19 }
 0x92a   : > { %v6948_v50 = vxor.u32 2147483648, %v14512_v24  ;;  %vm6970_vm6 = vcmp.lt.s32.totalorder %v14264_v14, 0  ;;  %v7192_v17 = vshrl.u32 %v15512_v31, %v7191_v19  ;;  %v7204_v22 = vor.u32 %v7203_v15, %v7202_v20 }
 0x92b   : > { %15988 = vst [vmem:[#allocation18_spill] sm:$0xff] %v14528_v36  ;;  %vm7208_vm2 = vcmp.lt.s32.totalorder %v7189_v3, 1  ;;  %v15989_v10 = vand.u32 2147483647, %v14187_v46  ;;  %v15990_v42 = vmov 0  ;;  %v7051_v34 = vmul.f32 %v7050_v48, %v7048_v25 }
 0x92c   : > { %v7135_v45 = vshll.u32 %v14528_v36, 30  ;;  %v7207_v28 = vor.u32 %v7206_v29, %v7205_v2  ;;  %vm7211_vm12 = vcmp.lt.s32.totalorder %v7189_v3, 4  ;;  %vm7210_vm1 = vcmp.lt.s32.totalorder %v7189_v3, 3 }
 0x92d   : > { %vm14537_vm7 = vcmp.le.f32.partialorder %v15989_v10, 0.7853982  ;;  %v7213_v39 = vsel %vm7211_vm12, %v7201_v35, 2102212464  ;;  %v7216_v5 = vsel %vm7208_vm2, %v7195_v1, %v7198_v43  ;;  %v7217_v7 = vsel %vm7211_vm12, %v7204_v22, 920167782 }
 0x92e   : > { %v15991_v42 = vsel %vm14537_vm7, 4294967295, %v15990_v42  ;;  %v14543_v23 = vsub.s32 %v7132_v55, %v7135_v45  ;;  %vm7209_vm11 = vcmp.lt.s32.totalorder %v7189_v3, 2  ;;  %v7218_v19 = vsel %vm7210_vm1, %v7201_v35, %v7217_v7 }
 0x92f   : > { %15992 = vst [vmem:[#allocation2_spill] sm:$0xff] %v15991_v42  ;;  %v7224_v54 = vshll.u32 %v7184_v63, 8  ;;  %v7212_v38 = vsel %vm7208_vm2, %v7192_v17, %v7195_v1  ;;  %v7219_v56 = vsel %vm7209_vm11, %v7216_v5, %v7218_v19  ;;  %v7220_v48 = vsel %vm7208_vm2, %v7198_v43, %v7201_v35 }
 0x930   : > { %v7221_v20 = vsel %vm7211_vm12, %v7207_v28, 1326507024  ;;  %v7052_v15 = vxor.u32 2147483648, %v7051_v34  ;;  %v7138_v25 = vsub.s32 0, %v14543_v23  ;;  %v7214_v2 = vsel %vm7210_vm1, %v7198_v43, %v7213_v39 }
 0x931   : > { %v7222_v29 = vsel %vm7210_vm1, %v7204_v22, %v7221_v20  ;;  %v7054_v10 = vsub.s32 4, %v14460_v62  ;;  %v14551_v45 = vmul.u32.u64.low %v7224_v54, %v7219_v56  ;;  %v14552_v32 = vmul.u32.u64.high %v7224_v54, %v7219_v56, %v14551_v45  ;;  %v5992_v56 = vpop.permute.xlu0 %5991 }
 0x932   : > { %v7223_v55 = vsel %vm7209_vm11, %v7220_v48, %v7222_v29  ;;  %v6949_v63 = vsel %vm15489_vm5, %v6948_v50, %v14512_v24  ;;  %v8307_v1 = vmin.u32 %v7138_v25, %v14543_v23  ;;  %8912 = vcosq.f32 %v14456_v12 }
 0x933   : > { %v14559_v35 = vmul.u32.u64.low %v7224_v54, %v7223_v55  ;;  %v14560_v17 = vmul.u32.u64.high %v7224_v54, %v7223_v55, %v14559_v35  ;;  %v15993_v43 = vand.u32 2147483647, %v14264_v14  ;;  %v7215_v28 = vsel %vm7209_vm11, %v7212_v38, %v7214_v2 }
 0x934   : > { %v7283_v39 = vand.u32 2139095040, %v14498_v6  ;;  %v6849_v24 = vsel %vm14409_vm14, 0, %v14451_v26  ;;  %8914 = vsinq.f32 %v14456_v12  ;;  %v7053_v50 = vsel %vm6970_vm6, %v7052_v15, %v7051_v34 }
 0x935   : > { %vm14565_vm8 = vcmp.le.f32.partialorder %v15993_v43, 0.7853982  ;;  %v7140_v5 = vclz %v8307_v1  ;;  %v6952_v7 = vsel %vm14537_vm7, %v14187_v46, %v6949_v63  ;;  %v7055_v3 = vsel %vm6970_vm6, %v7054_v10, %v14460_v62 }
 0x936   : > { %v7234_v19 = vadd.s32 1, %v14552_v32  ;;  %v7284_v38 = vshrl.u32 %v7283_v39, 23  ;;  %v7231_v26 = vmul.u32 %v7224_v54, %v7215_v28  ;;  %vm7233_vm14 = vc.u32 %v14560_v17, %v14551_v45 }
 0x937   : > { %v8308_v51 = vadd.s32 4294967294, %v7140_v5  ;;  %v15474_v12 = vand.u32 2147483647, %v14498_v6  ;;  %v7056_v34 = vsel %vm14565_vm8, %v14264_v14, %v7053_v50  ;;  %v14592_v62 = vadd.f32 %v14108_v40, %v5992_v56 }
 0x938   : > { %v7235_v48 = vsel %vm7233_vm14, %v7234_v19, %v14552_v32  ;;  %v8314_v20 = vadd.s32 4294967169, %v7284_v38  ;;  %8916 = vcosq.f32 %v6952_v7  ;;  %v7057_v15 = vsel %vm14565_vm8, 0, %v7055_v3 }
 0x939   : > { %vm8309_vm13 = vcmp.lt.s32.totalorder %v8308_v51, 0  ;;  %v7236_v54 = vadd.s32 %v7235_v48, %v7231_v26  ;;  %8918 = vsinq.f32 %v6952_v7  ;;  %v7128_v25 = vadd.s32 %v14501_v60, %v14507_v8  ;;  %v14612_v7 = vpop.permute.xlu1 %5996 }
 0x93a   : > { %v7143_v2 = vsel %vm8309_vm13, 0, %v8308_v51  ;;  %v7290_v29 = vadd.s32 1, %v8314_v20  ;;  %8920 = vcosq.f32 %v7056_v34  ;;  %v7287_v40 = vand.u32 8388607, %v15474_v12 }
 0x93b   : > { %v7144_v10 = vsub.s32 32, %v7143_v2  ;;  %v7148_v55 = vsub.s32 4294967266, %v7143_v2  ;;  %v7237_v32 = vadd.s32 536870912, %v7236_v54  ;;  %v15473_v63 = vand.u32 2147483647, %v14592_v62 }
 0x93c   : > { %vm7291_vm6 = vcmp.gt.s32.totalorder %v7290_v29, 0  ;;  %v7387_v1 = vand.u32 2139095040, %v14592_v62  ;;  %v14604_v60 = vpop.eup %8912  ;;  %v14606_v8 = vadd.s32 3, %v6849_v24  ;;  %8922 = vsinq.f32 %v7056_v34 }
 0x93d   : > { %v7146_v35 = vshrl.u32 %v7128_v25, %v7144_v10  ;;  %v7149_v43 = vadd.s32 127, %v7148_v55  ;;  %v14602_v22 = vshrl.u32 %v7237_v32, 30  ;;  %v7292_v28 = vsel %vm7291_vm6, %v7290_v29, 0  ;;  %15996 = vst [vmem:[#allocation30_spill] sm:$0xff] %v14604_v60 }
 0x93e   : > { %15997 = vst [vmem:[#allocation22_spill] sm:$0xff] %v14606_v8  ;;  %v14608_v39 = vadd.s32 3, %v7057_v15  ;;  %v7294_v50 = vand.u32 31, %v7292_v28  ;;  %v14610_v5 = vpop.eup %8914  ;;  %v7145_v3 = vshll.u32 %v14543_v23, %v7143_v2  ;;  %v14617_v51 = vadd.f32 %v14178_v11, %v5992_v56 }
 0x93f   : > { %15999 = vst [vmem:[#allocation8_spill] sm:$0xff] %v14610_v5  ;;  %v7150_v19 = vshll.u32 %v7149_v43, 23  ;;  %v7239_v38 = vshll.u32 %v14602_v22, 30  ;;  %v7288_v26 = vor.u32 8388608, %v7287_v40  ;;  %v14621_v24 = vand.u32 8388607, %v15473_v63 }
 0x940   : > { %15998 = vst [vmem:[#allocation20_spill] sm:$0xff] %v14608_v39  ;;  %v7295_v48 = vsub.s32 32, %v7294_v50  ;;  %v14625_v34 = vadd.f32 %v14277_v49, %v14612_v7  ;;  %v7147_v20 = vor.u32 %v7146_v35, %v7145_v3  ;;  %v14629_v23 = vshrl.u32 %v7292_v28, 5 }
 0x941   : > { %v14627_v15 = vsub.s32 %v7236_v54, %v7239_v38  ;;  %v7388_v25 = vshrl.u32 %v7387_v1, 23  ;;  %vm7178_vm2 = vcmp.lt.s32.totalorder %v14431_v9, 0  ;;  %v7297_v11 = vshll.u32 %v15512_v31, %v7294_v50 }
 0x942   : > { %v7298_v56 = vshrl.u32 %v15679_v53, %v7295_v48  ;;  %v7300_v2 = vshll.u32 %v15679_v53, %v7294_v50  ;;  %v7301_v29 = vshrl.u32 %v15680_v41, %v7295_v48  ;;  %v14636_v10 = vpop.eup %8916  ;;  %v7151_v49 = vor.u32 4788187, %v7150_v19 }
 0x943   : > { %16000 = vst [vmem:[#allocation12_spill] sm:$0xff] %v14636_v10  ;;  %v7242_v55 = vsub.s32 0, %v14627_v15  ;;  %v7303_v54 = vshll.u32 %v15680_v41, %v7294_v50  ;;  %v7304_v32 = vshrl.u32 %v15681_v16, %v7295_v48  ;;  %v14641_v40 = vpop.eup %8918  ;;  %v7306_v43 = vshll.u32 %v15681_v16, %v7294_v50 }
 0x944   : > { %16001 = vst [vmem:[#allocation7_spill] sm:$0xff] %v14641_v40  ;;  %v7299_v1 = vor.u32 %v7298_v56, %v7297_v11  ;;  %v7302_v35 = vor.u32 %v7301_v29, %v7300_v2  ;;  %v7307_v28 = vshrl.u32 %v15682_v37, %v7295_v48  ;;  %v14645_v3 = vpop.eup %8920  ;;  %v14648_v63 = vshll.u32 %v7288_v26, 8 }
 0x945   : > { %16002 = vst [vmem:[#allocation38_spill] sm:$0xff] %v14645_v3  ;;  %v8311_v38 = vmin.u32 %v7242_v55, %v14627_v15  ;;  %v8318_v19 = vadd.s32 4294967169, %v7388_v25  ;;  %v7392_v12 = vor.u32 8388608, %v14621_v24  ;;  %v7305_v14 = vor.u32 %v7304_v32, %v7303_v54 }
 0x946   : > { %v7308_v39 = vor.u32 %v7307_v28, %v7306_v43  ;;  %v7309_v36 = vshll.u32 %v15682_v37, %v7294_v50  ;;  %v7310_v11 = vshrl.u32 %v15683_v18, %v7295_v48  ;;  %v7154_v56 = vcvt.s32.f32 %v7147_v20  ;;  %v14661_v25 = vpop.eup %8922 }
 0x947   : > { %v16003_v2 = vand.u32 2147483647, %v14431_v9  ;;  %v7244_v3 = vclz %v8311_v38  ;;  %v7262_v26 = vsub.s32 4, %v14602_v22  ;;  %vm7312_vm1 = vcmp.lt.s32.totalorder %v14629_v23, 1  ;;  %16006 = vst [vmem:[#allocation37_spill] sm:$0xff] %v14661_v25 }
 0x948   : > { %v7152_v24 = vand.u32 2147483647, %v7151_v49  ;;  %v7311_v55 = vor.u32 %v7310_v11, %v7309_v36  ;;  %vm7315_vm11 = vcmp.lt.s32.totalorder %v14629_v23, 4  ;;  %v7320_v50 = vsel %vm7312_vm1, %v7299_v1, %v7302_v35 }
 0x949   : > { %vm14655_vm12 = vcmp.le.f32.partialorder %v16003_v2, 0.7853982  ;;  %v8312_v20 = vadd.s32 4294967294, %v7244_v3  ;;  %v7296_v54 = vshrl.u32 %v15512_v31, %v7295_v48  ;;  %vm7314_vm8 = vcmp.lt.s32.totalorder %v14629_v23, 3 }
 0x94a   : > { %v7321_v32 = vsel %vm7315_vm11, %v7308_v39, 920167782  ;;  %vm7313_vm14 = vcmp.lt.s32.totalorder %v14629_v23, 2  ;;  %v7317_v43 = vsel %vm7315_vm11, %v7305_v14, 2102212464  ;;  %v7324_v36 = vsel %vm7312_vm1, %v7302_v35, %v7305_v14 }
 0x94b   : > { %v7322_v28 = vsel %vm7314_vm8, %v7305_v14, %v7321_v32  ;;  %vm15488_vm13 = vcmp.lt.s32.totalorder %v14300_v30, 0  ;;  %vm8313_vm6 = vcmp.lt.s32.totalorder %v8312_v20, 0  ;;  %v7263_v49 = vsel %vm7178_vm2, %v7262_v26, %v14602_v22 }
 0x94c   : > { %v7323_v48 = vsel %vm7313_vm14, %v7320_v50, %v7322_v28  ;;  %v7325_v3 = vsel %vm7315_vm11, %v7311_v55, 1326507024  ;;  %v7155_v38 = vmul.f32 %v7154_v56, %v7152_v24  ;;  %v7247_v11 = vsel %vm8313_vm6, 0, %v8312_v20 }
 0x94d   : > { %v7316_v2 = vsel %vm7312_vm1, %v7296_v54, %v7299_v1  ;;  %v7326_v32 = vsel %vm7314_vm8, %v7308_v39, %v7325_v3  ;;  %v7248_v14 = vsub.s32 32, %v7247_v11  ;;  %v7252_v25 = vsub.s32 4294967266, %v7247_v11 }
 0x94e   : > { %v7318_v60 = vsel %vm7314_vm8, %v7302_v35, %v7317_v43  ;;  %v7327_v22 = vsel %vm7313_vm14, %v7324_v36, %v7326_v32  ;;  %v14692_v56 = vmul.u32.u64.low %v14648_v63, %v7323_v48  ;;  %v14693_v24 = vmul.u32.u64.high %v14648_v63, %v7323_v48, %v14692_v56 }
 0x94f   : > { %v14688_v26 = vmul.u32.u64.low %v14648_v63, %v7327_v22  ;;  %v14689_v50 = vmul.u32.u64.high %v14648_v63, %v7327_v22, %v14688_v26  ;;  %v7232_v39 = vadd.s32 %v14551_v45, %v14560_v17  ;;  %v7253_v1 = vadd.s32 127, %v7252_v25 }
 0x950   : > { %v7394_v55 = vadd.s32 1, %v8318_v19  ;;  %v14700_v35 = vadd.f32 %v14339_v44, %v14612_v7  ;;  %v7156_v20 = vxor.u32 2147483648, %v7155_v38  ;;  %v7265_v54 = vsel %vm14655_vm12, 0, %v7263_v49 }
 0x951   : > { %v7319_v43 = vsel %vm7313_vm14, %v7316_v2, %v7318_v60  ;;  %v15481_v28 = vand.u32 2147483647, %v14617_v51  ;;  %v7250_v36 = vshrl.u32 %v7232_v39, %v7248_v14  ;;  %v14707_v48 = vshll.u32 %v7392_v12, 8 }
 0x952   : > { %vm7395_vm1 = vcmp.gt.s32.totalorder %v7394_v55, 0  ;;  %v7491_v45 = vand.u32 2139095040, %v14617_v51  ;;  %v7254_v17 = vshll.u32 %v7253_v1, 23  ;;  %vm7337_vm11 = vc.u32 %v14689_v50, %v14692_v56 }
 0x953   : > { %v7338_v44 = vadd.s32 1, %v14693_v24  ;;  %v7396_v7 = vsel %vm7395_vm1, %v7394_v55, 0  ;;  %v7249_v19 = vshll.u32 %v14627_v15, %v7247_v11  ;;  %v14714_v25 = vadd.s32 3, %v7265_v54 }
 0x954   : > { %v7335_v60 = vmul.u32 %v14648_v63, %v7319_v43  ;;  %v7398_v23 = vand.u32 31, %v7396_v7  ;;  %v7157_v12 = vsel %vm15488_vm13, %v7156_v20, %v7155_v38  ;;  %v14722_v3 = vand.u32 8388607, %v15481_v28 }
 0x955   : > { %16007 = vst [vmem:[#allocation4_spill] sm:$0xff] %v14714_v25  ;;  %v7339_v49 = vsel %vm7337_vm11, %v7338_v44, %v14693_v24  ;;  %v7251_v32 = vor.u32 %v7250_v36, %v7249_v19  ;;  %v7492_v15 = vshrl.u32 %v7491_v45, 23  ;;  %v7255_v11 = vor.u32 4788187, %v7254_v17 }
 0x956   : > { %v7340_v14 = vadd.s32 %v7339_v49, %v7335_v60  ;;  %v7399_v22 = vsub.s32 32, %v7398_v23  ;;  %v7397_v26 = vshrl.u32 %v7396_v7, 5  ;;  %v7401_v63 = vshll.u32 %v15512_v31, %v7398_v23 }
 0x957   : > { %v7404_v39 = vshll.u32 %v15679_v53, %v7398_v23  ;;  %v7407_v24 = vshll.u32 %v15680_v41, %v7398_v23  ;;  %v7410_v55 = vshll.u32 %v15681_v16, %v7398_v23  ;;  %v16008_v20 = vand.u32 2147483647, %v14300_v30 }
 0x958   : > { %v7341_v1 = vadd.s32 536870912, %v7340_v14  ;;  %v7402_v38 = vshrl.u32 %v15679_v53, %v7399_v22  ;;  %v7405_v43 = vshrl.u32 %v15680_v41, %v7399_v22  ;;  %v7408_v36 = vshrl.u32 %v15681_v16, %v7399_v22 }
 0x959   : > { %vm14732_vm8 = vcmp.le.f32.partialorder %v16008_v20, 0.7853982  ;;  %v7411_v45 = vshrl.u32 %v15682_v37, %v7399_v22  ;;  %v7414_v17 = vshrl.u32 %v15683_v18, %v7399_v22  ;;  %v7413_v19 = vshll.u32 %v15682_v37, %v7398_v23 }
 0x95a   : > { %v14740_v44 = vshrl.u32 %v7341_v1, 30  ;;  %v7403_v7 = vor.u32 %v7402_v38, %v7401_v63  ;;  %v7595_v60 = vand.u32 2139095040, %v14625_v34  ;;  %v7256_v49 = vand.u32 2147483647, %v7255_v11 }
 0x95b   : > { %v7406_v20 = vor.u32 %v7405_v43, %v7404_v39  ;;  %v7409_v28 = vor.u32 %v7408_v36, %v7407_v24  ;;  %v7412_v2 = vor.u32 %v7411_v45, %v7410_v55  ;;  %v7258_v25 = vcvt.s32.f32 %v7251_v32 }
 0x95c   : > { %16011 = vst [vmem:[#allocation27_spill] sm:$0xff] %v14740_v44  ;;  %v7343_v5 = vshll.u32 %v14740_v44, 30  ;;  %v7415_v8 = vor.u32 %v7414_v17, %v7413_v19  ;;  %vm7416_vm14 = vcmp.lt.s32.totalorder %v7397_v26, 1  ;;  %v7400_v10 = vshrl.u32 %v15512_v31, %v7399_v22 }
 0x95d   : > { %vm7419_vm6 = vcmp.lt.s32.totalorder %v7397_v26, 4  ;;  %v7424_v40 = vsel %vm7416_vm14, %v7403_v7, %v7406_v20  ;;  %v8322_v1 = vadd.s32 4294967169, %v7492_v15  ;;  %vm7418_vm1 = vcmp.lt.s32.totalorder %v7397_v26, 3 }
 0x95e   : > { %v14746_v42 = vsub.s32 %v7340_v14, %v7343_v5  ;;  %v7421_v23 = vsel %vm7419_vm6, %v7409_v28, 2102212464  ;;  %v7425_v63 = vsel %vm7419_vm6, %v7412_v2, 920167782  ;;  %v7259_v38 = vmul.f32 %v7258_v25, %v7256_v49 }
 0x95f   : > { %vm7417_vm11 = vcmp.lt.s32.totalorder %v7397_v26, 2  ;;  %v7426_v11 = vsel %vm7418_vm1, %v7409_v28, %v7425_v63  ;;  %v7428_v39 = vsel %vm7416_vm14, %v7406_v20, %v7409_v28  ;;  %v7420_v24 = vsel %vm7416_vm14, %v7400_v10, %v7403_v7 }
 0x960   : > { %v7346_v32 = vsub.s32 0, %v14746_v42  ;;  %v7427_v55 = vsel %vm7417_vm11, %v7424_v40, %v7426_v11  ;;  %v7429_v43 = vsel %vm7419_vm6, %v7415_v8, 1326507024  ;;  %v7422_v36 = vsel %vm7418_vm1, %v7406_v20, %v7421_v23 }
 0x961   : > { %v7430_v22 = vsel %vm7418_vm1, %v7412_v2, %v7429_v43  ;;  %v14751_v45 = vmul.u32.u64.low %v14707_v48, %v7427_v55  ;;  %v14752_v15 = vmul.u32.u64.high %v14707_v48, %v7427_v55, %v14751_v45  ;;  %v7160_v5 = vsel %vm14732_vm8, %v14300_v30, %v7157_v12 }
 0x962   : > { %v8315_v25 = vmin.u32 %v7346_v32, %v14746_v42  ;;  %v7431_v28 = vsel %vm7417_vm11, %v7428_v39, %v7430_v22  ;;  %v7498_v14 = vadd.s32 1, %v8322_v1  ;;  %v7260_v10 = vxor.u32 2147483648, %v7259_v38 }
 0x963   : > { %v14761_v40 = vmul.u32.u64.low %v14707_v48, %v7431_v28  ;;  %v14762_v8 = vmul.u32.u64.high %v14707_v48, %v7431_v28, %v14761_v40  ;;  %v7496_v2 = vor.u32 8388608, %v14722_v3  ;;  %v7423_v7 = vsel %vm7417_vm11, %v7420_v24, %v7422_v36 }
 0x964   : > { %v7348_v17 = vclz %v8315_v25  ;;  %vm7499_vm14 = vcmp.gt.s32.totalorder %v7498_v14, 0  ;;  %v7596_v19 = vshrl.u32 %v7595_v60, 23  ;;  %8924 = vcosq.f32 %v7160_v5 }
 0x965   : > { %v7442_v12 = vadd.s32 1, %v14752_v15  ;;  %v7500_v49 = vsel %vm7499_vm14, %v7498_v14, 0  ;;  %v16012_v20 = vand.u32 2147483647, %v14625_v34  ;;  %8926 = vsinq.f32 %v7160_v5 }
 0x966   : > { %v7336_v1 = vadd.s32 %v14692_v56, %v14689_v50  ;;  %v8316_v63 = vadd.s32 4294967294, %v7348_v17  ;;  %v7502_v11 = vand.u32 31, %v7500_v49  ;;  %v14775_v3 = vsel %vm7178_vm2, %v7260_v10, %v7259_v38 }
 0x967   : > { %v14769_v23 = vand.u32 8388607, %v16012_v20  ;;  %v7439_v26 = vmul.u32 %v14707_v48, %v7423_v7  ;;  %vm7441_vm6 = vc.u32 %v14762_v8, %v14751_v45  ;;  %v14780_v60 = vshll.u32 %v7496_v2, 8 }
 0x968   : > { %vm8317_vm1 = vcmp.lt.s32.totalorder %v8316_v63, 0  ;;  %v7443_v39 = vsel %vm7441_vm6, %v7442_v12, %v14752_v15  ;;  %v7503_v32 = vsub.s32 32, %v7502_v11  ;;  %v8326_v24 = vadd.s32 4294967169, %v7596_v19 }
 0x969   : > { %v7351_v55 = vsel %vm8317_vm1, 0, %v8316_v63  ;;  %v7444_v50 = vadd.s32 %v7443_v39, %v7439_v26  ;;  %v7501_v56 = vshrl.u32 %v7500_v49, 5  ;;  %v7505_v22 = vshll.u32 %v15512_v31, %v7502_v11 }
 0x96a   : > { %v7352_v36 = vsub.s32 32, %v7351_v55  ;;  %v7356_v38 = vsub.s32 4294967266, %v7351_v55  ;;  %v7511_v48 = vshll.u32 %v15680_v41, %v7502_v11  ;;  %v7506_v25 = vshrl.u32 %v15679_v53, %v7503_v32 }
 0x96b   : > { %v7445_v5 = vadd.s32 536870912, %v7444_v50  ;;  %v7509_v28 = vshrl.u32 %v15680_v41, %v7503_v32  ;;  %v7512_v15 = vshrl.u32 %v15681_v16, %v7503_v32  ;;  %v7353_v14 = vshll.u32 %v14746_v42, %v7351_v55 }
 0x96c   : > { %v7354_v10 = vshrl.u32 %v7336_v1, %v7352_v36  ;;  %v7357_v40 = vadd.s32 127, %v7356_v38  ;;  %v7515_v2 = vshrl.u32 %v15682_v37, %v7503_v32  ;;  %v7508_v7 = vshll.u32 %v15679_v53, %v7502_v11 }
 0x96d   : > { %v7446_v17 = vshrl.u32 %v7445_v5, 30  ;;  %v7514_v19 = vshll.u32 %v15681_v16, %v7502_v11  ;;  %v7602_v12 = vadd.s32 1, %v8326_v24  ;;  %v7507_v63 = vor.u32 %v7506_v25, %v7505_v22 }
 0x96e   : > { %v7355_v49 = vor.u32 %v7354_v10, %v7353_v14  ;;  %v7358_v20 = vshll.u32 %v7357_v40, 23  ;;  %v7513_v26 = vor.u32 %v7512_v15, %v7511_v48  ;;  %v14793_v39 = vpop.eup %8924  ;;  %v7510_v44 = vor.u32 %v7509_v28, %v7508_v7 }
 0x96f   : > { %v7447_v43 = vshll.u32 %v7446_v17, 30  ;;  %v7517_v42 = vshll.u32 %v15682_v37, %v7502_v11  ;;  %v7518_v1 = vshrl.u32 %v15683_v18, %v7503_v32  ;;  %v14797_v55 = vpop.eup %8926  ;;  %v7504_v38 = vshrl.u32 %v15512_v31, %v7503_v32 }
 0x970   : > { %v7359_v36 = vor.u32 4788187, %v7358_v20  ;;  %v7516_v5 = vor.u32 %v7515_v2, %v7514_v19  ;;  %vm7520_vm2 = vcmp.lt.s32.totalorder %v7501_v56, 1  ;;  %vm15493_vm11 = vcmp.lt.s32.totalorder %v14498_v6, 0 }
 0x971   : > { %v7362_v24 = vcvt.s32.f32 %v7355_v49  ;;  %vm7386_vm14 = vcmp.lt.s32.totalorder %v14592_v62, 0  ;;  %v14802_v22 = vsub.s32 %v7444_v50, %v7447_v43  ;;  %v7519_v48 = vor.u32 %v7518_v1, %v7517_v42 }
 0x972   : > { %vm7523_vm6 = vcmp.lt.s32.totalorder %v7501_v56, 4  ;;  %v7360_v25 = vand.u32 2147483647, %v7359_v36  ;;  %vm7522_vm1 = vcmp.lt.s32.totalorder %v7501_v56, 3  ;;  %v7524_v11 = vsel %vm7520_vm2, %v7504_v38, %v7507_v63 }
 0x973   : > { %v7525_v28 = vsel %vm7523_vm6, %v7513_v26, 2102212464  ;;  %v7450_v15 = vsub.s32 0, %v14802_v22  ;;  %v7470_v32 = vsub.s32 4, %v7446_v17  ;;  %v7528_v10 = vsel %vm7520_vm2, %v7507_v63, %v7510_v44 }
 0x974   : > { %v7526_v14 = vsel %vm7522_vm1, %v7510_v44, %v7525_v28  ;;  %v7363_v40 = vmul.f32 %v7362_v24, %v7360_v25  ;;  %vm7521_vm13 = vcmp.lt.s32.totalorder %v7501_v56, 2  ;;  %v7529_v50 = vsel %vm7523_vm6, %v7516_v5, 920167782 }
 0x975   : > { %v7532_v43 = vsel %vm7520_vm2, %v7510_v44, %v7513_v26  ;;  %v8319_v2 = vmin.u32 %v7450_v15, %v14802_v22  ;;  %v7527_v7 = vsel %vm7521_vm13, %v7524_v11, %v7526_v14  ;;  %v7530_v19 = vsel %vm7522_vm1, %v7513_v26, %v7529_v50 }
 0x976   : > { %v7533_v49 = vsel %vm7523_vm6, %v7519_v48, 1326507024  ;;  %v7364_v20 = vxor.u32 2147483648, %v7363_v40  ;;  %v7531_v42 = vsel %vm7521_vm13, %v7528_v10, %v7530_v19  ;;  %vm7603_vm5 = vcmp.gt.s32.totalorder %v7602_v12, 0 }
 0x977   : > { %v7534_v1 = vsel %vm7522_vm1, %v7516_v5, %v7533_v49  ;;  %v7452_v36 = vclz %v8319_v2  ;;  %v14816_v38 = vmul.u32.u64.low %v14780_v60, %v7531_v42  ;;  %v14817_v24 = vmul.u32.u64.high %v14780_v60, %v7531_v42, %v14816_v38 }
 0x978   : > { %v7535_v63 = vsel %vm7521_vm13, %v7532_v43, %v7534_v1  ;;  %v14824_v44 = vsel %vm14655_vm12, %v14431_v9, %v14775_v3  ;;  %v7604_v56 = vsel %vm7603_vm5, %v7602_v12, 0  ;;  %v7440_v5 = vadd.s32 %v14751_v45, %v14762_v8 }
 0x979   : > { %v14827_v26 = vmul.u32.u64.low %v14780_v60, %v7535_v63  ;;  %v14828_v48 = vmul.u32.u64.high %v14780_v60, %v7535_v63, %v14827_v26  ;;  %v8320_v25 = vadd.s32 4294967294, %v7452_v36  ;;  %v7606_v11 = vand.u32 31, %v7604_v56 }
 0x97a   : > { %v14835_v15 = vsel %vm15493_vm11, %v7364_v20, %v7363_v40  ;;  %v14839_v29 = vsel %vm7386_vm14, %v7470_v32, %v7446_v17  ;;  %v7543_v3 = vmul.u32 %v14780_v60, %v7527_v7  ;;  %v16013_v14 = vor.u32 8388608, %v14769_v23 }
 0x97b   : > { %vm8321_vm5 = vcmp.lt.s32.totalorder %v8320_v25, 0  ;;  %v7546_v45 = vadd.s32 1, %v14817_v24  ;;  %v14847_v8 = vshrl.u32 %v7604_v56, 5  ;;  %v7607_v10 = vsub.s32 32, %v7606_v11 }
 0x97c   : > { %v14844_v12 = vshll.u32 %v16013_v14, 8  ;;  %v7455_v50 = vsel %vm8321_vm5, 0, %v8320_v25  ;;  %vm7545_vm12 = vc.u32 %v14828_v48, %v14816_v38  ;;  %v7699_v40 = vand.u32 2139095040, %v14700_v35 }
 0x97d   : > { %v6326_v17 = vsub.s32 4, %v13905_v57  ;;  %v7456_v32 = vsub.s32 32, %v7455_v50  ;;  %v7460_v60 = vsub.s32 4294967266, %v7455_v50  ;;  %v7547_v23 = vsel %vm7545_vm12, %v7546_v45, %v14817_v24 }
 0x97e   : > { %v7609_v43 = vshll.u32 %v15512_v31, %v7606_v11  ;;  %v7457_v2 = vshll.u32 %v14802_v22, %v7455_v50  ;;  %v7548_v7 = vadd.s32 %v7547_v23, %v7543_v3  ;;  %v7610_v19 = vshrl.u32 %v15679_v53, %v7607_v10 }
 0x97f   : > { %v7612_v49 = vshll.u32 %v15679_v53, %v7606_v11  ;;  %v7458_v20 = vshrl.u32 %v7440_v5, %v7456_v32  ;;  %v7461_v42 = vadd.s32 127, %v7460_v60  ;;  %v7613_v1 = vshrl.u32 %v15680_v41, %v7607_v10 }
 0x980   : > { %v7615_v36 = vshll.u32 %v15680_v41, %v7606_v11  ;;  %v7549_v63 = vadd.s32 536870912, %v7548_v7  ;;  %v7611_v26 = vor.u32 %v7610_v19, %v7609_v43  ;;  %v7616_v56 = vshrl.u32 %v15681_v16, %v7607_v10 }
 0x981   : > { %v7618_v24 = vshll.u32 %v15681_v16, %v7606_v11  ;;  %v7459_v25 = vor.u32 %v7458_v20, %v7457_v2  ;;  %v7462_v14 = vshll.u32 %v7461_v42, 23  ;;  %v7614_v22 = vor.u32 %v7613_v1, %v7612_v49 }
 0x982   : > { %v7619_v3 = vshrl.u32 %v15682_v37, %v7607_v10  ;;  %v14863_v45 = vshrl.u32 %v7549_v63, 30  ;;  %v7617_v50 = vor.u32 %v7616_v56, %v7615_v36  ;;  %v7621_v5 = vshll.u32 %v15682_v37, %v7606_v11 }
 0x983   : > { %v7622_v32 = vshrl.u32 %v15683_v18, %v7607_v10  ;;  %v7463_v60 = vor.u32 4788187, %v7462_v14  ;;  %v7466_v23 = vcvt.s32.f32 %v7459_v25  ;;  %v7608_v43 = vshrl.u32 %v15512_v31, %v7607_v10 }
 0x984   : > { %16014 = vst [vmem:[#allocation21_spill] sm:$0xff] %v14863_v45  ;;  %v7620_v19 = vor.u32 %v7619_v3, %v7618_v24  ;;  %v16015_v28 = vand.u32 2147483647, %v14498_v6  ;;  %v16018_v49 = vand.u32 2147483647, %v14592_v62  ;;  %v7551_v11 = vshll.u32 %v14863_v45, 30 }
 0x985   : > { %v7623_v42 = vor.u32 %v7622_v32, %v7621_v5  ;;  %vm7624_vm6 = vcmp.lt.s32.totalorder %v14847_v8, 1  ;;  %vm7625_vm1 = vcmp.lt.s32.totalorder %v14847_v8, 2  ;;  %v7464_v10 = vand.u32 2147483647, %v7463_v60 }
 0x986   : > { %vm14870_vm13 = vcmp.le.f32.partialorder %v16015_v28, 0.7853982  ;;  %vm14876_vm2 = vcmp.le.f32.partialorder %v16018_v49, 0.7853982  ;;  %vm7626_vm5 = vcmp.lt.s32.totalorder %v14847_v8, 3  ;;  %vm7627_vm12 = vcmp.lt.s32.totalorder %v14847_v8, 4 }
 0x987   : > { %v7632_v28 = vsel %vm7624_vm6, %v7611_v26, %v7614_v22  ;;  %v14885_v1 = vsub.s32 %v7548_v7, %v7551_v11  ;;  %v7629_v36 = vsel %vm7627_vm12, %v7617_v50, 2102212464  ;;  %v7633_v63 = vsel %vm7627_vm12, %v7620_v19, 920167782 }
 0x988   : > { %v7636_v56 = vsel %vm7624_vm6, %v7614_v22, %v7617_v50  ;;  %v7467_v24 = vmul.f32 %v7466_v23, %v7464_v10  ;;  %v7628_v25 = vsel %vm7624_vm6, %v7608_v43, %v7611_v26  ;;  %v7634_v14 = vsel %vm7626_vm5, %v7617_v50, %v7633_v63 }
 0x989   : > { %v7637_v3 = vsel %vm7627_vm12, %v7623_v42, 1326507024  ;;  %v7554_v5 = vsub.s32 0, %v14885_v1  ;;  %v7630_v32 = vsel %vm7626_vm5, %v7614_v22, %v7629_v36  ;;  %v7635_v60 = vsel %vm7625_vm1, %v7632_v28, %v7634_v14 }
 0x98a   : > { %v7638_v49 = vsel %vm7626_vm5, %v7620_v19, %v7637_v3  ;;  %v7468_v9 = vxor.u32 2147483648, %v7467_v24  ;;  %v14893_v7 = vmul.u32.u64.low %v14844_v12, %v7635_v60  ;;  %v14894_v11 = vmul.u32.u64.high %v14844_v12, %v7635_v60, %v14893_v7 }
 0x98b   : > { %v7639_v45 = vsel %vm7625_vm1, %v7636_v56, %v7638_v49  ;;  %v8323_v23 = vmin.u32 %v7554_v5, %v14885_v1  ;;  %v16021_v22 = vand.u32 2147483647, %v14700_v35  ;;  %8928 = vcosq.f32 %v14824_v44 }
 0x98c   : > { %v14898_v26 = vmul.u32.u64.low %v14844_v12, %v7639_v45  ;;  %v14899_v50 = vmul.u32.u64.high %v14844_v12, %v7639_v45, %v14898_v26  ;;  %v7631_v19 = vsel %vm7625_vm1, %v7628_v25, %v7630_v32  ;;  %v7700_v42 = vshrl.u32 %v7699_v40, 23 }
 0x98d   : > { %v7703_v43 = vand.u32 8388607, %v16021_v22  ;;  %v6327_v10 = vsel %vm6242_vm9, %v6326_v17, %v13905_v57  ;;  %8930 = vsinq.f32 %v14824_v44  ;;  %v7469_v28 = vsel %vm7386_vm14, %v7468_v9, %v7467_v24 }
 0x98e   : > { %v7556_v45 = vclz %v8323_v23  ;;  %v6329_v36 = vsel %vm14065_vm3, 0, %v6327_v10  ;;  %v7368_v8 = vsel %vm14870_vm13, %v14498_v6, %v14835_v15  ;;  %v7473_v40 = vsel %vm14876_vm2, 0, %v14839_v29 }
 0x98f   : > { %v7650_v57 = vadd.s32 1, %v14894_v11  ;;  %v8330_v17 = vadd.s32 4294967169, %v7700_v42  ;;  %v7647_v63 = vmul.u32 %v14844_v12, %v7631_v19  ;;  %vm7649_vm9 = vc.u32 %v14899_v50, %v14893_v7 }
 0x990   : > { %v8324_v44 = vadd.s32 4294967294, %v7556_v45  ;;  %v7704_v9 = vor.u32 8388608, %v7703_v43  ;;  %v7472_v47 = vsel %vm14876_vm2, %v14592_v62, %v7469_v28  ;;  %v6333_v24 = vadd.s32 3, %v6329_v36 }
 0x991   : > { %v7651_v56 = vsel %vm7649_vm9, %v7650_v57, %v14894_v11  ;;  %v7706_v15 = vadd.s32 1, %v8330_v17  ;;  %8932 = vcosq.f32 %v7368_v8  ;;  %v14928_v25 = vadd.s32 3, %v7473_v40 }
 0x992   : > { %vm8325_vm3 = vcmp.lt.s32.totalorder %v8324_v44, 0  ;;  %v7652_v29 = vadd.s32 %v7651_v56, %v7647_v63  ;;  %8934 = vsinq.f32 %v7368_v8  ;;  %v7544_v12 = vadd.s32 %v14816_v38, %v14828_v48 }
 0x993   : > { %v7559_v14 = vsel %vm8325_vm3, 0, %v8324_v44  ;;  %vm7707_vm14 = vcmp.gt.s32.totalorder %v7706_v15, 0  ;;  %8936 = vcosq.f32 %v7472_v47  ;;  %v14932_v60 = vshll.u32 %v7704_v9, 8 }
 0x994   : > { %v7560_v3 = vsub.s32 32, %v7559_v14  ;;  %v7564_v5 = vsub.s32 4294967266, %v7559_v14  ;;  %v7653_v20 = vadd.s32 536870912, %v7652_v29  ;;  %v7708_v32 = vsel %vm7707_vm14, %v7706_v15, 0 }
 0x995   : > { %v14934_v49 = vand.u32 3, %v6333_v24  ;;  %v6337_v11 = vxor.u32 2147483648, %v14286_v33  ;;  %v7561_v23 = vshll.u32 %v14885_v1, %v7559_v14  ;;  %v14940_v38 = vpop.eup %8928  ;;  %8938 = vsinq.f32 %v7472_v47 }
 0x996   : > { %v7562_v26 = vshrl.u32 %v7544_v12, %v7560_v3  ;;  %v7565_v22 = vadd.s32 127, %v7564_v5  ;;  %v14938_v43 = vshrl.u32 %v7653_v20, 30  ;;  %v14943_v48 = vadd.s32 %v14893_v7, %v14899_v50 }
 0x997   : > { %v7710_v19 = vand.u32 31, %v7708_v32  ;;  %v6340_v42 = vxor.u32 2147483648, %v14203_v27  ;;  %v14946_v10 = vpop.eup %8930  ;;  %v6534_v1 = vsub.s32 4, %v14041_v52  ;;  %v14950_v8 = vshrl.u32 %v7708_v32, 5 }
 0x998   : > { %v7563_v28 = vor.u32 %v7562_v26, %v7561_v23  ;;  %v7566_v45 = vshll.u32 %v7565_v22, 23  ;;  %v7655_v36 = vshll.u32 %v14938_v43, 30  ;;  %vm6336_vm2 = vcmp.eq.s32.totalorder %v14934_v49, 0 }
 0x999   : > { %v7711_v40 = vsub.s32 32, %v7710_v19  ;;  %vm6339_vm6 = vcmp.eq.s32.totalorder %v14934_v49, 2  ;;  %vm7490_vm1 = vcmp.lt.s32.totalorder %v14617_v51, 0  ;;  %v7713_v57 = vshll.u32 %v15512_v31, %v7710_v19 }
 0x99a   : > { %v7567_v7 = vor.u32 4788187, %v7566_v45  ;;  %v14955_v50 = vsub.s32 %v7652_v29, %v7655_v36  ;;  %v14959_v17 = vsel %vm6336_vm2, %v14203_v27, %v6337_v11  ;;  %vm7594_vm5 = vcmp.lt.s32.totalorder %v14625_v34, 0 }
 0x99b   : > { %v7714_v44 = vshrl.u32 %v15679_v53, %v7711_v40  ;;  %v7716_v63 = vshll.u32 %v15679_v53, %v7710_v19  ;;  %v7717_v9 = vshrl.u32 %v15680_v41, %v7711_v40  ;;  %v7719_v47 = vshll.u32 %v15680_v41, %v7710_v19  ;;  %v14966_v56 = vpop.eup %8932 }
 0x99c   : > { %v7568_v15 = vand.u32 2147483647, %v7567_v7  ;;  %v7570_v24 = vcvt.s32.f32 %v7563_v28  ;;  %v7658_v29 = vsub.s32 0, %v14955_v50  ;;  %v7720_v12 = vshrl.u32 %v15681_v16, %v7711_v40  ;;  %v14970_v27 = vpop.eup %8934 }
 0x99d   : > { %v16022_v14 = vand.u32 2147483647, %v14617_v51  ;;  %v7715_v53 = vor.u32 %v7714_v44, %v7713_v57  ;;  %v7718_v5 = vor.u32 %v7717_v9, %v7716_v63  ;;  %v7722_v41 = vshll.u32 %v15681_v16, %v7710_v19  ;;  %v14980_v32 = vpop.eup %8936 }
 0x99e   : > { %v7723_v20 = vshrl.u32 %v15682_v37, %v7711_v40  ;;  %v7571_v11 = vmul.f32 %v7570_v24, %v7568_v15  ;;  %v8327_v23 = vmin.u32 %v7658_v29, %v14955_v50  ;;  %v7721_v26 = vor.u32 %v7720_v12, %v7719_v47 }
 0x99f   : > { %vm14974_vm12 = vcmp.le.f32.partialorder %v16022_v14, 0.7853982  ;;  %v6341_v22 = vsel %vm6339_vm6, %v6340_v42, %v14286_v33  ;;  %v7725_v45 = vshll.u32 %v15682_v37, %v7710_v19  ;;  %v7726_v36 = vshrl.u32 %v15683_v18, %v7711_v40  ;;  %v14994_v63 = vpop.eup %8938 }
 0x9a0   : > { %v7724_v28 = vor.u32 %v7723_v20, %v7722_v41  ;;  %v6535_v16 = vsel %vm6450_vm15, %v6534_v1, %v14041_v52  ;;  %v7572_v7 = vxor.u32 2147483648, %v7571_v11  ;;  %v7660_v57 = vclz %v8327_v23 }
 0x9a1   : > { %v7678_v44 = vsub.s32 4, %v14938_v43  ;;  %vm7728_vm9 = vcmp.lt.s32.totalorder %v14950_v8, 1  ;;  %vm6335_vm3 = vcmp.lt.s32.totalorder %v14934_v49, 2  ;;  %v7712_v33 = vshrl.u32 %v15512_v31, %v7711_v40 }
 0x9a2   : > { %v7727_v42 = vor.u32 %v7726_v36, %v7725_v45  ;;  %vm7731_vm14 = vcmp.lt.s32.totalorder %v14950_v8, 4  ;;  %v7736_v37 = vsel %vm7728_vm9, %v7715_v53, %v7718_v5  ;;  %v8328_v18 = vadd.s32 4294967294, %v7660_v57 }
 0x9a3   : > { %vm7730_vm15 = vcmp.lt.s32.totalorder %v14950_v8, 3  ;;  %v7733_v52 = vsel %vm7731_vm14, %v7721_v26, 2102212464  ;;  %v7737_v19 = vsel %vm7731_vm14, %v7724_v28, 920167782  ;;  %v7573_v1 = vsel %vm7490_vm1, %v7572_v7, %v7571_v11 }
 0x9a4   : > { %vm7729_vm2 = vcmp.lt.s32.totalorder %v14950_v8, 2  ;;  %v7738_v9 = vsel %vm7730_vm15, %v7721_v26, %v7737_v19  ;;  %v7740_v31 = vsel %vm7728_vm9, %v7718_v5, %v7721_v26  ;;  %vm6332_vm6 = vweird.f32 %v13780_v59  ;;  %v16029_v59 = vld [vmem:[#allocation29_spill] sm:$0xff] }
 0x9a5   : > { %vm8329_vm11 = vcmp.lt.s32.totalorder %v8328_v18, 0  ;;  %v15010_v40 = vsel %vm7594_vm5, %v7678_v44, %v14938_v43  ;;  %v7739_v47 = vsel %vm7729_vm2, %v7736_v37, %v7738_v9  ;;  %v7741_v15 = vsel %vm7731_vm14, %v7727_v42, 1326507024 }
 0x9a6   : > { %v7663_v24 = vsel %vm8329_vm11, 0, %v8328_v18  ;;  %v7732_v29 = vsel %vm7728_vm9, %v7712_v33, %v7715_v53  ;;  %v7734_v12 = vsel %vm7730_vm15, %v7718_v5, %v7733_v52  ;;  %v7742_v14 = vsel %vm7730_vm15, %v7724_v28, %v7741_v15 }
 0x9a7   : > { %v7576_v41 = vsel %vm14974_vm12, %v14617_v51, %v7573_v1  ;;  %v7664_v20 = vsub.s32 32, %v7663_v24  ;;  %v7668_v11 = vsub.s32 4294967266, %v7663_v24  ;;  %v7743_v43 = vsel %vm7729_vm2, %v7740_v31, %v7742_v14 }
 0x9a8   : > { %v15022_v23 = vmul.u32.u64.low %v14932_v60, %v7743_v43  ;;  %v15023_v26 = vmul.u32.u64.high %v14932_v60, %v7743_v43, %v15022_v23  ;;  %v15026_v45 = vmul.u32.u64.low %v14932_v60, %v7739_v47  ;;  %v15027_v36 = vmul.u32.u64.high %v14932_v60, %v7739_v47, %v15026_v45 }
 0x9a9   : > { %vm6540_vm11 = vweird.f32 %v13799_v0  ;;  %v7665_v53 = vshll.u32 %v14955_v50, %v7663_v24  ;;  %v7666_v5 = vshrl.u32 %v14943_v48, %v7664_v20  ;;  %v7669_v28 = vadd.s32 127, %v7668_v11  ;;  %v16033_v0 = vld [vmem:[#allocation9_spill] sm:$0xff] }
 0x9aa   : > { %v6537_v7 = vsel %vm14223_vm4, 0, %v6535_v16  ;;  %8940 = vcosq.f32 %v7576_v41  ;;  %v7735_v57 = vsel %vm7729_vm2, %v7732_v29, %v7734_v12  ;;  %v6342_v44 = vsel %vm6335_vm3, %v14959_v17, %v6341_v22  ;;  %v16025_v16 = vld [vmem:[#allocation16_spill] sm:$0xff]  ;;  %v16030_v12 = vld [vmem:[#allocation19_spill] sm:$0xff] }
 0x9ab   : > { %v6541_v33 = vadd.s32 3, %v6537_v7  ;;  %v7667_v42 = vor.u32 %v7666_v5, %v7665_v53  ;;  %v7670_v37 = vshll.u32 %v7669_v28, 23  ;;  %v6545_v18 = vxor.u32 2147483648, %v14383_v58  ;;  %v16032_v7 = vld [vmem:[#allocation10_spill] sm:$0xff] }
 0x9ac   : > { %v6548_v50 = vxor.u32 2147483648, %v14327_v21  ;;  %vm7753_vm9 = vc.u32 %v15023_v26, %v15026_v45  ;;  %v7754_v61 = vadd.s32 1, %v15027_v36  ;;  %v6230_v52 = vand.u32 3, %v16025_v16  ;;  %v16035_v16 = vld [vmem:[#allocation32_spill] sm:$0xff] }
 0x9ad   : > { %v6542_v48 = vand.u32 3, %v6541_v33  ;;  %v7671_v8 = vor.u32 4788187, %v7670_v37  ;;  %v7674_v19 = vcvt.s32.f32 %v7667_v42  ;;  %v7751_v1 = vmul.u32 %v14932_v60, %v7735_v57 }
 0x9ae   : > { %v6343_v49 = vsel %vm6332_vm6, nan, %v6342_v44  ;;  %v16026_v17 = vand.u32 2147483647, %v14625_v34  ;;  %v7755_v9 = vsel %vm7753_vm9, %v7754_v61, %v15027_v36  ;;  %vm6232_vm2 = vcmp.eq.s32.totalorder %v6230_v52, 0 }
 0x9af   : > { %vm6543_vm3 = vcmp.lt.s32.totalorder %v6542_v48, 2  ;;  %vm6544_vm14 = vcmp.eq.s32.totalorder %v6542_v48, 0  ;;  %vm6547_vm15 = vcmp.eq.s32.totalorder %v6542_v48, 2  ;;  %v7672_v31 = vand.u32 2147483647, %v7671_v8 }
 0x9b0   : > { %vm15049_vm4 = vcmp.le.f32.partialorder %v16026_v17, 0.7853982  ;;  %v7756_v47 = vadd.s32 %v7755_v9, %v7751_v1  ;;  %v6546_v15 = vsel %vm6544_vm14, %v14327_v21, %v6545_v18  ;;  %v6549_v60 = vsel %vm6547_vm15, %v6548_v50, %v14383_v58  ;;  %v16031_v21 = vld [vmem:[#allocation34_spill] sm:$0xff]  ;;  %v16034_v18 = vld [vmem:[#allocation36_spill] sm:$0xff] }
 0x9b1   : > { %v6550_v24 = vsel %vm6543_vm3, %v6546_v15, %v6549_v60  ;;  %v6233_v29 = vxor.u32 2147483648, %v16029_v59  ;;  %v6236_v14 = vxor.u32 2147483648, %v16030_v12  ;;  %v7675_v20 = vmul.f32 %v7674_v19, %v7672_v31  ;;  %v16037_v9 = vld [vmem:[#allocation24_spill] sm:$0xff] }
 0x9b2   : > { %v7757_v11 = vadd.s32 536870912, %v7756_v47  ;;  %v6551_v43 = vsel %vm6540_vm11, nan, %v6550_v24  ;;  %vm6235_vm6 = vcmp.eq.s32.totalorder %v6230_v52, 2  ;;  %v6438_v5 = vand.u32 3, %v16031_v21  ;;  %v16042_v21 = vld [vmem:[#allocation7_spill] sm:$0xff] }
 0x9b3   : > { %v8389_v23 = vpack.c.bf16 %v6551_v43, %v6343_v49  ;;  %v6234_v36 = vsel %vm6232_vm2, %v16030_v12, %v6233_v29  ;;  %v6237_v53 = vsel %vm6235_vm6, %v6236_v14, %v16029_v59  ;;  %v7676_v58 = vxor.u32 2147483648, %v7675_v20 }
 0x9b4   : > { %v15063_v28 = vshrl.u32 %v7757_v11, 30  ;;  %vm6231_vm9 = vcmp.lt.s32.totalorder %v6230_v52, 2  ;;  %v6441_v57 = vxor.u32 2147483648, %v16032_v7  ;;  %v15066_v44 = vpop.eup %8940  ;;  %8942 = vsinq.f32 %v7576_v41  ;;  %v16036_v41 = vld [vmem:[#allocation17_spill] sm:$0xff] }
 0x9b5   : > { %8390 = vmatprep.subr.bf16.mxu0 %v8389_v23  ;;  %vm6228_vm11 = vweird.f32 %v16033_v0  ;;  %v6238_v33 = vsel %vm6231_vm9, %v6234_v36, %v6237_v53  ;;  %vm6440_vm3 = vcmp.eq.s32.totalorder %v6438_v5, 0  ;;  %v7677_v42 = vsel %vm7594_vm5, %v7676_v58, %v7675_v20  ;;  %v16044_v0 = vld [vmem:[#allocation23_spill] sm:$0xff] }
 0x9b6   : > { %v7759_v37 = vshll.u32 %v15063_v28, 30  ;;  %v6442_v50 = vsel %vm6440_vm3, %v16034_v18, %v6441_v57  ;;  %v6444_v61 = vxor.u32 2147483648, %v16034_v18  ;;  %v15075_v48 = vadd.s32 %v15026_v45, %v15023_v26  ;;  %v16038_v45 = vld [vmem:[#allocation5_spill] sm:$0xff] }
 0x9b7   : > { %vm6436_vm14 = vweird.f32 %v16035_v16  ;;  %vm6443_vm15 = vcmp.eq.s32.totalorder %v6438_v5, 2  ;;  %v6742_v52 = vsub.s32 4, %v16036_v41  ;;  %v7680_v8 = vsel %vm15049_vm4, %v14625_v34, %v7677_v42  ;;  %v16045_v42 = vld [vmem:[#allocation35_spill] sm:$0xff] }
 0x9b8   : > { %v15082_v19 = vsub.s32 %v7756_v47, %v7759_v37  ;;  %vm6439_vm5 = vcmp.lt.s32.totalorder %v6438_v5, 2  ;;  %v6445_v1 = vsel %vm6443_vm15, %v6444_v61, %v16032_v7  ;;  %v6239_v49 = vsel %vm6228_vm11, nan, %v6238_v33  ;;  %v16043_v7 = vld [vmem:[#allocation12_spill] sm:$0xff]  ;;  %v16046_v61 = vld [vmem:[#allocation6_spill] sm:$0xff] }
 0x9b9   : > { %v6446_v17 = vsel %vm6439_vm5, %v6442_v50, %v6445_v1  ;;  %v6743_v26 = vsel %vm6658_vm10, %v6742_v52, %v16036_v41  ;;  %v6950_v31 = vsub.s32 4, %v16038_v45  ;;  %vm6748_vm2 = vweird.f32 %v16037_v9 }
 0x9ba   : > { %v7762_v15 = vsub.s32 0, %v15082_v19  ;;  %v6447_v60 = vsel %vm6436_vm14, nan, %v6446_v17  ;;  %v6745_v59 = vsel %vm14388_vm0, 0, %v6743_v26  ;;  %v6753_v47 = vxor.u32 2147483648, %v14485_v13 }
 0x9bb   : > { %8944 = vcosq.f32 %v7680_v8  ;;  %v8391_v29 = vpack.c.bf16 %v6447_v60, %v6239_v49  ;;  %v6749_v12 = vadd.s32 3, %v6745_v59  ;;  %vm16040_vm6 = vcmp.lt.s32.totalorder %v14187_v46, 0  ;;  %v16047_v49 = vld [vmem:[#allocation22_spill] sm:$0xff] }
 0x9bc   : > { %v6951_v14 = vsel %vm16040_vm6, %v6950_v31, %v16038_v45  ;;  %8946 = vsinq.f32 %v7680_v8  ;;  %v8331_v20 = vmin.u32 %v7762_v15, %v15082_v19  ;;  %v6756_v11 = vxor.u32 2147483648, %v14482_v4 }
 0x9bd   : > { %v6953_v23 = vsel %vm14537_vm7, 0, %v6951_v14  ;;  %8392 = vmatpush1.bf16.msra.mxu0 %v8391_v29  ;;  %v6750_v36 = vand.u32 3, %v6749_v12  ;;  %vm6956_vm10 = vweird.f32 %v14187_v46  ;;  %v6961_v5 = vxor.u32 2147483648, %v16042_v21  ;;  %v16048_v29 = vld [vmem:[#allocation25_spill] sm:$0xff] }
 0x9be   : > { %v6957_v53 = vadd.s32 3, %v6953_v23  ;;  %v7764_v58 = vclz %v8331_v20  ;;  %v6964_v57 = vxor.u32 2147483648, %v16043_v7  ;;  %v6646_v33 = vand.u32 3, %v16044_v0  ;;  %v15106_v18 = vpop.eup %8942  ;;  %v16049_v23 = vld [vmem:[#allocation8_spill] sm:$0xff]  ;;  %v16052_v0 = vld [vmem:[#allocation31_spill] sm:$0xff] }
 0x9bf   : > { %v6649_v37 = vxor.u32 2147483648, %v16045_v42  ;;  %vm6752_vm0 = vcmp.eq.s32.totalorder %v6750_v36, 0  ;;  %vm6755_vm9 = vcmp.eq.s32.totalorder %v6750_v36, 2  ;;  %v6652_v16 = vxor.u32 2147483648, %v16046_v61 }
 0x9c0   : > { %v6958_v50 = vand.u32 3, %v6957_v53  ;;  %v8332_v41 = vadd.s32 4294967294, %v7764_v58  ;;  %vm6751_vm7 = vcmp.lt.s32.totalorder %v6750_v36, 2  ;;  %v6754_v52 = vsel %vm6752_vm0, %v14482_v4, %v6753_v47  ;;  %v16050_v53 = vld [vmem:[#allocation30_spill] sm:$0xff] }
 0x9c1   : > { %v6757_v8 = vsel %vm6755_vm9, %v6756_v11, %v14485_v13  ;;  %v6854_v17 = vand.u32 3, %v16047_v49  ;;  %vm6648_vm5 = vcmp.eq.s32.totalorder %v6646_v33, 0  ;;  %vm6651_vm6 = vcmp.eq.s32.totalorder %v6646_v33, 2 }
 0x9c2   : > { %v6758_v1 = vsel %vm6751_vm7, %v6754_v52, %v6757_v8  ;;  %vm6960_vm11 = vcmp.eq.s32.totalorder %v6958_v50, 0  ;;  %vm6963_vm3 = vcmp.eq.s32.totalorder %v6958_v50, 2  ;;  %vm8333_vm14 = vcmp.lt.s32.totalorder %v8332_v41, 0  ;;  %v16057_v8 = vld [vmem:[#allocation27_spill] sm:$0xff] }
 0x9c3   : > { %vm6959_vm15 = vcmp.lt.s32.totalorder %v6958_v50, 2  ;;  %v6962_v26 = vsel %vm6960_vm11, %v16043_v7, %v6961_v5  ;;  %v6965_v45 = vsel %vm6963_vm3, %v6964_v57, %v16042_v21  ;;  %v7767_v31 = vsel %vm8333_vm14, 0, %v8332_v41  ;;  %v16051_v7 = vld [vmem:[#allocation18_spill] sm:$0xff] }
 0x9c4   : > { %v6759_v15 = vsel %vm6748_vm2, nan, %v6758_v1  ;;  %v6966_v60 = vsel %vm6959_vm15, %v6962_v26, %v6965_v45  ;;  %v7768_v4 = vsub.s32 32, %v7767_v31  ;;  %v7772_v24 = vsub.s32 4294967266, %v7767_v31 }
 0x9c5   : > { %v6967_v13 = vsel %vm6956_vm10, nan, %v6966_v60  ;;  %v15118_v59 = vpop.eup %8944  ;;  %vm6644_vm0 = vweird.f32 %v16048_v29  ;;  %v6650_v12 = vsel %vm6648_vm5, %v16046_v61, %v6649_v37  ;;  %v6653_v14 = vsel %vm6651_vm6, %v6652_v16, %v16045_v42 }
 0x9c6   : > { %v8393_v47 = vpack.c.bf16 %v6967_v13, %v6759_v15  ;;  %v15123_v20 = vpop.eup %8946  ;;  %v7769_v9 = vshll.u32 %v15082_v19, %v7767_v31  ;;  %v7770_v11 = vshrl.u32 %v15075_v48, %v7768_v4  ;;  %v7773_v43 = vadd.s32 127, %v7772_v24  ;;  %v16059_v4 = vld [vmem:[#allocation20_spill] sm:$0xff] }
 0x9c7   : > { %vm6647_vm2 = vcmp.lt.s32.totalorder %v6646_v33, 2  ;;  %vm6856_vm10 = vcmp.eq.s32.totalorder %v6854_v17, 0  ;;  %v6857_v36 = vxor.u32 2147483648, %v16049_v23  ;;  %v6860_v21 = vxor.u32 2147483648, %v16050_v53 }
 0x9c8   : > { %8394 = vmatprep.subr.bf16.mxu0 %v8393_v47  ;;  %v6654_v46 = vsel %vm6647_vm2, %v6650_v12, %v6653_v14  ;;  %v7771_v5 = vor.u32 %v7770_v11, %v7769_v9  ;;  %v7774_v58 = vshll.u32 %v7773_v43, 23  ;;  %vm6859_vm9 = vcmp.eq.s32.totalorder %v6854_v17, 2  ;;  %v16060_v9 = vld [vmem:[#allocation37_spill] sm:$0xff] }
 0x9c9   : > { %v7158_v57 = vsub.s32 4, %v16051_v7  ;;  %vm7698_vm7 = vcmp.lt.s32.totalorder %v14700_v35, 0  ;;  %vm6852_vm11 = vweird.f32 %v16052_v0  ;;  %vm6855_vm3 = vcmp.lt.s32.totalorder %v6854_v17, 2 }
 0x9ca   : > { %v6858_v48 = vsel %vm6856_vm10, %v16050_v53, %v6857_v36  ;;  %v6861_v19 = vsel %vm6859_vm9, %v6860_v21, %v16049_v23  ;;  %v16053_v33 = vand.u32 2147483647, %v14700_v35  ;;  %v7775_v37 = vor.u32 4788187, %v7774_v58  ;;  %v16061_v21 = vld [vmem:[#allocation38_spill] sm:$0xff] }
 0x9cb   : > { %v6655_v50 = vsel %vm6644_vm0, nan, %v6654_v46  ;;  %v6862_v61 = vsel %vm6855_vm3, %v6858_v48, %v6861_v19  ;;  %vm16056_vm15 = vcmp.lt.s32.totalorder %v14300_v30, 0  ;;  %vm7164_vm5 = vweird.f32 %v14300_v30  ;;  %v16062_v48 = vld [vmem:[#allocation4_spill] sm:$0xff] }
 0x9cc   : > { %vm15136_vm14 = vcmp.le.f32.partialorder %v16053_v33, 0.7853982  ;;  %v7159_v16 = vsel %vm16056_vm15, %v7158_v57, %v16051_v7  ;;  %v6863_v41 = vsel %vm6852_vm11, nan, %v6862_v61  ;;  %v7366_v1 = vsub.s32 4, %v16057_v8 }
 0x9cd   : > { %v7161_v52 = vsel %vm14732_vm8, 0, %v7159_v16  ;;  %v7776_v49 = vand.u32 2147483647, %v7775_v37  ;;  %v7778_v17 = vcvt.s32.f32 %v7771_v5  ;;  %v8395_v26 = vpack.c.bf16 %v6863_v41, %v6655_v50  ;;  %v16063_v41 = vld [vmem:[#allocation21_spill] sm:$0xff] }
 0x9ce   : > { %v7165_v45 = vadd.s32 3, %v7161_v52  ;;  %v7169_v31 = vxor.u32 2147483648, %v14797_v55  ;;  %v7172_v15 = vxor.u32 2147483648, %v14793_v39  ;;  %vm16058_vm6 = vcmp.lt.s32.totalorder %v14498_v6, 0 }
 0x9cf   : > { %v7367_v60 = vsel %vm16058_vm6, %v7366_v1, %v16057_v8  ;;  %v7062_v24 = vand.u32 3, %v16059_v4  ;;  %v7779_v54 = vmul.f32 %v7778_v17, %v7776_v49  ;;  %8396 = vmatpush1.bf16.msra.mxu0 %v8395_v26  ;;  %vm7372_vm8 = vweird.f32 %v14498_v6  ;;  %v16064_v1 = vld [vmem:[#allocation41_spill] sm:$0xff]  ;;  %v16065_v49 = vld [vmem:[#allocation3_spill] sm:$0xff] }
 0x9d0   : > { %v7166_v13 = vand.u32 3, %v7165_v45  ;;  %v7369_v47 = vsel %vm14870_vm13, 0, %v7367_v60  ;;  %v7377_v29 = vxor.u32 2147483648, %v14970_v27  ;;  %v7380_v14 = vxor.u32 2147483648, %v14966_v56 }
 0x9d1   : > { %v7373_v12 = vadd.s32 3, %v7369_v47  ;;  %vm7063_vm0 = vcmp.lt.s32.totalorder %v7062_v24, 2  ;;  %v7065_v11 = vxor.u32 2147483648, %v16060_v9  ;;  %v7780_v43 = vxor.u32 2147483648, %v7779_v54 }
 0x9d2   : > { %vm7168_vm2 = vcmp.eq.s32.totalorder %v7166_v13, 0  ;;  %vm7171_vm10 = vcmp.eq.s32.totalorder %v7166_v13, 2  ;;  %vm7064_vm9 = vcmp.eq.s32.totalorder %v7062_v24, 0  ;;  %vm7167_vm11 = vcmp.lt.s32.totalorder %v7166_v13, 2 }
 0x9d3   : > { %v7170_v46 = vsel %vm7168_vm2, %v14793_v39, %v7169_v31  ;;  %v7173_v2 = vsel %vm7171_vm10, %v7172_v15, %v14797_v55  ;;  %v7374_v23 = vand.u32 3, %v7373_v12  ;;  %v7781_v36 = vsel %vm7698_vm7, %v7780_v43, %v7779_v54 }
 0x9d4   : > { %v7174_v53 = vsel %vm7167_vm11, %v7170_v46, %v7173_v2  ;;  %vm7067_vm13 = vcmp.eq.s32.totalorder %v7062_v24, 2  ;;  %v7068_v5 = vxor.u32 2147483648, %v16061_v21  ;;  %v7784_v58 = vsel %vm15136_vm14, %v14700_v35, %v7781_v36 }
 0x9d5   : > { %v7175_v7 = vsel %vm7164_vm5, nan, %v7174_v53  ;;  %vm7376_vm3 = vcmp.eq.s32.totalorder %v7374_v23, 0  ;;  %v7066_v39 = vsel %vm7064_vm9, %v16061_v21, %v7065_v11  ;;  %8948 = vcosq.f32 %v7784_v58 }
 0x9d6   : > { %v7378_v55 = vsel %vm7376_vm3, %v14966_v56, %v7377_v29  ;;  %vm7379_vm15 = vcmp.eq.s32.totalorder %v7374_v23, 2  ;;  %v7069_v57 = vsel %vm7067_vm13, %v7068_v5, %v16060_v9  ;;  %8950 = vsinq.f32 %v7784_v58 }
 0x9d7   : > { %vm7375_vm6 = vcmp.lt.s32.totalorder %v7374_v23, 2  ;;  %v7381_v0 = vsel %vm7379_vm15, %v7380_v14, %v14970_v27  ;;  %v7270_v19 = vand.u32 3, %v16062_v48  ;;  %v7070_v37 = vsel %vm7063_vm0, %v7066_v39, %v7069_v57 }
 0x9d8   : > { %v7382_v33 = vsel %vm7375_vm6, %v7378_v55, %v7381_v0  ;;  %v7273_v30 = vxor.u32 2147483648, %v14946_v10  ;;  %v7276_v50 = vxor.u32 2147483648, %v14940_v38  ;;  %v7574_v52 = vsub.s32 4, %v16063_v41  ;;  %v7800_v0 = vld [vmem:[%s15243_s5] sm:$0x7] }
 0x9d9   : > { %v7383_v61 = vsel %vm7372_vm8, nan, %v7382_v33  ;;  %vm7271_vm5 = vcmp.lt.s32.totalorder %v7270_v19, 2  ;;  %vm7272_vm2 = vcmp.eq.s32.totalorder %v7270_v19, 0  ;;  %vm7275_vm10 = vcmp.eq.s32.totalorder %v7270_v19, 2 }
 0x9da   : > { %v8397_v56 = vpack.c.bf16 %v7383_v61, %v7175_v7  ;;  %v7274_v16 = vsel %vm7272_vm2, %v14940_v38, %v7273_v30  ;;  %v7277_v27 = vsel %vm7275_vm10, %v7276_v50, %v14946_v10  ;;  %v7681_v8 = vsel %vm15049_vm4, 0, %v15010_v40 }
 0x9db   : > { %vm7060_vm0 = vweird.f32 %v16064_v1  ;;  %vm7268_vm9 = vweird.f32 %v16065_v49  ;;  %v7278_v6 = vsel %vm7271_vm5, %v7274_v16, %v7277_v27  ;;  %v7575_v38 = vsel %vm7490_vm1, %v7574_v52, %v16063_v41 }
 0x9dc   : > { %8398 = vmatprep.subr.bf16.mxu0 %v8397_v56  ;;  %v7071_v17 = vsel %vm7060_vm0, nan, %v7070_v37  ;;  %v7279_v26 = vsel %vm7268_vm9, nan, %v7278_v6  ;;  %v7782_v10 = vsub.s32 4, %v15063_v28  ;;  %v7577_v31 = vsel %vm14974_vm12, 0, %v7575_v38 }
 0x9dd   : > { %v8399_v45 = vpack.c.bf16 %v7279_v26, %v7071_v17  ;;  %v7478_v40 = vand.u32 3, %v14928_v25  ;;  %v7685_v22 = vadd.s32 3, %v7681_v8  ;;  %v7581_v15 = vadd.s32 3, %v7577_v31 }
 0x9de   : > { %v7783_v60 = vsel %vm7698_vm7, %v7782_v10, %v15063_v28  ;;  %v7585_v4 = vxor.u32 2147483648, %v15106_v18  ;;  %v7588_v24 = vxor.u32 2147483648, %v15066_v44  ;;  %vm7580_vm1 = vweird.f32 %v14617_v51 }
 0x9df   : > { %8400 = vmatpush1.bf16.msra.mxu0 %v8399_v45  ;;  %v7785_v54 = vsel %vm15136_vm14, 0, %v7783_v60  ;;  %v8949_v13 = vpop.eup %8948  ;;  %v7582_v3 = vand.u32 3, %v7581_v15  ;;  %v7481_v25 = vxor.u32 2147483648, %v14994_v63  ;;  %vm7480_vm12 = vcmp.eq.s32.totalorder %v7478_v40, 0 }
 0x9e0   : > { %v7789_v47 = vadd.s32 3, %v7785_v54  ;;  %v8951_v29 = vpop.eup %8950  ;;  %v7796_v12 = vxor.u32 2147483648, %v8949_v13  ;;  %vm7483_vm4 = vcmp.eq.s32.totalorder %v7478_v40, 2  ;;  %v7484_v28 = vxor.u32 2147483648, %v14980_v32 }
 0x9e1   : > { %vm7584_vm7 = vcmp.eq.s32.totalorder %v7582_v3, 0  ;;  %vm7587_vm8 = vcmp.eq.s32.totalorder %v7582_v3, 2  ;;  %v7686_v9 = vand.u32 3, %v7685_v22  ;;  %vm7583_vm11 = vcmp.lt.s32.totalorder %v7582_v3, 2 }
 0x9e2   : > { %v7790_v14 = vand.u32 3, %v7789_v47  ;;  %v7586_v42 = vsel %vm7584_vm7, %v15066_v44, %v7585_v4  ;;  %v7589_v11 = vsel %vm7587_vm8, %v7588_v24, %v15106_v18  ;;  %v7793_v43 = vxor.u32 2147483648, %v8951_v29 }
 0x9e3   : > { %v7590_v46 = vsel %vm7583_vm11, %v7586_v42, %v7589_v11  ;;  %v7482_v2 = vsel %vm7480_vm12, %v14980_v32, %v7481_v25  ;;  %v7485_v53 = vsel %vm7483_vm4, %v7484_v28, %v14994_v63  ;;  %vm7788_vm15 = vweird.f32 %v14700_v35 }
 0x9e4   : > { %vm7792_vm14 = vcmp.eq.s32.totalorder %v7790_v14, 0  ;;  %vm7795_vm13 = vcmp.eq.s32.totalorder %v7790_v14, 2  ;;  %vm7791_vm3 = vcmp.lt.s32.totalorder %v7790_v14, 2  ;;  %vm7479_vm6 = vcmp.lt.s32.totalorder %v7478_v40, 2 }
 0x9e5   : > { %v7794_v23 = vsel %vm7792_vm14, %v8949_v13, %v7793_v43  ;;  %v7797_v36 = vsel %vm7795_vm13, %v7796_v12, %v8951_v29  ;;  %v7689_v44 = vxor.u32 2147483648, %v15123_v20  ;;  %v7591_v18 = vsel %vm7580_vm1, nan, %v7590_v46 }
 0x9e6   : > { %v7798_v21 = vsel %vm7791_vm3, %v7794_v23, %v7797_v36  ;;  %vm7688_vm5 = vcmp.eq.s32.totalorder %v7686_v9, 0  ;;  %v7692_v58 = vxor.u32 2147483648, %v15118_v59  ;;  %v7486_v7 = vsel %vm7479_vm6, %v7482_v2, %v7485_v53 }
 0x9e7   : > { %v7799_v5 = vsel %vm7788_vm15, nan, %v7798_v21  ;;  %v7690_v39 = vsel %vm7688_vm5, %v15118_v59, %v7689_v44  ;;  %vm7691_vm2 = vcmp.eq.s32.totalorder %v7686_v9, 2  ;;  %vm7687_vm10 = vcmp.lt.s32.totalorder %v7686_v9, 2  ;;  %v7805_v59 = vpop.permute.xlu0 %7804 }
 0x9e8   : > { %v8401_v32 = vpack.c.bf16 %v7799_v5, %v7591_v18  ;;  %v7693_v63 = vsel %vm7691_vm2, %v7692_v58, %v15123_v20  ;;  %vm7476_vm0 = vweird.f32 %v14592_v62  ;;  %vm7684_vm9 = vweird.f32 %v14625_v34 }
 0x9e9   : > { %v7694_v35 = vsel %vm7687_vm10, %v7690_v39, %v7693_v63  ;;  %v7487_v51 = vsel %vm7476_vm0, nan, %v7486_v7  ;;  %vm16066_vm1 = vcmask 523264  }
 0x9ea   : > { %8402 = vmatprep.subr.bf16.mxu0 %v8401_v32  ;;  %v7695_v55 = vsel %vm7684_vm9, nan, %v7694_v35 }
 0x9eb   : > { %v8403_v57 = vpack.c.bf16 %v7695_v55, %v7487_v51 }
 0x9ed   : > { %8404 = vmatpush1.bf16.msra.mxu0 %v8403_v57 }
 0x9f0   : > { %8334 = vmatmul.mubr.msk.f32.vlgmr.msra.gmra.mrb[32].mxu0 %vm16066_vm1, %v7800_v0 }
 0xac3   : > { %v7876_v48 = vpop.f32.mrb[32].mxu0 }
 0xac4   : > { %v7877_v20 = vadd.f32 %v7876_v48, %v7805_v59  ;;  %v7878_v19 = vpop.f32.mrb[33].mxu0 }
 0xac5   : > { %v7879_v33 = vadd.f32 %v7878_v19, %v7805_v59 }
 0xac6   : > { %8952 = vtanh.f32 %v7877_v20 }
 0xac7   : > { %8954 = vtanh.f32 %v7879_v33 }
 0xad0   : > { %v8953_v62 = vpop.eup %8952 }
 0xad1   : > { %v8955_v34 = vpop.eup %8954 }
 0xad2   : > { %v7885_v37 = vcombine.low %v8953_v62, %v8955_v34 }
 0xad4   : > { %7887 = vst [vmem:[%s356_s10] sm:$0x77] %v7885_v37 }
 0xad5 PF: > { %s17_s26 = sadd.s32 1, %s8978_s26   ;;  %s16067_s24 = smov %s8974_s25 }
 0xad6   : > { %p14_p5 = scmp.ge.s32.totalorder %s17_s26, 4   ;;  %s16068_s25 = smov %s16070_s27 }
 0xad8   :  { %16 = sbr.rel (!%p14_p5) target bundleno = 2 (0x2), region = 88 }

</bundles_post_ra>
